<compile_context>
chip_gen: v5e
topology: v5e:2x2
jax: 0.10.0
libtpu: 0.0.40
codegen_flags: <defaults>
</compile_context>

<pallas_src>
import functools
import math

import jax
import jax.numpy as jnp
from jax import lax
from jax.experimental import pallas as pl
from jax.experimental.pallas import tpu as pltpu


# ----------------------------- helpers ---------------------------------------

def _row_tile(M):
    """Largest convenient row tile that divides M (falls back to full M)."""
    for tm in (512, 256, 128, 64, 32, 16, 8):
        if M % tm == 0:
            return tm
    return M


# ----------------------------- Pallas kernels --------------------------------

def _mha_ln_kernel(*refs, nhead, scale, eps, has_mask):
    """Fused: QKV proj -> per-head softmax attention -> out proj -> +residual -> LN.

    Block layout: one batch element per grid step.  All heads are computed in
    the same block so the output is a lane-dense (Sq, D) slab.
    """
    if has_mask:
        (q_ref, k_ref, v_ref, res_ref, mask_ref,
         wq_ref, bq_ref, wk_ref, bk_ref, wv_ref, bv_ref,
         wo_ref, bo_ref, g_ref, be_ref, o_ref) = refs
    else:
        (q_ref, k_ref, v_ref, res_ref,
         wq_ref, bq_ref, wk_ref, bk_ref, wv_ref, bv_ref,
         wo_ref, bo_ref, g_ref, be_ref, o_ref) = refs
        mask_ref = None

    xq = q_ref[0]            # (Sq, D)
    xk = k_ref[0]            # (Sk, D)
    xv = v_ref[0]            # (Sk, D)

    q = jnp.dot(xq, wq_ref[...], preferred_element_type=jnp.float32) + bq_ref[...]
    k = jnp.dot(xk, wk_ref[...], preferred_element_type=jnp.float32) + bk_ref[...]
    v = jnp.dot(xv, wv_ref[...], preferred_element_type=jnp.float32) + bv_ref[...]

    Sq, D = q.shape
    dk = D // nhead

    if has_mask:
        bias = jnp.where(mask_ref[0] > 0.0, jnp.float32(-1e30), jnp.float32(0.0))  # (1, Sk)

    head_outs = []
    for h in range(nhead):                       # static unrolled loop (nhead small)
        qh = q[:, h * dk:(h + 1) * dk]           # (Sq, dk)
        kh = k[:, h * dk:(h + 1) * dk]           # (Sk, dk)
        vh = v[:, h * dk:(h + 1) * dk]           # (Sk, dk)
        # contract dk of both operands -> (Sq, Sk), no explicit transpose of k
        s = lax.dot_general(qh, kh, (((1,), (1,)), ((), ())),
                            preferred_element_type=jnp.float32) * scale
        if has_mask:
            s = s + bias
        m = jnp.max(s, axis=-1, keepdims=True)
        p = jnp.exp(s - m)
        p = p * pl.reciprocal(jnp.sum(p, axis=-1, keepdims=True), approx=True)
        head_outs.append(jnp.dot(p, vh, preferred_element_type=jnp.float32))
    attn = jnp.concatenate(head_outs, axis=-1)   # (Sq, D) lane-dense

    out = jnp.dot(attn, wo_ref[...], preferred_element_type=jnp.float32) + bo_ref[...]
    y = res_ref[0] + out
    mean = jnp.mean(y, axis=-1, keepdims=True)
    var = jnp.mean(jnp.square(y - mean), axis=-1, keepdims=True)
    yn = (y - mean) * lax.rsqrt(var + eps)
    o_ref[0] = (yn * g_ref[...] + be_ref[...]).astype(o_ref.dtype)


def _ffn_ln_kernel(x_ref, w1_ref, b1_ref, w2_ref, b2_ref, g_ref, be_ref, o_ref, *, eps):
    """Fused: Linear -> ReLU -> Linear -> +residual -> LayerNorm on a row tile."""
    x = x_ref[...]                                                     # (TM, D)
    h = jnp.dot(x, w1_ref[...], preferred_element_type=jnp.float32) + b1_ref[...]
    h = jnp.maximum(h, 0.0)                                            # (TM, dff), never leaves VMEM
    y = jnp.dot(h, w2_ref[...], preferred_element_type=jnp.float32) + b2_ref[...]
    y = x + y                                                          # residual
    mean = jnp.mean(y, axis=-1, keepdims=True)
    var = jnp.mean(jnp.square(y - mean), axis=-1, keepdims=True)
    yn = (y - mean) * lax.rsqrt(var + eps)
    o_ref[...] = (yn * g_ref[...] + be_ref[...]).astype(o_ref.dtype)


def _layernorm_kernel(x_ref, g_ref, b_ref, o_ref, *, eps):
    x = x_ref[...]
    mean = jnp.mean(x, axis=-1, keepdims=True)
    var = jnp.mean(jnp.square(x - mean), axis=-1, keepdims=True)
    yn = (x - mean) * lax.rsqrt(var + eps)
    o_ref[...] = (yn * g_ref[...] + b_ref[...]).astype(o_ref.dtype)


# ------------------------------ fused wrappers --------------------------------

def mha_block(q_in, k_in, v_in, residual, attn_p, ln_g, ln_b, nhead,
              key_padding_mask=None, eps=1e-5):
    """softmax((x wq)(x wk)^T / sqrt(dk) [+mask]) (x wv) wo + residual, then LayerNorm.

    All activations batch-first (B, S, D).  One grid step per batch element,
    grid axis marked "parallel".
    """
    B, Sq, D = q_in.shape
    Sk = k_in.shape[1]
    dk = D // nhead
    scale = 1.0 / math.sqrt(dk)
    has_mask = key_padding_mask is not None

    kernel = functools.partial(_mha_ln_kernel, nhead=nhead, scale=scale,
                               eps=eps, has_mask=has_mask)

    q_spec = pl.BlockSpec((1, Sq, D), lambda b: (b, 0, 0))
    k_spec = pl.BlockSpec((1, Sk, D), lambda b: (b, 0, 0))
    w_spec = pl.BlockSpec((D, D), lambda b: (0, 0))
    v1_spec = pl.BlockSpec((1, D), lambda b: (0, 0))

    in_specs = [q_spec, k_spec, k_spec, q_spec]
    inputs = [q_in, k_in, v_in, residual]
    if has_mask:
        in_specs.append(pl.BlockSpec((1, 1, Sk), lambda b: (b, 0, 0)))
        inputs.append(key_padding_mask.astype(jnp.float32).reshape(B, 1, Sk))
    in_specs += [w_spec, v1_spec, w_spec, v1_spec, w_spec, v1_spec,
                 w_spec, v1_spec, v1_spec, v1_spec]
    inputs += [attn_p["wq"], attn_p["bq"], attn_p["wk"], attn_p["bk"],
               attn_p["wv"], attn_p["bv"], attn_p["wo"], attn_p["bo"],
               ln_g, ln_b]

    return pl.pallas_call(
        kernel,
        out_shape=jax.ShapeDtypeStruct((B, Sq, D), jnp.float32),
        grid=(B,),
        in_specs=in_specs,
        out_specs=pl.BlockSpec((1, Sq, D), lambda b: (b, 0, 0)),
        compiler_params=pltpu.CompilerParams(dimension_semantics=("parallel",)),
    )(*inputs)


def ffn_block(x, w1, b1, w2, b2, ln_g, ln_b, eps=1e-5):
    """linear2(relu(linear1(x))) + x, then LayerNorm.  x: (B, S, D)."""
    B, S, D = x.shape
    M = B * S
    dff = w1.shape[1]
    x2 = x.reshape(M, D)
    tm = _row_tile(M)
    out = pl.pallas_call(
        functools.partial(_ffn_ln_kernel, eps=eps),
        out_shape=jax.ShapeDtypeStruct((M, D), jnp.float32),
        grid=(M // tm,),
        in_specs=[pl.BlockSpec((tm, D), lambda i: (i, 0)),
                  pl.BlockSpec((D, dff), lambda i: (0, 0)),
                  pl.BlockSpec((1, dff), lambda i: (0, 0)),
                  pl.BlockSpec((dff, D), lambda i: (0, 0)),
                  pl.BlockSpec((1, D), lambda i: (0, 0)),
                  pl.BlockSpec((1, D), lambda i: (0, 0)),
                  pl.BlockSpec((1, D), lambda i: (0, 0))],
        out_specs=pl.BlockSpec((tm, D), lambda i: (i, 0)),
        compiler_params=pltpu.CompilerParams(dimension_semantics=("parallel",)),
    )(x2, w1, b1, w2, b2, ln_g, ln_b)
    return out.reshape(B, S, D)


def layernorm(x, gamma, beta, eps=1e-5):
    """Row-wise LayerNorm over the last dim of x:(M, D), row-tiled grid."""
    M, D = x.shape
    tm = _row_tile(M)
    return pl.pallas_call(
        functools.partial(_layernorm_kernel, eps=eps),
        out_shape=jax.ShapeDtypeStruct((M, D), jnp.float32),
        grid=(M // tm,),
        in_specs=[pl.BlockSpec((tm, D), lambda i: (i, 0)),
                  pl.BlockSpec((1, D), lambda i: (0, 0)),
                  pl.BlockSpec((1, D), lambda i: (0, 0))],
        out_specs=pl.BlockSpec((tm, D), lambda i: (i, 0)),
        compiler_params=pltpu.CompilerParams(dimension_semantics=("parallel",)),
    )(x, gamma, beta)


# ------------------------------ model wrappers --------------------------------

def encoder_layer_fwd(src, pos, p, nhead):
    """TransformerEncoderLayer.forward_post (normalize_before=False).
    MultiHeadAttention_with_constant with constant_head=0 ignores all masks."""
    q = src + pos
    src = mha_block(q, q, src, src, p["self_attn"], p["norm1_g"], p["norm1_b"], nhead)
    src = ffn_block(src, p["lin1_w"], p["lin1_b"], p["lin2_w"], p["lin2_b"],
                    p["norm2_g"], p["norm2_b"])
    return src


def decoder_layer_fwd(tgt, memory, mem_k, query_pos, mem_key_padding_mask, p, nhead):
    """TransformerDecoderLayer.forward_post (normalize_before=False)."""
    q = tgt + query_pos
    tgt = mha_block(q, q, tgt, tgt, p["self_attn"], p["norm1_g"], p["norm1_b"], nhead)
    tgt = mha_block(tgt + query_pos, mem_k, memory, tgt,
                    p["cross_attn"], p["norm2_g"], p["norm2_b"], nhead,
                    key_padding_mask=mem_key_padding_mask)
    tgt = ffn_block(tgt, p["lin1_w"], p["lin1_b"], p["lin2_w"], p["lin2_b"],
                    p["norm3_g"], p["norm3_b"])
    return tgt


@functools.partial(jax.jit, static_argnames=("nhead",))
def transformer_forward(params, src, mask, query_embed, pos_embed, *, nhead):
    """Equivalent of Transformer.forward.
    src, pos_embed: (bs, c, L) with c == d_model; mask: (bs, L) bool (True=pad);
    query_embed: (num_queries, d_model)."""
    bs, c, L = src.shape
    src_b = jnp.transpose(src, (0, 2, 1))        # (B, L, D) batch-first
    pos_b = jnp.transpose(pos_embed, (0, 2, 1))  # (B, L, D)
    nq = query_embed.shape[0]
    query_pos = jnp.broadcast_to(query_embed[None, :, :], (bs, nq, c))
    tgt = jnp.zeros((bs, nq, c), jnp.float32)

    # Encoder (src_key_padding_mask is ignored by MultiHeadAttention_with_constant).
    memory = src_b
    for lp in params["encoder_layers"]:
        # TODO(synk): the PyTorch reference chains the (src, attn_weights) tuple
        # into the next layer (crashes for >1 layer); we chain the tensor output.
        memory = encoder_layer_fwd(memory, pos_b, lp, nhead)

    # Decoder (return_intermediate=False, final LayerNorm applied).
    mem_k = memory + pos_b                       # hoisted out of the layer loop
    out = tgt
    for lp in params["decoder_layers"]:
        out = decoder_layer_fwd(out, memory, mem_k, query_pos, mask, lp, nhead)
    out = layernorm(out.reshape(bs * nq, c),
                    params["dec_norm_g"], params["dec_norm_b"]).reshape(bs, nq, c)

    hs_t = out[None]                             # (1, B, nq, D)  == hs.transpose(1, 2)
    mem_out = jnp.transpose(memory, (0, 2, 1))   # (B, D, L)
    return hs_t, mem_out


# --------------------------- deterministic params -----------------------------

def _xavier(key, fan_in, fan_out):
    bound = math.sqrt(6.0 / (fan_in + fan_out))
    # stored pre-transposed in (in, out) layout so kernels do x @ W directly
    return jax.random.uniform(key, (fan_in, fan_out), jnp.float32, -bound, bound)


def init_params(key, d_model, nhead, dff, n_enc, n_dec):
    keys = iter(jax.random.split(key, 512))

    def lin(fan_in, fan_out):
        return _xavier(next(keys), fan_in, fan_out)

    def vec(n, value=0.0):
        return jnp.full((1, n), value, jnp.float32)

    def attn_params():
        return {"wq": lin(d_model, d_model), "bq": vec(d_model),
                "wk": lin(d_model, d_model), "bk": vec(d_model),
                "wv": lin(d_model, d_model), "bv": vec(d_model),
                "wo": lin(d_model, d_model), "bo": vec(d_model)}

    enc = []
    for _ in range(n_enc):
        enc.append({
            "self_attn": attn_params(),
            "lin1_w": lin(d_model, dff), "lin1_b": vec(dff),
            "lin2_w": lin(dff, d_model), "lin2_b": vec(d_model),
            "norm1_g": vec(d_model, 1.0), "norm1_b": vec(d_model),
            "norm2_g": vec(d_model, 1.0), "norm2_b": vec(d_model),
        })
    dec = []
    for _ in range(n_dec):
        dec.append({
            "self_attn": attn_params(),
            "cross_attn": attn_params(),
            "lin1_w": lin(d_model, dff), "lin1_b": vec(dff),
            "lin2_w": lin(dff, d_model), "lin2_b": vec(d_model),
            "norm1_g": vec(d_model, 1.0), "norm1_b": vec(d_model),
            "norm2_g": vec(d_model, 1.0), "norm2_b": vec(d_model),
            "norm3_g": vec(d_model, 1.0), "norm3_b": vec(d_model),
        })
    return {"encoder_layers": enc, "decoder_layers": dec,
            "dec_norm_g": vec(d_model, 1.0), "dec_norm_b": vec(d_model)}


# ----------------------------------- main --------------------------------------

if __name__ == "__main__":
    d_model, nhead, dff = 32, 4, 64
    n_enc, n_dec = 2, 2
    bs, L, num_queries = 2, 16, 8

    key = jax.random.PRNGKey(0)
    k1, k2, k3, kp = jax.random.split(key, 4)
    src = jax.random.normal(k1, (bs, d_model, L), jnp.float32)
    pos_embed = jax.random.normal(k2, (bs, d_model, L), jnp.float32)
    query_embed = jax.random.normal(k3, (num_queries, d_model), jnp.float32)
    # key padding mask: True = padded position (last 2 keys of batch element 1)
    mask = jnp.zeros((bs, L), dtype=bool).at[1, -2:].set(True)

    params = init_params(kp, d_model, nhead, dff, n_enc, n_dec)

    hs, memory = transformer_forward(params, src, mask, query_embed, pos_embed,
                                     nhead=nhead)
    (hs, memory) = jax.block_until_ready((hs, memory))

    assert hs.shape == (1, bs, num_queries, d_model), hs.shape
    assert memory.shape == (bs, d_model, L), memory.shape
    assert bool(jnp.all(jnp.isfinite(hs))) and bool(jnp.all(jnp.isfinite(memory)))
    print("KERNEL_OK")
</pallas_src>

<mosaic_0001>
module attributes {stable_mosaic.version = 11 : i64} {
  func.func @_ffn_ln_kernel(%arg0: i32, %arg1: memref<32x32xf32, #tpu.memory_space<vmem>>, %arg2: memref<32x64xf32, #tpu.memory_space<vmem>>, %arg3: memref<1x64xf32, #tpu.memory_space<vmem>>, %arg4: memref<64x32xf32, #tpu.memory_space<vmem>>, %arg5: memref<1x32xf32, #tpu.memory_space<vmem>>, %arg6: memref<1x32xf32, #tpu.memory_space<vmem>>, %arg7: memref<1x32xf32, #tpu.memory_space<vmem>>, %arg8: memref<32x32xf32, #tpu.memory_space<vmem>>) attributes {dimension_semantics = [#tpu.dimension_semantics<parallel>], iteration_bounds = array<i64: 1>, scalar_prefetch = 0 : i64, scratch_operands = 0 : i64, tpu.core_type = #tpu.core_type<tc>, window_params = [{transform_indices = @transform_0, window_bounds = array<i64: 32, 32>}, {pipeline_mode = #tpu.pipeline_mode<synchronous>, transform_indices = @transform_1, window_bounds = array<i64: 32, 64>}, {pipeline_mode = #tpu.pipeline_mode<synchronous>, transform_indices = @transform_2, window_bounds = array<i64: 1, 64>}, {pipeline_mode = #tpu.pipeline_mode<synchronous>, transform_indices = @transform_3, window_bounds = array<i64: 64, 32>}, {pipeline_mode = #tpu.pipeline_mode<synchronous>, transform_indices = @transform_4, window_bounds = array<i64: 1, 32>}, {pipeline_mode = #tpu.pipeline_mode<synchronous>, transform_indices = @transform_5, window_bounds = array<i64: 1, 32>}, {pipeline_mode = #tpu.pipeline_mode<synchronous>, transform_indices = @transform_6, window_bounds = array<i64: 1, 32>}, {transform_indices = @transform_7, window_bounds = array<i64: 32, 32>}]} {
    %c0 = arith.constant 0 : index
    %c0_0 = arith.constant 0 : index
    %0 = vector.load %arg1[%c0, %c0_0] : memref<32x32xf32, #tpu.memory_space<vmem>>, vector<32x32xf32>
    %c0_1 = arith.constant 0 : index
    %c0_2 = arith.constant 0 : index
    %1 = vector.load %arg2[%c0_1, %c0_2] : memref<32x64xf32, #tpu.memory_space<vmem>>, vector<32x64xf32>
    %cst = arith.constant dense<0.000000e+00> : vector<32x64xf32>
    %2 = tpu.matmul %0, %1, %cst {dimension_numbers = #tpu.dot_dimension_numbers<[1], [0], [0], [1], [0, 0, 1, 1], [], []>} : vector<32x32xf32>, vector<32x64xf32>, vector<32x64xf32> -> vector<32x64xf32>
    %c0_3 = arith.constant 0 : index
    %c0_4 = arith.constant 0 : index
    %3 = vector.load %arg3[%c0_3, %c0_4] : memref<1x64xf32, #tpu.memory_space<vmem>>, vector<1x64xf32>
    %4 = vector.broadcast %3 : vector<1x64xf32> to vector<32x64xf32>
    %5 = arith.addf %2, %4 : vector<32x64xf32>
    %cst_5 = arith.constant 0.000000e+00 : f32
    %6 = vector.broadcast %cst_5 : f32 to vector<32x64xf32>
    %7 = arith.maximumf %5, %6 : vector<32x64xf32>
    %c0_6 = arith.constant 0 : index
    %c0_7 = arith.constant 0 : index
    %8 = vector.load %arg4[%c0_6, %c0_7] : memref<64x32xf32, #tpu.memory_space<vmem>>, vector<64x32xf32>
    %cst_8 = arith.constant dense<0.000000e+00> : vector<32x32xf32>
    %9 = tpu.matmul %7, %8, %cst_8 {dimension_numbers = #tpu.dot_dimension_numbers<[1], [0], [0], [1], [0, 0, 1, 1], [], []>} : vector<32x64xf32>, vector<64x32xf32>, vector<32x32xf32> -> vector<32x32xf32>
    %c0_9 = arith.constant 0 : index
    %c0_10 = arith.constant 0 : index
    %10 = vector.load %arg5[%c0_9, %c0_10] : memref<1x32xf32, #tpu.memory_space<vmem>>, vector<1x32xf32>
    %11 = vector.broadcast %10 : vector<1x32xf32> to vector<32x32xf32>
    %12 = arith.addf %9, %11 : vector<32x32xf32>
    %13 = arith.addf %0, %12 : vector<32x32xf32>
    %cst_11 = arith.constant dense<0.000000e+00> : vector<32xf32>
    %14 = vector.multi_reduction <add>, %13, %cst_11 [1] : vector<32x32xf32> to vector<32xf32>
    %15 = vector.shape_cast %14 : vector<32xf32> to vector<32x1xf32>
    %cst_12 = arith.constant 3.200000e+01 : f32
    %16 = vector.broadcast %cst_12 : f32 to vector<32x1xf32>
    %17 = arith.divf %15, %16 : vector<32x1xf32>
    %18 = vector.broadcast %17 : vector<32x1xf32> to vector<32x32xf32>
    %19 = arith.subf %13, %18 : vector<32x32xf32>
    %20 = arith.mulf %19, %19 : vector<32x32xf32>
    %cst_13 = arith.constant dense<0.000000e+00> : vector<32xf32>
    %21 = vector.multi_reduction <add>, %20, %cst_13 [1] : vector<32x32xf32> to vector<32xf32>
    %22 = vector.shape_cast %21 : vector<32xf32> to vector<32x1xf32>
    %cst_14 = arith.constant 3.200000e+01 : f32
    %23 = vector.broadcast %cst_14 : f32 to vector<32x1xf32>
    %24 = arith.divf %22, %23 : vector<32x1xf32>
    %25 = vector.broadcast %17 : vector<32x1xf32> to vector<32x32xf32>
    %26 = arith.subf %13, %25 : vector<32x32xf32>
    %cst_15 = arith.constant 9.99999974E-6 : f32
    %27 = vector.broadcast %cst_15 : f32 to vector<32x1xf32>
    %28 = arith.addf %24, %27 : vector<32x1xf32>
    %29 = math.rsqrt %28 : vector<32x1xf32>
    %30 = vector.broadcast %29 : vector<32x1xf32> to vector<32x32xf32>
    %31 = arith.mulf %26, %30 : vector<32x32xf32>
    %c0_16 = arith.constant 0 : index
    %c0_17 = arith.constant 0 : index
    %32 = vector.load %arg6[%c0_16, %c0_17] : memref<1x32xf32, #tpu.memory_space<vmem>>, vector<1x32xf32>
    %33 = vector.broadcast %32 : vector<1x32xf32> to vector<32x32xf32>
    %34 = arith.mulf %31, %33 : vector<32x32xf32>
    %c0_18 = arith.constant 0 : index
    %c0_19 = arith.constant 0 : index
    %35 = vector.load %arg7[%c0_18, %c0_19] : memref<1x32xf32, #tpu.memory_space<vmem>>, vector<1x32xf32>
    %36 = vector.broadcast %35 : vector<1x32xf32> to vector<32x32xf32>
    %37 = arith.addf %34, %36 : vector<32x32xf32>
    %c0_20 = arith.constant 0 : index
    %c0_21 = arith.constant 0 : index
    %38 = vector.load %arg8[%c0_20, %c0_21] : memref<32x32xf32, #tpu.memory_space<vmem>>, vector<32x32xf32>
    tpu.vector_store %arg8[%c0_20, %c0_21], %37 {strides = array<i32>} : memref<32x32xf32, #tpu.memory_space<vmem>>, vector<32x32xf32>,
    return
  }
  func.func @transform_0(%arg0: i32) -> (i32, i32) {
    %c0_i32 = arith.constant 0 : i32
    %c0_i32_0 = arith.constant 0 : i32
    return %arg0, %c0_i32 : i32, i32
  }
  func.func @transform_1(%arg0: i32) -> (i32, i32) {
    %c0_i32 = arith.constant 0 : i32
    %c0_i32_0 = arith.constant 0 : i32
    %c0_i32_1 = arith.constant 0 : i32
    return %c0_i32, %c0_i32_0 : i32, i32
  }
  func.func @transform_2(%arg0: i32) -> (i32, i32) {
    %c0_i32 = arith.constant 0 : i32
    %c0_i32_0 = arith.constant 0 : i32
    %c0_i32_1 = arith.constant 0 : i32
    return %c0_i32, %c0_i32_0 : i32, i32
  }
  func.func @transform_3(%arg0: i32) -> (i32, i32) {
    %c0_i32 = arith.constant 0 : i32
    %c0_i32_0 = arith.constant 0 : i32
    %c0_i32_1 = arith.constant 0 : i32
    return %c0_i32, %c0_i32_0 : i32, i32
  }
  func.func @transform_4(%arg0: i32) -> (i32, i32) {
    %c0_i32 = arith.constant 0 : i32
    %c0_i32_0 = arith.constant 0 : i32
    %c0_i32_1 = arith.constant 0 : i32
    return %c0_i32, %c0_i32_0 : i32, i32
  }
  func.func @transform_5(%arg0: i32) -> (i32, i32) {
    %c0_i32 = arith.constant 0 : i32
    %c0_i32_0 = arith.constant 0 : i32
    %c0_i32_1 = arith.constant 0 : i32
    return %c0_i32, %c0_i32_0 : i32, i32
  }
  func.func @transform_6(%arg0: i32) -> (i32, i32) {
    %c0_i32 = arith.constant 0 : i32
    %c0_i32_0 = arith.constant 0 : i32
    %c0_i32_1 = arith.constant 0 : i32
    return %c0_i32, %c0_i32_0 : i32, i32
  }
  func.func @transform_7(%arg0: i32) -> (i32, i32) {
    %c0_i32 = arith.constant 0 : i32
    %c0_i32_0 = arith.constant 0 : i32
    return %arg0, %c0_i32 : i32, i32
  }
}

module attributes {stable_mosaic.version = 11 : i64} {
  func.func @_mha_ln_kernel(%arg0: i32, %arg1: memref<1x16x32xf32, #tpu.memory_space<vmem>>, %arg2: memref<1x16x32xf32, #tpu.memory_space<vmem>>, %arg3: memref<1x16x32xf32, #tpu.memory_space<vmem>>, %arg4: memref<1x16x32xf32, #tpu.memory_space<vmem>>, %arg5: memref<32x32xf32, #tpu.memory_space<vmem>>, %arg6: memref<1x32xf32, #tpu.memory_space<vmem>>, %arg7: memref<32x32xf32, #tpu.memory_space<vmem>>, %arg8: memref<1x32xf32, #tpu.memory_space<vmem>>, %arg9: memref<32x32xf32, #tpu.memory_space<vmem>>, %arg10: memref<1x32xf32, #tpu.memory_space<vmem>>, %arg11: memref<32x32xf32, #tpu.memory_space<vmem>>, %arg12: memref<1x32xf32, #tpu.memory_space<vmem>>, %arg13: memref<1x32xf32, #tpu.memory_space<vmem>>, %arg14: memref<1x32xf32, #tpu.memory_space<vmem>>, %arg15: memref<1x16x32xf32, #tpu.memory_space<vmem>>) attributes {dimension_semantics = [#tpu.dimension_semantics<parallel>], iteration_bounds = array<i64: 2>, scalar_prefetch = 0 : i64, scratch_operands = 0 : i64, tpu.core_type = #tpu.core_type<tc>, window_params = [{transform_indices = @transform_0, window_bounds = array<i64: 1, 16, 32>}, {transform_indices = @transform_1, window_bounds = array<i64: 1, 16, 32>}, {transform_indices = @transform_2, window_bounds = array<i64: 1, 16, 32>}, {transform_indices = @transform_3, window_bounds = array<i64: 1, 16, 32>}, {pipeline_mode = #tpu.pipeline_mode<synchronous>, transform_indices = @transform_4, window_bounds = array<i64: 32, 32>}, {pipeline_mode = #tpu.pipeline_mode<synchronous>, transform_indices = @transform_5, window_bounds = array<i64: 1, 32>}, {pipeline_mode = #tpu.pipeline_mode<synchronous>, transform_indices = @transform_6, window_bounds = array<i64: 32, 32>}, {pipeline_mode = #tpu.pipeline_mode<synchronous>, transform_indices = @transform_7, window_bounds = array<i64: 1, 32>}, {pipeline_mode = #tpu.pipeline_mode<synchronous>, transform_indices = @transform_8, window_bounds = array<i64: 32, 32>}, {pipeline_mode = #tpu.pipeline_mode<synchronous>, transform_indices = @transform_9, window_bounds = array<i64: 1, 32>}, {pipeline_mode = #tpu.pipeline_mode<synchronous>, transform_indices = @transform_10, window_bounds = array<i64: 32, 32>}, {pipeline_mode = #tpu.pipeline_mode<synchronous>, transform_indices = @transform_11, window_bounds = array<i64: 1, 32>}, {pipeline_mode = #tpu.pipeline_mode<synchronous>, transform_indices = @transform_12, window_bounds = array<i64: 1, 32>}, {pipeline_mode = #tpu.pipeline_mode<synchronous>, transform_indices = @transform_13, window_bounds = array<i64: 1, 32>}, {transform_indices = @transform_14, window_bounds = array<i64: 1, 16, 32>}]} {
    %c0 = arith.constant 0 : index
    %c0_0 = arith.constant 0 : index
    %c0_1 = arith.constant 0 : index
    %0 = vector.load %arg1[%c0, %c0_0, %c0_1] : memref<1x16x32xf32, #tpu.memory_space<vmem>>, vector<1x16x32xf32>
    %1 = vector.shape_cast %0 : vector<1x16x32xf32> to vector<16x32xf32>
    %c0_2 = arith.constant 0 : index
    %c0_3 = arith.constant 0 : index
    %c0_4 = arith.constant 0 : index
    %2 = vector.load %arg2[%c0_2, %c0_3, %c0_4] : memref<1x16x32xf32, #tpu.memory_space<vmem>>, vector<1x16x32xf32>
    %3 = vector.shape_cast %2 : vector<1x16x32xf32> to vector<16x32xf32>
    %c0_5 = arith.constant 0 : index
    %c0_6 = arith.constant 0 : index
    %c0_7 = arith.constant 0 : index
    %4 = vector.load %arg3[%c0_5, %c0_6, %c0_7] : memref<1x16x32xf32, #tpu.memory_space<vmem>>, vector<1x16x32xf32>
    %5 = vector.shape_cast %4 : vector<1x16x32xf32> to vector<16x32xf32>
    %c0_8 = arith.constant 0 : index
    %c0_9 = arith.constant 0 : index
    %6 = vector.load %arg5[%c0_8, %c0_9] : memref<32x32xf32, #tpu.memory_space<vmem>>, vector<32x32xf32>
    %cst = arith.constant dense<0.000000e+00> : vector<16x32xf32>
    %7 = tpu.matmul %1, %6, %cst {dimension_numbers = #tpu.dot_dimension_numbers<[1], [0], [0], [1], [0, 0, 1, 1], [], []>} : vector<16x32xf32>, vector<32x32xf32>, vector<16x32xf32> -> vector<16x32xf32>
    %c0_10 = arith.constant 0 : index
    %c0_11 = arith.constant 0 : index
    %8 = vector.load %arg6[%c0_10, %c0_11] : memref<1x32xf32, #tpu.memory_space<vmem>>, vector<1x32xf32>
    %9 = vector.broadcast %8 : vector<1x32xf32> to vector<16x32xf32>
    %10 = arith.addf %7, %9 : vector<16x32xf32>
    %c0_12 = arith.constant 0 : index
    %c0_13 = arith.constant 0 : index
    %11 = vector.load %arg7[%c0_12, %c0_13] : memref<32x32xf32, #tpu.memory_space<vmem>>, vector<32x32xf32>
    %cst_14 = arith.constant dense<0.000000e+00> : vector<16x32xf32>
    %12 = tpu.matmul %3, %11, %cst_14 {dimension_numbers = #tpu.dot_dimension_numbers<[1], [0], [0], [1], [0, 0, 1, 1], [], []>} : vector<16x32xf32>, vector<32x32xf32>, vector<16x32xf32> -> vector<16x32xf32>
    %c0_15 = arith.constant 0 : index
    %c0_16 = arith.constant 0 : index
    %13 = vector.load %arg8[%c0_15, %c0_16] : memref<1x32xf32, #tpu.memory_space<vmem>>, vector<1x32xf32>
    %14 = vector.broadcast %13 : vector<1x32xf32> to vector<16x32xf32>
    %15 = arith.addf %12, %14 : vector<16x32xf32>
    %c0_17 = arith.constant 0 : index
    %c0_18 = arith.constant 0 : index
    %16 = vector.load %arg9[%c0_17, %c0_18] : memref<32x32xf32, #tpu.memory_space<vmem>>, vector<32x32xf32>
    %cst_19 = arith.constant dense<0.000000e+00> : vector<16x32xf32>
    %17 = tpu.matmul %5, %16, %cst_19 {dimension_numbers = #tpu.dot_dimension_numbers<[1], [0], [0], [1], [0, 0, 1, 1], [], []>} : vector<16x32xf32>, vector<32x32xf32>, vector<16x32xf32> -> vector<16x32xf32>
    %c0_20 = arith.constant 0 : index
    %c0_21 = arith.constant 0 : index
    %18 = vector.load %arg10[%c0_20, %c0_21] : memref<1x32xf32, #tpu.memory_space<vmem>>, vector<1x32xf32>
    %19 = vector.broadcast %18 : vector<1x32xf32> to vector<16x32xf32>
    %20 = arith.addf %17, %19 : vector<16x32xf32>
    %21 = vector.extract_strided_slice %10 {offsets = [0, 0], sizes = [16, 8], strides = [1, 1]} : vector<16x32xf32> to vector<16x8xf32>
    %22 = vector.extract_strided_slice %15 {offsets = [0, 0], sizes = [16, 8], strides = [1, 1]} : vector<16x32xf32> to vector<16x8xf32>
    %23 = vector.extract_strided_slice %20 {offsets = [0, 0], sizes = [16, 8], strides = [1, 1]} : vector<16x32xf32> to vector<16x8xf32>
    %cst_22 = arith.constant dense<0.000000e+00> : vector<16x16xf32>
    %24 = tpu.matmul %21, %22, %cst_22 {dimension_numbers = #tpu.dot_dimension_numbers<[1], [1], [0], [0], [0, 0, 1, 0], [], []>} : vector<16x8xf32>, vector<16x8xf32>, vector<16x16xf32> -> vector<16x16xf32>
    %cst_23 = arith.constant 0.353553385 : f32
    %25 = vector.broadcast %cst_23 : f32 to vector<16x16xf32>
    %26 = arith.mulf %24, %25 : vector<16x16xf32>
    %cst_24 = arith.constant dense<0xFF800000> : vector<16xf32>
    %27 = vector.multi_reduction <maximumf>, %26, %cst_24 [1] : vector<16x16xf32> to vector<16xf32>
    %28 = vector.shape_cast %27 : vector<16xf32> to vector<16x1xf32>
    %29 = vector.broadcast %28 : vector<16x1xf32> to vector<16x16xf32>
    %30 = arith.subf %26, %29 : vector<16x16xf32>
    %31 = math.exp %30 : vector<16x16xf32>
    %cst_25 = arith.constant dense<0.000000e+00> : vector<16xf32>
    %32 = vector.multi_reduction <add>, %31, %cst_25 [1] : vector<16x16xf32> to vector<16xf32>
    %33 = vector.shape_cast %32 : vector<16xf32> to vector<16x1xf32>
    %34 = tpu.reciprocal %33 {approx = true} : vector<16x1xf32> -> vector<16x1xf32>
    %35 = vector.broadcast %34 : vector<16x1xf32> to vector<16x16xf32>
    %36 = arith.mulf %31, %35 : vector<16x16xf32>
    %cst_26 = arith.constant dense<0.000000e+00> : vector<16x8xf32>
    %37 = tpu.matmul %36, %23, %cst_26 {dimension_numbers = #tpu.dot_dimension_numbers<[1], [0], [0], [1], [0, 0, 1, 1], [], []>} : vector<16x16xf32>, vector<16x8xf32>, vector<16x8xf32> -> vector<16x8xf32>
    %38 = vector.extract_strided_slice %10 {offsets = [0, 8], sizes = [16, 8], strides = [1, 1]} : vector<16x32xf32> to vector<16x8xf32>
    %39 = vector.extract_strided_slice %15 {offsets = [0, 8], sizes = [16, 8], strides = [1, 1]} : vector<16x32xf32> to vector<16x8xf32>
    %40 = vector.extract_strided_slice %20 {offsets = [0, 8], sizes = [16, 8], strides = [1, 1]} : vector<16x32xf32> to vector<16x8xf32>
    %cst_27 = arith.constant dense<0.000000e+00> : vector<16x16xf32>
    %41 = tpu.matmul %38, %39, %cst_27 {dimension_numbers = #tpu.dot_dimension_numbers<[1], [1], [0], [0], [0, 0, 1, 0], [], []>} : vector<16x8xf32>, vector<16x8xf32>, vector<16x16xf32> -> vector<16x16xf32>
    %cst_28 = arith.constant 0.353553385 : f32
    %42 = vector.broadcast %cst_28 : f32 to vector<16x16xf32>
    %43 = arith.mulf %41, %42 : vector<16x16xf32>
    %cst_29 = arith.constant dense<0xFF800000> : vector<16xf32>
    %44 = vector.multi_reduction <maximumf>, %43, %cst_29 [1] : vector<16x16xf32> to vector<16xf32>
    %45 = vector.shape_cast %44 : vector<16xf32> to vector<16x1xf32>
    %46 = vector.broadcast %45 : vector<16x1xf32> to vector<16x16xf32>
    %47 = arith.subf %43, %46 : vector<16x16xf32>
    %48 = math.exp %47 : vector<16x16xf32>
    %cst_30 = arith.constant dense<0.000000e+00> : vector<16xf32>
    %49 = vector.multi_reduction <add>, %48, %cst_30 [1] : vector<16x16xf32> to vector<16xf32>
    %50 = vector.shape_cast %49 : vector<16xf32> to vector<16x1xf32>
    %51 = tpu.reciprocal %50 {approx = true} : vector<16x1xf32> -> vector<16x1xf32>
    %52 = vector.broadcast %51 : vector<16x1xf32> to vector<16x16xf32>
    %53 = arith.mulf %48, %52 : vector<16x16xf32>
    %cst_31 = arith.constant dense<0.000000e+00> : vector<16x8xf32>
    %54 = tpu.matmul %53, %40, %cst_31 {dimension_numbers = #tpu.dot_dimension_numbers<[1], [0], [0], [1], [0, 0, 1, 1], [], []>} : vector<16x16xf32>, vector<16x8xf32>, vector<16x8xf32> -> vector<16x8xf32>
    %55 = vector.extract_strided_slice %10 {offsets = [0, 16], sizes = [16, 8], strides = [1, 1]} : vector<16x32xf32> to vector<16x8xf32>
    %56 = vector.extract_strided_slice %15 {offsets = [0, 16], sizes = [16, 8], strides = [1, 1]} : vector<16x32xf32> to vector<16x8xf32>
    %57 = vector.extract_strided_slice %20 {offsets = [0, 16], sizes = [16, 8], strides = [1, 1]} : vector<16x32xf32> to vector<16x8xf32>
    %cst_32 = arith.constant dense<0.000000e+00> : vector<16x16xf32>
    %58 = tpu.matmul %55, %56, %cst_32 {dimension_numbers = #tpu.dot_dimension_numbers<[1], [1], [0], [0], [0, 0, 1, 0], [], []>} : vector<16x8xf32>, vector<16x8xf32>, vector<16x16xf32> -> vector<16x16xf32>
    %cst_33 = arith.constant 0.353553385 : f32
    %59 = vector.broadcast %cst_33 : f32 to vector<16x16xf32>
    %60 = arith.mulf %58, %59 : vector<16x16xf32>
    %cst_34 = arith.constant dense<0xFF800000> : vector<16xf32>
    %61 = vector.multi_reduction <maximumf>, %60, %cst_34 [1] : vector<16x16xf32> to vector<16xf32>
    %62 = vector.shape_cast %61 : vector<16xf32> to vector<16x1xf32>
    %63 = vector.broadcast %62 : vector<16x1xf32> to vector<16x16xf32>
    %64 = arith.subf %60, %63 : vector<16x16xf32>
    %65 = math.exp %64 : vector<16x16xf32>
    %cst_35 = arith.constant dense<0.000000e+00> : vector<16xf32>
    %66 = vector.multi_reduction <add>, %65, %cst_35 [1] : vector<16x16xf32> to vector<16xf32>
    %67 = vector.shape_cast %66 : vector<16xf32> to vector<16x1xf32>
    %68 = tpu.reciprocal %67 {approx = true} : vector<16x1xf32> -> vector<16x1xf32>
    %69 = vector.broadcast %68 : vector<16x1xf32> to vector<16x16xf32>
    %70 = arith.mulf %65, %69 : vector<16x16xf32>
    %cst_36 = arith.constant dense<0.000000e+00> : vector<16x8xf32>
    %71 = tpu.matmul %70, %57, %cst_36 {dimension_numbers = #tpu.dot_dimension_numbers<[1], [0], [0], [1], [0, 0, 1, 1], [], []>} : vector<16x16xf32>, vector<16x8xf32>, vector<16x8xf32> -> vector<16x8xf32>
    %72 = vector.extract_strided_slice %10 {offsets = [0, 24], sizes = [16, 8], strides = [1, 1]} : vector<16x32xf32> to vector<16x8xf32>
    %73 = vector.extract_strided_slice %15 {offsets = [0, 24], sizes = [16, 8], strides = [1, 1]} : vector<16x32xf32> to vector<16x8xf32>
    %74 = vector.extract_strided_slice %20 {offsets = [0, 24], sizes = [16, 8], strides = [1, 1]} : vector<16x32xf32> to vector<16x8xf32>
    %cst_37 = arith.constant dense<0.000000e+00> : vector<16x16xf32>
    %75 = tpu.matmul %72, %73, %cst_37 {dimension_numbers = #tpu.dot_dimension_numbers<[1], [1], [0], [0], [0, 0, 1, 0], [], []>} : vector<16x8xf32>, vector<16x8xf32>, vector<16x16xf32> -> vector<16x16xf32>
    %cst_38 = arith.constant 0.353553385 : f32
    %76 = vector.broadcast %cst_38 : f32 to vector<16x16xf32>
    %77 = arith.mulf %75, %76 : vector<16x16xf32>
    %cst_39 = arith.constant dense<0xFF800000> : vector<16xf32>
    %78 = vector.multi_reduction <maximumf>, %77, %cst_39 [1] : vector<16x16xf32> to vector<16xf32>
    %79 = vector.shape_cast %78 : vector<16xf32> to vector<16x1xf32>
    %80 = vector.broadcast %79 : vector<16x1xf32> to vector<16x16xf32>
    %81 = arith.subf %77, %80 : vector<16x16xf32>
    %82 = math.exp %81 : vector<16x16xf32>
    %cst_40 = arith.constant dense<0.000000e+00> : vector<16xf32>
    %83 = vector.multi_reduction <add>, %82, %cst_40 [1] : vector<16x16xf32> to vector<16xf32>
    %84 = vector.shape_cast %83 : vector<16xf32> to vector<16x1xf32>
    %85 = tpu.reciprocal %84 {approx = true} : vector<16x1xf32> -> vector<16x1xf32>
    %86 = vector.broadcast %85 : vector<16x1xf32> to vector<16x16xf32>
    %87 = arith.mulf %82, %86 : vector<16x16xf32>
    %cst_41 = arith.constant dense<0.000000e+00> : vector<16x8xf32>
    %88 = tpu.matmul %87, %74, %cst_41 {dimension_numbers = #tpu.dot_dimension_numbers<[1], [0], [0], [1], [0, 0, 1, 1], [], []>} : vector<16x16xf32>, vector<16x8xf32>, vector<16x8xf32> -> vector<16x8xf32>
    %89 = tpu.concatenate %37, %54, %71, %88 in 1 : vector<16x8xf32>, vector<16x8xf32>, vector<16x8xf32>, vector<16x8xf32> -> vector<16x32xf32>
    %c0_42 = arith.constant 0 : index
    %c0_43 = arith.constant 0 : index
    %90 = vector.load %arg11[%c0_42, %c0_43] : memref<32x32xf32, #tpu.memory_space<vmem>>, vector<32x32xf32>
    %cst_44 = arith.constant dense<0.000000e+00> : vector<16x32xf32>
    %91 = tpu.matmul %89, %90, %cst_44 {dimension_numbers = #tpu.dot_dimension_numbers<[1], [0], [0], [1], [0, 0, 1, 1], [], []>} : vector<16x32xf32>, vector<32x32xf32>, vector<16x32xf32> -> vector<16x32xf32>
    %c0_45 = arith.constant 0 : index
    %c0_46 = arith.constant 0 : index
    %92 = vector.load %arg12[%c0_45, %c0_46] : memref<1x32xf32, #tpu.memory_space<vmem>>, vector<1x32xf32>
    %93 = vector.broadcast %92 : vector<1x32xf32> to vector<16x32xf32>
    %94 = arith.addf %91, %93 : vector<16x32xf32>
    %c0_47 = arith.constant 0 : index
    %c0_48 = arith.constant 0 : index
    %c0_49 = arith.constant 0 : index
    %95 = vector.load %arg4[%c0_47, %c0_48, %c0_49] : memref<1x16x32xf32, #tpu.memory_space<vmem>>, vector<1x16x32xf32>
    %96 = vector.shape_cast %95 : vector<1x16x32xf32> to vector<16x32xf32>
    %97 = arith.addf %96, %94 : vector<16x32xf32>
    %cst_50 = arith.constant dense<0.000000e+00> : vector<16xf32>
    %98 = vector.multi_reduction <add>, %97, %cst_50 [1] : vector<16x32xf32> to vector<16xf32>
    %99 = vector.shape_cast %98 : vector<16xf32> to vector<16x1xf32>
    %cst_51 = arith.constant 3.200000e+01 : f32
    %100 = vector.broadcast %cst_51 : f32 to vector<16x1xf32>
    %101 = arith.divf %99, %100 : vector<16x1xf32>
    %102 = vector.broadcast %101 : vector<16x1xf32> to vector<16x32xf32>
    %103 = arith.subf %97, %102 : vector<16x32xf32>
    %104 = arith.mulf %103, %103 : vector<16x32xf32>
    %cst_52 = arith.constant dense<0.000000e+00> : vector<16xf32>
    %105 = vector.multi_reduction <add>, %104, %cst_52 [1] : vector<16x32xf32> to vector<16xf32>
    %106 = vector.shape_cast %105 : vector<16xf32> to vector<16x1xf32>
    %cst_53 = arith.constant 3.200000e+01 : f32
    %107 = vector.broadcast %cst_53 : f32 to vector<16x1xf32>
    %108 = arith.divf %106, %107 : vector<16x1xf32>
    %109 = vector.broadcast %101 : vector<16x1xf32> to vector<16x32xf32>
    %110 = arith.subf %97, %109 : vector<16x32xf32>
    %cst_54 = arith.constant 9.99999974E-6 : f32
    %111 = vector.broadcast %cst_54 : f32 to vector<16x1xf32>
    %112 = arith.addf %108, %111 : vector<16x1xf32>
    %113 = math.rsqrt %112 : vector<16x1xf32>
    %114 = vector.broadcast %113 : vector<16x1xf32> to vector<16x32xf32>
    %115 = arith.mulf %110, %114 : vector<16x32xf32>
    %c0_55 = arith.constant 0 : index
    %c0_56 = arith.constant 0 : index
    %116 = vector.load %arg13[%c0_55, %c0_56] : memref<1x32xf32, #tpu.memory_space<vmem>>, vector<1x32xf32>
    %117 = vector.broadcast %116 : vector<1x32xf32> to vector<16x32xf32>
    %118 = arith.mulf %115, %117 : vector<16x32xf32>
    %c0_57 = arith.constant 0 : index
    %c0_58 = arith.constant 0 : index
    %119 = vector.load %arg14[%c0_57, %c0_58] : memref<1x32xf32, #tpu.memory_space<vmem>>, vector<1x32xf32>
    %120 = vector.broadcast %119 : vector<1x32xf32> to vector<16x32xf32>
    %121 = arith.addf %118, %120 : vector<16x32xf32>
    %c0_59 = arith.constant 0 : index
    %c0_60 = arith.constant 0 : index
    %c0_61 = arith.constant 0 : index
    %122 = vector.load %arg15[%c0_59, %c0_60, %c0_61] : memref<1x16x32xf32, #tpu.memory_space<vmem>>, vector<1x16x32xf32>
    %123 = vector.shape_cast %122 : vector<1x16x32xf32> to vector<16x32xf32>
    %124 = vector.shape_cast %121 : vector<16x32xf32> to vector<1x16x32xf32>
    tpu.vector_store %arg15[%c0_59, %c0_60, %c0_61], %124 {strides = array<i32>} : memref<1x16x32xf32, #tpu.memory_space<vmem>>, vector<1x16x32xf32>,
    return
  }
  func.func @transform_0(%arg0: i32) -> (i32, i32, i32) {
    %c0_i32 = arith.constant 0 : i32
    %c0_i32_0 = arith.constant 0 : i32
    %c0_i32_1 = arith.constant 0 : i32
    return %arg0, %c0_i32, %c0_i32_0 : i32, i32, i32
  }
  func.func @transform_1(%arg0: i32) -> (i32, i32, i32) {
    %c0_i32 = arith.constant 0 : i32
    %c0_i32_0 = arith.constant 0 : i32
    %c0_i32_1 = arith.constant 0 : i32
    return %arg0, %c0_i32, %c0_i32_0 : i32, i32, i32
  }
  func.func @transform_2(%arg0: i32) -> (i32, i32, i32) {
    %c0_i32 = arith.constant 0 : i32
    %c0_i32_0 = arith.constant 0 : i32
    %c0_i32_1 = arith.constant 0 : i32
    return %arg0, %c0_i32, %c0_i32_0 : i32, i32, i32
  }
  func.func @transform_3(%arg0: i32) -> (i32, i32, i32) {
    %c0_i32 = arith.constant 0 : i32
    %c0_i32_0 = arith.constant 0 : i32
    %c0_i32_1 = arith.constant 0 : i32
    return %arg0, %c0_i32, %c0_i32_0 : i32, i32, i32
  }
  func.func @transform_4(%arg0: i32) -> (i32, i32) {
    %c0_i32 = arith.constant 0 : i32
    %c0_i32_0 = arith.constant 0 : i32
    %c0_i32_1 = arith.constant 0 : i32
    return %c0_i32, %c0_i32_0 : i32, i32
  }
  func.func @transform_5(%arg0: i32) -> (i32, i32) {
    %c0_i32 = arith.constant 0 : i32
    %c0_i32_0 = arith.constant 0 : i32
    %c0_i32_1 = arith.constant 0 : i32
    return %c0_i32, %c0_i32_0 : i32, i32
  }
  func.func @transform_6(%arg0: i32) -> (i32, i32) {
    %c0_i32 = arith.constant 0 : i32
    %c0_i32_0 = arith.constant 0 : i32
    %c0_i32_1 = arith.constant 0 : i32
    return %c0_i32, %c0_i32_0 : i32, i32
  }
  func.func @transform_7(%arg0: i32) -> (i32, i32) {
    %c0_i32 = arith.constant 0 : i32
    %c0_i32_0 = arith.constant 0 : i32
    %c0_i32_1 = arith.constant 0 : i32
    return %c0_i32, %c0_i32_0 : i32, i32
  }
  func.func @transform_8(%arg0: i32) -> (i32, i32) {
    %c0_i32 = arith.constant 0 : i32
    %c0_i32_0 = arith.constant 0 : i32
    %c0_i32_1 = arith.constant 0 : i32
    return %c0_i32, %c0_i32_0 : i32, i32
  }
  func.func @transform_9(%arg0: i32) -> (i32, i32) {
    %c0_i32 = arith.constant 0 : i32
    %c0_i32_0 = arith.constant 0 : i32
    %c0_i32_1 = arith.constant 0 : i32
    return %c0_i32, %c0_i32_0 : i32, i32
  }
  func.func @transform_10(%arg0: i32) -> (i32, i32) {
    %c0_i32 = arith.constant 0 : i32
    %c0_i32_0 = arith.constant 0 : i32
    %c0_i32_1 = arith.constant 0 : i32
    return %c0_i32, %c0_i32_0 : i32, i32
  }
  func.func @transform_11(%arg0: i32) -> (i32, i32) {
    %c0_i32 = arith.constant 0 : i32
    %c0_i32_0 = arith.constant 0 : i32
    %c0_i32_1 = arith.constant 0 : i32
    return %c0_i32, %c0_i32_0 : i32, i32
  }
  func.func @transform_12(%arg0: i32) -> (i32, i32) {
    %c0_i32 = arith.constant 0 : i32
    %c0_i32_0 = arith.constant 0 : i32
    %c0_i32_1 = arith.constant 0 : i32
    return %c0_i32, %c0_i32_0 : i32, i32
  }
  func.func @transform_13(%arg0: i32) -> (i32, i32) {
    %c0_i32 = arith.constant 0 : i32
    %c0_i32_0 = arith.constant 0 : i32
    %c0_i32_1 = arith.constant 0 : i32
    return %c0_i32, %c0_i32_0 : i32, i32
  }
  func.func @transform_14(%arg0: i32) -> (i32, i32, i32) {
    %c0_i32 = arith.constant 0 : i32
    %c0_i32_0 = arith.constant 0 : i32
    %c0_i32_1 = arith.constant 0 : i32
    return %arg0, %c0_i32, %c0_i32_0 : i32, i32, i32
  }
}

module attributes {stable_mosaic.version = 11 : i64} {
  func.func @_ffn_ln_kernel(%arg0: i32, %arg1: memref<32x32xf32, #tpu.memory_space<vmem>>, %arg2: memref<32x64xf32, #tpu.memory_space<vmem>>, %arg3: memref<1x64xf32, #tpu.memory_space<vmem>>, %arg4: memref<64x32xf32, #tpu.memory_space<vmem>>, %arg5: memref<1x32xf32, #tpu.memory_space<vmem>>, %arg6: memref<1x32xf32, #tpu.memory_space<vmem>>, %arg7: memref<1x32xf32, #tpu.memory_space<vmem>>, %arg8: memref<32x32xf32, #tpu.memory_space<vmem>>) attributes {dimension_semantics = [#tpu.dimension_semantics<parallel>], iteration_bounds = array<i64: 1>, scalar_prefetch = 0 : i64, scratch_operands = 0 : i64, tpu.core_type = #tpu.core_type<tc>, window_params = [{transform_indices = @transform_0, window_bounds = array<i64: 32, 32>}, {pipeline_mode = #tpu.pipeline_mode<synchronous>, transform_indices = @transform_1, window_bounds = array<i64: 32, 64>}, {pipeline_mode = #tpu.pipeline_mode<synchronous>, transform_indices = @transform_2, window_bounds = array<i64: 1, 64>}, {pipeline_mode = #tpu.pipeline_mode<synchronous>, transform_indices = @transform_3, window_bounds = array<i64: 64, 32>}, {pipeline_mode = #tpu.pipeline_mode<synchronous>, transform_indices = @transform_4, window_bounds = array<i64: 1, 32>}, {pipeline_mode = #tpu.pipeline_mode<synchronous>, transform_indices = @transform_5, window_bounds = array<i64: 1, 32>}, {pipeline_mode = #tpu.pipeline_mode<synchronous>, transform_indices = @transform_6, window_bounds = array<i64: 1, 32>}, {transform_indices = @transform_7, window_bounds = array<i64: 32, 32>}]} {
    %c0 = arith.constant 0 : index
    %c0_0 = arith.constant 0 : index
    %0 = vector.load %arg1[%c0, %c0_0] : memref<32x32xf32, #tpu.memory_space<vmem>>, vector<32x32xf32>
    %c0_1 = arith.constant 0 : index
    %c0_2 = arith.constant 0 : index
    %1 = vector.load %arg2[%c0_1, %c0_2] : memref<32x64xf32, #tpu.memory_space<vmem>>, vector<32x64xf32>
    %cst = arith.constant dense<0.000000e+00> : vector<32x64xf32>
    %2 = tpu.matmul %0, %1, %cst {dimension_numbers = #tpu.dot_dimension_numbers<[1], [0], [0], [1], [0, 0, 1, 1], [], []>} : vector<32x32xf32>, vector<32x64xf32>, vector<32x64xf32> -> vector<32x64xf32>
    %c0_3 = arith.constant 0 : index
    %c0_4 = arith.constant 0 : index
    %3 = vector.load %arg3[%c0_3, %c0_4] : memref<1x64xf32, #tpu.memory_space<vmem>>, vector<1x64xf32>
    %4 = vector.broadcast %3 : vector<1x64xf32> to vector<32x64xf32>
    %5 = arith.addf %2, %4 : vector<32x64xf32>
    %cst_5 = arith.constant 0.000000e+00 : f32
    %6 = vector.broadcast %cst_5 : f32 to vector<32x64xf32>
    %7 = arith.maximumf %5, %6 : vector<32x64xf32>
    %c0_6 = arith.constant 0 : index
    %c0_7 = arith.constant 0 : index
    %8 = vector.load %arg4[%c0_6, %c0_7] : memref<64x32xf32, #tpu.memory_space<vmem>>, vector<64x32xf32>
    %cst_8 = arith.constant dense<0.000000e+00> : vector<32x32xf32>
    %9 = tpu.matmul %7, %8, %cst_8 {dimension_numbers = #tpu.dot_dimension_numbers<[1], [0], [0], [1], [0, 0, 1, 1], [], []>} : vector<32x64xf32>, vector<64x32xf32>, vector<32x32xf32> -> vector<32x32xf32>
    %c0_9 = arith.constant 0 : index
    %c0_10 = arith.constant 0 : index
    %10 = vector.load %arg5[%c0_9, %c0_10] : memref<1x32xf32, #tpu.memory_space<vmem>>, vector<1x32xf32>
    %11 = vector.broadcast %10 : vector<1x32xf32> to vector<32x32xf32>
    %12 = arith.addf %9, %11 : vector<32x32xf32>
    %13 = arith.addf %0, %12 : vector<32x32xf32>
    %cst_11 = arith.constant dense<0.000000e+00> : vector<32xf32>
    %14 = vector.multi_reduction <add>, %13, %cst_11 [1] : vector<32x32xf32> to vector<32xf32>
    %15 = vector.shape_cast %14 : vector<32xf32> to vector<32x1xf32>
    %cst_12 = arith.constant 3.200000e+01 : f32
    %16 = vector.broadcast %cst_12 : f32 to vector<32x1xf32>
    %17 = arith.divf %15, %16 : vector<32x1xf32>
    %18 = vector.broadcast %17 : vector<32x1xf32> to vector<32x32xf32>
    %19 = arith.subf %13, %18 : vector<32x32xf32>
    %20 = arith.mulf %19, %19 : vector<32x32xf32>
    %cst_13 = arith.constant dense<0.000000e+00> : vector<32xf32>
    %21 = vector.multi_reduction <add>, %20, %cst_13 [1] : vector<32x32xf32> to vector<32xf32>
    %22 = vector.shape_cast %21 : vector<32xf32> to vector<32x1xf32>
    %cst_14 = arith.constant 3.200000e+01 : f32
    %23 = vector.broadcast %cst_14 : f32 to vector<32x1xf32>
    %24 = arith.divf %22, %23 : vector<32x1xf32>
    %25 = vector.broadcast %17 : vector<32x1xf32> to vector<32x32xf32>
    %26 = arith.subf %13, %25 : vector<32x32xf32>
    %cst_15 = arith.constant 9.99999974E-6 : f32
    %27 = vector.broadcast %cst_15 : f32 to vector<32x1xf32>
    %28 = arith.addf %24, %27 : vector<32x1xf32>
    %29 = math.rsqrt %28 : vector<32x1xf32>
    %30 = vector.broadcast %29 : vector<32x1xf32> to vector<32x32xf32>
    %31 = arith.mulf %26, %30 : vector<32x32xf32>
    %c0_16 = arith.constant 0 : index
    %c0_17 = arith.constant 0 : index
    %32 = vector.load %arg6[%c0_16, %c0_17] : memref<1x32xf32, #tpu.memory_space<vmem>>, vector<1x32xf32>
    %33 = vector.broadcast %32 : vector<1x32xf32> to vector<32x32xf32>
    %34 = arith.mulf %31, %33 : vector<32x32xf32>
    %c0_18 = arith.constant 0 : index
    %c0_19 = arith.constant 0 : index
    %35 = vector.load %arg7[%c0_18, %c0_19] : memref<1x32xf32, #tpu.memory_space<vmem>>, vector<1x32xf32>
    %36 = vector.broadcast %35 : vector<1x32xf32> to vector<32x32xf32>
    %37 = arith.addf %34, %36 : vector<32x32xf32>
    %c0_20 = arith.constant 0 : index
    %c0_21 = arith.constant 0 : index
    %38 = vector.load %arg8[%c0_20, %c0_21] : memref<32x32xf32, #tpu.memory_space<vmem>>, vector<32x32xf32>
    tpu.vector_store %arg8[%c0_20, %c0_21], %37 {strides = array<i32>} : memref<32x32xf32, #tpu.memory_space<vmem>>, vector<32x32xf32>,
    return
  }
  func.func @transform_0(%arg0: i32) -> (i32, i32) {
    %c0_i32 = arith.constant 0 : i32
    %c0_i32_0 = arith.constant 0 : i32
    return %arg0, %c0_i32 : i32, i32
  }
  func.func @transform_1(%arg0: i32) -> (i32, i32) {
    %c0_i32 = arith.constant 0 : i32
    %c0_i32_0 = arith.constant 0 : i32
    %c0_i32_1 = arith.constant 0 : i32
    return %c0_i32, %c0_i32_0 : i32, i32
  }
  func.func @transform_2(%arg0: i32) -> (i32, i32) {
    %c0_i32 = arith.constant 0 : i32
    %c0_i32_0 = arith.constant 0 : i32
    %c0_i32_1 = arith.constant 0 : i32
    return %c0_i32, %c0_i32_0 : i32, i32
  }
  func.func @transform_3(%arg0: i32) -> (i32, i32) {
    %c0_i32 = arith.constant 0 : i32
    %c0_i32_0 = arith.constant 0 : i32
    %c0_i32_1 = arith.constant 0 : i32
    return %c0_i32, %c0_i32_0 : i32, i32
  }
  func.func @transform_4(%arg0: i32) -> (i32, i32) {
    %c0_i32 = arith.constant 0 : i32
    %c0_i32_0 = arith.constant 0 : i32
    %c0_i32_1 = arith.constant 0 : i32
    return %c0_i32, %c0_i32_0 : i32, i32
  }
  func.func @transform_5(%arg0: i32) -> (i32, i32) {
    %c0_i32 = arith.constant 0 : i32
    %c0_i32_0 = arith.constant 0 : i32
    %c0_i32_1 = arith.constant 0 : i32
    return %c0_i32, %c0_i32_0 : i32, i32
  }
  func.func @transform_6(%arg0: i32) -> (i32, i32) {
    %c0_i32 = arith.constant 0 : i32
    %c0_i32_0 = arith.constant 0 : i32
    %c0_i32_1 = arith.constant 0 : i32
    return %c0_i32, %c0_i32_0 : i32, i32
  }
  func.func @transform_7(%arg0: i32) -> (i32, i32) {
    %c0_i32 = arith.constant 0 : i32
    %c0_i32_0 = arith.constant 0 : i32
    return %arg0, %c0_i32 : i32, i32
  }
}

module attributes {stable_mosaic.version = 11 : i64} {
  func.func @_mha_ln_kernel(%arg0: i32, %arg1: memref<1x16x32xf32, #tpu.memory_space<vmem>>, %arg2: memref<1x16x32xf32, #tpu.memory_space<vmem>>, %arg3: memref<1x16x32xf32, #tpu.memory_space<vmem>>, %arg4: memref<1x16x32xf32, #tpu.memory_space<vmem>>, %arg5: memref<32x32xf32, #tpu.memory_space<vmem>>, %arg6: memref<1x32xf32, #tpu.memory_space<vmem>>, %arg7: memref<32x32xf32, #tpu.memory_space<vmem>>, %arg8: memref<1x32xf32, #tpu.memory_space<vmem>>, %arg9: memref<32x32xf32, #tpu.memory_space<vmem>>, %arg10: memref<1x32xf32, #tpu.memory_space<vmem>>, %arg11: memref<32x32xf32, #tpu.memory_space<vmem>>, %arg12: memref<1x32xf32, #tpu.memory_space<vmem>>, %arg13: memref<1x32xf32, #tpu.memory_space<vmem>>, %arg14: memref<1x32xf32, #tpu.memory_space<vmem>>, %arg15: memref<1x16x32xf32, #tpu.memory_space<vmem>>) attributes {dimension_semantics = [#tpu.dimension_semantics<parallel>], iteration_bounds = array<i64: 2>, scalar_prefetch = 0 : i64, scratch_operands = 0 : i64, tpu.core_type = #tpu.core_type<tc>, window_params = [{transform_indices = @transform_0, window_bounds = array<i64: 1, 16, 32>}, {transform_indices = @transform_1, window_bounds = array<i64: 1, 16, 32>}, {transform_indices = @transform_2, window_bounds = array<i64: 1, 16, 32>}, {transform_indices = @transform_3, window_bounds = array<i64: 1, 16, 32>}, {pipeline_mode = #tpu.pipeline_mode<synchronous>, transform_indices = @transform_4, window_bounds = array<i64: 32, 32>}, {pipeline_mode = #tpu.pipeline_mode<synchronous>, transform_indices = @transform_5, window_bounds = array<i64: 1, 32>}, {pipeline_mode = #tpu.pipeline_mode<synchronous>, transform_indices = @transform_6, window_bounds = array<i64: 32, 32>}, {pipeline_mode = #tpu.pipeline_mode<synchronous>, transform_indices = @transform_7, window_bounds = array<i64: 1, 32>}, {pipeline_mode = #tpu.pipeline_mode<synchronous>, transform_indices = @transform_8, window_bounds = array<i64: 32, 32>}, {pipeline_mode = #tpu.pipeline_mode<synchronous>, transform_indices = @transform_9, window_bounds = array<i64: 1, 32>}, {pipeline_mode = #tpu.pipeline_mode<synchronous>, transform_indices = @transform_10, window_bounds = array<i64: 32, 32>}, {pipeline_mode = #tpu.pipeline_mode<synchronous>, transform_indices = @transform_11, window_bounds = array<i64: 1, 32>}, {pipeline_mode = #tpu.pipeline_mode<synchronous>, transform_indices = @transform_12, window_bounds = array<i64: 1, 32>}, {pipeline_mode = #tpu.pipeline_mode<synchronous>, transform_indices = @transform_13, window_bounds = array<i64: 1, 32>}, {transform_indices = @transform_14, window_bounds = array<i64: 1, 16, 32>}]} {
    %c0 = arith.constant 0 : index
    %c0_0 = arith.constant 0 : index
    %c0_1 = arith.constant 0 : index
    %0 = vector.load %arg1[%c0, %c0_0, %c0_1] : memref<1x16x32xf32, #tpu.memory_space<vmem>>, vector<1x16x32xf32>
    %1 = vector.shape_cast %0 : vector<1x16x32xf32> to vector<16x32xf32>
    %c0_2 = arith.constant 0 : index
    %c0_3 = arith.constant 0 : index
    %c0_4 = arith.constant 0 : index
    %2 = vector.load %arg2[%c0_2, %c0_3, %c0_4] : memref<1x16x32xf32, #tpu.memory_space<vmem>>, vector<1x16x32xf32>
    %3 = vector.shape_cast %2 : vector<1x16x32xf32> to vector<16x32xf32>
    %c0_5 = arith.constant 0 : index
    %c0_6 = arith.constant 0 : index
    %c0_7 = arith.constant 0 : index
    %4 = vector.load %arg3[%c0_5, %c0_6, %c0_7] : memref<1x16x32xf32, #tpu.memory_space<vmem>>, vector<1x16x32xf32>
    %5 = vector.shape_cast %4 : vector<1x16x32xf32> to vector<16x32xf32>
    %c0_8 = arith.constant 0 : index
    %c0_9 = arith.constant 0 : index
    %6 = vector.load %arg5[%c0_8, %c0_9] : memref<32x32xf32, #tpu.memory_space<vmem>>, vector<32x32xf32>
    %cst = arith.constant dense<0.000000e+00> : vector<16x32xf32>
    %7 = tpu.matmul %1, %6, %cst {dimension_numbers = #tpu.dot_dimension_numbers<[1], [0], [0], [1], [0, 0, 1, 1], [], []>} : vector<16x32xf32>, vector<32x32xf32>, vector<16x32xf32> -> vector<16x32xf32>
    %c0_10 = arith.constant 0 : index
    %c0_11 = arith.constant 0 : index
    %8 = vector.load %arg6[%c0_10, %c0_11] : memref<1x32xf32, #tpu.memory_space<vmem>>, vector<1x32xf32>
    %9 = vector.broadcast %8 : vector<1x32xf32> to vector<16x32xf32>
    %10 = arith.addf %7, %9 : vector<16x32xf32>
    %c0_12 = arith.constant 0 : index
    %c0_13 = arith.constant 0 : index
    %11 = vector.load %arg7[%c0_12, %c0_13] : memref<32x32xf32, #tpu.memory_space<vmem>>, vector<32x32xf32>
    %cst_14 = arith.constant dense<0.000000e+00> : vector<16x32xf32>
    %12 = tpu.matmul %3, %11, %cst_14 {dimension_numbers = #tpu.dot_dimension_numbers<[1], [0], [0], [1], [0, 0, 1, 1], [], []>} : vector<16x32xf32>, vector<32x32xf32>, vector<16x32xf32> -> vector<16x32xf32>
    %c0_15 = arith.constant 0 : index
    %c0_16 = arith.constant 0 : index
    %13 = vector.load %arg8[%c0_15, %c0_16] : memref<1x32xf32, #tpu.memory_space<vmem>>, vector<1x32xf32>
    %14 = vector.broadcast %13 : vector<1x32xf32> to vector<16x32xf32>
    %15 = arith.addf %12, %14 : vector<16x32xf32>
    %c0_17 = arith.constant 0 : index
    %c0_18 = arith.constant 0 : index
    %16 = vector.load %arg9[%c0_17, %c0_18] : memref<32x32xf32, #tpu.memory_space<vmem>>, vector<32x32xf32>
    %cst_19 = arith.constant dense<0.000000e+00> : vector<16x32xf32>
    %17 = tpu.matmul %5, %16, %cst_19 {dimension_numbers = #tpu.dot_dimension_numbers<[1], [0], [0], [1], [0, 0, 1, 1], [], []>} : vector<16x32xf32>, vector<32x32xf32>, vector<16x32xf32> -> vector<16x32xf32>
    %c0_20 = arith.constant 0 : index
    %c0_21 = arith.constant 0 : index
    %18 = vector.load %arg10[%c0_20, %c0_21] : memref<1x32xf32, #tpu.memory_space<vmem>>, vector<1x32xf32>
    %19 = vector.broadcast %18 : vector<1x32xf32> to vector<16x32xf32>
    %20 = arith.addf %17, %19 : vector<16x32xf32>
    %21 = vector.extract_strided_slice %10 {offsets = [0, 0], sizes = [16, 8], strides = [1, 1]} : vector<16x32xf32> to vector<16x8xf32>
    %22 = vector.extract_strided_slice %15 {offsets = [0, 0], sizes = [16, 8], strides = [1, 1]} : vector<16x32xf32> to vector<16x8xf32>
    %23 = vector.extract_strided_slice %20 {offsets = [0, 0], sizes = [16, 8], strides = [1, 1]} : vector<16x32xf32> to vector<16x8xf32>
    %cst_22 = arith.constant dense<0.000000e+00> : vector<16x16xf32>
    %24 = tpu.matmul %21, %22, %cst_22 {dimension_numbers = #tpu.dot_dimension_numbers<[1], [1], [0], [0], [0, 0, 1, 0], [], []>} : vector<16x8xf32>, vector<16x8xf32>, vector<16x16xf32> -> vector<16x16xf32>
    %cst_23 = arith.constant 0.353553385 : f32
    %25 = vector.broadcast %cst_23 : f32 to vector<16x16xf32>
    %26 = arith.mulf %24, %25 : vector<16x16xf32>
    %cst_24 = arith.constant dense<0xFF800000> : vector<16xf32>
    %27 = vector.multi_reduction <maximumf>, %26, %cst_24 [1] : vector<16x16xf32> to vector<16xf32>
    %28 = vector.shape_cast %27 : vector<16xf32> to vector<16x1xf32>
    %29 = vector.broadcast %28 : vector<16x1xf32> to vector<16x16xf32>
    %30 = arith.subf %26, %29 : vector<16x16xf32>
    %31 = math.exp %30 : vector<16x16xf32>
    %cst_25 = arith.constant dense<0.000000e+00> : vector<16xf32>
    %32 = vector.multi_reduction <add>, %31, %cst_25 [1] : vector<16x16xf32> to vector<16xf32>
    %33 = vector.shape_cast %32 : vector<16xf32> to vector<16x1xf32>
    %34 = tpu.reciprocal %33 {approx = true} : vector<16x1xf32> -> vector<16x1xf32>
    %35 = vector.broadcast %34 : vector<16x1xf32> to vector<16x16xf32>
    %36 = arith.mulf %31, %35 : vector<16x16xf32>
    %cst_26 = arith.constant dense<0.000000e+00> : vector<16x8xf32>
    %37 = tpu.matmul %36, %23, %cst_26 {dimension_numbers = #tpu.dot_dimension_numbers<[1], [0], [0], [1], [0, 0, 1, 1], [], []>} : vector<16x16xf32>, vector<16x8xf32>, vector<16x8xf32> -> vector<16x8xf32>
    %38 = vector.extract_strided_slice %10 {offsets = [0, 8], sizes = [16, 8], strides = [1, 1]} : vector<16x32xf32> to vector<16x8xf32>
    %39 = vector.extract_strided_slice %15 {offsets = [0, 8], sizes = [16, 8], strides = [1, 1]} : vector<16x32xf32> to vector<16x8xf32>
    %40 = vector.extract_strided_slice %20 {offsets = [0, 8], sizes = [16, 8], strides = [1, 1]} : vector<16x32xf32> to vector<16x8xf32>
    %cst_27 = arith.constant dense<0.000000e+00> : vector<16x16xf32>
    %41 = tpu.matmul %38, %39, %cst_27 {dimension_numbers = #tpu.dot_dimension_numbers<[1], [1], [0], [0], [0, 0, 1, 0], [], []>} : vector<16x8xf32>, vector<16x8xf32>, vector<16x16xf32> -> vector<16x16xf32>
    %cst_28 = arith.constant 0.353553385 : f32
    %42 = vector.broadcast %cst_28 : f32 to vector<16x16xf32>
    %43 = arith.mulf %41, %42 : vector<16x16xf32>
    %cst_29 = arith.constant dense<0xFF800000> : vector<16xf32>
    %44 = vector.multi_reduction <maximumf>, %43, %cst_29 [1] : vector<16x16xf32> to vector<16xf32>
    %45 = vector.shape_cast %44 : vector<16xf32> to vector<16x1xf32>
    %46 = vector.broadcast %45 : vector<16x1xf32> to vector<16x16xf32>
    %47 = arith.subf %43, %46 : vector<16x16xf32>
    %48 = math.exp %47 : vector<16x16xf32>
    %cst_30 = arith.constant dense<0.000000e+00> : vector<16xf32>
    %49 = vector.multi_reduction <add>, %48, %cst_30 [1] : vector<16x16xf32> to vector<16xf32>
    %50 = vector.shape_cast %49 : vector<16xf32> to vector<16x1xf32>
    %51 = tpu.reciprocal %50 {approx = true} : vector<16x1xf32> -> vector<16x1xf32>
    %52 = vector.broadcast %51 : vector<16x1xf32> to vector<16x16xf32>
    %53 = arith.mulf %48, %52 : vector<16x16xf32>
    %cst_31 = arith.constant dense<0.000000e+00> : vector<16x8xf32>
    %54 = tpu.matmul %53, %40, %cst_31 {dimension_numbers = #tpu.dot_dimension_numbers<[1], [0], [0], [1], [0, 0, 1, 1], [], []>} : vector<16x16xf32>, vector<16x8xf32>, vector<16x8xf32> -> vector<16x8xf32>
    %55 = vector.extract_strided_slice %10 {offsets = [0, 16], sizes = [16, 8], strides = [1, 1]} : vector<16x32xf32> to vector<16x8xf32>
    %56 = vector.extract_strided_slice %15 {offsets = [0, 16], sizes = [16, 8], strides = [1, 1]} : vector<16x32xf32> to vector<16x8xf32>
    %57 = vector.extract_strided_slice %20 {offsets = [0, 16], sizes = [16, 8], strides = [1, 1]} : vector<16x32xf32> to vector<16x8xf32>
    %cst_32 = arith.constant dense<0.000000e+00> : vector<16x16xf32>
    %58 = tpu.matmul %55, %56, %cst_32 {dimension_numbers = #tpu.dot_dimension_numbers<[1], [1], [0], [0], [0, 0, 1, 0], [], []>} : vector<16x8xf32>, vector<16x8xf32>, vector<16x16xf32> -> vector<16x16xf32>
    %cst_33 = arith.constant 0.353553385 : f32
    %59 = vector.broadcast %cst_33 : f32 to vector<16x16xf32>
    %60 = arith.mulf %58, %59 : vector<16x16xf32>
    %cst_34 = arith.constant dense<0xFF800000> : vector<16xf32>
    %61 = vector.multi_reduction <maximumf>, %60, %cst_34 [1] : vector<16x16xf32> to vector<16xf32>
    %62 = vector.shape_cast %61 : vector<16xf32> to vector<16x1xf32>
    %63 = vector.broadcast %62 : vector<16x1xf32> to vector<16x16xf32>
    %64 = arith.subf %60, %63 : vector<16x16xf32>
    %65 = math.exp %64 : vector<16x16xf32>
    %cst_35 = arith.constant dense<0.000000e+00> : vector<16xf32>
    %66 = vector.multi_reduction <add>, %65, %cst_35 [1] : vector<16x16xf32> to vector<16xf32>
    %67 = vector.shape_cast %66 : vector<16xf32> to vector<16x1xf32>
    %68 = tpu.reciprocal %67 {approx = true} : vector<16x1xf32> -> vector<16x1xf32>
    %69 = vector.broadcast %68 : vector<16x1xf32> to vector<16x16xf32>
    %70 = arith.mulf %65, %69 : vector<16x16xf32>
    %cst_36 = arith.constant dense<0.000000e+00> : vector<16x8xf32>
    %71 = tpu.matmul %70, %57, %cst_36 {dimension_numbers = #tpu.dot_dimension_numbers<[1], [0], [0], [1], [0, 0, 1, 1], [], []>} : vector<16x16xf32>, vector<16x8xf32>, vector<16x8xf32> -> vector<16x8xf32>
    %72 = vector.extract_strided_slice %10 {offsets = [0, 24], sizes = [16, 8], strides = [1, 1]} : vector<16x32xf32> to vector<16x8xf32>
    %73 = vector.extract_strided_slice %15 {offsets = [0, 24], sizes = [16, 8], strides = [1, 1]} : vector<16x32xf32> to vector<16x8xf32>
    %74 = vector.extract_strided_slice %20 {offsets = [0, 24], sizes = [16, 8], strides = [1, 1]} : vector<16x32xf32> to vector<16x8xf32>
    %cst_37 = arith.constant dense<0.000000e+00> : vector<16x16xf32>
    %75 = tpu.matmul %72, %73, %cst_37 {dimension_numbers = #tpu.dot_dimension_numbers<[1], [1], [0], [0], [0, 0, 1, 0], [], []>} : vector<16x8xf32>, vector<16x8xf32>, vector<16x16xf32> -> vector<16x16xf32>
    %cst_38 = arith.constant 0.353553385 : f32
    %76 = vector.broadcast %cst_38 : f32 to vector<16x16xf32>
    %77 = arith.mulf %75, %76 : vector<16x16xf32>
    %cst_39 = arith.constant dense<0xFF800000> : vector<16xf32>
    %78 = vector.multi_reduction <maximumf>, %77, %cst_39 [1] : vector<16x16xf32> to vector<16xf32>
    %79 = vector.shape_cast %78 : vector<16xf32> to vector<16x1xf32>
    %80 = vector.broadcast %79 : vector<16x1xf32> to vector<16x16xf32>
    %81 = arith.subf %77, %80 : vector<16x16xf32>
    %82 = math.exp %81 : vector<16x16xf32>
    %cst_40 = arith.constant dense<0.000000e+00> : vector<16xf32>
    %83 = vector.multi_reduction <add>, %82, %cst_40 [1] : vector<16x16xf32> to vector<16xf32>
    %84 = vector.shape_cast %83 : vector<16xf32> to vector<16x1xf32>
    %85 = tpu.reciprocal %84 {approx = true} : vector<16x1xf32> -> vector<16x1xf32>
    %86 = vector.broadcast %85 : vector<16x1xf32> to vector<16x16xf32>
    %87 = arith.mulf %82, %86 : vector<16x16xf32>
    %cst_41 = arith.constant dense<0.000000e+00> : vector<16x8xf32>
    %88 = tpu.matmul %87, %74, %cst_41 {dimension_numbers = #tpu.dot_dimension_numbers<[1], [0], [0], [1], [0, 0, 1, 1], [], []>} : vector<16x16xf32>, vector<16x8xf32>, vector<16x8xf32> -> vector<16x8xf32>
    %89 = tpu.concatenate %37, %54, %71, %88 in 1 : vector<16x8xf32>, vector<16x8xf32>, vector<16x8xf32>, vector<16x8xf32> -> vector<16x32xf32>
    %c0_42 = arith.constant 0 : index
    %c0_43 = arith.constant 0 : index
    %90 = vector.load %arg11[%c0_42, %c0_43] : memref<32x32xf32, #tpu.memory_space<vmem>>, vector<32x32xf32>
    %cst_44 = arith.constant dense<0.000000e+00> : vector<16x32xf32>
    %91 = tpu.matmul %89, %90, %cst_44 {dimension_numbers = #tpu.dot_dimension_numbers<[1], [0], [0], [1], [0, 0, 1, 1], [], []>} : vector<16x32xf32>, vector<32x32xf32>, vector<16x32xf32> -> vector<16x32xf32>
    %c0_45 = arith.constant 0 : index
    %c0_46 = arith.constant 0 : index
    %92 = vector.load %arg12[%c0_45, %c0_46] : memref<1x32xf32, #tpu.memory_space<vmem>>, vector<1x32xf32>
    %93 = vector.broadcast %92 : vector<1x32xf32> to vector<16x32xf32>
    %94 = arith.addf %91, %93 : vector<16x32xf32>
    %c0_47 = arith.constant 0 : index
    %c0_48 = arith.constant 0 : index
    %c0_49 = arith.constant 0 : index
    %95 = vector.load %arg4[%c0_47, %c0_48, %c0_49] : memref<1x16x32xf32, #tpu.memory_space<vmem>>, vector<1x16x32xf32>
    %96 = vector.shape_cast %95 : vector<1x16x32xf32> to vector<16x32xf32>
    %97 = arith.addf %96, %94 : vector<16x32xf32>
    %cst_50 = arith.constant dense<0.000000e+00> : vector<16xf32>
    %98 = vector.multi_reduction <add>, %97, %cst_50 [1] : vector<16x32xf32> to vector<16xf32>
    %99 = vector.shape_cast %98 : vector<16xf32> to vector<16x1xf32>
    %cst_51 = arith.constant 3.200000e+01 : f32
    %100 = vector.broadcast %cst_51 : f32 to vector<16x1xf32>
    %101 = arith.divf %99, %100 : vector<16x1xf32>
    %102 = vector.broadcast %101 : vector<16x1xf32> to vector<16x32xf32>
    %103 = arith.subf %97, %102 : vector<16x32xf32>
    %104 = arith.mulf %103, %103 : vector<16x32xf32>
    %cst_52 = arith.constant dense<0.000000e+00> : vector<16xf32>
    %105 = vector.multi_reduction <add>, %104, %cst_52 [1] : vector<16x32xf32> to vector<16xf32>
    %106 = vector.shape_cast %105 : vector<16xf32> to vector<16x1xf32>
    %cst_53 = arith.constant 3.200000e+01 : f32
    %107 = vector.broadcast %cst_53 : f32 to vector<16x1xf32>
    %108 = arith.divf %106, %107 : vector<16x1xf32>
    %109 = vector.broadcast %101 : vector<16x1xf32> to vector<16x32xf32>
    %110 = arith.subf %97, %109 : vector<16x32xf32>
    %cst_54 = arith.constant 9.99999974E-6 : f32
    %111 = vector.broadcast %cst_54 : f32 to vector<16x1xf32>
    %112 = arith.addf %108, %111 : vector<16x1xf32>
    %113 = math.rsqrt %112 : vector<16x1xf32>
    %114 = vector.broadcast %113 : vector<16x1xf32> to vector<16x32xf32>
    %115 = arith.mulf %110, %114 : vector<16x32xf32>
    %c0_55 = arith.constant 0 : index
    %c0_56 = arith.constant 0 : index
    %116 = vector.load %arg13[%c0_55, %c0_56] : memref<1x32xf32, #tpu.memory_space<vmem>>, vector<1x32xf32>
    %117 = vector.broadcast %116 : vector<1x32xf32> to vector<16x32xf32>
    %118 = arith.mulf %115, %117 : vector<16x32xf32>
    %c0_57 = arith.constant 0 : index
    %c0_58 = arith.constant 0 : index
    %119 = vector.load %arg14[%c0_57, %c0_58] : memref<1x32xf32, #tpu.memory_space<vmem>>, vector<1x32xf32>
    %120 = vector.broadcast %119 : vector<1x32xf32> to vector<16x32xf32>
    %121 = arith.addf %118, %120 : vector<16x32xf32>
    %c0_59 = arith.constant 0 : index
    %c0_60 = arith.constant 0 : index
    %c0_61 = arith.constant 0 : index
    %122 = vector.load %arg15[%c0_59, %c0_60, %c0_61] : memref<1x16x32xf32, #tpu.memory_space<vmem>>, vector<1x16x32xf32>
    %123 = vector.shape_cast %122 : vector<1x16x32xf32> to vector<16x32xf32>
    %124 = vector.shape_cast %121 : vector<16x32xf32> to vector<1x16x32xf32>
    tpu.vector_store %arg15[%c0_59, %c0_60, %c0_61], %124 {strides = array<i32>} : memref<1x16x32xf32, #tpu.memory_space<vmem>>, vector<1x16x32xf32>,
    return
  }
  func.func @transform_0(%arg0: i32) -> (i32, i32, i32) {
    %c0_i32 = arith.constant 0 : i32
    %c0_i32_0 = arith.constant 0 : i32
    %c0_i32_1 = arith.constant 0 : i32
    return %arg0, %c0_i32, %c0_i32_0 : i32, i32, i32
  }
  func.func @transform_1(%arg0: i32) -> (i32, i32, i32) {
    %c0_i32 = arith.constant 0 : i32
    %c0_i32_0 = arith.constant 0 : i32
    %c0_i32_1 = arith.constant 0 : i32
    return %arg0, %c0_i32, %c0_i32_0 : i32, i32, i32
  }
  func.func @transform_2(%arg0: i32) -> (i32, i32, i32) {
    %c0_i32 = arith.constant 0 : i32
    %c0_i32_0 = arith.constant 0 : i32
    %c0_i32_1 = arith.constant 0 : i32
    return %arg0, %c0_i32, %c0_i32_0 : i32, i32, i32
  }
  func.func @transform_3(%arg0: i32) -> (i32, i32, i32) {
    %c0_i32 = arith.constant 0 : i32
    %c0_i32_0 = arith.constant 0 : i32
    %c0_i32_1 = arith.constant 0 : i32
    return %arg0, %c0_i32, %c0_i32_0 : i32, i32, i32
  }
  func.func @transform_4(%arg0: i32) -> (i32, i32) {
    %c0_i32 = arith.constant 0 : i32
    %c0_i32_0 = arith.constant 0 : i32
    %c0_i32_1 = arith.constant 0 : i32
    return %c0_i32, %c0_i32_0 : i32, i32
  }
  func.func @transform_5(%arg0: i32) -> (i32, i32) {
    %c0_i32 = arith.constant 0 : i32
    %c0_i32_0 = arith.constant 0 : i32
    %c0_i32_1 = arith.constant 0 : i32
    return %c0_i32, %c0_i32_0 : i32, i32
  }
  func.func @transform_6(%arg0: i32) -> (i32, i32) {
    %c0_i32 = arith.constant 0 : i32
    %c0_i32_0 = arith.constant 0 : i32
    %c0_i32_1 = arith.constant 0 : i32
    return %c0_i32, %c0_i32_0 : i32, i32
  }
  func.func @transform_7(%arg0: i32) -> (i32, i32) {
    %c0_i32 = arith.constant 0 : i32
    %c0_i32_0 = arith.constant 0 : i32
    %c0_i32_1 = arith.constant 0 : i32
    return %c0_i32, %c0_i32_0 : i32, i32
  }
  func.func @transform_8(%arg0: i32) -> (i32, i32) {
    %c0_i32 = arith.constant 0 : i32
    %c0_i32_0 = arith.constant 0 : i32
    %c0_i32_1 = arith.constant 0 : i32
    return %c0_i32, %c0_i32_0 : i32, i32
  }
  func.func @transform_9(%arg0: i32) -> (i32, i32) {
    %c0_i32 = arith.constant 0 : i32
    %c0_i32_0 = arith.constant 0 : i32
    %c0_i32_1 = arith.constant 0 : i32
    return %c0_i32, %c0_i32_0 : i32, i32
  }
  func.func @transform_10(%arg0: i32) -> (i32, i32) {
    %c0_i32 = arith.constant 0 : i32
    %c0_i32_0 = arith.constant 0 : i32
    %c0_i32_1 = arith.constant 0 : i32
    return %c0_i32, %c0_i32_0 : i32, i32
  }
  func.func @transform_11(%arg0: i32) -> (i32, i32) {
    %c0_i32 = arith.constant 0 : i32
    %c0_i32_0 = arith.constant 0 : i32
    %c0_i32_1 = arith.constant 0 : i32
    return %c0_i32, %c0_i32_0 : i32, i32
  }
  func.func @transform_12(%arg0: i32) -> (i32, i32) {
    %c0_i32 = arith.constant 0 : i32
    %c0_i32_0 = arith.constant 0 : i32
    %c0_i32_1 = arith.constant 0 : i32
    return %c0_i32, %c0_i32_0 : i32, i32
  }
  func.func @transform_13(%arg0: i32) -> (i32, i32) {
    %c0_i32 = arith.constant 0 : i32
    %c0_i32_0 = arith.constant 0 : i32
    %c0_i32_1 = arith.constant 0 : i32
    return %c0_i32, %c0_i32_0 : i32, i32
  }
  func.func @transform_14(%arg0: i32) -> (i32, i32, i32) {
    %c0_i32 = arith.constant 0 : i32
    %c0_i32_0 = arith.constant 0 : i32
    %c0_i32_1 = arith.constant 0 : i32
    return %arg0, %c0_i32, %c0_i32_0 : i32, i32, i32
  }
}

module attributes {stable_mosaic.version = 11 : i64} {
  func.func @_mha_ln_kernel(%arg0: i32, %arg1: memref<1x8x32xf32, #tpu.memory_space<vmem>>, %arg2: memref<1x8x32xf32, #tpu.memory_space<vmem>>, %arg3: memref<1x8x32xf32, #tpu.memory_space<vmem>>, %arg4: memref<1x8x32xf32, #tpu.memory_space<vmem>>, %arg5: memref<32x32xf32, #tpu.memory_space<vmem>>, %arg6: memref<1x32xf32, #tpu.memory_space<vmem>>, %arg7: memref<32x32xf32, #tpu.memory_space<vmem>>, %arg8: memref<1x32xf32, #tpu.memory_space<vmem>>, %arg9: memref<32x32xf32, #tpu.memory_space<vmem>>, %arg10: memref<1x32xf32, #tpu.memory_space<vmem>>, %arg11: memref<32x32xf32, #tpu.memory_space<vmem>>, %arg12: memref<1x32xf32, #tpu.memory_space<vmem>>, %arg13: memref<1x32xf32, #tpu.memory_space<vmem>>, %arg14: memref<1x32xf32, #tpu.memory_space<vmem>>, %arg15: memref<1x8x32xf32, #tpu.memory_space<vmem>>) attributes {dimension_semantics = [#tpu.dimension_semantics<parallel>], iteration_bounds = array<i64: 2>, scalar_prefetch = 0 : i64, scratch_operands = 0 : i64, tpu.core_type = #tpu.core_type<tc>, window_params = [{transform_indices = @transform_0, window_bounds = array<i64: 1, 8, 32>}, {transform_indices = @transform_1, window_bounds = array<i64: 1, 8, 32>}, {transform_indices = @transform_2, window_bounds = array<i64: 1, 8, 32>}, {transform_indices = @transform_3, window_bounds = array<i64: 1, 8, 32>}, {pipeline_mode = #tpu.pipeline_mode<synchronous>, transform_indices = @transform_4, window_bounds = array<i64: 32, 32>}, {pipeline_mode = #tpu.pipeline_mode<synchronous>, transform_indices = @transform_5, window_bounds = array<i64: 1, 32>}, {pipeline_mode = #tpu.pipeline_mode<synchronous>, transform_indices = @transform_6, window_bounds = array<i64: 32, 32>}, {pipeline_mode = #tpu.pipeline_mode<synchronous>, transform_indices = @transform_7, window_bounds = array<i64: 1, 32>}, {pipeline_mode = #tpu.pipeline_mode<synchronous>, transform_indices = @transform_8, window_bounds = array<i64: 32, 32>}, {pipeline_mode = #tpu.pipeline_mode<synchronous>, transform_indices = @transform_9, window_bounds = array<i64: 1, 32>}, {pipeline_mode = #tpu.pipeline_mode<synchronous>, transform_indices = @transform_10, window_bounds = array<i64: 32, 32>}, {pipeline_mode = #tpu.pipeline_mode<synchronous>, transform_indices = @transform_11, window_bounds = array<i64: 1, 32>}, {pipeline_mode = #tpu.pipeline_mode<synchronous>, transform_indices = @transform_12, window_bounds = array<i64: 1, 32>}, {pipeline_mode = #tpu.pipeline_mode<synchronous>, transform_indices = @transform_13, window_bounds = array<i64: 1, 32>}, {transform_indices = @transform_14, window_bounds = array<i64: 1, 8, 32>}]} {
    %c0 = arith.constant 0 : index
    %c0_0 = arith.constant 0 : index
    %c0_1 = arith.constant 0 : index
    %0 = vector.load %arg1[%c0, %c0_0, %c0_1] : memref<1x8x32xf32, #tpu.memory_space<vmem>>, vector<1x8x32xf32>
    %1 = vector.shape_cast %0 : vector<1x8x32xf32> to vector<8x32xf32>
    %c0_2 = arith.constant 0 : index
    %c0_3 = arith.constant 0 : index
    %c0_4 = arith.constant 0 : index
    %2 = vector.load %arg2[%c0_2, %c0_3, %c0_4] : memref<1x8x32xf32, #tpu.memory_space<vmem>>, vector<1x8x32xf32>
    %3 = vector.shape_cast %2 : vector<1x8x32xf32> to vector<8x32xf32>
    %c0_5 = arith.constant 0 : index
    %c0_6 = arith.constant 0 : index
    %c0_7 = arith.constant 0 : index
    %4 = vector.load %arg3[%c0_5, %c0_6, %c0_7] : memref<1x8x32xf32, #tpu.memory_space<vmem>>, vector<1x8x32xf32>
    %5 = vector.shape_cast %4 : vector<1x8x32xf32> to vector<8x32xf32>
    %c0_8 = arith.constant 0 : index
    %c0_9 = arith.constant 0 : index
    %6 = vector.load %arg5[%c0_8, %c0_9] : memref<32x32xf32, #tpu.memory_space<vmem>>, vector<32x32xf32>
    %cst = arith.constant dense<0.000000e+00> : vector<8x32xf32>
    %7 = tpu.matmul %1, %6, %cst {dimension_numbers = #tpu.dot_dimension_numbers<[1], [0], [0], [1], [0, 0, 1, 1], [], []>} : vector<8x32xf32>, vector<32x32xf32>, vector<8x32xf32> -> vector<8x32xf32>
    %c0_10 = arith.constant 0 : index
    %c0_11 = arith.constant 0 : index
    %8 = vector.load %arg6[%c0_10, %c0_11] : memref<1x32xf32, #tpu.memory_space<vmem>>, vector<1x32xf32>
    %9 = vector.broadcast %8 : vector<1x32xf32> to vector<8x32xf32>
    %10 = arith.addf %7, %9 : vector<8x32xf32>
    %c0_12 = arith.constant 0 : index
    %c0_13 = arith.constant 0 : index
    %11 = vector.load %arg7[%c0_12, %c0_13] : memref<32x32xf32, #tpu.memory_space<vmem>>, vector<32x32xf32>
    %cst_14 = arith.constant dense<0.000000e+00> : vector<8x32xf32>
    %12 = tpu.matmul %3, %11, %cst_14 {dimension_numbers = #tpu.dot_dimension_numbers<[1], [0], [0], [1], [0, 0, 1, 1], [], []>} : vector<8x32xf32>, vector<32x32xf32>, vector<8x32xf32> -> vector<8x32xf32>
    %c0_15 = arith.constant 0 : index
    %c0_16 = arith.constant 0 : index
    %13 = vector.load %arg8[%c0_15, %c0_16] : memref<1x32xf32, #tpu.memory_space<vmem>>, vector<1x32xf32>
    %14 = vector.broadcast %13 : vector<1x32xf32> to vector<8x32xf32>
    %15 = arith.addf %12, %14 : vector<8x32xf32>
    %c0_17 = arith.constant 0 : index
    %c0_18 = arith.constant 0 : index
    %16 = vector.load %arg9[%c0_17, %c0_18] : memref<32x32xf32, #tpu.memory_space<vmem>>, vector<32x32xf32>
    %cst_19 = arith.constant dense<0.000000e+00> : vector<8x32xf32>
    %17 = tpu.matmul %5, %16, %cst_19 {dimension_numbers = #tpu.dot_dimension_numbers<[1], [0], [0], [1], [0, 0, 1, 1], [], []>} : vector<8x32xf32>, vector<32x32xf32>, vector<8x32xf32> -> vector<8x32xf32>
    %c0_20 = arith.constant 0 : index
    %c0_21 = arith.constant 0 : index
    %18 = vector.load %arg10[%c0_20, %c0_21] : memref<1x32xf32, #tpu.memory_space<vmem>>, vector<1x32xf32>
    %19 = vector.broadcast %18 : vector<1x32xf32> to vector<8x32xf32>
    %20 = arith.addf %17, %19 : vector<8x32xf32>
    %21 = vector.extract_strided_slice %10 {offsets = [0, 0], sizes = [8, 8], strides = [1, 1]} : vector<8x32xf32> to vector<8x8xf32>
    %22 = vector.extract_strided_slice %15 {offsets = [0, 0], sizes = [8, 8], strides = [1, 1]} : vector<8x32xf32> to vector<8x8xf32>
    %23 = vector.extract_strided_slice %20 {offsets = [0, 0], sizes = [8, 8], strides = [1, 1]} : vector<8x32xf32> to vector<8x8xf32>
    %cst_22 = arith.constant dense<0.000000e+00> : vector<8x8xf32>
    %24 = tpu.matmul %21, %22, %cst_22 {dimension_numbers = #tpu.dot_dimension_numbers<[1], [1], [0], [0], [0, 0, 1, 0], [], []>} : vector<8x8xf32>, vector<8x8xf32>, vector<8x8xf32> -> vector<8x8xf32>
    %cst_23 = arith.constant 0.353553385 : f32
    %25 = vector.broadcast %cst_23 : f32 to vector<8x8xf32>
    %26 = arith.mulf %24, %25 : vector<8x8xf32>
    %cst_24 = arith.constant dense<0xFF800000> : vector<8xf32>
    %27 = vector.multi_reduction <maximumf>, %26, %cst_24 [1] : vector<8x8xf32> to vector<8xf32>
    %28 = vector.shape_cast %27 : vector<8xf32> to vector<8x1xf32>
    %29 = vector.broadcast %28 : vector<8x1xf32> to vector<8x8xf32>
    %30 = arith.subf %26, %29 : vector<8x8xf32>
    %31 = math.exp %30 : vector<8x8xf32>
    %cst_25 = arith.constant dense<0.000000e+00> : vector<8xf32>
    %32 = vector.multi_reduction <add>, %31, %cst_25 [1] : vector<8x8xf32> to vector<8xf32>
    %33 = vector.shape_cast %32 : vector<8xf32> to vector<8x1xf32>
    %34 = tpu.reciprocal %33 {approx = true} : vector<8x1xf32> -> vector<8x1xf32>
    %35 = vector.broadcast %34 : vector<8x1xf32> to vector<8x8xf32>
    %36 = arith.mulf %31, %35 : vector<8x8xf32>
    %cst_26 = arith.constant dense<0.000000e+00> : vector<8x8xf32>
    %37 = tpu.matmul %36, %23, %cst_26 {dimension_numbers = #tpu.dot_dimension_numbers<[1], [0], [0], [1], [0, 0, 1, 1], [], []>} : vector<8x8xf32>, vector<8x8xf32>, vector<8x8xf32> -> vector<8x8xf32>
    %38 = vector.extract_strided_slice %10 {offsets = [0, 8], sizes = [8, 8], strides = [1, 1]} : vector<8x32xf32> to vector<8x8xf32>
    %39 = vector.extract_strided_slice %15 {offsets = [0, 8], sizes = [8, 8], strides = [1, 1]} : vector<8x32xf32> to vector<8x8xf32>
    %40 = vector.extract_strided_slice %20 {offsets = [0, 8], sizes = [8, 8], strides = [1, 1]} : vector<8x32xf32> to vector<8x8xf32>
    %cst_27 = arith.constant dense<0.000000e+00> : vector<8x8xf32>
    %41 = tpu.matmul %38, %39, %cst_27 {dimension_numbers = #tpu.dot_dimension_numbers<[1], [1], [0], [0], [0, 0, 1, 0], [], []>} : vector<8x8xf32>, vector<8x8xf32>, vector<8x8xf32> -> vector<8x8xf32>
    %cst_28 = arith.constant 0.353553385 : f32
    %42 = vector.broadcast %cst_28 : f32 to vector<8x8xf32>
    %43 = arith.mulf %41, %42 : vector<8x8xf32>
    %cst_29 = arith.constant dense<0xFF800000> : vector<8xf32>
    %44 = vector.multi_reduction <maximumf>, %43, %cst_29 [1] : vector<8x8xf32> to vector<8xf32>
    %45 = vector.shape_cast %44 : vector<8xf32> to vector<8x1xf32>
    %46 = vector.broadcast %45 : vector<8x1xf32> to vector<8x8xf32>
    %47 = arith.subf %43, %46 : vector<8x8xf32>
    %48 = math.exp %47 : vector<8x8xf32>
    %cst_30 = arith.constant dense<0.000000e+00> : vector<8xf32>
    %49 = vector.multi_reduction <add>, %48, %cst_30 [1] : vector<8x8xf32> to vector<8xf32>
    %50 = vector.shape_cast %49 : vector<8xf32> to vector<8x1xf32>
    %51 = tpu.reciprocal %50 {approx = true} : vector<8x1xf32> -> vector<8x1xf32>
    %52 = vector.broadcast %51 : vector<8x1xf32> to vector<8x8xf32>
    %53 = arith.mulf %48, %52 : vector<8x8xf32>
    %cst_31 = arith.constant dense<0.000000e+00> : vector<8x8xf32>
    %54 = tpu.matmul %53, %40, %cst_31 {dimension_numbers = #tpu.dot_dimension_numbers<[1], [0], [0], [1], [0, 0, 1, 1], [], []>} : vector<8x8xf32>, vector<8x8xf32>, vector<8x8xf32> -> vector<8x8xf32>
    %55 = vector.extract_strided_slice %10 {offsets = [0, 16], sizes = [8, 8], strides = [1, 1]} : vector<8x32xf32> to vector<8x8xf32>
    %56 = vector.extract_strided_slice %15 {offsets = [0, 16], sizes = [8, 8], strides = [1, 1]} : vector<8x32xf32> to vector<8x8xf32>
    %57 = vector.extract_strided_slice %20 {offsets = [0, 16], sizes = [8, 8], strides = [1, 1]} : vector<8x32xf32> to vector<8x8xf32>
    %cst_32 = arith.constant dense<0.000000e+00> : vector<8x8xf32>
    %58 = tpu.matmul %55, %56, %cst_32 {dimension_numbers = #tpu.dot_dimension_numbers<[1], [1], [0], [0], [0, 0, 1, 0], [], []>} : vector<8x8xf32>, vector<8x8xf32>, vector<8x8xf32> -> vector<8x8xf32>
    %cst_33 = arith.constant 0.353553385 : f32
    %59 = vector.broadcast %cst_33 : f32 to vector<8x8xf32>
    %60 = arith.mulf %58, %59 : vector<8x8xf32>
    %cst_34 = arith.constant dense<0xFF800000> : vector<8xf32>
    %61 = vector.multi_reduction <maximumf>, %60, %cst_34 [1] : vector<8x8xf32> to vector<8xf32>
    %62 = vector.shape_cast %61 : vector<8xf32> to vector<8x1xf32>
    %63 = vector.broadcast %62 : vector<8x1xf32> to vector<8x8xf32>
    %64 = arith.subf %60, %63 : vector<8x8xf32>
    %65 = math.exp %64 : vector<8x8xf32>
    %cst_35 = arith.constant dense<0.000000e+00> : vector<8xf32>
    %66 = vector.multi_reduction <add>, %65, %cst_35 [1] : vector<8x8xf32> to vector<8xf32>
    %67 = vector.shape_cast %66 : vector<8xf32> to vector<8x1xf32>
    %68 = tpu.reciprocal %67 {approx = true} : vector<8x1xf32> -> vector<8x1xf32>
    %69 = vector.broadcast %68 : vector<8x1xf32> to vector<8x8xf32>
    %70 = arith.mulf %65, %69 : vector<8x8xf32>
    %cst_36 = arith.constant dense<0.000000e+00> : vector<8x8xf32>
    %71 = tpu.matmul %70, %57, %cst_36 {dimension_numbers = #tpu.dot_dimension_numbers<[1], [0], [0], [1], [0, 0, 1, 1], [], []>} : vector<8x8xf32>, vector<8x8xf32>, vector<8x8xf32> -> vector<8x8xf32>
    %72 = vector.extract_strided_slice %10 {offsets = [0, 24], sizes = [8, 8], strides = [1, 1]} : vector<8x32xf32> to vector<8x8xf32>
    %73 = vector.extract_strided_slice %15 {offsets = [0, 24], sizes = [8, 8], strides = [1, 1]} : vector<8x32xf32> to vector<8x8xf32>
    %74 = vector.extract_strided_slice %20 {offsets = [0, 24], sizes = [8, 8], strides = [1, 1]} : vector<8x32xf32> to vector<8x8xf32>
    %cst_37 = arith.constant dense<0.000000e+00> : vector<8x8xf32>
    %75 = tpu.matmul %72, %73, %cst_37 {dimension_numbers = #tpu.dot_dimension_numbers<[1], [1], [0], [0], [0, 0, 1, 0], [], []>} : vector<8x8xf32>, vector<8x8xf32>, vector<8x8xf32> -> vector<8x8xf32>
    %cst_38 = arith.constant 0.353553385 : f32
    %76 = vector.broadcast %cst_38 : f32 to vector<8x8xf32>
    %77 = arith.mulf %75, %76 : vector<8x8xf32>
    %cst_39 = arith.constant dense<0xFF800000> : vector<8xf32>
    %78 = vector.multi_reduction <maximumf>, %77, %cst_39 [1] : vector<8x8xf32> to vector<8xf32>
    %79 = vector.shape_cast %78 : vector<8xf32> to vector<8x1xf32>
    %80 = vector.broadcast %79 : vector<8x1xf32> to vector<8x8xf32>
    %81 = arith.subf %77, %80 : vector<8x8xf32>
    %82 = math.exp %81 : vector<8x8xf32>
    %cst_40 = arith.constant dense<0.000000e+00> : vector<8xf32>
    %83 = vector.multi_reduction <add>, %82, %cst_40 [1] : vector<8x8xf32> to vector<8xf32>
    %84 = vector.shape_cast %83 : vector<8xf32> to vector<8x1xf32>
    %85 = tpu.reciprocal %84 {approx = true} : vector<8x1xf32> -> vector<8x1xf32>
    %86 = vector.broadcast %85 : vector<8x1xf32> to vector<8x8xf32>
    %87 = arith.mulf %82, %86 : vector<8x8xf32>
    %cst_41 = arith.constant dense<0.000000e+00> : vector<8x8xf32>
    %88 = tpu.matmul %87, %74, %cst_41 {dimension_numbers = #tpu.dot_dimension_numbers<[1], [0], [0], [1], [0, 0, 1, 1], [], []>} : vector<8x8xf32>, vector<8x8xf32>, vector<8x8xf32> -> vector<8x8xf32>
    %89 = tpu.concatenate %37, %54, %71, %88 in 1 : vector<8x8xf32>, vector<8x8xf32>, vector<8x8xf32>, vector<8x8xf32> -> vector<8x32xf32>
    %c0_42 = arith.constant 0 : index
    %c0_43 = arith.constant 0 : index
    %90 = vector.load %arg11[%c0_42, %c0_43] : memref<32x32xf32, #tpu.memory_space<vmem>>, vector<32x32xf32>
    %cst_44 = arith.constant dense<0.000000e+00> : vector<8x32xf32>
    %91 = tpu.matmul %89, %90, %cst_44 {dimension_numbers = #tpu.dot_dimension_numbers<[1], [0], [0], [1], [0, 0, 1, 1], [], []>} : vector<8x32xf32>, vector<32x32xf32>, vector<8x32xf32> -> vector<8x32xf32>
    %c0_45 = arith.constant 0 : index
    %c0_46 = arith.constant 0 : index
    %92 = vector.load %arg12[%c0_45, %c0_46] : memref<1x32xf32, #tpu.memory_space<vmem>>, vector<1x32xf32>
    %93 = vector.broadcast %92 : vector<1x32xf32> to vector<8x32xf32>
    %94 = arith.addf %91, %93 : vector<8x32xf32>
    %c0_47 = arith.constant 0 : index
    %c0_48 = arith.constant 0 : index
    %c0_49 = arith.constant 0 : index
    %95 = vector.load %arg4[%c0_47, %c0_48, %c0_49] : memref<1x8x32xf32, #tpu.memory_space<vmem>>, vector<1x8x32xf32>
    %96 = vector.shape_cast %95 : vector<1x8x32xf32> to vector<8x32xf32>
    %97 = arith.addf %96, %94 : vector<8x32xf32>
    %cst_50 = arith.constant dense<0.000000e+00> : vector<8xf32>
    %98 = vector.multi_reduction <add>, %97, %cst_50 [1] : vector<8x32xf32> to vector<8xf32>
    %99 = vector.shape_cast %98 : vector<8xf32> to vector<8x1xf32>
    %cst_51 = arith.constant 3.200000e+01 : f32
    %100 = vector.broadcast %cst_51 : f32 to vector<8x1xf32>
    %101 = arith.divf %99, %100 : vector<8x1xf32>
    %102 = vector.broadcast %101 : vector<8x1xf32> to vector<8x32xf32>
    %103 = arith.subf %97, %102 : vector<8x32xf32>
    %104 = arith.mulf %103, %103 : vector<8x32xf32>
    %cst_52 = arith.constant dense<0.000000e+00> : vector<8xf32>
    %105 = vector.multi_reduction <add>, %104, %cst_52 [1] : vector<8x32xf32> to vector<8xf32>
    %106 = vector.shape_cast %105 : vector<8xf32> to vector<8x1xf32>
    %cst_53 = arith.constant 3.200000e+01 : f32
    %107 = vector.broadcast %cst_53 : f32 to vector<8x1xf32>
    %108 = arith.divf %106, %107 : vector<8x1xf32>
    %109 = vector.broadcast %101 : vector<8x1xf32> to vector<8x32xf32>
    %110 = arith.subf %97, %109 : vector<8x32xf32>
    %cst_54 = arith.constant 9.99999974E-6 : f32
    %111 = vector.broadcast %cst_54 : f32 to vector<8x1xf32>
    %112 = arith.addf %108, %111 : vector<8x1xf32>
    %113 = math.rsqrt %112 : vector<8x1xf32>
    %114 = vector.broadcast %113 : vector<8x1xf32> to vector<8x32xf32>
    %115 = arith.mulf %110, %114 : vector<8x32xf32>
    %c0_55 = arith.constant 0 : index
    %c0_56 = arith.constant 0 : index
    %116 = vector.load %arg13[%c0_55, %c0_56] : memref<1x32xf32, #tpu.memory_space<vmem>>, vector<1x32xf32>
    %117 = vector.broadcast %116 : vector<1x32xf32> to vector<8x32xf32>
    %118 = arith.mulf %115, %117 : vector<8x32xf32>
    %c0_57 = arith.constant 0 : index
    %c0_58 = arith.constant 0 : index
    %119 = vector.load %arg14[%c0_57, %c0_58] : memref<1x32xf32, #tpu.memory_space<vmem>>, vector<1x32xf32>
    %120 = vector.broadcast %119 : vector<1x32xf32> to vector<8x32xf32>
    %121 = arith.addf %118, %120 : vector<8x32xf32>
    %c0_59 = arith.constant 0 : index
    %c0_60 = arith.constant 0 : index
    %c0_61 = arith.constant 0 : index
    %122 = vector.load %arg15[%c0_59, %c0_60, %c0_61] : memref<1x8x32xf32, #tpu.memory_space<vmem>>, vector<1x8x32xf32>
    %123 = vector.shape_cast %122 : vector<1x8x32xf32> to vector<8x32xf32>
    %124 = vector.shape_cast %121 : vector<8x32xf32> to vector<1x8x32xf32>
    tpu.vector_store %arg15[%c0_59, %c0_60, %c0_61], %124 {strides = array<i32>} : memref<1x8x32xf32, #tpu.memory_space<vmem>>, vector<1x8x32xf32>,
    return
  }
  func.func @transform_0(%arg0: i32) -> (i32, i32, i32) {
    %c0_i32 = arith.constant 0 : i32
    %c0_i32_0 = arith.constant 0 : i32
    %c0_i32_1 = arith.constant 0 : i32
    return %arg0, %c0_i32, %c0_i32_0 : i32, i32, i32
  }
  func.func @transform_1(%arg0: i32) -> (i32, i32, i32) {
    %c0_i32 = arith.constant 0 : i32
    %c0_i32_0 = arith.constant 0 : i32
    %c0_i32_1 = arith.constant 0 : i32
    return %arg0, %c0_i32, %c0_i32_0 : i32, i32, i32
  }
  func.func @transform_2(%arg0: i32) -> (i32, i32, i32) {
    %c0_i32 = arith.constant 0 : i32
    %c0_i32_0 = arith.constant 0 : i32
    %c0_i32_1 = arith.constant 0 : i32
    return %arg0, %c0_i32, %c0_i32_0 : i32, i32, i32
  }
  func.func @transform_3(%arg0: i32) -> (i32, i32, i32) {
    %c0_i32 = arith.constant 0 : i32
    %c0_i32_0 = arith.constant 0 : i32
    %c0_i32_1 = arith.constant 0 : i32
    return %arg0, %c0_i32, %c0_i32_0 : i32, i32, i32
  }
  func.func @transform_4(%arg0: i32) -> (i32, i32) {
    %c0_i32 = arith.constant 0 : i32
    %c0_i32_0 = arith.constant 0 : i32
    %c0_i32_1 = arith.constant 0 : i32
    return %c0_i32, %c0_i32_0 : i32, i32
  }
  func.func @transform_5(%arg0: i32) -> (i32, i32) {
    %c0_i32 = arith.constant 0 : i32
    %c0_i32_0 = arith.constant 0 : i32
    %c0_i32_1 = arith.constant 0 : i32
    return %c0_i32, %c0_i32_0 : i32, i32
  }
  func.func @transform_6(%arg0: i32) -> (i32, i32) {
    %c0_i32 = arith.constant 0 : i32
    %c0_i32_0 = arith.constant 0 : i32
    %c0_i32_1 = arith.constant 0 : i32
    return %c0_i32, %c0_i32_0 : i32, i32
  }
  func.func @transform_7(%arg0: i32) -> (i32, i32) {
    %c0_i32 = arith.constant 0 : i32
    %c0_i32_0 = arith.constant 0 : i32
    %c0_i32_1 = arith.constant 0 : i32
    return %c0_i32, %c0_i32_0 : i32, i32
  }
  func.func @transform_8(%arg0: i32) -> (i32, i32) {
    %c0_i32 = arith.constant 0 : i32
    %c0_i32_0 = arith.constant 0 : i32
    %c0_i32_1 = arith.constant 0 : i32
    return %c0_i32, %c0_i32_0 : i32, i32
  }
  func.func @transform_9(%arg0: i32) -> (i32, i32) {
    %c0_i32 = arith.constant 0 : i32
    %c0_i32_0 = arith.constant 0 : i32
    %c0_i32_1 = arith.constant 0 : i32
    return %c0_i32, %c0_i32_0 : i32, i32
  }
  func.func @transform_10(%arg0: i32) -> (i32, i32) {
    %c0_i32 = arith.constant 0 : i32
    %c0_i32_0 = arith.constant 0 : i32
    %c0_i32_1 = arith.constant 0 : i32
    return %c0_i32, %c0_i32_0 : i32, i32
  }
  func.func @transform_11(%arg0: i32) -> (i32, i32) {
    %c0_i32 = arith.constant 0 : i32
    %c0_i32_0 = arith.constant 0 : i32
    %c0_i32_1 = arith.constant 0 : i32
    return %c0_i32, %c0_i32_0 : i32, i32
  }
  func.func @transform_12(%arg0: i32) -> (i32, i32) {
    %c0_i32 = arith.constant 0 : i32
    %c0_i32_0 = arith.constant 0 : i32
    %c0_i32_1 = arith.constant 0 : i32
    return %c0_i32, %c0_i32_0 : i32, i32
  }
  func.func @transform_13(%arg0: i32) -> (i32, i32) {
    %c0_i32 = arith.constant 0 : i32
    %c0_i32_0 = arith.constant 0 : i32
    %c0_i32_1 = arith.constant 0 : i32
    return %c0_i32, %c0_i32_0 : i32, i32
  }
  func.func @transform_14(%arg0: i32) -> (i32, i32, i32) {
    %c0_i32 = arith.constant 0 : i32
    %c0_i32_0 = arith.constant 0 : i32
    %c0_i32_1 = arith.constant 0 : i32
    return %arg0, %c0_i32, %c0_i32_0 : i32, i32, i32
  }
}

module attributes {stable_mosaic.version = 11 : i64} {
  func.func @_ffn_ln_kernel(%arg0: i32, %arg1: memref<16x32xf32, #tpu.memory_space<vmem>>, %arg2: memref<32x64xf32, #tpu.memory_space<vmem>>, %arg3: memref<1x64xf32, #tpu.memory_space<vmem>>, %arg4: memref<64x32xf32, #tpu.memory_space<vmem>>, %arg5: memref<1x32xf32, #tpu.memory_space<vmem>>, %arg6: memref<1x32xf32, #tpu.memory_space<vmem>>, %arg7: memref<1x32xf32, #tpu.memory_space<vmem>>, %arg8: memref<16x32xf32, #tpu.memory_space<vmem>>) attributes {dimension_semantics = [#tpu.dimension_semantics<parallel>], iteration_bounds = array<i64: 1>, scalar_prefetch = 0 : i64, scratch_operands = 0 : i64, tpu.core_type = #tpu.core_type<tc>, window_params = [{transform_indices = @transform_0, window_bounds = array<i64: 16, 32>}, {pipeline_mode = #tpu.pipeline_mode<synchronous>, transform_indices = @transform_1, window_bounds = array<i64: 32, 64>}, {pipeline_mode = #tpu.pipeline_mode<synchronous>, transform_indices = @transform_2, window_bounds = array<i64: 1, 64>}, {pipeline_mode = #tpu.pipeline_mode<synchronous>, transform_indices = @transform_3, window_bounds = array<i64: 64, 32>}, {pipeline_mode = #tpu.pipeline_mode<synchronous>, transform_indices = @transform_4, window_bounds = array<i64: 1, 32>}, {pipeline_mode = #tpu.pipeline_mode<synchronous>, transform_indices = @transform_5, window_bounds = array<i64: 1, 32>}, {pipeline_mode = #tpu.pipeline_mode<synchronous>, transform_indices = @transform_6, window_bounds = array<i64: 1, 32>}, {transform_indices = @transform_7, window_bounds = array<i64: 16, 32>}]} {
    %c0 = arith.constant 0 : index
    %c0_0 = arith.constant 0 : index
    %0 = vector.load %arg1[%c0, %c0_0] : memref<16x32xf32, #tpu.memory_space<vmem>>, vector<16x32xf32>
    %c0_1 = arith.constant 0 : index
    %c0_2 = arith.constant 0 : index
    %1 = vector.load %arg2[%c0_1, %c0_2] : memref<32x64xf32, #tpu.memory_space<vmem>>, vector<32x64xf32>
    %cst = arith.constant dense<0.000000e+00> : vector<16x64xf32>
    %2 = tpu.matmul %0, %1, %cst {dimension_numbers = #tpu.dot_dimension_numbers<[1], [0], [0], [1], [0, 0, 1, 1], [], []>} : vector<16x32xf32>, vector<32x64xf32>, vector<16x64xf32> -> vector<16x64xf32>
    %c0_3 = arith.constant 0 : index
    %c0_4 = arith.constant 0 : index
    %3 = vector.load %arg3[%c0_3, %c0_4] : memref<1x64xf32, #tpu.memory_space<vmem>>, vector<1x64xf32>
    %4 = vector.broadcast %3 : vector<1x64xf32> to vector<16x64xf32>
    %5 = arith.addf %2, %4 : vector<16x64xf32>
    %cst_5 = arith.constant 0.000000e+00 : f32
    %6 = vector.broadcast %cst_5 : f32 to vector<16x64xf32>
    %7 = arith.maximumf %5, %6 : vector<16x64xf32>
    %c0_6 = arith.constant 0 : index
    %c0_7 = arith.constant 0 : index
    %8 = vector.load %arg4[%c0_6, %c0_7] : memref<64x32xf32, #tpu.memory_space<vmem>>, vector<64x32xf32>
    %cst_8 = arith.constant dense<0.000000e+00> : vector<16x32xf32>
    %9 = tpu.matmul %7, %8, %cst_8 {dimension_numbers = #tpu.dot_dimension_numbers<[1], [0], [0], [1], [0, 0, 1, 1], [], []>} : vector<16x64xf32>, vector<64x32xf32>, vector<16x32xf32> -> vector<16x32xf32>
    %c0_9 = arith.constant 0 : index
    %c0_10 = arith.constant 0 : index
    %10 = vector.load %arg5[%c0_9, %c0_10] : memref<1x32xf32, #tpu.memory_space<vmem>>, vector<1x32xf32>
    %11 = vector.broadcast %10 : vector<1x32xf32> to vector<16x32xf32>
    %12 = arith.addf %9, %11 : vector<16x32xf32>
    %13 = arith.addf %0, %12 : vector<16x32xf32>
    %cst_11 = arith.constant dense<0.000000e+00> : vector<16xf32>
    %14 = vector.multi_reduction <add>, %13, %cst_11 [1] : vector<16x32xf32> to vector<16xf32>
    %15 = vector.shape_cast %14 : vector<16xf32> to vector<16x1xf32>
    %cst_12 = arith.constant 3.200000e+01 : f32
    %16 = vector.broadcast %cst_12 : f32 to vector<16x1xf32>
    %17 = arith.divf %15, %16 : vector<16x1xf32>
    %18 = vector.broadcast %17 : vector<16x1xf32> to vector<16x32xf32>
    %19 = arith.subf %13, %18 : vector<16x32xf32>
    %20 = arith.mulf %19, %19 : vector<16x32xf32>
    %cst_13 = arith.constant dense<0.000000e+00> : vector<16xf32>
    %21 = vector.multi_reduction <add>, %20, %cst_13 [1] : vector<16x32xf32> to vector<16xf32>
    %22 = vector.shape_cast %21 : vector<16xf32> to vector<16x1xf32>
    %cst_14 = arith.constant 3.200000e+01 : f32
    %23 = vector.broadcast %cst_14 : f32 to vector<16x1xf32>
    %24 = arith.divf %22, %23 : vector<16x1xf32>
    %25 = vector.broadcast %17 : vector<16x1xf32> to vector<16x32xf32>
    %26 = arith.subf %13, %25 : vector<16x32xf32>
    %cst_15 = arith.constant 9.99999974E-6 : f32
    %27 = vector.broadcast %cst_15 : f32 to vector<16x1xf32>
    %28 = arith.addf %24, %27 : vector<16x1xf32>
    %29 = math.rsqrt %28 : vector<16x1xf32>
    %30 = vector.broadcast %29 : vector<16x1xf32> to vector<16x32xf32>
    %31 = arith.mulf %26, %30 : vector<16x32xf32>
    %c0_16 = arith.constant 0 : index
    %c0_17 = arith.constant 0 : index
    %32 = vector.load %arg6[%c0_16, %c0_17] : memref<1x32xf32, #tpu.memory_space<vmem>>, vector<1x32xf32>
    %33 = vector.broadcast %32 : vector<1x32xf32> to vector<16x32xf32>
    %34 = arith.mulf %31, %33 : vector<16x32xf32>
    %c0_18 = arith.constant 0 : index
    %c0_19 = arith.constant 0 : index
    %35 = vector.load %arg7[%c0_18, %c0_19] : memref<1x32xf32, #tpu.memory_space<vmem>>, vector<1x32xf32>
    %36 = vector.broadcast %35 : vector<1x32xf32> to vector<16x32xf32>
    %37 = arith.addf %34, %36 : vector<16x32xf32>
    %c0_20 = arith.constant 0 : index
    %c0_21 = arith.constant 0 : index
    %38 = vector.load %arg8[%c0_20, %c0_21] : memref<16x32xf32, #tpu.memory_space<vmem>>, vector<16x32xf32>
    tpu.vector_store %arg8[%c0_20, %c0_21], %37 {strides = array<i32>} : memref<16x32xf32, #tpu.memory_space<vmem>>, vector<16x32xf32>,
    return
  }
  func.func @transform_0(%arg0: i32) -> (i32, i32) {
    %c0_i32 = arith.constant 0 : i32
    %c0_i32_0 = arith.constant 0 : i32
    return %arg0, %c0_i32 : i32, i32
  }
  func.func @transform_1(%arg0: i32) -> (i32, i32) {
    %c0_i32 = arith.constant 0 : i32
    %c0_i32_0 = arith.constant 0 : i32
    %c0_i32_1 = arith.constant 0 : i32
    return %c0_i32, %c0_i32_0 : i32, i32
  }
  func.func @transform_2(%arg0: i32) -> (i32, i32) {
    %c0_i32 = arith.constant 0 : i32
    %c0_i32_0 = arith.constant 0 : i32
    %c0_i32_1 = arith.constant 0 : i32
    return %c0_i32, %c0_i32_0 : i32, i32
  }
  func.func @transform_3(%arg0: i32) -> (i32, i32) {
    %c0_i32 = arith.constant 0 : i32
    %c0_i32_0 = arith.constant 0 : i32
    %c0_i32_1 = arith.constant 0 : i32
    return %c0_i32, %c0_i32_0 : i32, i32
  }
  func.func @transform_4(%arg0: i32) -> (i32, i32) {
    %c0_i32 = arith.constant 0 : i32
    %c0_i32_0 = arith.constant 0 : i32
    %c0_i32_1 = arith.constant 0 : i32
    return %c0_i32, %c0_i32_0 : i32, i32
  }
  func.func @transform_5(%arg0: i32) -> (i32, i32) {
    %c0_i32 = arith.constant 0 : i32
    %c0_i32_0 = arith.constant 0 : i32
    %c0_i32_1 = arith.constant 0 : i32
    return %c0_i32, %c0_i32_0 : i32, i32
  }
  func.func @transform_6(%arg0: i32) -> (i32, i32) {
    %c0_i32 = arith.constant 0 : i32
    %c0_i32_0 = arith.constant 0 : i32
    %c0_i32_1 = arith.constant 0 : i32
    return %c0_i32, %c0_i32_0 : i32, i32
  }
  func.func @transform_7(%arg0: i32) -> (i32, i32) {
    %c0_i32 = arith.constant 0 : i32
    %c0_i32_0 = arith.constant 0 : i32
    return %arg0, %c0_i32 : i32, i32
  }
}

module attributes {stable_mosaic.version = 11 : i64} {
  func.func @_mha_ln_kernel(%arg0: i32, %arg1: memref<1x8x32xf32, #tpu.memory_space<vmem>>, %arg2: memref<1x16x32xf32, #tpu.memory_space<vmem>>, %arg3: memref<1x16x32xf32, #tpu.memory_space<vmem>>, %arg4: memref<1x8x32xf32, #tpu.memory_space<vmem>>, %arg5: memref<1x1x16xf32, #tpu.memory_space<vmem>>, %arg6: memref<32x32xf32, #tpu.memory_space<vmem>>, %arg7: memref<1x32xf32, #tpu.memory_space<vmem>>, %arg8: memref<32x32xf32, #tpu.memory_space<vmem>>, %arg9: memref<1x32xf32, #tpu.memory_space<vmem>>, %arg10: memref<32x32xf32, #tpu.memory_space<vmem>>, %arg11: memref<1x32xf32, #tpu.memory_space<vmem>>, %arg12: memref<32x32xf32, #tpu.memory_space<vmem>>, %arg13: memref<1x32xf32, #tpu.memory_space<vmem>>, %arg14: memref<1x32xf32, #tpu.memory_space<vmem>>, %arg15: memref<1x32xf32, #tpu.memory_space<vmem>>, %arg16: memref<1x8x32xf32, #tpu.memory_space<vmem>>) attributes {dimension_semantics = [#tpu.dimension_semantics<parallel>], iteration_bounds = array<i64: 2>, scalar_prefetch = 0 : i64, scratch_operands = 0 : i64, tpu.core_type = #tpu.core_type<tc>, window_params = [{transform_indices = @transform_0, window_bounds = array<i64: 1, 8, 32>}, {transform_indices = @transform_1, window_bounds = array<i64: 1, 16, 32>}, {transform_indices = @transform_2, window_bounds = array<i64: 1, 16, 32>}, {transform_indices = @transform_3, window_bounds = array<i64: 1, 8, 32>}, {transform_indices = @transform_4, window_bounds = array<i64: 1, 1, 16>}, {pipeline_mode = #tpu.pipeline_mode<synchronous>, transform_indices = @transform_5, window_bounds = array<i64: 32, 32>}, {pipeline_mode = #tpu.pipeline_mode<synchronous>, transform_indices = @transform_6, window_bounds = array<i64: 1, 32>}, {pipeline_mode = #tpu.pipeline_mode<synchronous>, transform_indices = @transform_7, window_bounds = array<i64: 32, 32>}, {pipeline_mode = #tpu.pipeline_mode<synchronous>, transform_indices = @transform_8, window_bounds = array<i64: 1, 32>}, {pipeline_mode = #tpu.pipeline_mode<synchronous>, transform_indices = @transform_9, window_bounds = array<i64: 32, 32>}, {pipeline_mode = #tpu.pipeline_mode<synchronous>, transform_indices = @transform_10, window_bounds = array<i64: 1, 32>}, {pipeline_mode = #tpu.pipeline_mode<synchronous>, transform_indices = @transform_11, window_bounds = array<i64: 32, 32>}, {pipeline_mode = #tpu.pipeline_mode<synchronous>, transform_indices = @transform_12, window_bounds = array<i64: 1, 32>}, {pipeline_mode = #tpu.pipeline_mode<synchronous>, transform_indices = @transform_13, window_bounds = array<i64: 1, 32>}, {pipeline_mode = #tpu.pipeline_mode<synchronous>, transform_indices = @transform_14, window_bounds = array<i64: 1, 32>}, {transform_indices = @transform_15, window_bounds = array<i64: 1, 8, 32>}]} {
    %c0 = arith.constant 0 : index
    %c0_0 = arith.constant 0 : index
    %c0_1 = arith.constant 0 : index
    %0 = vector.load %arg1[%c0, %c0_0, %c0_1] : memref<1x8x32xf32, #tpu.memory_space<vmem>>, vector<1x8x32xf32>
    %1 = vector.shape_cast %0 : vector<1x8x32xf32> to vector<8x32xf32>
    %c0_2 = arith.constant 0 : index
    %c0_3 = arith.constant 0 : index
    %c0_4 = arith.constant 0 : index
    %2 = vector.load %arg2[%c0_2, %c0_3, %c0_4] : memref<1x16x32xf32, #tpu.memory_space<vmem>>, vector<1x16x32xf32>
    %3 = vector.shape_cast %2 : vector<1x16x32xf32> to vector<16x32xf32>
    %c0_5 = arith.constant 0 : index
    %c0_6 = arith.constant 0 : index
    %c0_7 = arith.constant 0 : index
    %4 = vector.load %arg3[%c0_5, %c0_6, %c0_7] : memref<1x16x32xf32, #tpu.memory_space<vmem>>, vector<1x16x32xf32>
    %5 = vector.shape_cast %4 : vector<1x16x32xf32> to vector<16x32xf32>
    %c0_8 = arith.constant 0 : index
    %c0_9 = arith.constant 0 : index
    %6 = vector.load %arg6[%c0_8, %c0_9] : memref<32x32xf32, #tpu.memory_space<vmem>>, vector<32x32xf32>
    %cst = arith.constant dense<0.000000e+00> : vector<8x32xf32>
    %7 = tpu.matmul %1, %6, %cst {dimension_numbers = #tpu.dot_dimension_numbers<[1], [0], [0], [1], [0, 0, 1, 1], [], []>} : vector<8x32xf32>, vector<32x32xf32>, vector<8x32xf32> -> vector<8x32xf32>
    %c0_10 = arith.constant 0 : index
    %c0_11 = arith.constant 0 : index
    %8 = vector.load %arg7[%c0_10, %c0_11] : memref<1x32xf32, #tpu.memory_space<vmem>>, vector<1x32xf32>
    %9 = vector.broadcast %8 : vector<1x32xf32> to vector<8x32xf32>
    %10 = arith.addf %7, %9 : vector<8x32xf32>
    %c0_12 = arith.constant 0 : index
    %c0_13 = arith.constant 0 : index
    %11 = vector.load %arg8[%c0_12, %c0_13] : memref<32x32xf32, #tpu.memory_space<vmem>>, vector<32x32xf32>
    %cst_14 = arith.constant dense<0.000000e+00> : vector<16x32xf32>
    %12 = tpu.matmul %3, %11, %cst_14 {dimension_numbers = #tpu.dot_dimension_numbers<[1], [0], [0], [1], [0, 0, 1, 1], [], []>} : vector<16x32xf32>, vector<32x32xf32>, vector<16x32xf32> -> vector<16x32xf32>
    %c0_15 = arith.constant 0 : index
    %c0_16 = arith.constant 0 : index
    %13 = vector.load %arg9[%c0_15, %c0_16] : memref<1x32xf32, #tpu.memory_space<vmem>>, vector<1x32xf32>
    %14 = vector.broadcast %13 : vector<1x32xf32> to vector<16x32xf32>
    %15 = arith.addf %12, %14 : vector<16x32xf32>
    %c0_17 = arith.constant 0 : index
    %c0_18 = arith.constant 0 : index
    %16 = vector.load %arg10[%c0_17, %c0_18] : memref<32x32xf32, #tpu.memory_space<vmem>>, vector<32x32xf32>
    %cst_19 = arith.constant dense<0.000000e+00> : vector<16x32xf32>
    %17 = tpu.matmul %5, %16, %cst_19 {dimension_numbers = #tpu.dot_dimension_numbers<[1], [0], [0], [1], [0, 0, 1, 1], [], []>} : vector<16x32xf32>, vector<32x32xf32>, vector<16x32xf32> -> vector<16x32xf32>
    %c0_20 = arith.constant 0 : index
    %c0_21 = arith.constant 0 : index
    %18 = vector.load %arg11[%c0_20, %c0_21] : memref<1x32xf32, #tpu.memory_space<vmem>>, vector<1x32xf32>
    %19 = vector.broadcast %18 : vector<1x32xf32> to vector<16x32xf32>
    %20 = arith.addf %17, %19 : vector<16x32xf32>
    %c0_22 = arith.constant 0 : index
    %c0_23 = arith.constant 0 : index
    %c0_24 = arith.constant 0 : index
    %21 = vector.load %arg5[%c0_22, %c0_23, %c0_24] : memref<1x1x16xf32, #tpu.memory_space<vmem>>, vector<1x1x16xf32>
    %22 = vector.shape_cast %21 : vector<1x1x16xf32> to vector<1x16xf32>
    %cst_25 = arith.constant 0.000000e+00 : f32
    %23 = vector.broadcast %cst_25 : f32 to vector<1x16xf32>
    %24 = arith.cmpf ogt, %22, %23 : vector<1x16xf32>
    %cst_26 = arith.constant -1.000000e+30 : f32
    %cst_27 = arith.constant 0.000000e+00 : f32
    %25 = vector.broadcast %cst_26 : f32 to vector<1x16xf32>
    %26 = vector.broadcast %cst_27 : f32 to vector<1x16xf32>
    %27 = arith.select %24, %25, %26 : vector<1x16xi1>, vector<1x16xf32>
    %28 = vector.extract_strided_slice %10 {offsets = [0, 0], sizes = [8, 8], strides = [1, 1]} : vector<8x32xf32> to vector<8x8xf32>
    %29 = vector.extract_strided_slice %15 {offsets = [0, 0], sizes = [16, 8], strides = [1, 1]} : vector<16x32xf32> to vector<16x8xf32>
    %30 = vector.extract_strided_slice %20 {offsets = [0, 0], sizes = [16, 8], strides = [1, 1]} : vector<16x32xf32> to vector<16x8xf32>
    %cst_28 = arith.constant dense<0.000000e+00> : vector<8x16xf32>
    %31 = tpu.matmul %28, %29, %cst_28 {dimension_numbers = #tpu.dot_dimension_numbers<[1], [1], [0], [0], [0, 0, 1, 0], [], []>} : vector<8x8xf32>, vector<16x8xf32>, vector<8x16xf32> -> vector<8x16xf32>
    %cst_29 = arith.constant 0.353553385 : f32
    %32 = vector.broadcast %cst_29 : f32 to vector<8x16xf32>
    %33 = arith.mulf %31, %32 : vector<8x16xf32>
    %34 = vector.broadcast %27 : vector<1x16xf32> to vector<8x16xf32>
    %35 = arith.addf %33, %34 : vector<8x16xf32>
    %cst_30 = arith.constant dense<0xFF800000> : vector<8xf32>
    %36 = vector.multi_reduction <maximumf>, %35, %cst_30 [1] : vector<8x16xf32> to vector<8xf32>
    %37 = vector.shape_cast %36 : vector<8xf32> to vector<8x1xf32>
    %38 = vector.broadcast %37 : vector<8x1xf32> to vector<8x16xf32>
    %39 = arith.subf %35, %38 : vector<8x16xf32>
    %40 = math.exp %39 : vector<8x16xf32>
    %cst_31 = arith.constant dense<0.000000e+00> : vector<8xf32>
    %41 = vector.multi_reduction <add>, %40, %cst_31 [1] : vector<8x16xf32> to vector<8xf32>
    %42 = vector.shape_cast %41 : vector<8xf32> to vector<8x1xf32>
    %43 = tpu.reciprocal %42 {approx = true} : vector<8x1xf32> -> vector<8x1xf32>
    %44 = vector.broadcast %43 : vector<8x1xf32> to vector<8x16xf32>
    %45 = arith.mulf %40, %44 : vector<8x16xf32>
    %cst_32 = arith.constant dense<0.000000e+00> : vector<8x8xf32>
    %46 = tpu.matmul %45, %30, %cst_32 {dimension_numbers = #tpu.dot_dimension_numbers<[1], [0], [0], [1], [0, 0, 1, 1], [], []>} : vector<8x16xf32>, vector<16x8xf32>, vector<8x8xf32> -> vector<8x8xf32>
    %47 = vector.extract_strided_slice %10 {offsets = [0, 8], sizes = [8, 8], strides = [1, 1]} : vector<8x32xf32> to vector<8x8xf32>
    %48 = vector.extract_strided_slice %15 {offsets = [0, 8], sizes = [16, 8], strides = [1, 1]} : vector<16x32xf32> to vector<16x8xf32>
    %49 = vector.extract_strided_slice %20 {offsets = [0, 8], sizes = [16, 8], strides = [1, 1]} : vector<16x32xf32> to vector<16x8xf32>
    %cst_33 = arith.constant dense<0.000000e+00> : vector<8x16xf32>
    %50 = tpu.matmul %47, %48, %cst_33 {dimension_numbers = #tpu.dot_dimension_numbers<[1], [1], [0], [0], [0, 0, 1, 0], [], []>} : vector<8x8xf32>, vector<16x8xf32>, vector<8x16xf32> -> vector<8x16xf32>
    %cst_34 = arith.constant 0.353553385 : f32
    %51 = vector.broadcast %cst_34 : f32 to vector<8x16xf32>
    %52 = arith.mulf %50, %51 : vector<8x16xf32>
    %53 = vector.broadcast %27 : vector<1x16xf32> to vector<8x16xf32>
    %54 = arith.addf %52, %53 : vector<8x16xf32>
    %cst_35 = arith.constant dense<0xFF800000> : vector<8xf32>
    %55 = vector.multi_reduction <maximumf>, %54, %cst_35 [1] : vector<8x16xf32> to vector<8xf32>
    %56 = vector.shape_cast %55 : vector<8xf32> to vector<8x1xf32>
    %57 = vector.broadcast %56 : vector<8x1xf32> to vector<8x16xf32>
    %58 = arith.subf %54, %57 : vector<8x16xf32>
    %59 = math.exp %58 : vector<8x16xf32>
    %cst_36 = arith.constant dense<0.000000e+00> : vector<8xf32>
    %60 = vector.multi_reduction <add>, %59, %cst_36 [1] : vector<8x16xf32> to vector<8xf32>
    %61 = vector.shape_cast %60 : vector<8xf32> to vector<8x1xf32>
    %62 = tpu.reciprocal %61 {approx = true} : vector<8x1xf32> -> vector<8x1xf32>
    %63 = vector.broadcast %62 : vector<8x1xf32> to vector<8x16xf32>
    %64 = arith.mulf %59, %63 : vector<8x16xf32>
    %cst_37 = arith.constant dense<0.000000e+00> : vector<8x8xf32>
    %65 = tpu.matmul %64, %49, %cst_37 {dimension_numbers = #tpu.dot_dimension_numbers<[1], [0], [0], [1], [0, 0, 1, 1], [], []>} : vector<8x16xf32>, vector<16x8xf32>, vector<8x8xf32> -> vector<8x8xf32>
    %66 = vector.extract_strided_slice %10 {offsets = [0, 16], sizes = [8, 8], strides = [1, 1]} : vector<8x32xf32> to vector<8x8xf32>
    %67 = vector.extract_strided_slice %15 {offsets = [0, 16], sizes = [16, 8], strides = [1, 1]} : vector<16x32xf32> to vector<16x8xf32>
    %68 = vector.extract_strided_slice %20 {offsets = [0, 16], sizes = [16, 8], strides = [1, 1]} : vector<16x32xf32> to vector<16x8xf32>
    %cst_38 = arith.constant dense<0.000000e+00> : vector<8x16xf32>
    %69 = tpu.matmul %66, %67, %cst_38 {dimension_numbers = #tpu.dot_dimension_numbers<[1], [1], [0], [0], [0, 0, 1, 0], [], []>} : vector<8x8xf32>, vector<16x8xf32>, vector<8x16xf32> -> vector<8x16xf32>
    %cst_39 = arith.constant 0.353553385 : f32
    %70 = vector.broadcast %cst_39 : f32 to vector<8x16xf32>
    %71 = arith.mulf %69, %70 : vector<8x16xf32>
    %72 = vector.broadcast %27 : vector<1x16xf32> to vector<8x16xf32>
    %73 = arith.addf %71, %72 : vector<8x16xf32>
    %cst_40 = arith.constant dense<0xFF800000> : vector<8xf32>
    %74 = vector.multi_reduction <maximumf>, %73, %cst_40 [1] : vector<8x16xf32> to vector<8xf32>
    %75 = vector.shape_cast %74 : vector<8xf32> to vector<8x1xf32>
    %76 = vector.broadcast %75 : vector<8x1xf32> to vector<8x16xf32>
    %77 = arith.subf %73, %76 : vector<8x16xf32>
    %78 = math.exp %77 : vector<8x16xf32>
    %cst_41 = arith.constant dense<0.000000e+00> : vector<8xf32>
    %79 = vector.multi_reduction <add>, %78, %cst_41 [1] : vector<8x16xf32> to vector<8xf32>
    %80 = vector.shape_cast %79 : vector<8xf32> to vector<8x1xf32>
    %81 = tpu.reciprocal %80 {approx = true} : vector<8x1xf32> -> vector<8x1xf32>
    %82 = vector.broadcast %81 : vector<8x1xf32> to vector<8x16xf32>
    %83 = arith.mulf %78, %82 : vector<8x16xf32>
    %cst_42 = arith.constant dense<0.000000e+00> : vector<8x8xf32>
    %84 = tpu.matmul %83, %68, %cst_42 {dimension_numbers = #tpu.dot_dimension_numbers<[1], [0], [0], [1], [0, 0, 1, 1], [], []>} : vector<8x16xf32>, vector<16x8xf32>, vector<8x8xf32> -> vector<8x8xf32>
    %85 = vector.extract_strided_slice %10 {offsets = [0, 24], sizes = [8, 8], strides = [1, 1]} : vector<8x32xf32> to vector<8x8xf32>
    %86 = vector.extract_strided_slice %15 {offsets = [0, 24], sizes = [16, 8], strides = [1, 1]} : vector<16x32xf32> to vector<16x8xf32>
    %87 = vector.extract_strided_slice %20 {offsets = [0, 24], sizes = [16, 8], strides = [1, 1]} : vector<16x32xf32> to vector<16x8xf32>
    %cst_43 = arith.constant dense<0.000000e+00> : vector<8x16xf32>
    %88 = tpu.matmul %85, %86, %cst_43 {dimension_numbers = #tpu.dot_dimension_numbers<[1], [1], [0], [0], [0, 0, 1, 0], [], []>} : vector<8x8xf32>, vector<16x8xf32>, vector<8x16xf32> -> vector<8x16xf32>
    %cst_44 = arith.constant 0.353553385 : f32
    %89 = vector.broadcast %cst_44 : f32 to vector<8x16xf32>
    %90 = arith.mulf %88, %89 : vector<8x16xf32>
    %91 = vector.broadcast %27 : vector<1x16xf32> to vector<8x16xf32>
    %92 = arith.addf %90, %91 : vector<8x16xf32>
    %cst_45 = arith.constant dense<0xFF800000> : vector<8xf32>
    %93 = vector.multi_reduction <maximumf>, %92, %cst_45 [1] : vector<8x16xf32> to vector<8xf32>
    %94 = vector.shape_cast %93 : vector<8xf32> to vector<8x1xf32>
    %95 = vector.broadcast %94 : vector<8x1xf32> to vector<8x16xf32>
    %96 = arith.subf %92, %95 : vector<8x16xf32>
    %97 = math.exp %96 : vector<8x16xf32>
    %cst_46 = arith.constant dense<0.000000e+00> : vector<8xf32>
    %98 = vector.multi_reduction <add>, %97, %cst_46 [1] : vector<8x16xf32> to vector<8xf32>
    %99 = vector.shape_cast %98 : vector<8xf32> to vector<8x1xf32>
    %100 = tpu.reciprocal %99 {approx = true} : vector<8x1xf32> -> vector<8x1xf32>
    %101 = vector.broadcast %100 : vector<8x1xf32> to vector<8x16xf32>
    %102 = arith.mulf %97, %101 : vector<8x16xf32>
    %cst_47 = arith.constant dense<0.000000e+00> : vector<8x8xf32>
    %103 = tpu.matmul %102, %87, %cst_47 {dimension_numbers = #tpu.dot_dimension_numbers<[1], [0], [0], [1], [0, 0, 1, 1], [], []>} : vector<8x16xf32>, vector<16x8xf32>, vector<8x8xf32> -> vector<8x8xf32>
    %104 = tpu.concatenate %46, %65, %84, %103 in 1 : vector<8x8xf32>, vector<8x8xf32>, vector<8x8xf32>, vector<8x8xf32> -> vector<8x32xf32>
    %c0_48 = arith.constant 0 : index
    %c0_49 = arith.constant 0 : index
    %105 = vector.load %arg12[%c0_48, %c0_49] : memref<32x32xf32, #tpu.memory_space<vmem>>, vector<32x32xf32>
    %cst_50 = arith.constant dense<0.000000e+00> : vector<8x32xf32>
    %106 = tpu.matmul %104, %105, %cst_50 {dimension_numbers = #tpu.dot_dimension_numbers<[1], [0], [0], [1], [0, 0, 1, 1], [], []>} : vector<8x32xf32>, vector<32x32xf32>, vector<8x32xf32> -> vector<8x32xf32>
    %c0_51 = arith.constant 0 : index
    %c0_52 = arith.constant 0 : index
    %107 = vector.load %arg13[%c0_51, %c0_52] : memref<1x32xf32, #tpu.memory_space<vmem>>, vector<1x32xf32>
    %108 = vector.broadcast %107 : vector<1x32xf32> to vector<8x32xf32>
    %109 = arith.addf %106, %108 : vector<8x32xf32>
    %c0_53 = arith.constant 0 : index
    %c0_54 = arith.constant 0 : index
    %c0_55 = arith.constant 0 : index
    %110 = vector.load %arg4[%c0_53, %c0_54, %c0_55] : memref<1x8x32xf32, #tpu.memory_space<vmem>>, vector<1x8x32xf32>
    %111 = vector.shape_cast %110 : vector<1x8x32xf32> to vector<8x32xf32>
    %112 = arith.addf %111, %109 : vector<8x32xf32>
    %cst_56 = arith.constant dense<0.000000e+00> : vector<8xf32>
    %113 = vector.multi_reduction <add>, %112, %cst_56 [1] : vector<8x32xf32> to vector<8xf32>
    %114 = vector.shape_cast %113 : vector<8xf32> to vector<8x1xf32>
    %cst_57 = arith.constant 3.200000e+01 : f32
    %115 = vector.broadcast %cst_57 : f32 to vector<8x1xf32>
    %116 = arith.divf %114, %115 : vector<8x1xf32>
    %117 = vector.broadcast %116 : vector<8x1xf32> to vector<8x32xf32>
    %118 = arith.subf %112, %117 : vector<8x32xf32>
    %119 = arith.mulf %118, %118 : vector<8x32xf32>
    %cst_58 = arith.constant dense<0.000000e+00> : vector<8xf32>
    %120 = vector.multi_reduction <add>, %119, %cst_58 [1] : vector<8x32xf32> to vector<8xf32>
    %121 = vector.shape_cast %120 : vector<8xf32> to vector<8x1xf32>
    %cst_59 = arith.constant 3.200000e+01 : f32
    %122 = vector.broadcast %cst_59 : f32 to vector<8x1xf32>
    %123 = arith.divf %121, %122 : vector<8x1xf32>
    %124 = vector.broadcast %116 : vector<8x1xf32> to vector<8x32xf32>
    %125 = arith.subf %112, %124 : vector<8x32xf32>
    %cst_60 = arith.constant 9.99999974E-6 : f32
    %126 = vector.broadcast %cst_60 : f32 to vector<8x1xf32>
    %127 = arith.addf %123, %126 : vector<8x1xf32>
    %128 = math.rsqrt %127 : vector<8x1xf32>
    %129 = vector.broadcast %128 : vector<8x1xf32> to vector<8x32xf32>
    %130 = arith.mulf %125, %129 : vector<8x32xf32>
    %c0_61 = arith.constant 0 : index
    %c0_62 = arith.constant 0 : index
    %131 = vector.load %arg14[%c0_61, %c0_62] : memref<1x32xf32, #tpu.memory_space<vmem>>, vector<1x32xf32>
    %132 = vector.broadcast %131 : vector<1x32xf32> to vector<8x32xf32>
    %133 = arith.mulf %130, %132 : vector<8x32xf32>
    %c0_63 = arith.constant 0 : index
    %c0_64 = arith.constant 0 : index
    %134 = vector.load %arg15[%c0_63, %c0_64] : memref<1x32xf32, #tpu.memory_space<vmem>>, vector<1x32xf32>
    %135 = vector.broadcast %134 : vector<1x32xf32> to vector<8x32xf32>
    %136 = arith.addf %133, %135 : vector<8x32xf32>
    %c0_65 = arith.constant 0 : index
    %c0_66 = arith.constant 0 : index
    %c0_67 = arith.constant 0 : index
    %137 = vector.load %arg16[%c0_65, %c0_66, %c0_67] : memref<1x8x32xf32, #tpu.memory_space<vmem>>, vector<1x8x32xf32>
    %138 = vector.shape_cast %137 : vector<1x8x32xf32> to vector<8x32xf32>
    %139 = vector.shape_cast %136 : vector<8x32xf32> to vector<1x8x32xf32>
    tpu.vector_store %arg16[%c0_65, %c0_66, %c0_67], %139 {strides = array<i32>} : memref<1x8x32xf32, #tpu.memory_space<vmem>>, vector<1x8x32xf32>,
    return
  }
  func.func @transform_0(%arg0: i32) -> (i32, i32, i32) {
    %c0_i32 = arith.constant 0 : i32
    %c0_i32_0 = arith.constant 0 : i32
    %c0_i32_1 = arith.constant 0 : i32
    return %arg0, %c0_i32, %c0_i32_0 : i32, i32, i32
  }
  func.func @transform_1(%arg0: i32) -> (i32, i32, i32) {
    %c0_i32 = arith.constant 0 : i32
    %c0_i32_0 = arith.constant 0 : i32
    %c0_i32_1 = arith.constant 0 : i32
    return %arg0, %c0_i32, %c0_i32_0 : i32, i32, i32
  }
  func.func @transform_2(%arg0: i32) -> (i32, i32, i32) {
    %c0_i32 = arith.constant 0 : i32
    %c0_i32_0 = arith.constant 0 : i32
    %c0_i32_1 = arith.constant 0 : i32
    return %arg0, %c0_i32, %c0_i32_0 : i32, i32, i32
  }
  func.func @transform_3(%arg0: i32) -> (i32, i32, i32) {
    %c0_i32 = arith.constant 0 : i32
    %c0_i32_0 = arith.constant 0 : i32
    %c0_i32_1 = arith.constant 0 : i32
    return %arg0, %c0_i32, %c0_i32_0 : i32, i32, i32
  }
  func.func @transform_4(%arg0: i32) -> (i32, i32, i32) {
    %c0_i32 = arith.constant 0 : i32
    %c0_i32_0 = arith.constant 0 : i32
    %c0_i32_1 = arith.constant 0 : i32
    return %arg0, %c0_i32, %c0_i32_0 : i32, i32, i32
  }
  func.func @transform_5(%arg0: i32) -> (i32, i32) {
    %c0_i32 = arith.constant 0 : i32
    %c0_i32_0 = arith.constant 0 : i32
    %c0_i32_1 = arith.constant 0 : i32
    return %c0_i32, %c0_i32_0 : i32, i32
  }
  func.func @transform_6(%arg0: i32) -> (i32, i32) {
    %c0_i32 = arith.constant 0 : i32
    %c0_i32_0 = arith.constant 0 : i32
    %c0_i32_1 = arith.constant 0 : i32
    return %c0_i32, %c0_i32_0 : i32, i32
  }
  func.func @transform_7(%arg0: i32) -> (i32, i32) {
    %c0_i32 = arith.constant 0 : i32
    %c0_i32_0 = arith.constant 0 : i32
    %c0_i32_1 = arith.constant 0 : i32
    return %c0_i32, %c0_i32_0 : i32, i32
  }
  func.func @transform_8(%arg0: i32) -> (i32, i32) {
    %c0_i32 = arith.constant 0 : i32
    %c0_i32_0 = arith.constant 0 : i32
    %c0_i32_1 = arith.constant 0 : i32
    return %c0_i32, %c0_i32_0 : i32, i32
  }
  func.func @transform_9(%arg0: i32) -> (i32, i32) {
    %c0_i32 = arith.constant 0 : i32
    %c0_i32_0 = arith.constant 0 : i32
    %c0_i32_1 = arith.constant 0 : i32
    return %c0_i32, %c0_i32_0 : i32, i32
  }
  func.func @transform_10(%arg0: i32) -> (i32, i32) {
    %c0_i32 = arith.constant 0 : i32
    %c0_i32_0 = arith.constant 0 : i32
    %c0_i32_1 = arith.constant 0 : i32
    return %c0_i32, %c0_i32_0 : i32, i32
  }
  func.func @transform_11(%arg0: i32) -> (i32, i32) {
    %c0_i32 = arith.constant 0 : i32
    %c0_i32_0 = arith.constant 0 : i32
    %c0_i32_1 = arith.constant 0 : i32
    return %c0_i32, %c0_i32_0 : i32, i32
  }
  func.func @transform_12(%arg0: i32) -> (i32, i32) {
    %c0_i32 = arith.constant 0 : i32
    %c0_i32_0 = arith.constant 0 : i32
    %c0_i32_1 = arith.constant 0 : i32
    return %c0_i32, %c0_i32_0 : i32, i32
  }
  func.func @transform_13(%arg0: i32) -> (i32, i32) {
    %c0_i32 = arith.constant 0 : i32
    %c0_i32_0 = arith.constant 0 : i32
    %c0_i32_1 = arith.constant 0 : i32
    return %c0_i32, %c0_i32_0 : i32, i32
  }
  func.func @transform_14(%arg0: i32) -> (i32, i32) {
    %c0_i32 = arith.constant 0 : i32
    %c0_i32_0 = arith.constant 0 : i32
    %c0_i32_1 = arith.constant 0 : i32
    return %c0_i32, %c0_i32_0 : i32, i32
  }
  func.func @transform_15(%arg0: i32) -> (i32, i32, i32) {
    %c0_i32 = arith.constant 0 : i32
    %c0_i32_0 = arith.constant 0 : i32
    %c0_i32_1 = arith.constant 0 : i32
    return %arg0, %c0_i32, %c0_i32_0 : i32, i32, i32
  }
}

module attributes {stable_mosaic.version = 11 : i64} {
  func.func @_mha_ln_kernel(%arg0: i32, %arg1: memref<1x8x32xf32, #tpu.memory_space<vmem>>, %arg2: memref<1x8x32xf32, #tpu.memory_space<vmem>>, %arg3: memref<1x8x32xf32, #tpu.memory_space<vmem>>, %arg4: memref<1x8x32xf32, #tpu.memory_space<vmem>>, %arg5: memref<32x32xf32, #tpu.memory_space<vmem>>, %arg6: memref<1x32xf32, #tpu.memory_space<vmem>>, %arg7: memref<32x32xf32, #tpu.memory_space<vmem>>, %arg8: memref<1x32xf32, #tpu.memory_space<vmem>>, %arg9: memref<32x32xf32, #tpu.memory_space<vmem>>, %arg10: memref<1x32xf32, #tpu.memory_space<vmem>>, %arg11: memref<32x32xf32, #tpu.memory_space<vmem>>, %arg12: memref<1x32xf32, #tpu.memory_space<vmem>>, %arg13: memref<1x32xf32, #tpu.memory_space<vmem>>, %arg14: memref<1x32xf32, #tpu.memory_space<vmem>>, %arg15: memref<1x8x32xf32, #tpu.memory_space<vmem>>) attributes {dimension_semantics = [#tpu.dimension_semantics<parallel>], iteration_bounds = array<i64: 2>, scalar_prefetch = 0 : i64, scratch_operands = 0 : i64, tpu.core_type = #tpu.core_type<tc>, window_params = [{transform_indices = @transform_0, window_bounds = array<i64: 1, 8, 32>}, {transform_indices = @transform_1, window_bounds = array<i64: 1, 8, 32>}, {transform_indices = @transform_2, window_bounds = array<i64: 1, 8, 32>}, {transform_indices = @transform_3, window_bounds = array<i64: 1, 8, 32>}, {pipeline_mode = #tpu.pipeline_mode<synchronous>, transform_indices = @transform_4, window_bounds = array<i64: 32, 32>}, {pipeline_mode = #tpu.pipeline_mode<synchronous>, transform_indices = @transform_5, window_bounds = array<i64: 1, 32>}, {pipeline_mode = #tpu.pipeline_mode<synchronous>, transform_indices = @transform_6, window_bounds = array<i64: 32, 32>}, {pipeline_mode = #tpu.pipeline_mode<synchronous>, transform_indices = @transform_7, window_bounds = array<i64: 1, 32>}, {pipeline_mode = #tpu.pipeline_mode<synchronous>, transform_indices = @transform_8, window_bounds = array<i64: 32, 32>}, {pipeline_mode = #tpu.pipeline_mode<synchronous>, transform_indices = @transform_9, window_bounds = array<i64: 1, 32>}, {pipeline_mode = #tpu.pipeline_mode<synchronous>, transform_indices = @transform_10, window_bounds = array<i64: 32, 32>}, {pipeline_mode = #tpu.pipeline_mode<synchronous>, transform_indices = @transform_11, window_bounds = array<i64: 1, 32>}, {pipeline_mode = #tpu.pipeline_mode<synchronous>, transform_indices = @transform_12, window_bounds = array<i64: 1, 32>}, {pipeline_mode = #tpu.pipeline_mode<synchronous>, transform_indices = @transform_13, window_bounds = array<i64: 1, 32>}, {transform_indices = @transform_14, window_bounds = array<i64: 1, 8, 32>}]} {
    %c0 = arith.constant 0 : index
    %c0_0 = arith.constant 0 : index
    %c0_1 = arith.constant 0 : index
    %0 = vector.load %arg1[%c0, %c0_0, %c0_1] : memref<1x8x32xf32, #tpu.memory_space<vmem>>, vector<1x8x32xf32>
    %1 = vector.shape_cast %0 : vector<1x8x32xf32> to vector<8x32xf32>
    %c0_2 = arith.constant 0 : index
    %c0_3 = arith.constant 0 : index
    %c0_4 = arith.constant 0 : index
    %2 = vector.load %arg2[%c0_2, %c0_3, %c0_4] : memref<1x8x32xf32, #tpu.memory_space<vmem>>, vector<1x8x32xf32>
    %3 = vector.shape_cast %2 : vector<1x8x32xf32> to vector<8x32xf32>
    %c0_5 = arith.constant 0 : index
    %c0_6 = arith.constant 0 : index
    %c0_7 = arith.constant 0 : index
    %4 = vector.load %arg3[%c0_5, %c0_6, %c0_7] : memref<1x8x32xf32, #tpu.memory_space<vmem>>, vector<1x8x32xf32>
    %5 = vector.shape_cast %4 : vector<1x8x32xf32> to vector<8x32xf32>
    %c0_8 = arith.constant 0 : index
    %c0_9 = arith.constant 0 : index
    %6 = vector.load %arg5[%c0_8, %c0_9] : memref<32x32xf32, #tpu.memory_space<vmem>>, vector<32x32xf32>
    %cst = arith.constant dense<0.000000e+00> : vector<8x32xf32>
    %7 = tpu.matmul %1, %6, %cst {dimension_numbers = #tpu.dot_dimension_numbers<[1], [0], [0], [1], [0, 0, 1, 1], [], []>} : vector<8x32xf32>, vector<32x32xf32>, vector<8x32xf32> -> vector<8x32xf32>
    %c0_10 = arith.constant 0 : index
    %c0_11 = arith.constant 0 : index
    %8 = vector.load %arg6[%c0_10, %c0_11] : memref<1x32xf32, #tpu.memory_space<vmem>>, vector<1x32xf32>
    %9 = vector.broadcast %8 : vector<1x32xf32> to vector<8x32xf32>
    %10 = arith.addf %7, %9 : vector<8x32xf32>
    %c0_12 = arith.constant 0 : index
    %c0_13 = arith.constant 0 : index
    %11 = vector.load %arg7[%c0_12, %c0_13] : memref<32x32xf32, #tpu.memory_space<vmem>>, vector<32x32xf32>
    %cst_14 = arith.constant dense<0.000000e+00> : vector<8x32xf32>
    %12 = tpu.matmul %3, %11, %cst_14 {dimension_numbers = #tpu.dot_dimension_numbers<[1], [0], [0], [1], [0, 0, 1, 1], [], []>} : vector<8x32xf32>, vector<32x32xf32>, vector<8x32xf32> -> vector<8x32xf32>
    %c0_15 = arith.constant 0 : index
    %c0_16 = arith.constant 0 : index
    %13 = vector.load %arg8[%c0_15, %c0_16] : memref<1x32xf32, #tpu.memory_space<vmem>>, vector<1x32xf32>
    %14 = vector.broadcast %13 : vector<1x32xf32> to vector<8x32xf32>
    %15 = arith.addf %12, %14 : vector<8x32xf32>
    %c0_17 = arith.constant 0 : index
    %c0_18 = arith.constant 0 : index
    %16 = vector.load %arg9[%c0_17, %c0_18] : memref<32x32xf32, #tpu.memory_space<vmem>>, vector<32x32xf32>
    %cst_19 = arith.constant dense<0.000000e+00> : vector<8x32xf32>
    %17 = tpu.matmul %5, %16, %cst_19 {dimension_numbers = #tpu.dot_dimension_numbers<[1], [0], [0], [1], [0, 0, 1, 1], [], []>} : vector<8x32xf32>, vector<32x32xf32>, vector<8x32xf32> -> vector<8x32xf32>
    %c0_20 = arith.constant 0 : index
    %c0_21 = arith.constant 0 : index
    %18 = vector.load %arg10[%c0_20, %c0_21] : memref<1x32xf32, #tpu.memory_space<vmem>>, vector<1x32xf32>
    %19 = vector.broadcast %18 : vector<1x32xf32> to vector<8x32xf32>
    %20 = arith.addf %17, %19 : vector<8x32xf32>
    %21 = vector.extract_strided_slice %10 {offsets = [0, 0], sizes = [8, 8], strides = [1, 1]} : vector<8x32xf32> to vector<8x8xf32>
    %22 = vector.extract_strided_slice %15 {offsets = [0, 0], sizes = [8, 8], strides = [1, 1]} : vector<8x32xf32> to vector<8x8xf32>
    %23 = vector.extract_strided_slice %20 {offsets = [0, 0], sizes = [8, 8], strides = [1, 1]} : vector<8x32xf32> to vector<8x8xf32>
    %cst_22 = arith.constant dense<0.000000e+00> : vector<8x8xf32>
    %24 = tpu.matmul %21, %22, %cst_22 {dimension_numbers = #tpu.dot_dimension_numbers<[1], [1], [0], [0], [0, 0, 1, 0], [], []>} : vector<8x8xf32>, vector<8x8xf32>, vector<8x8xf32> -> vector<8x8xf32>
    %cst_23 = arith.constant 0.353553385 : f32
    %25 = vector.broadcast %cst_23 : f32 to vector<8x8xf32>
    %26 = arith.mulf %24, %25 : vector<8x8xf32>
    %cst_24 = arith.constant dense<0xFF800000> : vector<8xf32>
    %27 = vector.multi_reduction <maximumf>, %26, %cst_24 [1] : vector<8x8xf32> to vector<8xf32>
    %28 = vector.shape_cast %27 : vector<8xf32> to vector<8x1xf32>
    %29 = vector.broadcast %28 : vector<8x1xf32> to vector<8x8xf32>
    %30 = arith.subf %26, %29 : vector<8x8xf32>
    %31 = math.exp %30 : vector<8x8xf32>
    %cst_25 = arith.constant dense<0.000000e+00> : vector<8xf32>
    %32 = vector.multi_reduction <add>, %31, %cst_25 [1] : vector<8x8xf32> to vector<8xf32>
    %33 = vector.shape_cast %32 : vector<8xf32> to vector<8x1xf32>
    %34 = tpu.reciprocal %33 {approx = true} : vector<8x1xf32> -> vector<8x1xf32>
    %35 = vector.broadcast %34 : vector<8x1xf32> to vector<8x8xf32>
    %36 = arith.mulf %31, %35 : vector<8x8xf32>
    %cst_26 = arith.constant dense<0.000000e+00> : vector<8x8xf32>
    %37 = tpu.matmul %36, %23, %cst_26 {dimension_numbers = #tpu.dot_dimension_numbers<[1], [0], [0], [1], [0, 0, 1, 1], [], []>} : vector<8x8xf32>, vector<8x8xf32>, vector<8x8xf32> -> vector<8x8xf32>
    %38 = vector.extract_strided_slice %10 {offsets = [0, 8], sizes = [8, 8], strides = [1, 1]} : vector<8x32xf32> to vector<8x8xf32>
    %39 = vector.extract_strided_slice %15 {offsets = [0, 8], sizes = [8, 8], strides = [1, 1]} : vector<8x32xf32> to vector<8x8xf32>
    %40 = vector.extract_strided_slice %20 {offsets = [0, 8], sizes = [8, 8], strides = [1, 1]} : vector<8x32xf32> to vector<8x8xf32>
    %cst_27 = arith.constant dense<0.000000e+00> : vector<8x8xf32>
    %41 = tpu.matmul %38, %39, %cst_27 {dimension_numbers = #tpu.dot_dimension_numbers<[1], [1], [0], [0], [0, 0, 1, 0], [], []>} : vector<8x8xf32>, vector<8x8xf32>, vector<8x8xf32> -> vector<8x8xf32>
    %cst_28 = arith.constant 0.353553385 : f32
    %42 = vector.broadcast %cst_28 : f32 to vector<8x8xf32>
    %43 = arith.mulf %41, %42 : vector<8x8xf32>
    %cst_29 = arith.constant dense<0xFF800000> : vector<8xf32>
    %44 = vector.multi_reduction <maximumf>, %43, %cst_29 [1] : vector<8x8xf32> to vector<8xf32>
    %45 = vector.shape_cast %44 : vector<8xf32> to vector<8x1xf32>
    %46 = vector.broadcast %45 : vector<8x1xf32> to vector<8x8xf32>
    %47 = arith.subf %43, %46 : vector<8x8xf32>
    %48 = math.exp %47 : vector<8x8xf32>
    %cst_30 = arith.constant dense<0.000000e+00> : vector<8xf32>
    %49 = vector.multi_reduction <add>, %48, %cst_30 [1] : vector<8x8xf32> to vector<8xf32>
    %50 = vector.shape_cast %49 : vector<8xf32> to vector<8x1xf32>
    %51 = tpu.reciprocal %50 {approx = true} : vector<8x1xf32> -> vector<8x1xf32>
    %52 = vector.broadcast %51 : vector<8x1xf32> to vector<8x8xf32>
    %53 = arith.mulf %48, %52 : vector<8x8xf32>
    %cst_31 = arith.constant dense<0.000000e+00> : vector<8x8xf32>
    %54 = tpu.matmul %53, %40, %cst_31 {dimension_numbers = #tpu.dot_dimension_numbers<[1], [0], [0], [1], [0, 0, 1, 1], [], []>} : vector<8x8xf32>, vector<8x8xf32>, vector<8x8xf32> -> vector<8x8xf32>
    %55 = vector.extract_strided_slice %10 {offsets = [0, 16], sizes = [8, 8], strides = [1, 1]} : vector<8x32xf32> to vector<8x8xf32>
    %56 = vector.extract_strided_slice %15 {offsets = [0, 16], sizes = [8, 8], strides = [1, 1]} : vector<8x32xf32> to vector<8x8xf32>
    %57 = vector.extract_strided_slice %20 {offsets = [0, 16], sizes = [8, 8], strides = [1, 1]} : vector<8x32xf32> to vector<8x8xf32>
    %cst_32 = arith.constant dense<0.000000e+00> : vector<8x8xf32>
    %58 = tpu.matmul %55, %56, %cst_32 {dimension_numbers = #tpu.dot_dimension_numbers<[1], [1], [0], [0], [0, 0, 1, 0], [], []>} : vector<8x8xf32>, vector<8x8xf32>, vector<8x8xf32> -> vector<8x8xf32>
    %cst_33 = arith.constant 0.353553385 : f32
    %59 = vector.broadcast %cst_33 : f32 to vector<8x8xf32>
    %60 = arith.mulf %58, %59 : vector<8x8xf32>
    %cst_34 = arith.constant dense<0xFF800000> : vector<8xf32>
    %61 = vector.multi_reduction <maximumf>, %60, %cst_34 [1] : vector<8x8xf32> to vector<8xf32>
    %62 = vector.shape_cast %61 : vector<8xf32> to vector<8x1xf32>
    %63 = vector.broadcast %62 : vector<8x1xf32> to vector<8x8xf32>
    %64 = arith.subf %60, %63 : vector<8x8xf32>
    %65 = math.exp %64 : vector<8x8xf32>
    %cst_35 = arith.constant dense<0.000000e+00> : vector<8xf32>
    %66 = vector.multi_reduction <add>, %65, %cst_35 [1] : vector<8x8xf32> to vector<8xf32>
    %67 = vector.shape_cast %66 : vector<8xf32> to vector<8x1xf32>
    %68 = tpu.reciprocal %67 {approx = true} : vector<8x1xf32> -> vector<8x1xf32>
    %69 = vector.broadcast %68 : vector<8x1xf32> to vector<8x8xf32>
    %70 = arith.mulf %65, %69 : vector<8x8xf32>
    %cst_36 = arith.constant dense<0.000000e+00> : vector<8x8xf32>
    %71 = tpu.matmul %70, %57, %cst_36 {dimension_numbers = #tpu.dot_dimension_numbers<[1], [0], [0], [1], [0, 0, 1, 1], [], []>} : vector<8x8xf32>, vector<8x8xf32>, vector<8x8xf32> -> vector<8x8xf32>
    %72 = vector.extract_strided_slice %10 {offsets = [0, 24], sizes = [8, 8], strides = [1, 1]} : vector<8x32xf32> to vector<8x8xf32>
    %73 = vector.extract_strided_slice %15 {offsets = [0, 24], sizes = [8, 8], strides = [1, 1]} : vector<8x32xf32> to vector<8x8xf32>
    %74 = vector.extract_strided_slice %20 {offsets = [0, 24], sizes = [8, 8], strides = [1, 1]} : vector<8x32xf32> to vector<8x8xf32>
    %cst_37 = arith.constant dense<0.000000e+00> : vector<8x8xf32>
    %75 = tpu.matmul %72, %73, %cst_37 {dimension_numbers = #tpu.dot_dimension_numbers<[1], [1], [0], [0], [0, 0, 1, 0], [], []>} : vector<8x8xf32>, vector<8x8xf32>, vector<8x8xf32> -> vector<8x8xf32>
    %cst_38 = arith.constant 0.353553385 : f32
    %76 = vector.broadcast %cst_38 : f32 to vector<8x8xf32>
    %77 = arith.mulf %75, %76 : vector<8x8xf32>
    %cst_39 = arith.constant dense<0xFF800000> : vector<8xf32>
    %78 = vector.multi_reduction <maximumf>, %77, %cst_39 [1] : vector<8x8xf32> to vector<8xf32>
    %79 = vector.shape_cast %78 : vector<8xf32> to vector<8x1xf32>
    %80 = vector.broadcast %79 : vector<8x1xf32> to vector<8x8xf32>
    %81 = arith.subf %77, %80 : vector<8x8xf32>
    %82 = math.exp %81 : vector<8x8xf32>
    %cst_40 = arith.constant dense<0.000000e+00> : vector<8xf32>
    %83 = vector.multi_reduction <add>, %82, %cst_40 [1] : vector<8x8xf32> to vector<8xf32>
    %84 = vector.shape_cast %83 : vector<8xf32> to vector<8x1xf32>
    %85 = tpu.reciprocal %84 {approx = true} : vector<8x1xf32> -> vector<8x1xf32>
    %86 = vector.broadcast %85 : vector<8x1xf32> to vector<8x8xf32>
    %87 = arith.mulf %82, %86 : vector<8x8xf32>
    %cst_41 = arith.constant dense<0.000000e+00> : vector<8x8xf32>
    %88 = tpu.matmul %87, %74, %cst_41 {dimension_numbers = #tpu.dot_dimension_numbers<[1], [0], [0], [1], [0, 0, 1, 1], [], []>} : vector<8x8xf32>, vector<8x8xf32>, vector<8x8xf32> -> vector<8x8xf32>
    %89 = tpu.concatenate %37, %54, %71, %88 in 1 : vector<8x8xf32>, vector<8x8xf32>, vector<8x8xf32>, vector<8x8xf32> -> vector<8x32xf32>
    %c0_42 = arith.constant 0 : index
    %c0_43 = arith.constant 0 : index
    %90 = vector.load %arg11[%c0_42, %c0_43] : memref<32x32xf32, #tpu.memory_space<vmem>>, vector<32x32xf32>
    %cst_44 = arith.constant dense<0.000000e+00> : vector<8x32xf32>
    %91 = tpu.matmul %89, %90, %cst_44 {dimension_numbers = #tpu.dot_dimension_numbers<[1], [0], [0], [1], [0, 0, 1, 1], [], []>} : vector<8x32xf32>, vector<32x32xf32>, vector<8x32xf32> -> vector<8x32xf32>
    %c0_45 = arith.constant 0 : index
    %c0_46 = arith.constant 0 : index
    %92 = vector.load %arg12[%c0_45, %c0_46] : memref<1x32xf32, #tpu.memory_space<vmem>>, vector<1x32xf32>
    %93 = vector.broadcast %92 : vector<1x32xf32> to vector<8x32xf32>
    %94 = arith.addf %91, %93 : vector<8x32xf32>
    %c0_47 = arith.constant 0 : index
    %c0_48 = arith.constant 0 : index
    %c0_49 = arith.constant 0 : index
    %95 = vector.load %arg4[%c0_47, %c0_48, %c0_49] : memref<1x8x32xf32, #tpu.memory_space<vmem>>, vector<1x8x32xf32>
    %96 = vector.shape_cast %95 : vector<1x8x32xf32> to vector<8x32xf32>
    %97 = arith.addf %96, %94 : vector<8x32xf32>
    %cst_50 = arith.constant dense<0.000000e+00> : vector<8xf32>
    %98 = vector.multi_reduction <add>, %97, %cst_50 [1] : vector<8x32xf32> to vector<8xf32>
    %99 = vector.shape_cast %98 : vector<8xf32> to vector<8x1xf32>
    %cst_51 = arith.constant 3.200000e+01 : f32
    %100 = vector.broadcast %cst_51 : f32 to vector<8x1xf32>
    %101 = arith.divf %99, %100 : vector<8x1xf32>
    %102 = vector.broadcast %101 : vector<8x1xf32> to vector<8x32xf32>
    %103 = arith.subf %97, %102 : vector<8x32xf32>
    %104 = arith.mulf %103, %103 : vector<8x32xf32>
    %cst_52 = arith.constant dense<0.000000e+00> : vector<8xf32>
    %105 = vector.multi_reduction <add>, %104, %cst_52 [1] : vector<8x32xf32> to vector<8xf32>
    %106 = vector.shape_cast %105 : vector<8xf32> to vector<8x1xf32>
    %cst_53 = arith.constant 3.200000e+01 : f32
    %107 = vector.broadcast %cst_53 : f32 to vector<8x1xf32>
    %108 = arith.divf %106, %107 : vector<8x1xf32>
    %109 = vector.broadcast %101 : vector<8x1xf32> to vector<8x32xf32>
    %110 = arith.subf %97, %109 : vector<8x32xf32>
    %cst_54 = arith.constant 9.99999974E-6 : f32
    %111 = vector.broadcast %cst_54 : f32 to vector<8x1xf32>
    %112 = arith.addf %108, %111 : vector<8x1xf32>
    %113 = math.rsqrt %112 : vector<8x1xf32>
    %114 = vector.broadcast %113 : vector<8x1xf32> to vector<8x32xf32>
    %115 = arith.mulf %110, %114 : vector<8x32xf32>
    %c0_55 = arith.constant 0 : index
    %c0_56 = arith.constant 0 : index
    %116 = vector.load %arg13[%c0_55, %c0_56] : memref<1x32xf32, #tpu.memory_space<vmem>>, vector<1x32xf32>
    %117 = vector.broadcast %116 : vector<1x32xf32> to vector<8x32xf32>
    %118 = arith.mulf %115, %117 : vector<8x32xf32>
    %c0_57 = arith.constant 0 : index
    %c0_58 = arith.constant 0 : index
    %119 = vector.load %arg14[%c0_57, %c0_58] : memref<1x32xf32, #tpu.memory_space<vmem>>, vector<1x32xf32>
    %120 = vector.broadcast %119 : vector<1x32xf32> to vector<8x32xf32>
    %121 = arith.addf %118, %120 : vector<8x32xf32>
    %c0_59 = arith.constant 0 : index
    %c0_60 = arith.constant 0 : index
    %c0_61 = arith.constant 0 : index
    %122 = vector.load %arg15[%c0_59, %c0_60, %c0_61] : memref<1x8x32xf32, #tpu.memory_space<vmem>>, vector<1x8x32xf32>
    %123 = vector.shape_cast %122 : vector<1x8x32xf32> to vector<8x32xf32>
    %124 = vector.shape_cast %121 : vector<8x32xf32> to vector<1x8x32xf32>
    tpu.vector_store %arg15[%c0_59, %c0_60, %c0_61], %124 {strides = array<i32>} : memref<1x8x32xf32, #tpu.memory_space<vmem>>, vector<1x8x32xf32>,
    return
  }
  func.func @transform_0(%arg0: i32) -> (i32, i32, i32) {
    %c0_i32 = arith.constant 0 : i32
    %c0_i32_0 = arith.constant 0 : i32
    %c0_i32_1 = arith.constant 0 : i32
    return %arg0, %c0_i32, %c0_i32_0 : i32, i32, i32
  }
  func.func @transform_1(%arg0: i32) -> (i32, i32, i32) {
    %c0_i32 = arith.constant 0 : i32
    %c0_i32_0 = arith.constant 0 : i32
    %c0_i32_1 = arith.constant 0 : i32
    return %arg0, %c0_i32, %c0_i32_0 : i32, i32, i32
  }
  func.func @transform_2(%arg0: i32) -> (i32, i32, i32) {
    %c0_i32 = arith.constant 0 : i32
    %c0_i32_0 = arith.constant 0 : i32
    %c0_i32_1 = arith.constant 0 : i32
    return %arg0, %c0_i32, %c0_i32_0 : i32, i32, i32
  }
  func.func @transform_3(%arg0: i32) -> (i32, i32, i32) {
    %c0_i32 = arith.constant 0 : i32
    %c0_i32_0 = arith.constant 0 : i32
    %c0_i32_1 = arith.constant 0 : i32
    return %arg0, %c0_i32, %c0_i32_0 : i32, i32, i32
  }
  func.func @transform_4(%arg0: i32) -> (i32, i32) {
    %c0_i32 = arith.constant 0 : i32
    %c0_i32_0 = arith.constant 0 : i32
    %c0_i32_1 = arith.constant 0 : i32
    return %c0_i32, %c0_i32_0 : i32, i32
  }
  func.func @transform_5(%arg0: i32) -> (i32, i32) {
    %c0_i32 = arith.constant 0 : i32
    %c0_i32_0 = arith.constant 0 : i32
    %c0_i32_1 = arith.constant 0 : i32
    return %c0_i32, %c0_i32_0 : i32, i32
  }
  func.func @transform_6(%arg0: i32) -> (i32, i32) {
    %c0_i32 = arith.constant 0 : i32
    %c0_i32_0 = arith.constant 0 : i32
    %c0_i32_1 = arith.constant 0 : i32
    return %c0_i32, %c0_i32_0 : i32, i32
  }
  func.func @transform_7(%arg0: i32) -> (i32, i32) {
    %c0_i32 = arith.constant 0 : i32
    %c0_i32_0 = arith.constant 0 : i32
    %c0_i32_1 = arith.constant 0 : i32
    return %c0_i32, %c0_i32_0 : i32, i32
  }
  func.func @transform_8(%arg0: i32) -> (i32, i32) {
    %c0_i32 = arith.constant 0 : i32
    %c0_i32_0 = arith.constant 0 : i32
    %c0_i32_1 = arith.constant 0 : i32
    return %c0_i32, %c0_i32_0 : i32, i32
  }
  func.func @transform_9(%arg0: i32) -> (i32, i32) {
    %c0_i32 = arith.constant 0 : i32
    %c0_i32_0 = arith.constant 0 : i32
    %c0_i32_1 = arith.constant 0 : i32
    return %c0_i32, %c0_i32_0 : i32, i32
  }
  func.func @transform_10(%arg0: i32) -> (i32, i32) {
    %c0_i32 = arith.constant 0 : i32
    %c0_i32_0 = arith.constant 0 : i32
    %c0_i32_1 = arith.constant 0 : i32
    return %c0_i32, %c0_i32_0 : i32, i32
  }
  func.func @transform_11(%arg0: i32) -> (i32, i32) {
    %c0_i32 = arith.constant 0 : i32
    %c0_i32_0 = arith.constant 0 : i32
    %c0_i32_1 = arith.constant 0 : i32
    return %c0_i32, %c0_i32_0 : i32, i32
  }
  func.func @transform_12(%arg0: i32) -> (i32, i32) {
    %c0_i32 = arith.constant 0 : i32
    %c0_i32_0 = arith.constant 0 : i32
    %c0_i32_1 = arith.constant 0 : i32
    return %c0_i32, %c0_i32_0 : i32, i32
  }
  func.func @transform_13(%arg0: i32) -> (i32, i32) {
    %c0_i32 = arith.constant 0 : i32
    %c0_i32_0 = arith.constant 0 : i32
    %c0_i32_1 = arith.constant 0 : i32
    return %c0_i32, %c0_i32_0 : i32, i32
  }
  func.func @transform_14(%arg0: i32) -> (i32, i32, i32) {
    %c0_i32 = arith.constant 0 : i32
    %c0_i32_0 = arith.constant 0 : i32
    %c0_i32_1 = arith.constant 0 : i32
    return %arg0, %c0_i32, %c0_i32_0 : i32, i32, i32
  }
}

module attributes {stable_mosaic.version = 11 : i64} {
  func.func @_mha_ln_kernel(%arg0: i32, %arg1: memref<1x8x32xf32, #tpu.memory_space<vmem>>, %arg2: memref<1x16x32xf32, #tpu.memory_space<vmem>>, %arg3: memref<1x16x32xf32, #tpu.memory_space<vmem>>, %arg4: memref<1x8x32xf32, #tpu.memory_space<vmem>>, %arg5: memref<1x1x16xf32, #tpu.memory_space<vmem>>, %arg6: memref<32x32xf32, #tpu.memory_space<vmem>>, %arg7: memref<1x32xf32, #tpu.memory_space<vmem>>, %arg8: memref<32x32xf32, #tpu.memory_space<vmem>>, %arg9: memref<1x32xf32, #tpu.memory_space<vmem>>, %arg10: memref<32x32xf32, #tpu.memory_space<vmem>>, %arg11: memref<1x32xf32, #tpu.memory_space<vmem>>, %arg12: memref<32x32xf32, #tpu.memory_space<vmem>>, %arg13: memref<1x32xf32, #tpu.memory_space<vmem>>, %arg14: memref<1x32xf32, #tpu.memory_space<vmem>>, %arg15: memref<1x32xf32, #tpu.memory_space<vmem>>, %arg16: memref<1x8x32xf32, #tpu.memory_space<vmem>>) attributes {dimension_semantics = [#tpu.dimension_semantics<parallel>], iteration_bounds = array<i64: 2>, scalar_prefetch = 0 : i64, scratch_operands = 0 : i64, tpu.core_type = #tpu.core_type<tc>, window_params = [{transform_indices = @transform_0, window_bounds = array<i64: 1, 8, 32>}, {transform_indices = @transform_1, window_bounds = array<i64: 1, 16, 32>}, {transform_indices = @transform_2, window_bounds = array<i64: 1, 16, 32>}, {transform_indices = @transform_3, window_bounds = array<i64: 1, 8, 32>}, {transform_indices = @transform_4, window_bounds = array<i64: 1, 1, 16>}, {pipeline_mode = #tpu.pipeline_mode<synchronous>, transform_indices = @transform_5, window_bounds = array<i64: 32, 32>}, {pipeline_mode = #tpu.pipeline_mode<synchronous>, transform_indices = @transform_6, window_bounds = array<i64: 1, 32>}, {pipeline_mode = #tpu.pipeline_mode<synchronous>, transform_indices = @transform_7, window_bounds = array<i64: 32, 32>}, {pipeline_mode = #tpu.pipeline_mode<synchronous>, transform_indices = @transform_8, window_bounds = array<i64: 1, 32>}, {pipeline_mode = #tpu.pipeline_mode<synchronous>, transform_indices = @transform_9, window_bounds = array<i64: 32, 32>}, {pipeline_mode = #tpu.pipeline_mode<synchronous>, transform_indices = @transform_10, window_bounds = array<i64: 1, 32>}, {pipeline_mode = #tpu.pipeline_mode<synchronous>, transform_indices = @transform_11, window_bounds = array<i64: 32, 32>}, {pipeline_mode = #tpu.pipeline_mode<synchronous>, transform_indices = @transform_12, window_bounds = array<i64: 1, 32>}, {pipeline_mode = #tpu.pipeline_mode<synchronous>, transform_indices = @transform_13, window_bounds = array<i64: 1, 32>}, {pipeline_mode = #tpu.pipeline_mode<synchronous>, transform_indices = @transform_14, window_bounds = array<i64: 1, 32>}, {transform_indices = @transform_15, window_bounds = array<i64: 1, 8, 32>}]} {
    %c0 = arith.constant 0 : index
    %c0_0 = arith.constant 0 : index
    %c0_1 = arith.constant 0 : index
    %0 = vector.load %arg1[%c0, %c0_0, %c0_1] : memref<1x8x32xf32, #tpu.memory_space<vmem>>, vector<1x8x32xf32>
    %1 = vector.shape_cast %0 : vector<1x8x32xf32> to vector<8x32xf32>
    %c0_2 = arith.constant 0 : index
    %c0_3 = arith.constant 0 : index
    %c0_4 = arith.constant 0 : index
    %2 = vector.load %arg2[%c0_2, %c0_3, %c0_4] : memref<1x16x32xf32, #tpu.memory_space<vmem>>, vector<1x16x32xf32>
    %3 = vector.shape_cast %2 : vector<1x16x32xf32> to vector<16x32xf32>
    %c0_5 = arith.constant 0 : index
    %c0_6 = arith.constant 0 : index
    %c0_7 = arith.constant 0 : index
    %4 = vector.load %arg3[%c0_5, %c0_6, %c0_7] : memref<1x16x32xf32, #tpu.memory_space<vmem>>, vector<1x16x32xf32>
    %5 = vector.shape_cast %4 : vector<1x16x32xf32> to vector<16x32xf32>
    %c0_8 = arith.constant 0 : index
    %c0_9 = arith.constant 0 : index
    %6 = vector.load %arg6[%c0_8, %c0_9] : memref<32x32xf32, #tpu.memory_space<vmem>>, vector<32x32xf32>
    %cst = arith.constant dense<0.000000e+00> : vector<8x32xf32>
    %7 = tpu.matmul %1, %6, %cst {dimension_numbers = #tpu.dot_dimension_numbers<[1], [0], [0], [1], [0, 0, 1, 1], [], []>} : vector<8x32xf32>, vector<32x32xf32>, vector<8x32xf32> -> vector<8x32xf32>
    %c0_10 = arith.constant 0 : index
    %c0_11 = arith.constant 0 : index
    %8 = vector.load %arg7[%c0_10, %c0_11] : memref<1x32xf32, #tpu.memory_space<vmem>>, vector<1x32xf32>
    %9 = vector.broadcast %8 : vector<1x32xf32> to vector<8x32xf32>
    %10 = arith.addf %7, %9 : vector<8x32xf32>
    %c0_12 = arith.constant 0 : index
    %c0_13 = arith.constant 0 : index
    %11 = vector.load %arg8[%c0_12, %c0_13] : memref<32x32xf32, #tpu.memory_space<vmem>>, vector<32x32xf32>
    %cst_14 = arith.constant dense<0.000000e+00> : vector<16x32xf32>
    %12 = tpu.matmul %3, %11, %cst_14 {dimension_numbers = #tpu.dot_dimension_numbers<[1], [0], [0], [1], [0, 0, 1, 1], [], []>} : vector<16x32xf32>, vector<32x32xf32>, vector<16x32xf32> -> vector<16x32xf32>
    %c0_15 = arith.constant 0 : index
    %c0_16 = arith.constant 0 : index
    %13 = vector.load %arg9[%c0_15, %c0_16] : memref<1x32xf32, #tpu.memory_space<vmem>>, vector<1x32xf32>
    %14 = vector.broadcast %13 : vector<1x32xf32> to vector<16x32xf32>
    %15 = arith.addf %12, %14 : vector<16x32xf32>
    %c0_17 = arith.constant 0 : index
    %c0_18 = arith.constant 0 : index
    %16 = vector.load %arg10[%c0_17, %c0_18] : memref<32x32xf32, #tpu.memory_space<vmem>>, vector<32x32xf32>
    %cst_19 = arith.constant dense<0.000000e+00> : vector<16x32xf32>
    %17 = tpu.matmul %5, %16, %cst_19 {dimension_numbers = #tpu.dot_dimension_numbers<[1], [0], [0], [1], [0, 0, 1, 1], [], []>} : vector<16x32xf32>, vector<32x32xf32>, vector<16x32xf32> -> vector<16x32xf32>
    %c0_20 = arith.constant 0 : index
    %c0_21 = arith.constant 0 : index
    %18 = vector.load %arg11[%c0_20, %c0_21] : memref<1x32xf32, #tpu.memory_space<vmem>>, vector<1x32xf32>
    %19 = vector.broadcast %18 : vector<1x32xf32> to vector<16x32xf32>
    %20 = arith.addf %17, %19 : vector<16x32xf32>
    %c0_22 = arith.constant 0 : index
    %c0_23 = arith.constant 0 : index
    %c0_24 = arith.constant 0 : index
    %21 = vector.load %arg5[%c0_22, %c0_23, %c0_24] : memref<1x1x16xf32, #tpu.memory_space<vmem>>, vector<1x1x16xf32>
    %22 = vector.shape_cast %21 : vector<1x1x16xf32> to vector<1x16xf32>
    %cst_25 = arith.constant 0.000000e+00 : f32
    %23 = vector.broadcast %cst_25 : f32 to vector<1x16xf32>
    %24 = arith.cmpf ogt, %22, %23 : vector<1x16xf32>
    %cst_26 = arith.constant -1.000000e+30 : f32
    %cst_27 = arith.constant 0.000000e+00 : f32
    %25 = vector.broadcast %cst_26 : f32 to vector<1x16xf32>
    %26 = vector.broadcast %cst_27 : f32 to vector<1x16xf32>
    %27 = arith.select %24, %25, %26 : vector<1x16xi1>, vector<1x16xf32>
    %28 = vector.extract_strided_slice %10 {offsets = [0, 0], sizes = [8, 8], strides = [1, 1]} : vector<8x32xf32> to vector<8x8xf32>
    %29 = vector.extract_strided_slice %15 {offsets = [0, 0], sizes = [16, 8], strides = [1, 1]} : vector<16x32xf32> to vector<16x8xf32>
    %30 = vector.extract_strided_slice %20 {offsets = [0, 0], sizes = [16, 8], strides = [1, 1]} : vector<16x32xf32> to vector<16x8xf32>
    %cst_28 = arith.constant dense<0.000000e+00> : vector<8x16xf32>
    %31 = tpu.matmul %28, %29, %cst_28 {dimension_numbers = #tpu.dot_dimension_numbers<[1], [1], [0], [0], [0, 0, 1, 0], [], []>} : vector<8x8xf32>, vector<16x8xf32>, vector<8x16xf32> -> vector<8x16xf32>
    %cst_29 = arith.constant 0.353553385 : f32
    %32 = vector.broadcast %cst_29 : f32 to vector<8x16xf32>
    %33 = arith.mulf %31, %32 : vector<8x16xf32>
    %34 = vector.broadcast %27 : vector<1x16xf32> to vector<8x16xf32>
    %35 = arith.addf %33, %34 : vector<8x16xf32>
    %cst_30 = arith.constant dense<0xFF800000> : vector<8xf32>
    %36 = vector.multi_reduction <maximumf>, %35, %cst_30 [1] : vector<8x16xf32> to vector<8xf32>
    %37 = vector.shape_cast %36 : vector<8xf32> to vector<8x1xf32>
    %38 = vector.broadcast %37 : vector<8x1xf32> to vector<8x16xf32>
    %39 = arith.subf %35, %38 : vector<8x16xf32>
    %40 = math.exp %39 : vector<8x16xf32>
    %cst_31 = arith.constant dense<0.000000e+00> : vector<8xf32>
    %41 = vector.multi_reduction <add>, %40, %cst_31 [1] : vector<8x16xf32> to vector<8xf32>
    %42 = vector.shape_cast %41 : vector<8xf32> to vector<8x1xf32>
    %43 = tpu.reciprocal %42 {approx = true} : vector<8x1xf32> -> vector<8x1xf32>
    %44 = vector.broadcast %43 : vector<8x1xf32> to vector<8x16xf32>
    %45 = arith.mulf %40, %44 : vector<8x16xf32>
    %cst_32 = arith.constant dense<0.000000e+00> : vector<8x8xf32>
    %46 = tpu.matmul %45, %30, %cst_32 {dimension_numbers = #tpu.dot_dimension_numbers<[1], [0], [0], [1], [0, 0, 1, 1], [], []>} : vector<8x16xf32>, vector<16x8xf32>, vector<8x8xf32> -> vector<8x8xf32>
    %47 = vector.extract_strided_slice %10 {offsets = [0, 8], sizes = [8, 8], strides = [1, 1]} : vector<8x32xf32> to vector<8x8xf32>
    %48 = vector.extract_strided_slice %15 {offsets = [0, 8], sizes = [16, 8], strides = [1, 1]} : vector<16x32xf32> to vector<16x8xf32>
    %49 = vector.extract_strided_slice %20 {offsets = [0, 8], sizes = [16, 8], strides = [1, 1]} : vector<16x32xf32> to vector<16x8xf32>
    %cst_33 = arith.constant dense<0.000000e+00> : vector<8x16xf32>
    %50 = tpu.matmul %47, %48, %cst_33 {dimension_numbers = #tpu.dot_dimension_numbers<[1], [1], [0], [0], [0, 0, 1, 0], [], []>} : vector<8x8xf32>, vector<16x8xf32>, vector<8x16xf32> -> vector<8x16xf32>
    %cst_34 = arith.constant 0.353553385 : f32
    %51 = vector.broadcast %cst_34 : f32 to vector<8x16xf32>
    %52 = arith.mulf %50, %51 : vector<8x16xf32>
    %53 = vector.broadcast %27 : vector<1x16xf32> to vector<8x16xf32>
    %54 = arith.addf %52, %53 : vector<8x16xf32>
    %cst_35 = arith.constant dense<0xFF800000> : vector<8xf32>
    %55 = vector.multi_reduction <maximumf>, %54, %cst_35 [1] : vector<8x16xf32> to vector<8xf32>
    %56 = vector.shape_cast %55 : vector<8xf32> to vector<8x1xf32>
    %57 = vector.broadcast %56 : vector<8x1xf32> to vector<8x16xf32>
    %58 = arith.subf %54, %57 : vector<8x16xf32>
    %59 = math.exp %58 : vector<8x16xf32>
    %cst_36 = arith.constant dense<0.000000e+00> : vector<8xf32>
    %60 = vector.multi_reduction <add>, %59, %cst_36 [1] : vector<8x16xf32> to vector<8xf32>
    %61 = vector.shape_cast %60 : vector<8xf32> to vector<8x1xf32>
    %62 = tpu.reciprocal %61 {approx = true} : vector<8x1xf32> -> vector<8x1xf32>
    %63 = vector.broadcast %62 : vector<8x1xf32> to vector<8x16xf32>
    %64 = arith.mulf %59, %63 : vector<8x16xf32>
    %cst_37 = arith.constant dense<0.000000e+00> : vector<8x8xf32>
    %65 = tpu.matmul %64, %49, %cst_37 {dimension_numbers = #tpu.dot_dimension_numbers<[1], [0], [0], [1], [0, 0, 1, 1], [], []>} : vector<8x16xf32>, vector<16x8xf32>, vector<8x8xf32> -> vector<8x8xf32>
    %66 = vector.extract_strided_slice %10 {offsets = [0, 16], sizes = [8, 8], strides = [1, 1]} : vector<8x32xf32> to vector<8x8xf32>
    %67 = vector.extract_strided_slice %15 {offsets = [0, 16], sizes = [16, 8], strides = [1, 1]} : vector<16x32xf32> to vector<16x8xf32>
    %68 = vector.extract_strided_slice %20 {offsets = [0, 16], sizes = [16, 8], strides = [1, 1]} : vector<16x32xf32> to vector<16x8xf32>
    %cst_38 = arith.constant dense<0.000000e+00> : vector<8x16xf32>
    %69 = tpu.matmul %66, %67, %cst_38 {dimension_numbers = #tpu.dot_dimension_numbers<[1], [1], [0], [0], [0, 0, 1, 0], [], []>} : vector<8x8xf32>, vector<16x8xf32>, vector<8x16xf32> -> vector<8x16xf32>
    %cst_39 = arith.constant 0.353553385 : f32
    %70 = vector.broadcast %cst_39 : f32 to vector<8x16xf32>
    %71 = arith.mulf %69, %70 : vector<8x16xf32>
    %72 = vector.broadcast %27 : vector<1x16xf32> to vector<8x16xf32>
    %73 = arith.addf %71, %72 : vector<8x16xf32>
    %cst_40 = arith.constant dense<0xFF800000> : vector<8xf32>
    %74 = vector.multi_reduction <maximumf>, %73, %cst_40 [1] : vector<8x16xf32> to vector<8xf32>
    %75 = vector.shape_cast %74 : vector<8xf32> to vector<8x1xf32>
    %76 = vector.broadcast %75 : vector<8x1xf32> to vector<8x16xf32>
    %77 = arith.subf %73, %76 : vector<8x16xf32>
    %78 = math.exp %77 : vector<8x16xf32>
    %cst_41 = arith.constant dense<0.000000e+00> : vector<8xf32>
    %79 = vector.multi_reduction <add>, %78, %cst_41 [1] : vector<8x16xf32> to vector<8xf32>
    %80 = vector.shape_cast %79 : vector<8xf32> to vector<8x1xf32>
    %81 = tpu.reciprocal %80 {approx = true} : vector<8x1xf32> -> vector<8x1xf32>
    %82 = vector.broadcast %81 : vector<8x1xf32> to vector<8x16xf32>
    %83 = arith.mulf %78, %82 : vector<8x16xf32>
    %cst_42 = arith.constant dense<0.000000e+00> : vector<8x8xf32>
    %84 = tpu.matmul %83, %68, %cst_42 {dimension_numbers = #tpu.dot_dimension_numbers<[1], [0], [0], [1], [0, 0, 1, 1], [], []>} : vector<8x16xf32>, vector<16x8xf32>, vector<8x8xf32> -> vector<8x8xf32>
    %85 = vector.extract_strided_slice %10 {offsets = [0, 24], sizes = [8, 8], strides = [1, 1]} : vector<8x32xf32> to vector<8x8xf32>
    %86 = vector.extract_strided_slice %15 {offsets = [0, 24], sizes = [16, 8], strides = [1, 1]} : vector<16x32xf32> to vector<16x8xf32>
    %87 = vector.extract_strided_slice %20 {offsets = [0, 24], sizes = [16, 8], strides = [1, 1]} : vector<16x32xf32> to vector<16x8xf32>
    %cst_43 = arith.constant dense<0.000000e+00> : vector<8x16xf32>
    %88 = tpu.matmul %85, %86, %cst_43 {dimension_numbers = #tpu.dot_dimension_numbers<[1], [1], [0], [0], [0, 0, 1, 0], [], []>} : vector<8x8xf32>, vector<16x8xf32>, vector<8x16xf32> -> vector<8x16xf32>
    %cst_44 = arith.constant 0.353553385 : f32
    %89 = vector.broadcast %cst_44 : f32 to vector<8x16xf32>
    %90 = arith.mulf %88, %89 : vector<8x16xf32>
    %91 = vector.broadcast %27 : vector<1x16xf32> to vector<8x16xf32>
    %92 = arith.addf %90, %91 : vector<8x16xf32>
    %cst_45 = arith.constant dense<0xFF800000> : vector<8xf32>
    %93 = vector.multi_reduction <maximumf>, %92, %cst_45 [1] : vector<8x16xf32> to vector<8xf32>
    %94 = vector.shape_cast %93 : vector<8xf32> to vector<8x1xf32>
    %95 = vector.broadcast %94 : vector<8x1xf32> to vector<8x16xf32>
    %96 = arith.subf %92, %95 : vector<8x16xf32>
    %97 = math.exp %96 : vector<8x16xf32>
    %cst_46 = arith.constant dense<0.000000e+00> : vector<8xf32>
    %98 = vector.multi_reduction <add>, %97, %cst_46 [1] : vector<8x16xf32> to vector<8xf32>
    %99 = vector.shape_cast %98 : vector<8xf32> to vector<8x1xf32>
    %100 = tpu.reciprocal %99 {approx = true} : vector<8x1xf32> -> vector<8x1xf32>
    %101 = vector.broadcast %100 : vector<8x1xf32> to vector<8x16xf32>
    %102 = arith.mulf %97, %101 : vector<8x16xf32>
    %cst_47 = arith.constant dense<0.000000e+00> : vector<8x8xf32>
    %103 = tpu.matmul %102, %87, %cst_47 {dimension_numbers = #tpu.dot_dimension_numbers<[1], [0], [0], [1], [0, 0, 1, 1], [], []>} : vector<8x16xf32>, vector<16x8xf32>, vector<8x8xf32> -> vector<8x8xf32>
    %104 = tpu.concatenate %46, %65, %84, %103 in 1 : vector<8x8xf32>, vector<8x8xf32>, vector<8x8xf32>, vector<8x8xf32> -> vector<8x32xf32>
    %c0_48 = arith.constant 0 : index
    %c0_49 = arith.constant 0 : index
    %105 = vector.load %arg12[%c0_48, %c0_49] : memref<32x32xf32, #tpu.memory_space<vmem>>, vector<32x32xf32>
    %cst_50 = arith.constant dense<0.000000e+00> : vector<8x32xf32>
    %106 = tpu.matmul %104, %105, %cst_50 {dimension_numbers = #tpu.dot_dimension_numbers<[1], [0], [0], [1], [0, 0, 1, 1], [], []>} : vector<8x32xf32>, vector<32x32xf32>, vector<8x32xf32> -> vector<8x32xf32>
    %c0_51 = arith.constant 0 : index
    %c0_52 = arith.constant 0 : index
    %107 = vector.load %arg13[%c0_51, %c0_52] : memref<1x32xf32, #tpu.memory_space<vmem>>, vector<1x32xf32>
    %108 = vector.broadcast %107 : vector<1x32xf32> to vector<8x32xf32>
    %109 = arith.addf %106, %108 : vector<8x32xf32>
    %c0_53 = arith.constant 0 : index
    %c0_54 = arith.constant 0 : index
    %c0_55 = arith.constant 0 : index
    %110 = vector.load %arg4[%c0_53, %c0_54, %c0_55] : memref<1x8x32xf32, #tpu.memory_space<vmem>>, vector<1x8x32xf32>
    %111 = vector.shape_cast %110 : vector<1x8x32xf32> to vector<8x32xf32>
    %112 = arith.addf %111, %109 : vector<8x32xf32>
    %cst_56 = arith.constant dense<0.000000e+00> : vector<8xf32>
    %113 = vector.multi_reduction <add>, %112, %cst_56 [1] : vector<8x32xf32> to vector<8xf32>
    %114 = vector.shape_cast %113 : vector<8xf32> to vector<8x1xf32>
    %cst_57 = arith.constant 3.200000e+01 : f32
    %115 = vector.broadcast %cst_57 : f32 to vector<8x1xf32>
    %116 = arith.divf %114, %115 : vector<8x1xf32>
    %117 = vector.broadcast %116 : vector<8x1xf32> to vector<8x32xf32>
    %118 = arith.subf %112, %117 : vector<8x32xf32>
    %119 = arith.mulf %118, %118 : vector<8x32xf32>
    %cst_58 = arith.constant dense<0.000000e+00> : vector<8xf32>
    %120 = vector.multi_reduction <add>, %119, %cst_58 [1] : vector<8x32xf32> to vector<8xf32>
    %121 = vector.shape_cast %120 : vector<8xf32> to vector<8x1xf32>
    %cst_59 = arith.constant 3.200000e+01 : f32
    %122 = vector.broadcast %cst_59 : f32 to vector<8x1xf32>
    %123 = arith.divf %121, %122 : vector<8x1xf32>
    %124 = vector.broadcast %116 : vector<8x1xf32> to vector<8x32xf32>
    %125 = arith.subf %112, %124 : vector<8x32xf32>
    %cst_60 = arith.constant 9.99999974E-6 : f32
    %126 = vector.broadcast %cst_60 : f32 to vector<8x1xf32>
    %127 = arith.addf %123, %126 : vector<8x1xf32>
    %128 = math.rsqrt %127 : vector<8x1xf32>
    %129 = vector.broadcast %128 : vector<8x1xf32> to vector<8x32xf32>
    %130 = arith.mulf %125, %129 : vector<8x32xf32>
    %c0_61 = arith.constant 0 : index
    %c0_62 = arith.constant 0 : index
    %131 = vector.load %arg14[%c0_61, %c0_62] : memref<1x32xf32, #tpu.memory_space<vmem>>, vector<1x32xf32>
    %132 = vector.broadcast %131 : vector<1x32xf32> to vector<8x32xf32>
    %133 = arith.mulf %130, %132 : vector<8x32xf32>
    %c0_63 = arith.constant 0 : index
    %c0_64 = arith.constant 0 : index
    %134 = vector.load %arg15[%c0_63, %c0_64] : memref<1x32xf32, #tpu.memory_space<vmem>>, vector<1x32xf32>
    %135 = vector.broadcast %134 : vector<1x32xf32> to vector<8x32xf32>
    %136 = arith.addf %133, %135 : vector<8x32xf32>
    %c0_65 = arith.constant 0 : index
    %c0_66 = arith.constant 0 : index
    %c0_67 = arith.constant 0 : index
    %137 = vector.load %arg16[%c0_65, %c0_66, %c0_67] : memref<1x8x32xf32, #tpu.memory_space<vmem>>, vector<1x8x32xf32>
    %138 = vector.shape_cast %137 : vector<1x8x32xf32> to vector<8x32xf32>
    %139 = vector.shape_cast %136 : vector<8x32xf32> to vector<1x8x32xf32>
    tpu.vector_store %arg16[%c0_65, %c0_66, %c0_67], %139 {strides = array<i32>} : memref<1x8x32xf32, #tpu.memory_space<vmem>>, vector<1x8x32xf32>,
    return
  }
  func.func @transform_0(%arg0: i32) -> (i32, i32, i32) {
    %c0_i32 = arith.constant 0 : i32
    %c0_i32_0 = arith.constant 0 : i32
    %c0_i32_1 = arith.constant 0 : i32
    return %arg0, %c0_i32, %c0_i32_0 : i32, i32, i32
  }
  func.func @transform_1(%arg0: i32) -> (i32, i32, i32) {
    %c0_i32 = arith.constant 0 : i32
    %c0_i32_0 = arith.constant 0 : i32
    %c0_i32_1 = arith.constant 0 : i32
    return %arg0, %c0_i32, %c0_i32_0 : i32, i32, i32
  }
  func.func @transform_2(%arg0: i32) -> (i32, i32, i32) {
    %c0_i32 = arith.constant 0 : i32
    %c0_i32_0 = arith.constant 0 : i32
    %c0_i32_1 = arith.constant 0 : i32
    return %arg0, %c0_i32, %c0_i32_0 : i32, i32, i32
  }
  func.func @transform_3(%arg0: i32) -> (i32, i32, i32) {
    %c0_i32 = arith.constant 0 : i32
    %c0_i32_0 = arith.constant 0 : i32
    %c0_i32_1 = arith.constant 0 : i32
    return %arg0, %c0_i32, %c0_i32_0 : i32, i32, i32
  }
  func.func @transform_4(%arg0: i32) -> (i32, i32, i32) {
    %c0_i32 = arith.constant 0 : i32
    %c0_i32_0 = arith.constant 0 : i32
    %c0_i32_1 = arith.constant 0 : i32
    return %arg0, %c0_i32, %c0_i32_0 : i32, i32, i32
  }
  func.func @transform_5(%arg0: i32) -> (i32, i32) {
    %c0_i32 = arith.constant 0 : i32
    %c0_i32_0 = arith.constant 0 : i32
    %c0_i32_1 = arith.constant 0 : i32
    return %c0_i32, %c0_i32_0 : i32, i32
  }
  func.func @transform_6(%arg0: i32) -> (i32, i32) {
    %c0_i32 = arith.constant 0 : i32
    %c0_i32_0 = arith.constant 0 : i32
    %c0_i32_1 = arith.constant 0 : i32
    return %c0_i32, %c0_i32_0 : i32, i32
  }
  func.func @transform_7(%arg0: i32) -> (i32, i32) {
    %c0_i32 = arith.constant 0 : i32
    %c0_i32_0 = arith.constant 0 : i32
    %c0_i32_1 = arith.constant 0 : i32
    return %c0_i32, %c0_i32_0 : i32, i32
  }
  func.func @transform_8(%arg0: i32) -> (i32, i32) {
    %c0_i32 = arith.constant 0 : i32
    %c0_i32_0 = arith.constant 0 : i32
    %c0_i32_1 = arith.constant 0 : i32
    return %c0_i32, %c0_i32_0 : i32, i32
  }
  func.func @transform_9(%arg0: i32) -> (i32, i32) {
    %c0_i32 = arith.constant 0 : i32
    %c0_i32_0 = arith.constant 0 : i32
    %c0_i32_1 = arith.constant 0 : i32
    return %c0_i32, %c0_i32_0 : i32, i32
  }
  func.func @transform_10(%arg0: i32) -> (i32, i32) {
    %c0_i32 = arith.constant 0 : i32
    %c0_i32_0 = arith.constant 0 : i32
    %c0_i32_1 = arith.constant 0 : i32
    return %c0_i32, %c0_i32_0 : i32, i32
  }
  func.func @transform_11(%arg0: i32) -> (i32, i32) {
    %c0_i32 = arith.constant 0 : i32
    %c0_i32_0 = arith.constant 0 : i32
    %c0_i32_1 = arith.constant 0 : i32
    return %c0_i32, %c0_i32_0 : i32, i32
  }
  func.func @transform_12(%arg0: i32) -> (i32, i32) {
    %c0_i32 = arith.constant 0 : i32
    %c0_i32_0 = arith.constant 0 : i32
    %c0_i32_1 = arith.constant 0 : i32
    return %c0_i32, %c0_i32_0 : i32, i32
  }
  func.func @transform_13(%arg0: i32) -> (i32, i32) {
    %c0_i32 = arith.constant 0 : i32
    %c0_i32_0 = arith.constant 0 : i32
    %c0_i32_1 = arith.constant 0 : i32
    return %c0_i32, %c0_i32_0 : i32, i32
  }
  func.func @transform_14(%arg0: i32) -> (i32, i32) {
    %c0_i32 = arith.constant 0 : i32
    %c0_i32_0 = arith.constant 0 : i32
    %c0_i32_1 = arith.constant 0 : i32
    return %c0_i32, %c0_i32_0 : i32, i32
  }
  func.func @transform_15(%arg0: i32) -> (i32, i32, i32) {
    %c0_i32 = arith.constant 0 : i32
    %c0_i32_0 = arith.constant 0 : i32
    %c0_i32_1 = arith.constant 0 : i32
    return %arg0, %c0_i32, %c0_i32_0 : i32, i32, i32
  }
}

module attributes {stable_mosaic.version = 11 : i64} {
  func.func @_layernorm_kernel(%arg0: i32, %arg1: memref<16x32xf32, #tpu.memory_space<vmem>>, %arg2: memref<1x32xf32, #tpu.memory_space<vmem>>, %arg3: memref<1x32xf32, #tpu.memory_space<vmem>>, %arg4: memref<16x32xf32, #tpu.memory_space<vmem>>) attributes {dimension_semantics = [#tpu.dimension_semantics<parallel>], iteration_bounds = array<i64: 1>, scalar_prefetch = 0 : i64, scratch_operands = 0 : i64, tpu.core_type = #tpu.core_type<tc>, window_params = [{transform_indices = @transform_0, window_bounds = array<i64: 16, 32>}, {pipeline_mode = #tpu.pipeline_mode<synchronous>, transform_indices = @transform_1, window_bounds = array<i64: 1, 32>}, {pipeline_mode = #tpu.pipeline_mode<synchronous>, transform_indices = @transform_2, window_bounds = array<i64: 1, 32>}, {transform_indices = @transform_3, window_bounds = array<i64: 16, 32>}]} {
    %c0 = arith.constant 0 : index
    %c0_0 = arith.constant 0 : index
    %0 = vector.load %arg1[%c0, %c0_0] : memref<16x32xf32, #tpu.memory_space<vmem>>, vector<16x32xf32>
    %cst = arith.constant dense<0.000000e+00> : vector<16xf32>
    %1 = vector.multi_reduction <add>, %0, %cst [1] : vector<16x32xf32> to vector<16xf32>
    %2 = vector.shape_cast %1 : vector<16xf32> to vector<16x1xf32>
    %cst_1 = arith.constant 3.200000e+01 : f32
    %3 = vector.broadcast %cst_1 : f32 to vector<16x1xf32>
    %4 = arith.divf %2, %3 : vector<16x1xf32>
    %5 = vector.broadcast %4 : vector<16x1xf32> to vector<16x32xf32>
    %6 = arith.subf %0, %5 : vector<16x32xf32>
    %7 = arith.mulf %6, %6 : vector<16x32xf32>
    %cst_2 = arith.constant dense<0.000000e+00> : vector<16xf32>
    %8 = vector.multi_reduction <add>, %7, %cst_2 [1] : vector<16x32xf32> to vector<16xf32>
    %9 = vector.shape_cast %8 : vector<16xf32> to vector<16x1xf32>
    %cst_3 = arith.constant 3.200000e+01 : f32
    %10 = vector.broadcast %cst_3 : f32 to vector<16x1xf32>
    %11 = arith.divf %9, %10 : vector<16x1xf32>
    %12 = vector.broadcast %4 : vector<16x1xf32> to vector<16x32xf32>
    %13 = arith.subf %0, %12 : vector<16x32xf32>
    %cst_4 = arith.constant 9.99999974E-6 : f32
    %14 = vector.broadcast %cst_4 : f32 to vector<16x1xf32>
    %15 = arith.addf %11, %14 : vector<16x1xf32>
    %16 = math.rsqrt %15 : vector<16x1xf32>
    %17 = vector.broadcast %16 : vector<16x1xf32> to vector<16x32xf32>
    %18 = arith.mulf %13, %17 : vector<16x32xf32>
    %c0_5 = arith.constant 0 : index
    %c0_6 = arith.constant 0 : index
    %19 = vector.load %arg2[%c0_5, %c0_6] : memref<1x32xf32, #tpu.memory_space<vmem>>, vector<1x32xf32>
    %20 = vector.broadcast %19 : vector<1x32xf32> to vector<16x32xf32>
    %21 = arith.mulf %18, %20 : vector<16x32xf32>
    %c0_7 = arith.constant 0 : index
    %c0_8 = arith.constant 0 : index
    %22 = vector.load %arg3[%c0_7, %c0_8] : memref<1x32xf32, #tpu.memory_space<vmem>>, vector<1x32xf32>
    %23 = vector.broadcast %22 : vector<1x32xf32> to vector<16x32xf32>
    %24 = arith.addf %21, %23 : vector<16x32xf32>
    %c0_9 = arith.constant 0 : index
    %c0_10 = arith.constant 0 : index
    %25 = vector.load %arg4[%c0_9, %c0_10] : memref<16x32xf32, #tpu.memory_space<vmem>>, vector<16x32xf32>
    tpu.vector_store %arg4[%c0_9, %c0_10], %24 {strides = array<i32>} : memref<16x32xf32, #tpu.memory_space<vmem>>, vector<16x32xf32>,
    return
  }
  func.func @transform_0(%arg0: i32) -> (i32, i32) {
    %c0_i32 = arith.constant 0 : i32
    %c0_i32_0 = arith.constant 0 : i32
    return %arg0, %c0_i32 : i32, i32
  }
  func.func @transform_1(%arg0: i32) -> (i32, i32) {
    %c0_i32 = arith.constant 0 : i32
    %c0_i32_0 = arith.constant 0 : i32
    %c0_i32_1 = arith.constant 0 : i32
    return %c0_i32, %c0_i32_0 : i32, i32
  }
  func.func @transform_2(%arg0: i32) -> (i32, i32) {
    %c0_i32 = arith.constant 0 : i32
    %c0_i32_0 = arith.constant 0 : i32
    %c0_i32_1 = arith.constant 0 : i32
    return %c0_i32, %c0_i32_0 : i32, i32
  }
  func.func @transform_3(%arg0: i32) -> (i32, i32) {
    %c0_i32 = arith.constant 0 : i32
    %c0_i32_0 = arith.constant 0 : i32
    return %arg0, %c0_i32 : i32, i32
  }
}

</mosaic_0001>

<bundles_post_ra>
// kernel: transformer_forward.14
= control target key start
LH: loop header
LB: loop body
LE: loop exit
PB: predicated region body
PF: predicated region fallthrough
CT: control target
= control target key end

     0   :  { %vm38_vm0 = vcmask 261120   ;;  %vm96_vm1 = vcmask 523264   ;;  %v296_v46 = vmov 32.0   ;;  %s445_s1 = inlined_call_operand.vmem [shape: f32[32,64], index: 1, kind: input, shape index: {}]   ;;  %s446_s3 = inlined_call_operand.vmem [shape: f32[64,32], index: 3, kind: input, shape index: {}]   ;;  %s447_s0 = inlined_call_operand.vmem [shape: f32[32,32], index: 0, kind: input, shape index: {}]   ;;  %s448_s2 = inlined_call_operand.vmem [shape: f32[1,64], index: 2, kind: input, shape index: {}]   ;;  %s449_s4 = inlined_call_operand.vmem [shape: f32[1,32], index: 4, kind: input, shape index: {}]   ;;  %s450_s5 = inlined_call_operand.vmem [shape: f32[1,32], index: 5, kind: input, shape index: {}]   ;;  %s451_s6 = inlined_call_operand.vmem [shape: f32[1,32], index: 6, kind: input, shape index: {}]   ;;  %s452_s7 = inlined_call_operand.vmem [shape: f32[32,32], index: 7, kind: output, shape index: {}]  }
   0x1   :  { %v33_v0 = vld [vmem:[%s445_s1 + $0x18] sm:$0xff]  ;;  %v32_v1 = vld [vmem:[%s445_s1 + $0x10] sm:$0xff]  ;;  %v31_v2 = vld [vmem:[%s445_s1 + $0x8] sm:$0xff]  ;;  %286 = vrcp.f32 %v296_v46 }
   0x2   :  { %63 = vmatpush.msra.mxu0 %v33_v0  ;;  %269 = vmatpush.msra.mxu3 %v33_v0  ;;  %v91_v3 = vld [vmem:[%s446_s3 + $0x38] sm:$0xff]  ;;  %v90_v4 = vld [vmem:[%s446_s3 + $0x30] sm:$0xff]  ;;  %v30_v5 = vld [vmem:[%s445_s1] sm:$0xff] }
   0x3   :  { %117 = vmatpush.msra.mxu1 %v91_v3  ;;  %273 = vmatpush.msra.mxu2 %v91_v3  ;;  %v26_v6 = vld [vmem:[%s447_s0] sm:$0xff]  ;;  %v27_v7 = vld [vmem:[%s447_s0 + $0x8] sm:$0xff]  ;;  %v87_v10 = vld [vmem:[%s446_s3 + $0x18] sm:$0xff] }
   0x4   :  { %64 = vmatpush.msra.mxu0 %v32_v1  ;;  %270 = vmatpush.msra.mxu3 %v32_v1  ;;  %v89_v8 = vld [vmem:[%s446_s3 + $0x28] sm:$0xff]  ;;  %v88_v9 = vld [vmem:[%s446_s3 + $0x20] sm:$0xff]  ;;  %v28_v11 = vld [vmem:[%s447_s0 + $0x10] sm:$0xff] }
   0x5   :  { %118 = vmatpush.msra.mxu1 %v90_v4  ;;  %274 = vmatpush.msra.mxu2 %v90_v4  ;;  %v29_v12 = vld [vmem:[%s447_s0 + $0x18] sm:$0xff]  ;;  %v86_v13 = vld [vmem:[%s446_s3 + $0x10] sm:$0xff]  ;;  %v85_v14 = vld [vmem:[%s446_s3 + $0x8] sm:$0xff] }
   0x6   :  { %65 = vmatpush.msra.mxu0 %v31_v2  ;;  %271 = vmatpush.msra.mxu3 %v31_v2  ;;  %v84_v15 = vld [vmem:[%s446_s3] sm:$0xff] }
   0x7   :  { %119 = vmatpush.msra.mxu1 %v89_v8  ;;  %275 = vmatpush.msra.mxu2 %v89_v8  ;;  %v282_v16 = vld [vmem:[%s448_s2] ss:$0 sm:$0xff]  ;;  %v287_v47 = vpop.eup %286 }
   0x8   :  { %66 = vmatpush.msra.mxu0 %v30_v5  ;;  %272 = vmatpush.msra.mxu3 %v30_v5  ;;  %v283_v29 = vld [vmem:[%s449_s4] ss:$0 sm:$0xff]  ;;  %v155_v48 = vmul.f32 32.0, %v287_v47  ;;  %vm159_vm2 = vweird.f32 %v287_v47 }
   0x9   :  { %261 = vmatmul.msk.f32.vlgmr.msra.gmra.mxu0 %vm38_vm0, %v26_v6  ;;  %262 = vmatmul.msk.f32.vlgmr.msra.gmra.mxu3 %vm38_vm0, %v27_v7 }
   0xa   :  { %120 = vmatpush.msra.mxu1 %v88_v9  ;;  %276 = vmatpush.msra.mxu2 %v88_v9  ;;  %v156_v49 = vsub.f32 1.0, %v155_v48 }
   0xc   :  { %121 = vmatpush.msra.mxu1 %v87_v10  ;;  %277 = vmatpush.msra.mxu2 %v87_v10  ;;  %v157_v50 = vmul.f32 %v287_v47, %v156_v49 }
   0xe   :  { %122 = vmatpush.msra.mxu1 %v86_v13  ;;  %278 = vmatpush.msra.mxu2 %v86_v13  ;;  %v158_v51 = vadd.f32 %v287_v47, %v157_v50 }
  0x10   :  { %123 = vmatpush.msra.mxu1 %v85_v14  ;;  %279 = vmatpush.msra.mxu2 %v85_v14  ;;  %v399_v52 = vsel %vm159_vm2, %v287_v47, %v158_v51 }
  0x11   :  { %263 = vmatmul.msk.f32.gmra.mxu3 %vm38_vm0, %v28_v11 }
  0x12   :  { %124 = vmatpush.msra.mxu1 %v84_v15  ;;  %280 = vmatpush.msra.mxu2 %v84_v15 }
  0x19   :  { %264 = vmatmul.msk.f32.gmra.mxu3 %vm38_vm0, %v29_v12 }
  0x86   :  { %v68_v17 = vpop.f32.mrf.mxu0 }
  0x87   :  { %v69_v18 = vadd.f32 %v282_v16, %v68_v17 }
  0x89   :  { %v80_v19 = vmax.f32 %v69_v18, 0.0 }
  0x8b   :  { %265 = vmatmul.msk.f32.vlgmr.msra.gmra.mxu1 %vm96_vm1, %v80_v19 }
  0x8c   :  { %v71_v20 = vpop.f32.mrf.mxu3 }
  0x8d   :  { %v72_v21 = vadd.f32 %v282_v16, %v71_v20 }
  0x8f   :  { %v81_v22 = vmax.f32 %v72_v21, 0.0 }
  0x93   :  { %266 = vmatmul.msk.f32.gmra.mxu1 %vm96_vm1, %v81_v22 }
  0x94   :  { %v74_v23 = vpop.f32.mrf.mxu3 }
  0x95   :  { %v75_v24 = vadd.f32 %v282_v16, %v74_v23 }
  0x97   :  { %v82_v25 = vmax.f32 %v75_v24, 0.0  ;;  %v284_v24 = vld [vmem:[%s450_s5] ss:$0 sm:$0xff] }
  0x99   :  { %267 = vmatmul.msk.f32.vlgmr.msra.gmra.mxu2 %vm96_vm1, %v82_v25 }
  0x9c   :  { %v77_v26 = vpop.f32.mrf.mxu3 }
  0x9d   :  { %v78_v27 = vadd.f32 %v282_v16, %v77_v26 }
  0x9f   :  { %v83_v28 = vmax.f32 %v78_v27, 0.0 }
  0xa1   :  { %268 = vmatmul.msk.f32.gmra.mxu2 %vm96_vm1, %v83_v28  ;;  %v285_v28 = vld [vmem:[%s451_s6] ss:$0 sm:$0xff] }
 0x108   :  { %v126_v30 = vpop.f32.mrf.mxu1 }
 0x109   :  { %v127_v31 = vadd.f32 %v283_v29, %v126_v30 }
 0x10b   :  { %v138_v32 = vadd.f32 %v127_v31, %v26_v6 }
 0x10d   :  { %v142_v33 = vsel %vm38_vm0, %v138_v32, 0.0 }
 0x10e   :  { %143 = vadd.xlane.f32.xlu0 %v142_v33 }
 0x110   :  { %v129_v34 = vpop.f32.mrf.mxu1 }
 0x111   :  { %v130_v35 = vadd.f32 %v283_v29, %v129_v34 }
 0x113   :  { %v139_v36 = vadd.f32 %v130_v35, %v27_v7 }
 0x115   :  { %v145_v37 = vsel %vm38_vm0, %v139_v36, 0.0 }
 0x116   :  { %146 = vadd.xlane.f32.xlu0 %v145_v37 }
 0x11c   :  { %v132_v38 = vpop.f32.mrf.mxu2 }
 0x11d   :  { %v133_v39 = vadd.f32 %v283_v29, %v132_v38 }
 0x11f   :  { %v140_v40 = vadd.f32 %v133_v39, %v28_v11 }
 0x121   :  { %v148_v41 = vsel %vm38_vm0, %v140_v40, 0.0 }
 0x122   :  { %149 = vadd.xlane.f32.xlu1 %v148_v41 }
 0x124   :  { %v135_v42 = vpop.f32.mrf.mxu2 }
 0x125   :  { %v136_v43 = vadd.f32 %v283_v29, %v135_v42 }
 0x127   :  { %v141_v44 = vadd.f32 %v136_v43, %v29_v12 }
 0x129   :  { %v151_v45 = vsel %vm38_vm0, %v141_v44, 0.0 }
 0x12a   :  { %152 = vadd.xlane.f32.xlu1 %v151_v45 }
 0x181   :  { %v144_v53 = vpop.xlane.xlu0 %143 }
 0x182   :  { %v161_v54 = vmul.f32 %v399_v52, %v144_v53 }
 0x184   :  { %v165_v55 = vsub.f32 %v138_v32, %v161_v54 }
 0x186   :  { %v169_v56 = vmul.f32 %v165_v55, %v165_v55 }
 0x188   :  { %v173_v57 = vsel %vm38_vm0, %v169_v56, 0.0 }
 0x189   :  { %174 = vadd.xlane.f32.xlu2 %v173_v57  ;;  %v147_v58 = vpop.xlane.xlu0 %146 }
 0x18a   :  { %v162_v59 = vmul.f32 %v399_v52, %v147_v58 }
 0x18c   :  { %v166_v60 = vsub.f32 %v139_v36, %v162_v59 }
 0x18e   :  { %v170_v61 = vmul.f32 %v166_v60, %v166_v60 }
 0x190   :  { %v176_v62 = vsel %vm38_vm0, %v170_v61, 0.0 }
 0x191   :  { %177 = vadd.xlane.f32.xlu2 %v176_v62 }
 0x195   :  { %v150_v63 = vpop.xlane.xlu1 %149 }
 0x196   :  { %v163_v0 = vmul.f32 %v399_v52, %v150_v63 }
 0x198   :  { %v406_v1 = vsub.f32 %v140_v40, %v163_v0 }
 0x19a   :  { %v171_v2 = vmul.f32 %v406_v1, %v406_v1 }
 0x19c   :  { %v179_v3 = vsel %vm38_vm0, %v171_v2, 0.0 }
 0x19d   :  { %v153_v4 = vpop.xlane.xlu1 %152  ;;  %180 = vadd.xlane.f32.xlu0 %v179_v3 }
 0x19e   :  { %v164_v5 = vmul.f32 %v399_v52, %v153_v4 }
 0x1a0   :  { %v412_v6 = vsub.f32 %v141_v44, %v164_v5 }
 0x1a2   :  { %v172_v7 = vmul.f32 %v412_v6, %v412_v6 }
 0x1a4   :  { %v182_v8 = vsel %vm38_vm0, %v172_v7, 0.0 }
 0x1a5   :  { %183 = vadd.xlane.f32.xlu1 %v182_v8 }
 0x1fc   :  { %v175_v9 = vpop.xlane.xlu2 %174 }
 0x1fd   :  { %v185_v10 = vmul.f32 %v175_v9, %v399_v52 }
 0x1ff   :  { %v189_v11 = vadd.f32 1e-05, %v185_v10 }
 0x201   :  { %288 = vrsqrt.f32 %v189_v11  ;;  %vm199_vm4 = vweird.f32 %v189_v11 }
 0x204   :  { %v178_v12 = vpop.xlane.xlu2 %177 }
 0x205   :  { %v186_v13 = vmul.f32 %v178_v12, %v399_v52 }
 0x207   :  { %v289_v14 = vpop.eup %288  ;;  %v190_v15 = vadd.f32 1e-05, %v186_v13 }
 0x208   :  { %v194_v16 = vmul.f32 %v289_v14, %v189_v11  ;;  %vm200_vm3 = vweird.f32 %v289_v14 }
 0x209   :  { %290 = vrsqrt.f32 %v190_v15  ;;  %vm201_vm5 = vmor %vm199_vm4, %vm200_vm3  ;;  %vm209_vm7 = vweird.f32 %v190_v15 }
 0x20a   :  { %v195_v17 = vmul.f32 %v289_v14, %v194_v16 }
 0x20c   :  { %v196_v18 = vmul.f32 0.5, %v195_v17 }
 0x20e   :  { %v197_v19 = vsub.f32 1.5, %v196_v18 }
 0x20f   :  { %v291_v20 = vpop.eup %290 }
 0x210   :  { %v198_v21 = vmul.f32 %v289_v14, %v197_v19  ;;  %v204_v22 = vmul.f32 %v291_v20, %v190_v15  ;;  %v181_v23 = vpop.xlane.xlu0 %180  ;;  %vm210_vm6 = vweird.f32 %v291_v20 }
 0x211   :  { %v187_v25 = vmul.f32 %v181_v23, %v399_v52  ;;  %vm211_vm8 = vmor %vm209_vm7, %vm210_vm6 }
 0x212   :  { %v202_v26 = vsel %vm201_vm5, %v289_v14, %v198_v21  ;;  %v205_v27 = vmul.f32 %v291_v20, %v204_v22 }
 0x213   :  { %v233_v29 = vmul.f32 %v202_v26, %v165_v55  ;;  %v191_v30 = vadd.f32 1e-05, %v187_v25 }
 0x214   :  { %v206_v31 = vmul.f32 0.5, %v205_v27 }
 0x215   :  { %v241_v32 = vmul.f32 %v284_v24, %v233_v29  ;;  %292 = vrsqrt.f32 %v191_v30  ;;  %vm219_vm10 = vweird.f32 %v191_v30 }
 0x216   :  { %v207_v33 = vsub.f32 1.5, %v206_v31 }
 0x217   :  { %v249_v34 = vadd.f32 %v285_v28, %v241_v32 }
 0x218   :  { %v208_v35 = vmul.f32 %v291_v20, %v207_v33  ;;  %v184_v36 = vpop.xlane.xlu1 %183 }
 0x219   :  { %253 = vst.msk [vmem:[%s452_s7] sm:$0xff] %vm38_vm0, %v249_v34  ;;  %v188_v37 = vmul.f32 %v184_v36, %v399_v52 }
 0x21a   :  { %v212_v38 = vsel %vm211_vm8, %v291_v20, %v208_v35 }
 0x21b   :  { %v293_v39 = vpop.eup %292  ;;  %v234_v40 = vmul.f32 %v212_v38, %v166_v60  ;;  %v192_v41 = vadd.f32 1e-05, %v188_v37 }
 0x21c   :  { %v214_v42 = vmul.f32 %v293_v39, %v191_v30  ;;  %vm220_vm9 = vweird.f32 %v293_v39 }
 0x21d   :  { %v242_v43 = vmul.f32 %v284_v24, %v234_v40  ;;  %294 = vrsqrt.f32 %v192_v41  ;;  %vm221_vm11 = vmor %vm219_vm10, %vm220_vm9  ;;  %vm229_vm13 = vweird.f32 %v192_v41 }
 0x21e   :  { %v215_v44 = vmul.f32 %v293_v39, %v214_v42 }
 0x21f   :  { %v250_v45 = vadd.f32 %v285_v28, %v242_v43 }
 0x220   :  { %v216_v46 = vmul.f32 0.5, %v215_v44 }
 0x221   :  { %254 = vst.msk [vmem:[%s452_s7 + $0x8] sm:$0xff] %vm38_vm0, %v250_v45 }
 0x222   :  { %v217_v47 = vsub.f32 1.5, %v216_v46 }
 0x223   :  { %v295_v48 = vpop.eup %294 }
 0x224   :  { %v218_v49 = vmul.f32 %v293_v39, %v217_v47  ;;  %v224_v50 = vmul.f32 %v295_v48, %v192_v41  ;;  %vm230_vm12 = vweird.f32 %v295_v48 }
 0x225   :  { %vm231_vm14 = vmor %vm229_vm13, %vm230_vm12 }
 0x226   :  { %v222_v51 = vsel %vm221_vm11, %v293_v39, %v218_v49  ;;  %v225_v52 = vmul.f32 %v295_v48, %v224_v50 }
 0x227   :  { %v235_v53 = vmul.f32 %v222_v51, %v406_v1 }
 0x228   :  { %v226_v54 = vmul.f32 0.5, %v225_v52 }
 0x229   :  { %v243_v55 = vmul.f32 %v284_v24, %v235_v53 }
 0x22a   :  { %v227_v56 = vsub.f32 1.5, %v226_v54 }
 0x22b   :  { %v251_v57 = vadd.f32 %v285_v28, %v243_v55 }
 0x22c   :  { %v228_v58 = vmul.f32 %v295_v48, %v227_v56 }
 0x22d   :  { %255 = vst.msk [vmem:[%s452_s7 + $0x10] sm:$0xff] %vm38_vm0, %v251_v57 }
 0x22e   :  { %v232_v59 = vsel %vm231_vm14, %v295_v48, %v228_v58 }
 0x22f   :  { %v236_v60 = vmul.f32 %v232_v59, %v412_v6 }
 0x231   :  { %v244_v61 = vmul.f32 %v284_v24, %v236_v60 }
 0x233   :  { %v252_v62 = vadd.f32 %v285_v28, %v244_v61 }
 0x235   :  { %256 = vst.msk [vmem:[%s452_s7 + $0x18] sm:$0xff] %vm38_vm0, %v252_v62 }

// kernel: transformer_forward.12
= control target key start
LH: loop header
LB: loop body
LE: loop exit
PB: predicated region body
PF: predicated region fallthrough
CT: control target
= control target key end

     0   :  { %12 = vsyncpa [#allocation3], 0  ;;  %s338_s27 = smov [#allocation2]   ;;  %s488_s0 = inlined_call_operand.vmem [shape: f32[32,32], index: 0, kind: input, shape index: {}]   ;;  %s489_s1 = inlined_call_operand.vmem [shape: f32[32,64], index: 1, kind: input, shape index: {}]   ;;  %s490_s2 = inlined_call_operand.vmem [shape: f32[1,64], index: 2, kind: input, shape index: {}]   ;;  %s491_s3 = inlined_call_operand.vmem [shape: f32[64,32], index: 3, kind: input, shape index: {}]   ;;  %s492_s4 = inlined_call_operand.vmem [shape: f32[1,32], index: 4, kind: input, shape index: {}]   ;;  %s493_s5 = inlined_call_operand.vmem [shape: f32[1,32], index: 5, kind: input, shape index: {}]   ;;  %s494_s6 = inlined_call_operand.hbm [shape: f32[1,32], index: 6, kind: input, shape index: {}]   ;;  %s495_s7 = inlined_call_operand.vmem [shape: f32[32,32], index: 7, kind: output, shape index: {}]  }
   0x1   :  { %s30_s26 = sshll.u32 %s494_s6, 4  ;;  %s32_s28 = sshll.u32 %s338_s27, 4  ;;  %s31_s26 = int_to_ptr.hbm [resolvable:$true] %s30_s26  ;;  %s33_s28 = int_to_ptr.vmem [resolvable:$true] %s32_s28 }
   0x2   :  { %35 = dma.hbm_to_vmem [thread:$0]  %s31_s26, 16, %s33_s28, [#allocation3]  }
   0x3   :  { %336 = dma.done.wait [#allocation3], 16  }
   0x4   :  { %337 = vsyncadd [#allocation3], 4294967280  ;;  %v47_v0 = vld [vmem:[%s489_s1 + $0x18] sm:$0xff]  ;;  %v46_v1 = vld [vmem:[%s489_s1 + $0x10] sm:$0xff]  ;;  %vm52_vm0 = vcmask 261120   ;;  %vm110_vm1 = vcmask 523264  }
   0x5   :  { %77 = vmatpush.msra.mxu0 %v47_v0  ;;  %284 = vmatpush.msra.mxu3 %v47_v0  ;;  %v45_v2 = vld [vmem:[%s489_s1 + $0x8] sm:$0xff]  ;;  %v105_v3 = vld [vmem:[%s491_s3 + $0x38] sm:$0xff]  ;;  %v44_v4 = vld [vmem:[%s489_s1] sm:$0xff]  ;;  %v339_v46 = vmov 32.0  }
   0x6   :  { %v104_v5 = vld [vmem:[%s491_s3 + $0x30] sm:$0xff]  ;;  %v40_v6 = vld [vmem:[%s488_s0] sm:$0xff]  ;;  %v41_v7 = vld [vmem:[%s488_s0 + $0x8] sm:$0xff]  ;;  %131 = vmatpush.msra.mxu1 %v105_v3  ;;  %288 = vmatpush.msra.mxu2 %v105_v3  ;;  %302 = vrcp.f32 %v339_v46 }
   0x7   :  { %78 = vmatpush.msra.mxu0 %v46_v1  ;;  %285 = vmatpush.msra.mxu3 %v46_v1  ;;  %v103_v8 = vld [vmem:[%s491_s3 + $0x28] sm:$0xff]  ;;  %v102_v9 = vld [vmem:[%s491_s3 + $0x20] sm:$0xff]  ;;  %v101_v10 = vld [vmem:[%s491_s3 + $0x18] sm:$0xff] }
   0x8   :  { %132 = vmatpush.msra.mxu1 %v104_v5  ;;  %289 = vmatpush.msra.mxu2 %v104_v5  ;;  %v42_v11 = vld [vmem:[%s488_s0 + $0x10] sm:$0xff]  ;;  %v43_v12 = vld [vmem:[%s488_s0 + $0x18] sm:$0xff]  ;;  %v99_v14 = vld [vmem:[%s491_s3 + $0x8] sm:$0xff] }
   0x9   :  { %79 = vmatpush.msra.mxu0 %v45_v2  ;;  %286 = vmatpush.msra.mxu3 %v45_v2  ;;  %v100_v13 = vld [vmem:[%s491_s3 + $0x10] sm:$0xff]  ;;  %v98_v15 = vld [vmem:[%s491_s3] sm:$0xff] }
   0xa   :  { %133 = vmatpush.msra.mxu1 %v103_v8  ;;  %290 = vmatpush.msra.mxu2 %v103_v8  ;;  %v298_v16 = vld [vmem:[%s490_s2] ss:$0 sm:$0xff] }
   0xb   :  { %80 = vmatpush.msra.mxu0 %v44_v4  ;;  %287 = vmatpush.msra.mxu3 %v44_v4  ;;  %v299_v29 = vld [vmem:[%s492_s4] ss:$0 sm:$0xff] }
   0xc   :  { %276 = vmatmul.msk.f32.vlgmr.msra.gmra.mxu0 %vm52_vm0, %v40_v6  ;;  %277 = vmatmul.msk.f32.vlgmr.msra.gmra.mxu3 %vm52_vm0, %v41_v7  ;;  %v303_v47 = vpop.eup %302 }
   0xd   :  { %134 = vmatpush.msra.mxu1 %v102_v9  ;;  %291 = vmatpush.msra.mxu2 %v102_v9  ;;  %v169_v48 = vmul.f32 32.0, %v303_v47  ;;  %vm173_vm2 = vweird.f32 %v303_v47 }
   0xf   :  { %135 = vmatpush.msra.mxu1 %v101_v10  ;;  %292 = vmatpush.msra.mxu2 %v101_v10  ;;  %v170_v49 = vsub.f32 1.0, %v169_v48 }
  0x11   :  { %136 = vmatpush.msra.mxu1 %v100_v13  ;;  %293 = vmatpush.msra.mxu2 %v100_v13  ;;  %v171_v50 = vmul.f32 %v303_v47, %v170_v49 }
  0x13   :  { %137 = vmatpush.msra.mxu1 %v99_v14  ;;  %294 = vmatpush.msra.mxu2 %v99_v14  ;;  %v172_v51 = vadd.f32 %v303_v47, %v171_v50 }
  0x14   :  { %278 = vmatmul.msk.f32.gmra.mxu3 %vm52_vm0, %v42_v11 }
  0x15   :  { %138 = vmatpush.msra.mxu1 %v98_v15  ;;  %295 = vmatpush.msra.mxu2 %v98_v15  ;;  %v445_v52 = vsel %vm173_vm2, %v303_v47, %v172_v51 }
  0x1c   :  { %279 = vmatmul.msk.f32.gmra.mxu3 %vm52_vm0, %v43_v12 }
  0x89   :  { %v82_v17 = vpop.f32.mrf.mxu0 }
  0x8a   :  { %v83_v18 = vadd.f32 %v298_v16, %v82_v17 }
  0x8c   :  { %v94_v19 = vmax.f32 %v83_v18, 0.0 }
  0x8e   :  { %280 = vmatmul.msk.f32.vlgmr.msra.gmra.mxu1 %vm110_vm1, %v94_v19 }
  0x8f   :  { %v85_v20 = vpop.f32.mrf.mxu3 }
  0x90   :  { %v86_v21 = vadd.f32 %v298_v16, %v85_v20 }
  0x92   :  { %v95_v22 = vmax.f32 %v86_v21, 0.0 }
  0x96   :  { %281 = vmatmul.msk.f32.gmra.mxu1 %vm110_vm1, %v95_v22 }
  0x97   :  { %v88_v23 = vpop.f32.mrf.mxu3 }
  0x98   :  { %v89_v24 = vadd.f32 %v298_v16, %v88_v23 }
  0x9a   :  { %v96_v25 = vmax.f32 %v89_v24, 0.0  ;;  %v300_v24 = vld [vmem:[%s493_s5] ss:$0 sm:$0xff] }
  0x9c   :  { %282 = vmatmul.msk.f32.vlgmr.msra.gmra.mxu2 %vm110_vm1, %v96_v25 }
  0x9f   :  { %v91_v26 = vpop.f32.mrf.mxu3 }
  0xa0   :  { %v92_v27 = vadd.f32 %v298_v16, %v91_v26 }
  0xa2   :  { %v97_v28 = vmax.f32 %v92_v27, 0.0 }
  0xa4   :  { %283 = vmatmul.msk.f32.gmra.mxu2 %vm110_vm1, %v97_v28  ;;  %v301_v28 = vld [vmem:[#allocation2] ss:$0 sm:$0xff] }
 0x10b   :  { %v140_v30 = vpop.f32.mrf.mxu1 }
 0x10c   :  { %v141_v31 = vadd.f32 %v299_v29, %v140_v30 }
 0x10e   :  { %v152_v32 = vadd.f32 %v141_v31, %v40_v6 }
 0x110   :  { %v156_v33 = vsel %vm52_vm0, %v152_v32, 0.0 }
 0x111   :  { %157 = vadd.xlane.f32.xlu0 %v156_v33 }
 0x113   :  { %v143_v34 = vpop.f32.mrf.mxu1 }
 0x114   :  { %v144_v35 = vadd.f32 %v299_v29, %v143_v34 }
 0x116   :  { %v153_v36 = vadd.f32 %v144_v35, %v41_v7 }
 0x118   :  { %v159_v37 = vsel %vm52_vm0, %v153_v36, 0.0 }
 0x119   :  { %160 = vadd.xlane.f32.xlu0 %v159_v37 }
 0x11f   :  { %v146_v38 = vpop.f32.mrf.mxu2 }
 0x120   :  { %v147_v39 = vadd.f32 %v299_v29, %v146_v38 }
 0x122   :  { %v154_v40 = vadd.f32 %v147_v39, %v42_v11 }
 0x124   :  { %v162_v41 = vsel %vm52_vm0, %v154_v40, 0.0 }
 0x125   :  { %163 = vadd.xlane.f32.xlu1 %v162_v41 }
 0x127   :  { %v149_v42 = vpop.f32.mrf.mxu2 }
 0x128   :  { %v150_v43 = vadd.f32 %v299_v29, %v149_v42 }
 0x12a   :  { %v155_v44 = vadd.f32 %v150_v43, %v43_v12 }
 0x12c   :  { %v165_v45 = vsel %vm52_vm0, %v155_v44, 0.0 }
 0x12d   :  { %166 = vadd.xlane.f32.xlu1 %v165_v45 }
 0x184   :  { %v158_v53 = vpop.xlane.xlu0 %157 }
 0x185   :  { %v175_v54 = vmul.f32 %v445_v52, %v158_v53 }
 0x187   :  { %v179_v55 = vsub.f32 %v152_v32, %v175_v54 }
 0x189   :  { %v183_v56 = vmul.f32 %v179_v55, %v179_v55 }
 0x18b   :  { %v187_v57 = vsel %vm52_vm0, %v183_v56, 0.0 }
 0x18c   :  { %188 = vadd.xlane.f32.xlu2 %v187_v57  ;;  %v161_v58 = vpop.xlane.xlu0 %160 }
 0x18d   :  { %v176_v59 = vmul.f32 %v445_v52, %v161_v58 }
 0x18f   :  { %v180_v60 = vsub.f32 %v153_v36, %v176_v59 }
 0x191   :  { %v184_v61 = vmul.f32 %v180_v60, %v180_v60 }
 0x193   :  { %v190_v62 = vsel %vm52_vm0, %v184_v61, 0.0 }
 0x194   :  { %191 = vadd.xlane.f32.xlu2 %v190_v62 }
 0x198   :  { %v164_v63 = vpop.xlane.xlu1 %163 }
 0x199   :  { %v177_v0 = vmul.f32 %v445_v52, %v164_v63 }
 0x19b   :  { %v452_v1 = vsub.f32 %v154_v40, %v177_v0 }
 0x19d   :  { %v185_v2 = vmul.f32 %v452_v1, %v452_v1 }
 0x19f   :  { %v193_v3 = vsel %vm52_vm0, %v185_v2, 0.0 }
 0x1a0   :  { %v167_v4 = vpop.xlane.xlu1 %166  ;;  %194 = vadd.xlane.f32.xlu0 %v193_v3 }
 0x1a1   :  { %v178_v5 = vmul.f32 %v445_v52, %v167_v4 }
 0x1a3   :  { %v458_v6 = vsub.f32 %v155_v44, %v178_v5 }
 0x1a5   :  { %v186_v7 = vmul.f32 %v458_v6, %v458_v6 }
 0x1a7   :  { %v196_v8 = vsel %vm52_vm0, %v186_v7, 0.0 }
 0x1a8   :  { %197 = vadd.xlane.f32.xlu1 %v196_v8 }
 0x1ff   :  { %v189_v9 = vpop.xlane.xlu2 %188 }
 0x200   :  { %v199_v10 = vmul.f32 %v189_v9, %v445_v52 }
 0x202   :  { %v203_v11 = vadd.f32 1e-05, %v199_v10 }
 0x204   :  { %304 = vrsqrt.f32 %v203_v11  ;;  %vm213_vm4 = vweird.f32 %v203_v11 }
 0x207   :  { %v192_v12 = vpop.xlane.xlu2 %191 }
 0x208   :  { %v200_v13 = vmul.f32 %v192_v12, %v445_v52 }
 0x20a   :  { %v305_v14 = vpop.eup %304  ;;  %v204_v15 = vadd.f32 1e-05, %v200_v13 }
 0x20b   :  { %v208_v16 = vmul.f32 %v305_v14, %v203_v11  ;;  %vm214_vm3 = vweird.f32 %v305_v14 }
 0x20c   :  { %306 = vrsqrt.f32 %v204_v15  ;;  %vm215_vm5 = vmor %vm213_vm4, %vm214_vm3  ;;  %vm223_vm7 = vweird.f32 %v204_v15 }
 0x20d   :  { %v209_v17 = vmul.f32 %v305_v14, %v208_v16 }
 0x20f   :  { %v210_v18 = vmul.f32 0.5, %v209_v17 }
 0x211   :  { %v211_v19 = vsub.f32 1.5, %v210_v18 }
 0x212   :  { %v307_v20 = vpop.eup %306 }
 0x213   :  { %v212_v21 = vmul.f32 %v305_v14, %v211_v19  ;;  %v218_v22 = vmul.f32 %v307_v20, %v204_v15  ;;  %v195_v23 = vpop.xlane.xlu0 %194  ;;  %vm224_vm6 = vweird.f32 %v307_v20 }
 0x214   :  { %v201_v25 = vmul.f32 %v195_v23, %v445_v52  ;;  %vm225_vm8 = vmor %vm223_vm7, %vm224_vm6 }
 0x215   :  { %v216_v26 = vsel %vm215_vm5, %v305_v14, %v212_v21  ;;  %v219_v27 = vmul.f32 %v307_v20, %v218_v22 }
 0x216   :  { %v247_v29 = vmul.f32 %v216_v26, %v179_v55  ;;  %v205_v30 = vadd.f32 1e-05, %v201_v25 }
 0x217   :  { %v220_v31 = vmul.f32 0.5, %v219_v27 }
 0x218   :  { %v255_v32 = vmul.f32 %v300_v24, %v247_v29  ;;  %308 = vrsqrt.f32 %v205_v30  ;;  %vm233_vm10 = vweird.f32 %v205_v30 }
 0x219   :  { %v221_v33 = vsub.f32 1.5, %v220_v31 }
 0x21a   :  { %v263_v34 = vadd.f32 %v301_v28, %v255_v32 }
 0x21b   :  { %v222_v35 = vmul.f32 %v307_v20, %v221_v33  ;;  %v198_v36 = vpop.xlane.xlu1 %197 }
 0x21c   :  { %267 = vst.msk [vmem:[%s495_s7] sm:$0xff] %vm52_vm0, %v263_v34  ;;  %v202_v37 = vmul.f32 %v198_v36, %v445_v52 }
 0x21d   :  { %v226_v38 = vsel %vm225_vm8, %v307_v20, %v222_v35 }
 0x21e   :  { %v309_v39 = vpop.eup %308  ;;  %v248_v40 = vmul.f32 %v226_v38, %v180_v60  ;;  %v206_v41 = vadd.f32 1e-05, %v202_v37 }
 0x21f   :  { %v228_v42 = vmul.f32 %v309_v39, %v205_v30  ;;  %vm234_vm9 = vweird.f32 %v309_v39 }
 0x220   :  { %v256_v43 = vmul.f32 %v300_v24, %v248_v40  ;;  %310 = vrsqrt.f32 %v206_v41  ;;  %vm235_vm11 = vmor %vm233_vm10, %vm234_vm9  ;;  %vm243_vm13 = vweird.f32 %v206_v41 }
 0x221   :  { %v229_v44 = vmul.f32 %v309_v39, %v228_v42 }
 0x222   :  { %v264_v45 = vadd.f32 %v301_v28, %v256_v43 }
 0x223   :  { %v230_v46 = vmul.f32 0.5, %v229_v44 }
 0x224   :  { %268 = vst.msk [vmem:[%s495_s7 + $0x8] sm:$0xff] %vm52_vm0, %v264_v45 }
 0x225   :  { %v231_v47 = vsub.f32 1.5, %v230_v46 }
 0x226   :  { %v311_v48 = vpop.eup %310 }
 0x227   :  { %v232_v49 = vmul.f32 %v309_v39, %v231_v47  ;;  %v238_v50 = vmul.f32 %v311_v48, %v206_v41  ;;  %vm244_vm12 = vweird.f32 %v311_v48 }
 0x228   :  { %vm245_vm14 = vmor %vm243_vm13, %vm244_vm12 }
 0x229   :  { %v236_v51 = vsel %vm235_vm11, %v309_v39, %v232_v49  ;;  %v239_v52 = vmul.f32 %v311_v48, %v238_v50 }
 0x22a   :  { %v249_v53 = vmul.f32 %v236_v51, %v452_v1 }
 0x22b   :  { %v240_v54 = vmul.f32 0.5, %v239_v52 }
 0x22c   :  { %v257_v55 = vmul.f32 %v300_v24, %v249_v53 }
 0x22d   :  { %v241_v56 = vsub.f32 1.5, %v240_v54 }
 0x22e   :  { %v265_v57 = vadd.f32 %v301_v28, %v257_v55 }
 0x22f   :  { %v242_v58 = vmul.f32 %v311_v48, %v241_v56 }
 0x230   :  { %269 = vst.msk [vmem:[%s495_s7 + $0x10] sm:$0xff] %vm52_vm0, %v265_v57 }
 0x231   :  { %v246_v59 = vsel %vm245_vm14, %v311_v48, %v242_v58 }
 0x232   :  { %v250_v60 = vmul.f32 %v246_v59, %v458_v6 }
 0x234   :  { %v258_v61 = vmul.f32 %v300_v24, %v250_v60 }
 0x236   :  { %v266_v62 = vadd.f32 %v301_v28, %v258_v61 }
 0x238   :  { %270 = vst.msk [vmem:[%s495_s7 + $0x18] sm:$0xff] %vm52_vm0, %v266_v62 }
 0x239   :  { %275 = vsyncpa [#allocation3], 1 }

// kernel: transformer_forward.11
= control target key start
LH: loop header
LB: loop body
LE: loop exit
PB: predicated region body
PF: predicated region fallthrough
CT: control target
= control target key end

     0   :  { %19 = vsyncpa [#allocation3], 0  ;;  %s1804_s0 = inlined_call_operand.vmem [shape: f32[2,16,32], index: 0, kind: input, shape index: {}, may-alias: {0,1}]   ;;  %s1805_s1 = inlined_call_operand.vmem [shape: f32[2,16,32], index: 1, kind: input, shape index: {}, may-alias: {0,1}]   ;;  %s1806_s2 = inlined_call_operand.vmem [shape: f32[2,16,32], index: 2, kind: input, shape index: {}, may-alias: {2,3}]   ;;  %s1807_s3 = inlined_call_operand.vmem [shape: f32[2,16,32], index: 3, kind: input, shape index: {}, may-alias: {2,3}]   ;;  %s1808_s4 = inlined_call_operand.vmem [shape: f32[32,32], index: 4, kind: input, shape index: {}]   ;;  %s1809_s5 = inlined_call_operand.vmem [shape: f32[1,32], index: 5, kind: input, shape index: {}]   ;;  %s1810_s6 = inlined_call_operand.vmem [shape: f32[32,32], index: 6, kind: input, shape index: {}]   ;;  %s1811_s7 = inlined_call_operand.vmem [shape: f32[1,32], index: 7, kind: input, shape index: {}]   ;;  %s1812_s8 = inlined_call_operand.hbm [shape: f32[32,32], index: 8, kind: input, shape index: {}]   ;;  %s1813_s9 = inlined_call_operand.vmem [shape: f32[1,32], index: 9, kind: input, shape index: {}]   ;;  %s1814_s10 = inlined_call_operand.hbm [shape: f32[32,32], index: 10, kind: input, shape index: {}]   ;;  %s1815_s11 = inlined_call_operand.vmem [shape: f32[1,32], index: 11, kind: input, shape index: {}]   ;;  %s1816_s12 = inlined_call_operand.vmem [shape: f32[1,32], index: 12, kind: input, shape index: {}]   ;;  %s1817_s13 = inlined_call_operand.vmem [shape: f32[1,32], index: 13, kind: input, shape index: {}]   ;;  %s1818_s14 = inlined_call_operand.vmem [shape: f32[2,16,32], index: 14, kind: output, shape index: {}]  }
   0x1   :  { %20 = vsyncpa [#allocation5], 0  ;;  %s1633_s29 = smov 0  }
   0x2 LB: > { %s394_s16 = sshll.u32 %s1812_s8, 4  ;;  %s1316_s17 = sadd.s32 4294967295, %s1545_s29   ;;  %s1545_s29 = sphi %s1633_s29, %s26_s29   ;;  %s395_s16 = int_to_ptr.hbm [resolvable:$true] %s394_s16 }
   0x3   : > { %p1318_p0 = scmp.ge.s32.totalorder %s1545_s29, 1  ;;  %p371_p1 = scmp.lt.s32.totalorder %s1545_s29, 3 }
   0x4   : > { %p1389_p2 = scmp.eq.s32.totalorder %s1316_s17, 0  ;;  %s1547_s19 = smov [#allocation2]  }
   0x5   : > { %p1644_p3 = pnand %p1318_p0, %p371_p1  ;;  %s396_s20 = sshll.u32 %s1547_s19, 4  ;;  %s397_s20 = int_to_ptr.vmem [resolvable:$true] %s396_s20 }
   0x6   : > { %s411_s23 = sshll.u32 %s1814_s10, 4  ;;  %s1548_s24 = smov [#allocation4]   ;;  %s412_s23 = int_to_ptr.hbm [resolvable:$true] %s411_s23 }
   0x7   : > { %p1382_p4 = pneg %p1644_p3  ;;  %s413_s25 = sshll.u32 %s1548_s24, 4  ;;  %s414_s25 = int_to_ptr.vmem [resolvable:$true] %s413_s25 }
   0x8   : > { %s1549_s26 = smov 128   ;;  %s1550_s27 = smov 8  }
   0x9   : > { %p1383_p5 = pnand %p1389_p2, %p1382_p4  ;;  %470 = sbr.rel (%p1644_p3) target bundleno = 1399 (0x577), region = 76 }
   0xb   : > { %1385 = dma.hbm_to_vmem [thread:$0]  (!%p1383_p5), %s395_s16, 512, %s397_s20, [#allocation3], %s1549_s26, %s1549_s26, %s1550_s27  }
   0xc   : > { %1388 = dma.hbm_to_vmem [thread:$0]  (!%p1383_p5), %s412_s23, 512, %s414_s25, [#allocation5], %s1549_s26, %s1549_s26, %s1550_s27  }
   0xe   : > { %1536 = dma.done.wait (%p1389_p2), [#allocation3], 512  }
   0xf   : > { %1538 = vsyncadd (%p1389_p2), [#allocation3], 4294966784 }
  0x10   : > { %1540 = dma.done.wait (%p1389_p2), [#allocation5], 512  }
  0x11   : > { %1542 = vsyncadd (%p1389_p2), [#allocation5], 4294966784  ;;  %p537_p6 = scmp.lt.s32.totalorder %s1316_s17, 1  ;;  %v571_v0 = vld [vmem:[%s1808_s4 + $0x18] sm:$0xff]  ;;  %v570_v2 = vld [vmem:[%s1808_s4 + $0x10] sm:$0xff]  ;;  %vm576_vm0 = vcmask 261120  }
  0x12   : > { %v609_v1 = vld [vmem:[%s1810_s6 + $0x18] sm:$0xff]  ;;  %595 = vmatpush.msra.mxu0 %v571_v0  ;;  %v608_v3 = vld [vmem:[%s1810_s6 + $0x10] sm:$0xff]  ;;  %v569_v4 = vld [vmem:[%s1808_s4 + $0x8] sm:$0xff]  ;;  %s1551_s25 = smov 120   ;;  %vm680_vm1 = vcmask 64512   ;;  %vm718_vm2 = vcmask 130048  }
  0x13   : > { %s1821_s17 = smov (!%p537_p6, %s1316_s17), 1  ;;  %632 = vmatpush.msra.mxu1 %v609_v1  ;;  %v607_v5 = vld [vmem:[%s1810_s6 + $0x8] sm:$0xff]  ;;  %v568_v6 = vld [vmem:[%s1808_s4] sm:$0xff]  ;;  %v646_v26 = vld [vmem:[#allocation2 + $0x18] sm:$0xff]  ;;  %s1554_s21 = smov 8   ;;  %vm1094_vm3 = vcmask 195584  }
  0x14   : > { %s1660_s28 = sshll.u32 %s1821_s17, 4  ;;  %596 = vmatpush.msra.mxu0 %v570_v2  ;;  %v606_v7 = vld [vmem:[%s1810_s6] sm:$0xff]  ;;  %v645_v27 = vld [vmem:[#allocation2 + $0x10] sm:$0xff]  ;;  %669 = vmatpush.msra.mxu2 %v646_v26  ;;  %v644_v28 = vld [vmem:[#allocation2 + $0x8] sm:$0xff]  ;;  %s1555_s22 = smov 16  }
  0x15   : > { %s541_s23 = scalar_lea.vmem %s1804_s0, %s1660_s28  ;;  %s546_s27 = scalar_lea.vmem %s1805_s1, %s1660_s28  ;;  %633 = vmatpush.msra.mxu1 %v608_v3  ;;  %v1427_v12 = vld [vmem:[%s1809_s5] ss:$0 sm:$0xff] }
  0x16   : > { %v562_v8 = vld [vmem:[%s541_s23] sm:$0xff]  ;;  %597 = vmatpush.msra.mxu0 %v569_v4  ;;  %v563_v10 = vld [vmem:[%s541_s23 + $0x8] sm:$0xff]  ;;  %s1552_s23 = smov 112   ;;  %s551_s18 = scalar_lea.vmem %s1806_s2, %s1660_s28  ;;  %670 = vmatpush.msra.mxu2 %v645_v27 }
  0x17   : > { %v564_v9 = vld [vmem:[%s546_s27] sm:$0xff]  ;;  %634 = vmatpush.msra.mxu1 %v607_v5  ;;  %v565_v11 = vld [vmem:[%s546_s27 + $0x8] sm:$0xff]  ;;  %s1553_s27 = smov 104   ;;  %s1556_s17 = smov 24  }
  0x18   : > { %598 = vmatpush.msra.mxu0 %v568_v6  ;;  %v1428_v16 = vld [vmem:[%s1811_s7] ss:$0 sm:$0xff]  ;;  %671 = vmatpush.msra.mxu2 %v644_v28  ;;  %v567_v35 = vld [vmem:[%s551_s18 + $0x8] sm:$0xff] }
  0x19   : > { %635 = vmatpush.msra.mxu1 %v606_v7  ;;  %1335 = vmatmul.msk.f32.vlgmr.msra.gmra.mxu0 %vm576_vm0, %v562_v8  ;;  %v643_v30 = vld [vmem:[#allocation2] sm:$0xff] }
  0x1a   : > { %1337 = vmatmul.msk.f32.vlgmr.msra.gmra.mxu1 %vm576_vm0, %v564_v9  ;;  %v566_v32 = vld [vmem:[%s551_s18] sm:$0xff]  ;;  %672 = vmatpush.msra.mxu2 %v643_v30 }
  0x1b   : > { %1339 = vmatmul.msk.f32.vlgmr.msra.gmra.mxu2 %vm576_vm0, %v566_v32  ;;  %v1429_v56 = vld [vmem:[%s1813_s9] ss:$0 sm:$0xff] }
  0x21   : > { %1336 = vmatmul.msk.f32.gmra.mxu0 %vm576_vm0, %v563_v10 }
  0x22   : > { %1338 = vmatmul.msk.f32.gmra.mxu1 %vm576_vm0, %v565_v11 }
  0x23   : > { %1340 = vmatmul.msk.f32.gmra.mxu2 %vm576_vm0, %v567_v35 }
  0x96   : > { %v600_v13 = vpop.f32.mrf.mxu0 }
  0x97   : > { %v637_v14 = vpop.f32.mrf.mxu1  ;;  %v601_v15 = vadd.f32 %v1427_v12, %v600_v13 }
  0x98   : > { %v638_v21 = vadd.f32 %v1428_v16, %v637_v14 }
  0x99   : > { %770 = vrot.lane.b32.xlu1 %v601_v15, %s1551_s25 }
  0x9e   : > { %v603_v17 = vpop.f32.mrf.mxu0  ;;  %v674_v49 = vpop.f32.mrf.mxu2 }
  0x9f   : > { %v640_v18 = vpop.f32.mrf.mxu1  ;;  %v604_v19 = vadd.f32 %v1427_v12, %v603_v17  ;;  %v675_v2 = vadd.f32 %v1429_v56, %v674_v49 }
  0xa0   : > { %v641_v20 = vadd.f32 %v1428_v16, %v640_v18 }
  0xa1   : > { %772 = vrot.lane.b32.xlu1 %v604_v19, %s1551_s25 }
  0xa2   : > { %876 = vrot.lane.b32.xlu2 %v641_v20, %s1552_s23  ;;  %776 = vrot.lane.b32.xlu0 %v641_v20, %s1551_s25 }
  0xa3   : > { %1341 = vmatpush.xpose.msk.msra.mxu3 %vm680_vm1, %v641_v20 }
  0xa6   : > { %v677_v60 = vpop.f32.mrf.mxu2 }
  0xa7   : > { %1342 = vmatpush.xpose.msk.msra.mxu3 %vm680_vm1, %v638_v21  ;;  %v678_v62 = vadd.f32 %v1429_v56, %v677_v60 }
  0xa9   : > { %972 = vrot.lane.b32.xlu1 %v638_v21, %s1553_s27  ;;  %761 = vmatpush.msrb.mxu0 %v678_v62 }
  0xaa   : > { %1343 = vmatmul.msk.f32.vlgmr.msra.gmra.mxu3 %vm680_vm1, %v601_v15  ;;  %974 = vrot.lane.b32.xlu2 %v641_v20, %s1553_s27 }
  0xab   : > { %774 = vrot.lane.b32.xlu0 %v638_v21, %s1551_s25  ;;  %762 = vmatpush.msrb.mxu0 %v675_v2 }
  0xb1   : > { %872 = vrot.lane.b32.xlu1 %v604_v19, %s1552_s23 }
  0xb2   : > { %1344 = vmatmul.msk.f32.gmra.mxu3 %vm680_vm1, %v604_v19  ;;  %870 = vrot.lane.b32.xlu2 %v601_v15, %s1552_s23 }
  0xb3   : > { %874 = vrot.lane.b32.xlu0 %v638_v21, %s1552_s23 }
  0xba   : > { %970 = vrot.lane.b32.xlu2 %v604_v19, %s1553_s27 }
  0xbb   : > { %968 = vrot.lane.b32.xlu0 %v601_v15, %s1553_s27  ;;  %v1412_v15 = vpack.i.bf16 %v675_v2, %v678_v62 }
  0xfc   : > { %v877_v22 = vpop.permute.xlu2 %876 }
  0xfd   : > { %1353 = vmatpush.xpose.msk.msrb.mxu3 %vm680_vm1, %v877_v22 }
 0x104   : > { %v975_v31 = vpop.permute.xlu2 %974 }
 0x10b   : > { %v771_v23 = vpop.permute.xlu1 %770 }
 0x10c   : > { %v871_v36 = vpop.permute.xlu2 %870 }
 0x113   : > { %v773_v25 = vpop.permute.xlu1 %772 }
 0x114   : > { %v777_v24 = vpop.permute.xlu0 %776  ;;  %v971_v44 = vpop.permute.xlu2 %970 }
 0x115   : > { %1347 = vmatpush.xpose.msk.msrb.mxu1 %vm680_vm1, %v777_v24 }
 0x11b   : > { %v973_v33 = vpop.permute.xlu1 %972 }
 0x11d   : > { %v775_v29 = vpop.permute.xlu0 %774 }
 0x11e   : > { %1348 = vmatpush.xpose.msk.msrb.mxu1 %vm680_vm1, %v775_v29 }
 0x121   : > { %1349 = vmatmul.msk.f32.vlgmr.msrb.gmra.mxu1 %vm680_vm1, %v771_v23 }
 0x122   : > { %1359 = vmatpush.xpose.msk.msra.mxu1 %vm680_vm1, %v975_v31 }
 0x123   : > { %v873_v39 = vpop.permute.xlu1 %872 }
 0x125   : > { %v875_v34 = vpop.permute.xlu0 %874 }
 0x126   : > { %1360 = vmatpush.xpose.msk.msra.mxu1 %vm680_vm1, %v973_v33  ;;  %1354 = vmatpush.xpose.msk.msrb.mxu3 %vm680_vm1, %v875_v34 }
 0x129   : > { %1350 = vmatmul.msk.f32.gmra.mxu1 %vm680_vm1, %v773_v25  ;;  %1355 = vmatmul.msk.f32.vlgmr.msrb.gmra.mxu3 %vm680_vm1, %v871_v36 }
 0x12d   : > { %v710_v37 = vpop.f32.mrf.mxu3  ;;  %v969_v40 = vpop.permute.xlu0 %968 }
 0x12e   : > { %v716_v38 = vmul.f32 0.35355338, %v710_v37 }
 0x130   : > { %v719_v41 = vsel %vm718_vm2, %v716_v38, -inf }
 0x131   : > { %1356 = vmatmul.msk.f32.gmra.mxu3 %vm680_vm1, %v873_v39  ;;  %1361 = vmatmul.msk.f32.vlgmr.msra.gmra.mxu1 %vm680_vm1, %v969_v40 }
 0x132   : > { %720 = vmax.xlane.f32.xlu1 %v719_v41 }
 0x135   : > { %v713_v42 = vpop.f32.mrf.mxu3 }
 0x136   : > { %v717_v43 = vmul.f32 0.35355338, %v713_v42 }
 0x138   : > { %v722_v45 = vsel %vm718_vm2, %v717_v43, -inf }
 0x139   : > { %1362 = vmatmul.msk.f32.gmra.mxu1 %vm680_vm1, %v971_v44  ;;  %723 = vmax.xlane.f32.xlu2 %v722_v45 }
 0x19e   : > { %v803_v46 = vpop.f32.mrf.mxu1 }
 0x19f   : > { %v809_v47 = vmul.f32 0.35355338, %v803_v46 }
 0x1a1   : > { %v811_v48 = vsel %vm718_vm2, %v809_v47, -inf }
 0x1a2   : > { %812 = vmax.xlane.f32.xlu0 %v811_v48 }
 0x1a5   : > { %v721_v50 = vpop.xlane.xlu1 %720 }
 0x1a6   : > { %v725_v51 = vsub.f32 %v716_v38, %v721_v50  ;;  %v806_v52 = vpop.f32.mrf.mxu1 }
 0x1a7   : > { %v810_v53 = vmul.f32 0.35355338, %v806_v52 }
 0x1a8   : > { %v727_v54 = vmul.f32 1.442695, %v725_v51 }
 0x1a9   : > { %v814_v55 = vsel %vm718_vm2, %v810_v53, -inf }
 0x1aa   : > { %1433 = vpow2.f32 %v727_v54  ;;  %815 = vmax.xlane.f32.xlu2 %v814_v55 }
 0x1ac   : > { %v903_v57 = vpop.f32.mrf.mxu3  ;;  %v724_v59 = vpop.xlane.xlu2 %723 }
 0x1ad   : > { %v909_v58 = vmul.f32 0.35355338, %v903_v57  ;;  %v726_v1 = vsub.f32 %v717_v43, %v724_v59 }
 0x1ae   : > { %v1001_v61 = vpop.f32.mrf.mxu1 }
 0x1af   : > { %v911_v63 = vsel %vm718_vm2, %v909_v58, -inf  ;;  %v729_v4 = vmul.f32 1.442695, %v726_v1  ;;  %v1007_v11 = vmul.f32 0.35355338, %v1001_v61 }
 0x1b0   : > { %v1434_v0 = vpop.eup %1433  ;;  %912 = vmax.xlane.f32.xlu1 %v911_v63 }
 0x1b1   : > { %v731_v3 = vsel %vm718_vm2, %v1434_v0, 0.0  ;;  %1435 = vpow2.f32 %v729_v4  ;;  %v1009_v13 = vsel %vm718_vm2, %v1007_v11, -inf }
 0x1b2   : > { %732 = vadd.xlane.f32.xlu2 %v731_v3 }
 0x1b4   : > { %v906_v5 = vpop.f32.mrf.mxu3 }
 0x1b5   : > { %v1747_v6 = vmul.f32 0.35355338, %v906_v5 }
 0x1b6   : > { %v1004_v7 = vpop.f32.mrf.mxu1 }
 0x1b7   : > { %v1008_v8 = vmul.f32 0.35355338, %v1004_v7  ;;  %v914_v9 = vsel %vm718_vm2, %v1747_v6, -inf  ;;  %v1436_v12 = vpop.eup %1435 }
 0x1b8   : > { %915 = vmax.xlane.f32.xlu0 %v914_v9  ;;  %v734_v14 = vsel %vm718_vm2, %v1436_v12, 0.0 }
 0x1b9   : > { %v1012_v10 = vsel %vm718_vm2, %v1008_v8, -inf }
 0x1ba   : > { %1013 = vmax.xlane.f32.xlu2 %v1012_v10 }
 0x1c0   : > { %1010 = vmax.xlane.f32.xlu0 %v1009_v13 }
 0x1c2   : > { %735 = vadd.xlane.f32.xlu2 %v734_v14 }
 0x1d4   : > { %1413 = vrot.lane.b32.xlu0 %v1412_v15, %s1551_s25 }
 0x215   : > { %v813_v16 = vpop.xlane.xlu0 %812 }
 0x216   : > { %v817_v17 = vsub.f32 %v809_v47, %v813_v16 }
 0x218   : > { %v819_v18 = vmul.f32 1.442695, %v817_v17 }
 0x21a   : > { %1437 = vpow2.f32 %v819_v18 }
 0x21d   : > { %v816_v19 = vpop.xlane.xlu2 %815 }
 0x21e   : > { %v818_v20 = vsub.f32 %v810_v53, %v816_v19 }
 0x220   : > { %v1438_v21 = vpop.eup %1437  ;;  %v821_v22 = vmul.f32 1.442695, %v818_v20 }
 0x221   : > { %v823_v23 = vsel %vm718_vm2, %v1438_v21, 0.0 }
 0x222   : > { %1439 = vpow2.f32 %v821_v22  ;;  %824 = vadd.xlane.f32.xlu1 %v823_v23  ;;  %v1099_v22 = vld [vmem:[#allocation4 + $0x10] sm:$0xff]  ;;  %v1098_v23 = vld [vmem:[#allocation4 + $0x8] sm:$0xff] }
 0x223   : > { %v913_v24 = vpop.xlane.xlu1 %912 }
 0x224   : > { %v917_v25 = vsub.f32 %v909_v58, %v913_v24 }
 0x225   : > { %v733_v26 = vpop.xlane.xlu2 %732 }
 0x226   : > { %v919_v27 = vmul.f32 1.442695, %v917_v25  ;;  %1441 = vrcp.f32 %v733_v26  ;;  %v1097_v26 = vld [vmem:[#allocation4] sm:$0xff] }
 0x228   : > { %v1440_v28 = vpop.eup %1439  ;;  %1443 = vpow2.f32 %v919_v27 }
 0x229   : > { %v826_v29 = vsel %vm718_vm2, %v1440_v28, 0.0 }
 0x22a   : > { %827 = vadd.xlane.f32.xlu1 %v826_v29 }
 0x22b   : > { %v916_v30 = vpop.xlane.xlu0 %915 }
 0x22c   : > { %v1442_v31 = vpop.eup %1441  ;;  %v918_v48 = vsub.f32 %v1747_v6, %v916_v30 }
 0x22d   : > { %v1014_v32 = vpop.xlane.xlu2 %1013  ;;  %v739_v33 = vmul.f32 %v1442_v31, %v1434_v0 }
 0x22e   : > { %v1444_v34 = vpop.eup %1443  ;;  %v1016_v35 = vsub.f32 %v1008_v8, %v1014_v32  ;;  %v921_v49 = vmul.f32 1.442695, %v918_v48 }
 0x22f   : > { %1345 = vmatmul.msk.f32.vlgmr.msrb.gmra.mxu0 %vm718_vm2, %v739_v33  ;;  %v923_v36 = vsel %vm718_vm2, %v1444_v34, 0.0 }
 0x230   : > { %v1019_v37 = vmul.f32 1.442695, %v1016_v35  ;;  %924 = vadd.xlane.f32.xlu2 %v923_v36 }
 0x232   : > { %1445 = vpow2.f32 %v1019_v37 }
 0x233   : > { %v1011_v38 = vpop.xlane.xlu0 %1010 }
 0x234   : > { %v1015_v39 = vsub.f32 %v1007_v11, %v1011_v38 }
 0x235   : > { %v736_v40 = vpop.xlane.xlu2 %735 }
 0x236   : > { %v1017_v41 = vmul.f32 1.442695, %v1015_v39  ;;  %1447 = vrcp.f32 %v736_v40  ;;  %v1430_v39 = vld [vmem:[%s1815_s11] ss:$0 sm:$0xff] }
 0x238   : > { %v1446_v42 = vpop.eup %1445  ;;  %1449 = vpow2.f32 %v1017_v41 }
 0x239   : > { %v1024_v43 = vsel %vm718_vm2, %v1446_v42, 0.0  ;;  %1451 = vpow2.f32 %v921_v49 }
 0x23a   : > { %1025 = vadd.xlane.f32.xlu0 %v1024_v43 }
 0x23c   : > { %v1448_v44 = vpop.eup %1447 }
 0x23d   : > { %v740_v45 = vmul.f32 %v1448_v44, %v1436_v12 }
 0x23e   : > { %v1450_v46 = vpop.eup %1449 }
 0x23f   : > { %1346 = vmatmul.msk.f32.gmra.mxu0 %vm718_vm2, %v740_v45  ;;  %v1021_v47 = vsel %vm718_vm2, %v1450_v46, 0.0  ;;  %v1452_v53 = vpop.eup %1451 }
 0x240   : > { %1022 = vadd.xlane.f32.xlu1 %v1021_v47  ;;  %v926_v54 = vsel %vm718_vm2, %v1452_v53, 0.0 }
 0x246   : > { %v1414_v50 = vpop.permute.xlu0 %1413 }
 0x247   : > { %v1415_v51 = vunpack.i.l.bf16 %v1414_v50  ;;  %v1416_v52 = vunpack.i.h.bf16 %v1414_v50  ;;  %v1557_v50 = vmov 32.0  }
 0x248   : > { %1423 = vrot.lane.b32.xlu2 %v1412_v15, %s1552_s23  ;;  %s556_s23 = scalar_lea.vmem %s1807_s3, %s1660_s28 }
 0x249   : > { %861 = vmatpush.msrb.mxu2 %v1415_v51  ;;  %v1134_v41 = vld [vmem:[%s556_s23] sm:$0xff] }
 0x24b   : > { %862 = vmatpush.msrb.mxu2 %v1416_v52 }
 0x259   : > { %1418 = vrot.lane.b32.xlu1 %v1412_v15, %s1553_s27 }
 0x283   : > { %927 = vadd.xlane.f32.xlu1 %v926_v54 }
 0x295   : > { %v825_v55 = vpop.xlane.xlu1 %824 }
 0x296   : > { %1453 = vrcp.f32 %v825_v55 }
 0x29c   : > { %v1454_v56 = vpop.eup %1453 }
 0x29d   : > { %v828_v57 = vpop.xlane.xlu1 %827  ;;  %v831_v58 = vmul.f32 %v1454_v56, %v1438_v21  ;;  %v1100_v21 = vld [vmem:[#allocation4 + $0x18] sm:$0xff] }
 0x29e   : > { %1455 = vrcp.f32 %v828_v57  ;;  %1123 = vmatpush.msra.mxu3 %v1100_v21 }
 0x29f   : > { %1351 = vmatmul.msk.f32.vlgmr.msrb.gmra.mxu2 %vm718_vm2, %v831_v58 }
 0x2a0   : > { %1124 = vmatpush.msra.mxu3 %v1099_v22 }
 0x2a2   : > { %1125 = vmatpush.msra.mxu3 %v1098_v23 }
 0x2a3   : > { %v925_v59 = vpop.xlane.xlu2 %924 }
 0x2a4   : > { %v1456_v60 = vpop.eup %1455  ;;  %1457 = vrcp.f32 %v925_v59  ;;  %1126 = vmatpush.msra.mxu3 %v1097_v26 }
 0x2a5   : > { %v832_v61 = vmul.f32 %v1456_v60, %v1440_v28 }
 0x2a7   : > { %1352 = vmatmul.msk.f32.gmra.mxu2 %vm718_vm2, %v832_v61 }
 0x2aa   : > { %v1458_v63 = vpop.eup %1457 }
 0x2ab   : > { %v1424_v62 = vpop.permute.xlu2 %1423  ;;  %v931_v2 = vmul.f32 %v1458_v63, %v1444_v34 }
 0x2ac   : > { %v1425_v0 = vunpack.i.l.bf16 %v1424_v62  ;;  %v1426_v1 = vunpack.i.h.bf16 %v1424_v62  ;;  %v764_v15 = vpop.f32.mrf.mxu0 }
 0x2ad   : > { %v1026_v4 = vpop.xlane.xlu0 %1025 }
 0x2ae   : > { %959 = vmatpush.msra.mxu0 %v1425_v0 }
 0x2b0   : > { %960 = vmatpush.msra.mxu0 %v1426_v1 }
 0x2b1   : > { %1357 = vmatmul.msk.f32.vlgmr.msra.gmra.mxu0 %vm718_vm2, %v931_v2 }
 0x2b3   : > { %v1023_v3 = vpop.xlane.xlu1 %1022 }
 0x2b4   : > { %1459 = vrcp.f32 %v1023_v3 }
 0x2b5   : > { %1461 = vrcp.f32 %v1026_v4 }
 0x2ba   : > { %v1460_v6 = vpop.eup %1459 }
 0x2bb   : > { %v1029_v9 = vmul.f32 %v1460_v6, %v1450_v46  ;;  %v1462_v10 = vpop.eup %1461  ;;  %v1135_v46 = vld [vmem:[%s556_s23 + $0x8] sm:$0xff] }
 0x2bc   : > { %v1030_v11 = vmul.f32 %v1462_v10, %v1446_v42  ;;  %v767_v17 = vpop.f32.mrf.mxu0 }
 0x2cb   : > { %v1419_v5 = vpop.permute.xlu1 %1418 }
 0x2cc   : > { %v1420_v7 = vunpack.i.l.bf16 %v1419_v5  ;;  %v1421_v8 = vunpack.i.h.bf16 %v1419_v5 }
 0x2ce   : > { %1057 = vmatpush.msra.mxu2 %v1420_v7 }
 0x2d0   : > { %1058 = vmatpush.msra.mxu2 %v1421_v8 }
 0x2d1   : > { %1363 = vmatmul.msk.f32.vlgmr.msra.gmra.mxu2 %vm718_vm2, %v1029_v9 }
 0x2d9   : > { %1364 = vmatmul.msk.f32.gmra.mxu2 %vm718_vm2, %v1030_v11 }
 0x2f6   : > { %v928_v12 = vpop.xlane.xlu1 %927 }
 0x2f7   : > { %1463 = vrcp.f32 %v928_v12  ;;  %v1431_v12 = vld [vmem:[%s1816_s12] ss:$0 sm:$0xff] }
 0x2f8   : > { %1465 = vrcp.f32 %v1557_v50 }
 0x2fd   : > { %v1464_v13 = vpop.eup %1463 }
 0x2fe   : > { %v932_v14 = vmul.f32 %v1464_v13, %v1452_v53  ;;  %v1466_v51 = vpop.eup %1465 }
 0x2ff   : > { %v1145_v52 = vmul.f32 32.0, %v1466_v51  ;;  %vm1149_vm4 = vweird.f32 %v1466_v51 }
 0x300   : > { %1358 = vmatmul.msk.f32.gmra.mxu0 %vm718_vm2, %v932_v14  ;;  %v1432_v14 = vld [vmem:[%s1817_s13] ss:$0 sm:$0xff] }
 0x301   : > { %v1146_v53 = vsub.f32 1.0, %v1145_v52 }
 0x303   : > { %v1147_v54 = vmul.f32 %v1466_v51, %v1146_v53 }
 0x305   : > { %v1148_v55 = vadd.f32 %v1466_v51, %v1147_v54 }
 0x307   : > { %v1150_v56 = vsel %vm1149_vm4, %v1466_v51, %v1148_v55 }
 0x322   : > { %v864_v16 = vpop.f32.mrf.mxu2 }
 0x323   : > { %1068 = vrot.lane.b32.xlu2 %v864_v16, %s1554_s21 }
 0x32a   : > { %v867_v19 = vpop.f32.mrf.mxu2 }
 0x32e   : > { %v962_v18 = vpop.f32.mrf.mxu0 }
 0x32f   : > { %1076 = vrot.lane.b32.xlu2 %v962_v18, %s1555_s22 }
 0x337   : > { %1070 = vrot.lane.b32.xlu2 %v867_v19, %s1554_s21  ;;  %s561_s21 = scalar_lea.vmem %s1818_s14, %s1660_s28 }
 0x354   : > { %v1060_v20 = vpop.f32.mrf.mxu2 }
 0x355   : > { %1084 = vrot.lane.b32.xlu0 %v1060_v20, %s1556_s17 }
 0x35c   : > { %v1063_v25 = vpop.f32.mrf.mxu2 }
 0x37d   : > { %v965_v24 = vpop.f32.mrf.mxu0  ;;  %v1069_v27 = vpop.permute.xlu2 %1068 }
 0x37e   : > { %1078 = vrot.lane.b32.xlu2 %v965_v24, %s1555_s22  ;;  %v1090_v29 = vsel %vm680_vm1, %v764_v15, %v1069_v27 }
 0x386   : > { %1086 = vrot.lane.b32.xlu2 %v1063_v25, %s1556_s17 }
 0x389   : > { %v1077_v28 = vpop.permute.xlu2 %1076 }
 0x38a   : > { %v1092_v30 = vsel %vm718_vm2, %v1090_v29, %v1077_v28 }
 0x391   : > { %v1071_v33 = vpop.permute.xlu2 %1070 }
 0x392   : > { %v1091_v35 = vsel %vm680_vm1, %v767_v17, %v1071_v33 }
 0x3c7   : > { %v1085_v31 = vpop.permute.xlu0 %1084 }
 0x3c8   : > { %v1095_v32 = vsel %vm1094_vm3, %v1092_v30, %v1085_v31 }
 0x3c9   : > { %1365 = vmatmul.msk.f32.vlgmr.msra.gmra.mxu3 %vm576_vm0, %v1095_v32 }
 0x3d8   : > { %v1079_v34 = vpop.permute.xlu2 %1078 }
 0x3d9   : > { %v1093_v36 = vsel %vm718_vm2, %v1091_v35, %v1079_v34 }
 0x3e0   : > { %v1087_v37 = vpop.permute.xlu2 %1086 }
 0x3e1   : > { %v1096_v38 = vsel %vm1094_vm3, %v1093_v36, %v1087_v37 }
 0x3e2   : > { %1366 = vmatmul.msk.f32.gmra.mxu3 %vm576_vm0, %v1096_v38 }
 0x44c   : > { %v1128_v40 = vpop.f32.mrf.mxu3 }
 0x44d   : > { %v1129_v42 = vadd.f32 %v1430_v39, %v1128_v40 }
 0x44f   : > { %v1136_v43 = vadd.f32 %v1134_v41, %v1129_v42 }
 0x451   : > { %v1138_v44 = vsel %vm576_vm0, %v1136_v43, 0.0 }
 0x452   : > { %1139 = vadd.xlane.f32.xlu0 %v1138_v44 }
 0x465   : > { %v1131_v45 = vpop.f32.mrf.mxu3 }
 0x466   : > { %v1132_v47 = vadd.f32 %v1430_v39, %v1131_v45 }
 0x468   : > { %v1137_v48 = vadd.f32 %v1135_v46, %v1132_v47 }
 0x46a   : > { %v1141_v49 = vsel %vm576_vm0, %v1137_v48, 0.0 }
 0x46b   : > { %1142 = vadd.xlane.f32.xlu1 %v1141_v49 }
 0x4c5   : > { %v1140_v57 = vpop.xlane.xlu0 %1139 }
 0x4c6   : > { %v1151_v58 = vmul.f32 %v1150_v56, %v1140_v57 }
 0x4c8   : > { %v1153_v59 = vsub.f32 %v1136_v43, %v1151_v58 }
 0x4ca   : > { %v1155_v60 = vmul.f32 %v1153_v59, %v1153_v59 }
 0x4cc   : > { %v1157_v61 = vsel %vm576_vm0, %v1155_v60, 0.0 }
 0x4cd   : > { %1158 = vadd.xlane.f32.xlu2 %v1157_v61 }
 0x4de   : > { %v1143_v62 = vpop.xlane.xlu1 %1142 }
 0x4df   : > { %v1152_v63 = vmul.f32 %v1150_v56, %v1143_v62 }
 0x4e1   : > { %v1154_v0 = vsub.f32 %v1137_v48, %v1152_v63 }
 0x4e3   : > { %v1156_v1 = vmul.f32 %v1154_v0, %v1154_v0 }
 0x4e5   : > { %v1160_v2 = vsel %vm576_vm0, %v1156_v1, 0.0 }
 0x4e6   : > { %1161 = vadd.xlane.f32.xlu1 %v1160_v2 }
 0x540   : > { %v1159_v3 = vpop.xlane.xlu2 %1158 }
 0x541   : > { %v1163_v4 = vmul.f32 %v1159_v3, %v1150_v56 }
 0x543   : > { %v1165_v5 = vadd.f32 1e-05, %v1163_v4 }
 0x545   : > { %1467 = vrsqrt.f32 %v1165_v5  ;;  %vm1173_vm6 = vweird.f32 %v1165_v5 }
 0x54b   : > { %v1468_v6 = vpop.eup %1467 }
 0x54c   : > { %v1168_v7 = vmul.f32 %v1468_v6, %v1165_v5  ;;  %vm1174_vm5 = vweird.f32 %v1468_v6 }
 0x54d   : > { %vm1175_vm7 = vmor %vm1173_vm6, %vm1174_vm5 }
 0x54e   : > { %v1169_v8 = vmul.f32 %v1468_v6, %v1168_v7 }
 0x550   : > { %v1170_v9 = vmul.f32 0.5, %v1169_v8 }
 0x552   : > { %v1171_v10 = vsub.f32 1.5, %v1170_v9 }
 0x554   : > { %v1172_v11 = vmul.f32 %v1468_v6, %v1171_v10 }
 0x556   : > { %v1176_v13 = vsel %vm1175_vm7, %v1468_v6, %v1172_v11 }
 0x557   : > { %v1187_v15 = vmul.f32 %v1176_v13, %v1153_v59 }
 0x559   : > { %v1193_v16 = vmul.f32 %v1431_v12, %v1187_v15  ;;  %v1162_v17 = vpop.xlane.xlu1 %1161 }
 0x55a   : > { %v1164_v18 = vmul.f32 %v1162_v17, %v1150_v56 }
 0x55b   : > { %v1199_v19 = vadd.f32 %v1432_v14, %v1193_v16 }
 0x55c   : > { %v1166_v20 = vadd.f32 1e-05, %v1164_v18 }
 0x55d   : > { %1201 = vst.msk [vmem:[%s561_s21] sm:$0xff] %vm576_vm0, %v1199_v19 }
 0x55e   : > { %1469 = vrsqrt.f32 %v1166_v20  ;;  %vm1183_vm9 = vweird.f32 %v1166_v20 }
 0x564   : > { %v1470_v21 = vpop.eup %1469 }
 0x565   : > { %v1178_v22 = vmul.f32 %v1470_v21, %v1166_v20  ;;  %vm1184_vm8 = vweird.f32 %v1470_v21 }
 0x566   : > { %vm1185_vm10 = vmor %vm1183_vm9, %vm1184_vm8 }
 0x567   : > { %v1179_v23 = vmul.f32 %v1470_v21, %v1178_v22 }
 0x569   : > { %v1180_v24 = vmul.f32 0.5, %v1179_v23 }
 0x56b   : > { %v1181_v25 = vsub.f32 1.5, %v1180_v24 }
 0x56d   : > { %v1182_v26 = vmul.f32 %v1470_v21, %v1181_v25 }
 0x56f   : > { %v1186_v27 = vsel %vm1185_vm10, %v1470_v21, %v1182_v26 }
 0x570   : > { %v1188_v28 = vmul.f32 %v1186_v27, %v1154_v0 }
 0x572   : > { %v1194_v29 = vmul.f32 %v1431_v12, %v1188_v28 }
 0x574   : > { %v1200_v30 = vadd.f32 %v1432_v14, %v1194_v29 }
 0x576   : > { %1202 = vst.msk [vmem:[%s561_s21 + $0x8] sm:$0xff] %vm576_vm0, %v1200_v30 }
 0x577 PF: > { %s26_s29 = sadd.s32 1, %s1545_s29  }
 0x578   : > { %p23_p7 = scmp.ge.s32.totalorder %s26_s29, 4  }
 0x57a   :  { %25 = sbr.rel (!%p23_p7) target bundleno = 2 (0x2), region = 124 }
 0x57f   :  { %1224 = vsyncpa [#allocation3], 1 }
 0x580   :  { %1226 = vsyncpa [#allocation3 + $0x1], 1 }
 0x581   :  { %1227 = vsyncpa [#allocation5], 1 }

// kernel: transformer_forward.13
= control target key start
LH: loop header
LB: loop body
LE: loop exit
PB: predicated region body
PF: predicated region fallthrough
CT: control target
= control target key end

     0   :  { %s2124_s0 = inlined_call_operand.vmem [shape: f32[2,16,32], index: 0, kind: input, shape index: {}, may-alias: {0,1}]   ;;  %s2125_s1 = inlined_call_operand.vmem [shape: f32[2,16,32], index: 1, kind: input, shape index: {}, may-alias: {0,1}]   ;;  %s2126_s2 = inlined_call_operand.vmem [shape: f32[2,16,32], index: 2, kind: input, shape index: {}, may-alias: {2,3}]   ;;  %s2127_s3 = inlined_call_operand.vmem [shape: f32[2,16,32], index: 3, kind: input, shape index: {}, may-alias: {2,3}]   ;;  %s2128_s4 = inlined_call_operand.vmem [shape: f32[32,32], index: 4, kind: input, shape index: {}]   ;;  %s2129_s5 = inlined_call_operand.hbm [shape: f32[1,32], index: 5, kind: input, shape index: {}]   ;;  %s2130_s6 = inlined_call_operand.vmem [shape: f32[32,32], index: 6, kind: input, shape index: {}]   ;;  %s2131_s7 = inlined_call_operand.hbm [shape: f32[1,32], index: 7, kind: input, shape index: {}]   ;;  %s2132_s8 = inlined_call_operand.vmem [shape: f32[32,32], index: 8, kind: input, shape index: {}]   ;;  %s2133_s9 = inlined_call_operand.hbm [shape: f32[1,32], index: 9, kind: input, shape index: {}]   ;;  %s2134_s10 = inlined_call_operand.vmem [shape: f32[32,32], index: 10, kind: input, shape index: {}]   ;;  %s2135_s11 = inlined_call_operand.hbm [shape: f32[1,32], index: 11, kind: input, shape index: {}]   ;;  %s2136_s12 = inlined_call_operand.hbm [shape: f32[1,32], index: 12, kind: input, shape index: {}]   ;;  %s2137_s13 = inlined_call_operand.hbm [shape: f32[1,32], index: 13, kind: input, shape index: {}]   ;;  %s2138_s14 = inlined_call_operand.vmem [shape: f32[2,16,32], index: 14, kind: output, shape index: {}]  }
   0x1   :  { %2139 = sst [smem:[#allocation16_spill]] %s2129_s5 }
   0x2   :  { %2140 = sst [smem:[#allocation17_spill]] %s2131_s7 }
   0x3   :  { %19 = vsyncpa [#allocation3], 0 }
   0x4   :  { %20 = vsyncpa [#allocation5], 0 }
   0x5   :  { %21 = vsyncpa [#allocation8], 0 }
   0x6   :  { %22 = vsyncpa [#allocation11], 0  ;;  %s1901_s29 = smov 0  }
   0x7 LB: > { %s2141_s7 = sld [smem:[#allocation17_spill]]  ;;  %s1910_s17 = sadd.s32 4294967295, %s1811_s29   ;;  %s1811_s29 = sphi %s1901_s29, %s28_s29  }
   0x8   : > { %p1410_p0 = scmp.ge.s32.totalorder %s1811_s29, 1  ;;  %p373_p1 = scmp.lt.s32.totalorder %s1811_s29, 3 }
   0x9   : > { %p1517_p2 = scmp.eq.s32.totalorder %s1910_s17, 0  ;;  %s1813_s19 = smov [#allocation4]  }
   0xa   : > { %p1915_p3 = pnand %p1410_p0, %p373_p1  ;;  %s405_s20 = sshll.u32 %s1813_s19, 4  ;;  %s406_s20 = int_to_ptr.vmem [resolvable:$true] %s405_s20 }
   0xb   : > { %s433_s23 = sshll.u32 %s2135_s11, 4  ;;  %s2143_s5 = sld [smem:[#allocation16_spill]]  ;;  %s434_s23 = int_to_ptr.hbm [resolvable:$true] %s433_s23 }
   0xc   : > { %p1498_p4 = pneg %p1915_p3  ;;  %s1814_s28 = smov [#allocation7]  }
   0xd   : > { %s403_s16 = sshll.u32 %s2141_s7, 4  ;;  %s435_s30 = sshll.u32 %s1814_s28, 4  ;;  %s404_s16 = int_to_ptr.hbm [resolvable:$true] %s403_s16  ;;  %s436_s30 = int_to_ptr.vmem [resolvable:$true] %s435_s30 }
   0xe   : > { %p1929_p5 = pnand %p1517_p2, %p1498_p4  ;;  %s1815_s15 = smov [#allocation2]  }
   0xf   : > { %s390_s19 = sshll.u32 %s1815_s15, 4  ;;  %s418_s24 = sshll.u32 %s2133_s9, 4  ;;  %s391_s19 = int_to_ptr.vmem [resolvable:$true] %s390_s19  ;;  %s419_s24 = int_to_ptr.hbm [resolvable:$true] %s418_s24 }
  0x10   : > { %1504 = dma.hbm_to_vmem [thread:$0]  (!%p1929_p5), %s404_s16, 16, %s406_s20, [#allocation5]  }
  0x11   : > { %s388_s26 = sshll.u32 %s2143_s5, 4  ;;  %s445_s5 = sshll.u32 %s2136_s12, 4  ;;  %s389_s26 = int_to_ptr.hbm [resolvable:$true] %s388_s26  ;;  %s446_s5 = int_to_ptr.hbm [resolvable:$true] %s445_s5 }
  0x12   : > { %1510 = dma.hbm_to_vmem [thread:$0]  (!%p1929_p5), %s434_s23, 16, %s436_s30, [#allocation8]  }
  0x13   : > { %1501 = dma.hbm_to_vmem [thread:$0]  (!%p1929_p5), %s389_s26, 16, %s391_s19, [#allocation3]  }
  0x14   : > { %s1816_s7 = smov [#allocation6]   ;;  %s1817_s20 = smov [#allocation9]  }
  0x15   : > { %s420_s16 = sshll.u32 %s1816_s7, 4  ;;  %s447_s23 = sshll.u32 %s1817_s20, 4  ;;  %s421_s16 = int_to_ptr.vmem [resolvable:$true] %s420_s16  ;;  %s448_s23 = int_to_ptr.vmem [resolvable:$true] %s447_s23 }
  0x16   : > { %1507 = dma.hbm_to_vmem [thread:$0]  (!%p1929_p5), %s419_s24, 16, %s421_s16, [#allocation5]  }
  0x17   : > { %s457_s21 = sshll.u32 %s2137_s13, 4  ;;  %s1818_s26 = smov [#allocation10]   ;;  %s458_s21 = int_to_ptr.hbm [resolvable:$true] %s457_s21 }
  0x18   : > { %1513 = dma.hbm_to_vmem [thread:$0]  (!%p1929_p5), %s446_s5, 16, %s448_s23, [#allocation8]  }
  0x19   : > { %s459_s19 = sshll.u32 %s1818_s26, 4  ;;  %504 = sbr.rel (%p1915_p3) target bundleno = 1419 (0x58b), region = 76  ;;  %s460_s19 = int_to_ptr.vmem [resolvable:$true] %s459_s19 }
  0x1a   : > { %1516 = dma.hbm_to_vmem [thread:$0]  (!%p1929_p5), %s458_s21, 16, %s460_s19, [#allocation11]  }
  0x1e   : > { %1794 = dma.done.wait (%p1517_p2), [#allocation3], 16  }
  0x1f   : > { %1796 = vsyncadd (%p1517_p2), [#allocation3], 4294967280 }
  0x20   : > { %1798 = dma.done.wait (%p1517_p2), [#allocation5], 32  }
  0x21   : > { %1800 = vsyncadd (%p1517_p2), [#allocation5], 4294967264 }
  0x22   : > { %1802 = dma.done.wait (%p1517_p2), [#allocation8], 32  }
  0x23   : > { %1804 = vsyncadd (%p1517_p2), [#allocation8], 4294967264 }
  0x24   : > { %1806 = dma.done.wait (%p1517_p2), [#allocation11], 16  }
  0x25   : > { %1808 = vsyncadd (%p1517_p2), [#allocation11], 4294967280  ;;  %p591_p6 = scmp.lt.s32.totalorder %s1910_s17, 1  ;;  %v625_v0 = vld [vmem:[%s2128_s4 + $0x18] sm:$0xff]  ;;  %v624_v2 = vld [vmem:[%s2128_s4 + $0x10] sm:$0xff]  ;;  %vm630_vm0 = vcmask 261120  }
  0x26   : > { %v663_v1 = vld [vmem:[%s2130_s6 + $0x18] sm:$0xff]  ;;  %649 = vmatpush.msra.mxu0 %v625_v0  ;;  %v662_v3 = vld [vmem:[%s2130_s6 + $0x10] sm:$0xff]  ;;  %v623_v4 = vld [vmem:[%s2128_s4 + $0x8] sm:$0xff]  ;;  %s1819_s28 = smov 120   ;;  %vm734_vm1 = vcmask 64512   ;;  %s1820_s16 = smov 112  }
  0x27   : > { %s2146_s17 = smov (!%p591_p6, %s1910_s17), 1  ;;  %686 = vmatpush.msra.mxu1 %v663_v1  ;;  %v661_v5 = vld [vmem:[%s2130_s6 + $0x8] sm:$0xff]  ;;  %v622_v6 = vld [vmem:[%s2128_s4] sm:$0xff]  ;;  %v700_v26 = vld [vmem:[%s2132_s8 + $0x18] sm:$0xff]  ;;  %vm772_vm2 = vcmask 130048   ;;  %s1822_s24 = smov 8  }
  0x28   : > { %s1974_s5 = sshll.u32 %s2146_s17, 4  ;;  %650 = vmatpush.msra.mxu0 %v624_v2  ;;  %v660_v7 = vld [vmem:[%s2130_s6] sm:$0xff]  ;;  %v699_v27 = vld [vmem:[%s2132_s8 + $0x10] sm:$0xff]  ;;  %723 = vmatpush.msra.mxu2 %v700_v26  ;;  %v698_v28 = vld [vmem:[%s2132_s8 + $0x8] sm:$0xff]  ;;  %s1823_s25 = smov 16   ;;  %vm1148_vm3 = vcmask 195584  }
  0x29   : > { %s595_s20 = scalar_lea.vmem %s2124_s0, %s1974_s5  ;;  %s600_s21 = scalar_lea.vmem %s2125_s1, %s1974_s5  ;;  %687 = vmatpush.msra.mxu1 %v662_v3  ;;  %v1565_v12 = vld [vmem:[#allocation2] ss:$0 sm:$0xff]  ;;  %v1566_v16 = vld [vmem:[#allocation4] ss:$0 sm:$0xff]  ;;  %v1567_v56 = vld [vmem:[#allocation6] ss:$0 sm:$0xff] }
  0x2a   : > { %v616_v8 = vld [vmem:[%s595_s20] sm:$0xff]  ;;  %651 = vmatpush.msra.mxu0 %v623_v4  ;;  %v617_v10 = vld [vmem:[%s595_s20 + $0x8] sm:$0xff]  ;;  %s1821_s20 = smov 104   ;;  %s605_s18 = scalar_lea.vmem %s2126_s2, %s1974_s5  ;;  %724 = vmatpush.msra.mxu2 %v699_v27 }
  0x2b   : > { %v618_v9 = vld [vmem:[%s600_s21] sm:$0xff]  ;;  %688 = vmatpush.msra.mxu1 %v661_v5  ;;  %v619_v11 = vld [vmem:[%s600_s21 + $0x8] sm:$0xff] }
  0x2c   : > { %652 = vmatpush.msra.mxu0 %v622_v6  ;;  %v697_v30 = vld [vmem:[%s2132_s8] sm:$0xff]  ;;  %725 = vmatpush.msra.mxu2 %v698_v28  ;;  %v621_v35 = vld [vmem:[%s605_s18 + $0x8] sm:$0xff] }
  0x2d   : > { %689 = vmatpush.msra.mxu1 %v660_v7  ;;  %1435 = vmatmul.msk.f32.vlgmr.msra.gmra.mxu0 %vm630_vm0, %v616_v8  ;;  %v620_v32 = vld [vmem:[%s605_s18] sm:$0xff]  ;;  %s610_s18 = scalar_lea.vmem %s2127_s3, %s1974_s5 }
  0x2e   : > { %1437 = vmatmul.msk.f32.vlgmr.msra.gmra.mxu1 %vm630_vm0, %v618_v9  ;;  %726 = vmatpush.msra.mxu2 %v697_v30 }
  0x2f   : > { %1439 = vmatmul.msk.f32.vlgmr.msra.gmra.mxu2 %vm630_vm0, %v620_v32 }
  0x35   : > { %1436 = vmatmul.msk.f32.gmra.mxu0 %vm630_vm0, %v617_v10 }
  0x36   : > { %1438 = vmatmul.msk.f32.gmra.mxu1 %vm630_vm0, %v619_v11 }
  0x37   : > { %1440 = vmatmul.msk.f32.gmra.mxu2 %vm630_vm0, %v621_v35 }
  0xaa   : > { %v654_v13 = vpop.f32.mrf.mxu0 }
  0xab   : > { %v691_v14 = vpop.f32.mrf.mxu1  ;;  %v655_v15 = vadd.f32 %v1565_v12, %v654_v13 }
  0xac   : > { %v692_v21 = vadd.f32 %v1566_v16, %v691_v14 }
  0xad   : > { %824 = vrot.lane.b32.xlu1 %v655_v15, %s1819_s28 }
  0xb2   : > { %v657_v17 = vpop.f32.mrf.mxu0  ;;  %v728_v49 = vpop.f32.mrf.mxu2 }
  0xb3   : > { %v694_v18 = vpop.f32.mrf.mxu1  ;;  %v658_v19 = vadd.f32 %v1565_v12, %v657_v17  ;;  %v729_v2 = vadd.f32 %v1567_v56, %v728_v49 }
  0xb4   : > { %v695_v20 = vadd.f32 %v1566_v16, %v694_v18 }
  0xb5   : > { %826 = vrot.lane.b32.xlu1 %v658_v19, %s1819_s28 }
  0xb6   : > { %930 = vrot.lane.b32.xlu2 %v695_v20, %s1820_s16  ;;  %830 = vrot.lane.b32.xlu0 %v695_v20, %s1819_s28 }
  0xb7   : > { %1441 = vmatpush.xpose.msk.msra.mxu3 %vm734_vm1, %v695_v20 }
  0xba   : > { %v731_v60 = vpop.f32.mrf.mxu2 }
  0xbb   : > { %1442 = vmatpush.xpose.msk.msra.mxu3 %vm734_vm1, %v692_v21  ;;  %v732_v62 = vadd.f32 %v1567_v56, %v731_v60 }
  0xbd   : > { %1026 = vrot.lane.b32.xlu1 %v692_v21, %s1821_s20  ;;  %815 = vmatpush.msrb.mxu0 %v732_v62 }
  0xbe   : > { %1443 = vmatmul.msk.f32.vlgmr.msra.gmra.mxu3 %vm734_vm1, %v655_v15  ;;  %1028 = vrot.lane.b32.xlu2 %v695_v20, %s1821_s20 }
  0xbf   : > { %828 = vrot.lane.b32.xlu0 %v692_v21, %s1819_s28  ;;  %816 = vmatpush.msrb.mxu0 %v729_v2 }
  0xc5   : > { %926 = vrot.lane.b32.xlu1 %v658_v19, %s1820_s16 }
  0xc6   : > { %1444 = vmatmul.msk.f32.gmra.mxu3 %vm734_vm1, %v658_v19  ;;  %924 = vrot.lane.b32.xlu2 %v655_v15, %s1820_s16 }
  0xc7   : > { %928 = vrot.lane.b32.xlu0 %v692_v21, %s1820_s16 }
  0xce   : > { %1024 = vrot.lane.b32.xlu2 %v658_v19, %s1821_s20 }
  0xcf   : > { %1022 = vrot.lane.b32.xlu0 %v655_v15, %s1821_s20  ;;  %v1550_v15 = vpack.i.bf16 %v729_v2, %v732_v62 }
 0x110   : > { %v931_v22 = vpop.permute.xlu2 %930 }
 0x111   : > { %1453 = vmatpush.xpose.msk.msrb.mxu3 %vm734_vm1, %v931_v22 }
 0x118   : > { %v1029_v31 = vpop.permute.xlu2 %1028 }
 0x11f   : > { %v825_v23 = vpop.permute.xlu1 %824 }
 0x120   : > { %v925_v36 = vpop.permute.xlu2 %924 }
 0x127   : > { %v827_v25 = vpop.permute.xlu1 %826 }
 0x128   : > { %v831_v24 = vpop.permute.xlu0 %830  ;;  %v1025_v44 = vpop.permute.xlu2 %1024 }
 0x129   : > { %1447 = vmatpush.xpose.msk.msrb.mxu1 %vm734_vm1, %v831_v24 }
 0x12f   : > { %v1027_v33 = vpop.permute.xlu1 %1026 }
 0x131   : > { %v829_v29 = vpop.permute.xlu0 %828 }
 0x132   : > { %1448 = vmatpush.xpose.msk.msrb.mxu1 %vm734_vm1, %v829_v29 }
 0x135   : > { %1449 = vmatmul.msk.f32.vlgmr.msrb.gmra.mxu1 %vm734_vm1, %v825_v23 }
 0x136   : > { %1459 = vmatpush.xpose.msk.msra.mxu1 %vm734_vm1, %v1029_v31 }
 0x137   : > { %v927_v39 = vpop.permute.xlu1 %926 }
 0x139   : > { %v929_v34 = vpop.permute.xlu0 %928 }
 0x13a   : > { %1460 = vmatpush.xpose.msk.msra.mxu1 %vm734_vm1, %v1027_v33  ;;  %1454 = vmatpush.xpose.msk.msrb.mxu3 %vm734_vm1, %v929_v34 }
 0x13d   : > { %1450 = vmatmul.msk.f32.gmra.mxu1 %vm734_vm1, %v827_v25  ;;  %1455 = vmatmul.msk.f32.vlgmr.msrb.gmra.mxu3 %vm734_vm1, %v925_v36 }
 0x141   : > { %v764_v37 = vpop.f32.mrf.mxu3  ;;  %v1023_v40 = vpop.permute.xlu0 %1022 }
 0x142   : > { %v770_v38 = vmul.f32 0.35355338, %v764_v37 }
 0x144   : > { %v773_v41 = vsel %vm772_vm2, %v770_v38, -inf }
 0x145   : > { %1456 = vmatmul.msk.f32.gmra.mxu3 %vm734_vm1, %v927_v39  ;;  %1461 = vmatmul.msk.f32.vlgmr.msra.gmra.mxu1 %vm734_vm1, %v1023_v40 }
 0x146   : > { %774 = vmax.xlane.f32.xlu1 %v773_v41 }
 0x149   : > { %v767_v42 = vpop.f32.mrf.mxu3 }
 0x14a   : > { %v771_v43 = vmul.f32 0.35355338, %v767_v42 }
 0x14c   : > { %v776_v45 = vsel %vm772_vm2, %v771_v43, -inf }
 0x14d   : > { %1462 = vmatmul.msk.f32.gmra.mxu1 %vm734_vm1, %v1025_v44  ;;  %777 = vmax.xlane.f32.xlu2 %v776_v45 }
 0x1b2   : > { %v857_v46 = vpop.f32.mrf.mxu1 }
 0x1b3   : > { %v863_v47 = vmul.f32 0.35355338, %v857_v46 }
 0x1b5   : > { %v865_v48 = vsel %vm772_vm2, %v863_v47, -inf }
 0x1b6   : > { %866 = vmax.xlane.f32.xlu0 %v865_v48 }
 0x1b9   : > { %v775_v50 = vpop.xlane.xlu1 %774 }
 0x1ba   : > { %v779_v51 = vsub.f32 %v770_v38, %v775_v50  ;;  %v860_v52 = vpop.f32.mrf.mxu1 }
 0x1bb   : > { %v864_v53 = vmul.f32 0.35355338, %v860_v52 }
 0x1bc   : > { %v781_v54 = vmul.f32 1.442695, %v779_v51 }
 0x1bd   : > { %v868_v55 = vsel %vm772_vm2, %v864_v53, -inf }
 0x1be   : > { %1571 = vpow2.f32 %v781_v54  ;;  %869 = vmax.xlane.f32.xlu2 %v868_v55 }
 0x1c0   : > { %v957_v57 = vpop.f32.mrf.mxu3  ;;  %v778_v59 = vpop.xlane.xlu2 %777 }
 0x1c1   : > { %v963_v58 = vmul.f32 0.35355338, %v957_v57  ;;  %v780_v1 = vsub.f32 %v771_v43, %v778_v59 }
 0x1c2   : > { %v1055_v61 = vpop.f32.mrf.mxu1 }
 0x1c3   : > { %v965_v63 = vsel %vm772_vm2, %v963_v58, -inf  ;;  %v783_v4 = vmul.f32 1.442695, %v780_v1  ;;  %v1061_v11 = vmul.f32 0.35355338, %v1055_v61 }
 0x1c4   : > { %v1572_v0 = vpop.eup %1571  ;;  %966 = vmax.xlane.f32.xlu1 %v965_v63 }
 0x1c5   : > { %v785_v3 = vsel %vm772_vm2, %v1572_v0, 0.0  ;;  %1573 = vpow2.f32 %v783_v4  ;;  %v1063_v13 = vsel %vm772_vm2, %v1061_v11, -inf }
 0x1c6   : > { %786 = vadd.xlane.f32.xlu2 %v785_v3 }
 0x1c8   : > { %v960_v5 = vpop.f32.mrf.mxu3 }
 0x1c9   : > { %v2064_v6 = vmul.f32 0.35355338, %v960_v5 }
 0x1ca   : > { %v1058_v7 = vpop.f32.mrf.mxu1 }
 0x1cb   : > { %v1062_v8 = vmul.f32 0.35355338, %v1058_v7  ;;  %v968_v9 = vsel %vm772_vm2, %v2064_v6, -inf  ;;  %v1574_v12 = vpop.eup %1573 }
 0x1cc   : > { %969 = vmax.xlane.f32.xlu0 %v968_v9  ;;  %v788_v14 = vsel %vm772_vm2, %v1574_v12, 0.0 }
 0x1cd   : > { %v1066_v10 = vsel %vm772_vm2, %v1062_v8, -inf }
 0x1ce   : > { %1067 = vmax.xlane.f32.xlu2 %v1066_v10 }
 0x1d4   : > { %1064 = vmax.xlane.f32.xlu0 %v1063_v13 }
 0x1d6   : > { %789 = vadd.xlane.f32.xlu2 %v788_v14 }
 0x1e8   : > { %1551 = vrot.lane.b32.xlu0 %v1550_v15, %s1819_s28  ;;  %s1824_s28 = smov 24  }
 0x229   : > { %v867_v16 = vpop.xlane.xlu0 %866 }
 0x22a   : > { %v871_v17 = vsub.f32 %v863_v47, %v867_v16 }
 0x22c   : > { %v873_v18 = vmul.f32 1.442695, %v871_v17 }
 0x22e   : > { %1575 = vpow2.f32 %v873_v18 }
 0x231   : > { %v870_v19 = vpop.xlane.xlu2 %869 }
 0x232   : > { %v872_v20 = vsub.f32 %v864_v53, %v870_v19 }
 0x234   : > { %v1576_v21 = vpop.eup %1575  ;;  %v875_v22 = vmul.f32 1.442695, %v872_v20 }
 0x235   : > { %v877_v23 = vsel %vm772_vm2, %v1576_v21, 0.0 }
 0x236   : > { %1577 = vpow2.f32 %v875_v22  ;;  %878 = vadd.xlane.f32.xlu1 %v877_v23  ;;  %v1153_v22 = vld [vmem:[%s2134_s10 + $0x10] sm:$0xff]  ;;  %v1152_v23 = vld [vmem:[%s2134_s10 + $0x8] sm:$0xff] }
 0x237   : > { %v967_v24 = vpop.xlane.xlu1 %966 }
 0x238   : > { %v971_v25 = vsub.f32 %v963_v58, %v967_v24 }
 0x239   : > { %v787_v26 = vpop.xlane.xlu2 %786 }
 0x23a   : > { %v973_v27 = vmul.f32 1.442695, %v971_v25  ;;  %1579 = vrcp.f32 %v787_v26  ;;  %v1151_v26 = vld [vmem:[%s2134_s10] sm:$0xff] }
 0x23c   : > { %v1578_v28 = vpop.eup %1577  ;;  %1581 = vpow2.f32 %v973_v27 }
 0x23d   : > { %v880_v29 = vsel %vm772_vm2, %v1578_v28, 0.0 }
 0x23e   : > { %881 = vadd.xlane.f32.xlu1 %v880_v29 }
 0x23f   : > { %v970_v30 = vpop.xlane.xlu0 %969 }
 0x240   : > { %v1580_v31 = vpop.eup %1579  ;;  %v972_v48 = vsub.f32 %v2064_v6, %v970_v30 }
 0x241   : > { %v1068_v32 = vpop.xlane.xlu2 %1067  ;;  %v793_v33 = vmul.f32 %v1580_v31, %v1572_v0 }
 0x242   : > { %v1582_v34 = vpop.eup %1581  ;;  %v1070_v35 = vsub.f32 %v1062_v8, %v1068_v32  ;;  %v975_v49 = vmul.f32 1.442695, %v972_v48 }
 0x243   : > { %1445 = vmatmul.msk.f32.vlgmr.msrb.gmra.mxu0 %vm772_vm2, %v793_v33  ;;  %v977_v36 = vsel %vm772_vm2, %v1582_v34, 0.0 }
 0x244   : > { %v1073_v37 = vmul.f32 1.442695, %v1070_v35  ;;  %978 = vadd.xlane.f32.xlu2 %v977_v36 }
 0x246   : > { %1583 = vpow2.f32 %v1073_v37 }
 0x247   : > { %v1065_v38 = vpop.xlane.xlu0 %1064 }
 0x248   : > { %v1069_v39 = vsub.f32 %v1061_v11, %v1065_v38 }
 0x249   : > { %v790_v40 = vpop.xlane.xlu2 %789 }
 0x24a   : > { %v1071_v41 = vmul.f32 1.442695, %v1069_v39  ;;  %1585 = vrcp.f32 %v790_v40  ;;  %v1568_v39 = vld [vmem:[#allocation7] ss:$0 sm:$0xff] }
 0x24c   : > { %v1584_v42 = vpop.eup %1583  ;;  %1587 = vpow2.f32 %v1071_v41  ;;  %v1188_v41 = vld [vmem:[%s610_s18] sm:$0xff] }
 0x24d   : > { %v1078_v43 = vsel %vm772_vm2, %v1584_v42, 0.0  ;;  %1589 = vpow2.f32 %v975_v49 }
 0x24e   : > { %1079 = vadd.xlane.f32.xlu0 %v1078_v43 }
 0x250   : > { %v1586_v44 = vpop.eup %1585 }
 0x251   : > { %v794_v45 = vmul.f32 %v1586_v44, %v1574_v12 }
 0x252   : > { %v1588_v46 = vpop.eup %1587 }
 0x253   : > { %1446 = vmatmul.msk.f32.gmra.mxu0 %vm772_vm2, %v794_v45  ;;  %v1075_v47 = vsel %vm772_vm2, %v1588_v46, 0.0  ;;  %v1590_v53 = vpop.eup %1589 }
 0x254   : > { %1076 = vadd.xlane.f32.xlu1 %v1075_v47  ;;  %v980_v54 = vsel %vm772_vm2, %v1590_v53, 0.0 }
 0x25a   : > { %v1552_v50 = vpop.permute.xlu0 %1551 }
 0x25b   : > { %v1553_v51 = vunpack.i.l.bf16 %v1552_v50  ;;  %v1554_v52 = vunpack.i.h.bf16 %v1552_v50  ;;  %v1825_v50 = vmov 32.0  }
 0x25c   : > { %1561 = vrot.lane.b32.xlu2 %v1550_v15, %s1820_s16 }
 0x25d   : > { %915 = vmatpush.msrb.mxu2 %v1553_v51 }
 0x25f   : > { %916 = vmatpush.msrb.mxu2 %v1554_v52 }
 0x26d   : > { %1556 = vrot.lane.b32.xlu1 %v1550_v15, %s1821_s20 }
 0x297   : > { %981 = vadd.xlane.f32.xlu1 %v980_v54 }
 0x2a9   : > { %v879_v55 = vpop.xlane.xlu1 %878 }
 0x2aa   : > { %1591 = vrcp.f32 %v879_v55 }
 0x2b0   : > { %v1592_v56 = vpop.eup %1591 }
 0x2b1   : > { %v882_v57 = vpop.xlane.xlu1 %881  ;;  %v885_v58 = vmul.f32 %v1592_v56, %v1576_v21  ;;  %v1154_v21 = vld [vmem:[%s2134_s10 + $0x18] sm:$0xff] }
 0x2b2   : > { %1593 = vrcp.f32 %v882_v57  ;;  %1177 = vmatpush.msra.mxu3 %v1154_v21 }
 0x2b3   : > { %1451 = vmatmul.msk.f32.vlgmr.msrb.gmra.mxu2 %vm772_vm2, %v885_v58 }
 0x2b4   : > { %1178 = vmatpush.msra.mxu3 %v1153_v22 }
 0x2b6   : > { %1179 = vmatpush.msra.mxu3 %v1152_v23 }
 0x2b7   : > { %v979_v59 = vpop.xlane.xlu2 %978 }
 0x2b8   : > { %v1594_v60 = vpop.eup %1593  ;;  %1595 = vrcp.f32 %v979_v59  ;;  %1180 = vmatpush.msra.mxu3 %v1151_v26 }
 0x2b9   : > { %v886_v61 = vmul.f32 %v1594_v60, %v1578_v28 }
 0x2bb   : > { %1452 = vmatmul.msk.f32.gmra.mxu2 %vm772_vm2, %v886_v61 }
 0x2be   : > { %v1596_v63 = vpop.eup %1595 }
 0x2bf   : > { %v1562_v62 = vpop.permute.xlu2 %1561  ;;  %v985_v2 = vmul.f32 %v1596_v63, %v1582_v34 }
 0x2c0   : > { %v1563_v0 = vunpack.i.l.bf16 %v1562_v62  ;;  %v1564_v1 = vunpack.i.h.bf16 %v1562_v62  ;;  %v818_v15 = vpop.f32.mrf.mxu0 }
 0x2c1   : > { %v1080_v4 = vpop.xlane.xlu0 %1079 }
 0x2c2   : > { %1013 = vmatpush.msra.mxu0 %v1563_v0 }
 0x2c4   : > { %1014 = vmatpush.msra.mxu0 %v1564_v1 }
 0x2c5   : > { %1457 = vmatmul.msk.f32.vlgmr.msra.gmra.mxu0 %vm772_vm2, %v985_v2 }
 0x2c7   : > { %v1077_v3 = vpop.xlane.xlu1 %1076 }
 0x2c8   : > { %1597 = vrcp.f32 %v1077_v3 }
 0x2c9   : > { %1599 = vrcp.f32 %v1080_v4 }
 0x2ce   : > { %v1598_v6 = vpop.eup %1597 }
 0x2cf   : > { %v1083_v9 = vmul.f32 %v1598_v6, %v1588_v46  ;;  %v1600_v10 = vpop.eup %1599  ;;  %v1189_v46 = vld [vmem:[%s610_s18 + $0x8] sm:$0xff] }
 0x2d0   : > { %v1084_v11 = vmul.f32 %v1600_v10, %v1584_v42  ;;  %v821_v17 = vpop.f32.mrf.mxu0 }
 0x2df   : > { %v1557_v5 = vpop.permute.xlu1 %1556 }
 0x2e0   : > { %v1558_v7 = vunpack.i.l.bf16 %v1557_v5  ;;  %v1559_v8 = vunpack.i.h.bf16 %v1557_v5 }
 0x2e2   : > { %1111 = vmatpush.msra.mxu2 %v1558_v7 }
 0x2e4   : > { %1112 = vmatpush.msra.mxu2 %v1559_v8 }
 0x2e5   : > { %1463 = vmatmul.msk.f32.vlgmr.msra.gmra.mxu2 %vm772_vm2, %v1083_v9 }
 0x2ed   : > { %1464 = vmatmul.msk.f32.gmra.mxu2 %vm772_vm2, %v1084_v11 }
 0x30a   : > { %v982_v12 = vpop.xlane.xlu1 %981 }
 0x30b   : > { %1601 = vrcp.f32 %v982_v12  ;;  %v1569_v12 = vld [vmem:[#allocation9] ss:$0 sm:$0xff] }
 0x30c   : > { %1603 = vrcp.f32 %v1825_v50 }
 0x311   : > { %v1602_v13 = vpop.eup %1601 }
 0x312   : > { %v986_v14 = vmul.f32 %v1602_v13, %v1590_v53  ;;  %v1604_v51 = vpop.eup %1603 }
 0x313   : > { %v1199_v52 = vmul.f32 32.0, %v1604_v51  ;;  %vm1203_vm4 = vweird.f32 %v1604_v51 }
 0x314   : > { %1458 = vmatmul.msk.f32.gmra.mxu0 %vm772_vm2, %v986_v14  ;;  %v1570_v14 = vld [vmem:[#allocation10] ss:$0 sm:$0xff] }
 0x315   : > { %v1200_v53 = vsub.f32 1.0, %v1199_v52 }
 0x317   : > { %v1201_v54 = vmul.f32 %v1604_v51, %v1200_v53 }
 0x319   : > { %v1202_v55 = vadd.f32 %v1604_v51, %v1201_v54 }
 0x31b   : > { %v1204_v56 = vsel %vm1203_vm4, %v1604_v51, %v1202_v55 }
 0x336   : > { %v918_v16 = vpop.f32.mrf.mxu2 }
 0x337   : > { %1122 = vrot.lane.b32.xlu2 %v918_v16, %s1822_s24 }
 0x33e   : > { %v921_v19 = vpop.f32.mrf.mxu2 }
 0x342   : > { %v1016_v18 = vpop.f32.mrf.mxu0 }
 0x343   : > { %1130 = vrot.lane.b32.xlu2 %v1016_v18, %s1823_s25 }
 0x34b   : > { %1124 = vrot.lane.b32.xlu2 %v921_v19, %s1822_s24  ;;  %s615_s24 = scalar_lea.vmem %s2138_s14, %s1974_s5 }
 0x368   : > { %v1114_v20 = vpop.f32.mrf.mxu2 }
 0x369   : > { %1138 = vrot.lane.b32.xlu0 %v1114_v20, %s1824_s28 }
 0x370   : > { %v1117_v25 = vpop.f32.mrf.mxu2 }
 0x391   : > { %v1019_v24 = vpop.f32.mrf.mxu0  ;;  %v1123_v27 = vpop.permute.xlu2 %1122 }
 0x392   : > { %1132 = vrot.lane.b32.xlu2 %v1019_v24, %s1823_s25  ;;  %v1144_v29 = vsel %vm734_vm1, %v818_v15, %v1123_v27 }
 0x39a   : > { %1140 = vrot.lane.b32.xlu2 %v1117_v25, %s1824_s28 }
 0x39d   : > { %v1131_v28 = vpop.permute.xlu2 %1130 }
 0x39e   : > { %v1146_v30 = vsel %vm772_vm2, %v1144_v29, %v1131_v28 }
 0x3a5   : > { %v1125_v33 = vpop.permute.xlu2 %1124 }
 0x3a6   : > { %v1145_v35 = vsel %vm734_vm1, %v821_v17, %v1125_v33 }
 0x3db   : > { %v1139_v31 = vpop.permute.xlu0 %1138 }
 0x3dc   : > { %v1149_v32 = vsel %vm1148_vm3, %v1146_v30, %v1139_v31 }
 0x3dd   : > { %1465 = vmatmul.msk.f32.vlgmr.msra.gmra.mxu3 %vm630_vm0, %v1149_v32 }
 0x3ec   : > { %v1133_v34 = vpop.permute.xlu2 %1132 }
 0x3ed   : > { %v1147_v36 = vsel %vm772_vm2, %v1145_v35, %v1133_v34 }
 0x3f4   : > { %v1141_v37 = vpop.permute.xlu2 %1140 }
 0x3f5   : > { %v1150_v38 = vsel %vm1148_vm3, %v1147_v36, %v1141_v37 }
 0x3f6   : > { %1466 = vmatmul.msk.f32.gmra.mxu3 %vm630_vm0, %v1150_v38 }
 0x460   : > { %v1182_v40 = vpop.f32.mrf.mxu3 }
 0x461   : > { %v1183_v42 = vadd.f32 %v1568_v39, %v1182_v40 }
 0x463   : > { %v1190_v43 = vadd.f32 %v1188_v41, %v1183_v42 }
 0x465   : > { %v1192_v44 = vsel %vm630_vm0, %v1190_v43, 0.0 }
 0x466   : > { %1193 = vadd.xlane.f32.xlu0 %v1192_v44 }
 0x479   : > { %v1185_v45 = vpop.f32.mrf.mxu3 }
 0x47a   : > { %v1186_v47 = vadd.f32 %v1568_v39, %v1185_v45 }
 0x47c   : > { %v1191_v48 = vadd.f32 %v1189_v46, %v1186_v47 }
 0x47e   : > { %v1195_v49 = vsel %vm630_vm0, %v1191_v48, 0.0 }
 0x47f   : > { %1196 = vadd.xlane.f32.xlu1 %v1195_v49 }
 0x4d9   : > { %v1194_v57 = vpop.xlane.xlu0 %1193 }
 0x4da   : > { %v1205_v58 = vmul.f32 %v1204_v56, %v1194_v57 }
 0x4dc   : > { %v1207_v59 = vsub.f32 %v1190_v43, %v1205_v58 }
 0x4de   : > { %v1209_v60 = vmul.f32 %v1207_v59, %v1207_v59 }
 0x4e0   : > { %v1211_v61 = vsel %vm630_vm0, %v1209_v60, 0.0 }
 0x4e1   : > { %1212 = vadd.xlane.f32.xlu2 %v1211_v61 }
 0x4f2   : > { %v1197_v62 = vpop.xlane.xlu1 %1196 }
 0x4f3   : > { %v1206_v63 = vmul.f32 %v1204_v56, %v1197_v62 }
 0x4f5   : > { %v1208_v0 = vsub.f32 %v1191_v48, %v1206_v63 }
 0x4f7   : > { %v1210_v1 = vmul.f32 %v1208_v0, %v1208_v0 }
 0x4f9   : > { %v1214_v2 = vsel %vm630_vm0, %v1210_v1, 0.0 }
 0x4fa   : > { %1215 = vadd.xlane.f32.xlu1 %v1214_v2 }
 0x554   : > { %v1213_v3 = vpop.xlane.xlu2 %1212 }
 0x555   : > { %v1217_v4 = vmul.f32 %v1213_v3, %v1204_v56 }
 0x557   : > { %v1219_v5 = vadd.f32 1e-05, %v1217_v4 }
 0x559   : > { %1605 = vrsqrt.f32 %v1219_v5  ;;  %vm1227_vm6 = vweird.f32 %v1219_v5 }
 0x55f   : > { %v1606_v6 = vpop.eup %1605 }
 0x560   : > { %v1222_v7 = vmul.f32 %v1606_v6, %v1219_v5  ;;  %vm1228_vm5 = vweird.f32 %v1606_v6 }
 0x561   : > { %vm1229_vm7 = vmor %vm1227_vm6, %vm1228_vm5 }
 0x562   : > { %v1223_v8 = vmul.f32 %v1606_v6, %v1222_v7 }
 0x564   : > { %v1224_v9 = vmul.f32 0.5, %v1223_v8 }
 0x566   : > { %v1225_v10 = vsub.f32 1.5, %v1224_v9 }
 0x568   : > { %v1226_v11 = vmul.f32 %v1606_v6, %v1225_v10 }
 0x56a   : > { %v1230_v13 = vsel %vm1229_vm7, %v1606_v6, %v1226_v11 }
 0x56b   : > { %v1241_v15 = vmul.f32 %v1230_v13, %v1207_v59 }
 0x56d   : > { %v1247_v16 = vmul.f32 %v1569_v12, %v1241_v15  ;;  %v1216_v17 = vpop.xlane.xlu1 %1215 }
 0x56e   : > { %v1218_v18 = vmul.f32 %v1216_v17, %v1204_v56 }
 0x56f   : > { %v1253_v19 = vadd.f32 %v1570_v14, %v1247_v16 }
 0x570   : > { %v1220_v20 = vadd.f32 1e-05, %v1218_v18 }
 0x571   : > { %1255 = vst.msk [vmem:[%s615_s24] sm:$0xff] %vm630_vm0, %v1253_v19 }
 0x572   : > { %1607 = vrsqrt.f32 %v1220_v20  ;;  %vm1237_vm9 = vweird.f32 %v1220_v20 }
 0x578   : > { %v1608_v21 = vpop.eup %1607 }
 0x579   : > { %v1232_v22 = vmul.f32 %v1608_v21, %v1220_v20  ;;  %vm1238_vm8 = vweird.f32 %v1608_v21 }
 0x57a   : > { %vm1239_vm10 = vmor %vm1237_vm9, %vm1238_vm8 }
 0x57b   : > { %v1233_v23 = vmul.f32 %v1608_v21, %v1232_v22 }
 0x57d   : > { %v1234_v24 = vmul.f32 0.5, %v1233_v23 }
 0x57f   : > { %v1235_v25 = vsub.f32 1.5, %v1234_v24 }
 0x581   : > { %v1236_v26 = vmul.f32 %v1608_v21, %v1235_v25 }
 0x583   : > { %v1240_v27 = vsel %vm1239_vm10, %v1608_v21, %v1236_v26 }
 0x584   : > { %v1242_v28 = vmul.f32 %v1240_v27, %v1208_v0 }
 0x586   : > { %v1248_v29 = vmul.f32 %v1569_v12, %v1242_v28 }
 0x588   : > { %v1254_v30 = vadd.f32 %v1570_v14, %v1248_v29 }
 0x58a   : > { %1256 = vst.msk [vmem:[%s615_s24 + $0x8] sm:$0xff] %vm630_vm0, %v1254_v30 }
 0x58b PF: > { %s28_s29 = sadd.s32 1, %s1811_s29  }
 0x58c   : > { %p25_p7 = scmp.ge.s32.totalorder %s28_s29, 4  }
 0x58e   :  { %27 = sbr.rel (!%p25_p7) target bundleno = 7 (0x7), region = 140 }
 0x593   :  { %1278 = vsyncpa [#allocation3], 1 }
 0x594   :  { %1280 = vsyncpa [#allocation3 + $0x1], 1 }
 0x595   :  { %1281 = vsyncpa [#allocation5], 1 }
 0x596   :  { %1282 = vsyncpa [#allocation8], 1 }
 0x597   :  { %1283 = vsyncpa [#allocation11], 1 }

// kernel: transformer_forward.17
= control target key start
LH: loop header
LB: loop body
LE: loop exit
PB: predicated region body
PF: predicated region fallthrough
CT: control target
= control target key end

     0   :  { %vm36_vm0 = vcmask 261120   ;;  %vm80_vm1 = vcmask 523264   ;;  %v208_v30 = vmov 32.0   ;;  %s317_s1 = inlined_call_operand.vmem [shape: f32[32,64], index: 1, kind: input, shape index: {}]   ;;  %s318_s3 = inlined_call_operand.vmem [shape: f32[64,32], index: 3, kind: input, shape index: {}]   ;;  %s319_s0 = inlined_call_operand.vmem [shape: f32[16,32], index: 0, kind: input, shape index: {}]   ;;  %s320_s2 = inlined_call_operand.vmem [shape: f32[1,64], index: 2, kind: input, shape index: {}]   ;;  %s321_s4 = inlined_call_operand.vmem [shape: f32[1,32], index: 4, kind: input, shape index: {}]   ;;  %s322_s5 = inlined_call_operand.vmem [shape: f32[1,32], index: 5, kind: input, shape index: {}]   ;;  %s323_s6 = inlined_call_operand.vmem [shape: f32[1,32], index: 6, kind: input, shape index: {}]   ;;  %s324_s7 = inlined_call_operand.vmem [shape: f32[16,32], index: 7, kind: output, shape index: {}]  }
   0x1   :  { %v31_v0 = vld [vmem:[%s317_s1 + $0x18] sm:$0xff]  ;;  %v30_v1 = vld [vmem:[%s317_s1 + $0x10] sm:$0xff]  ;;  %v29_v2 = vld [vmem:[%s317_s1 + $0x8] sm:$0xff]  ;;  %202 = vrcp.f32 %v208_v30 }
   0x2   :  { %55 = vmatpush.msra.mxu0 %v31_v0  ;;  %185 = vmatpush.msra.mxu3 %v31_v0  ;;  %v75_v3 = vld [vmem:[%s318_s3 + $0x38] sm:$0xff]  ;;  %v74_v4 = vld [vmem:[%s318_s3 + $0x30] sm:$0xff]  ;;  %v28_v5 = vld [vmem:[%s317_s1] sm:$0xff] }
   0x3   :  { %95 = vmatpush.msra.mxu1 %v75_v3  ;;  %189 = vmatpush.msra.mxu2 %v75_v3  ;;  %v26_v6 = vld [vmem:[%s319_s0] sm:$0xff]  ;;  %v27_v7 = vld [vmem:[%s319_s0 + $0x8] sm:$0xff]  ;;  %v71_v10 = vld [vmem:[%s318_s3 + $0x18] sm:$0xff] }
   0x4   :  { %56 = vmatpush.msra.mxu0 %v30_v1  ;;  %186 = vmatpush.msra.mxu3 %v30_v1  ;;  %v73_v8 = vld [vmem:[%s318_s3 + $0x28] sm:$0xff]  ;;  %v72_v9 = vld [vmem:[%s318_s3 + $0x20] sm:$0xff]  ;;  %v70_v11 = vld [vmem:[%s318_s3 + $0x10] sm:$0xff] }
   0x5   :  { %96 = vmatpush.msra.mxu1 %v74_v4  ;;  %190 = vmatpush.msra.mxu2 %v74_v4  ;;  %v69_v12 = vld [vmem:[%s318_s3 + $0x8] sm:$0xff]  ;;  %v68_v13 = vld [vmem:[%s318_s3] sm:$0xff] }
   0x6   :  { %57 = vmatpush.msra.mxu0 %v29_v2  ;;  %187 = vmatpush.msra.mxu3 %v29_v2  ;;  %v198_v14 = vld [vmem:[%s320_s2] ss:$0 sm:$0xff] }
   0x7   :  { %97 = vmatpush.msra.mxu1 %v73_v8  ;;  %191 = vmatpush.msra.mxu2 %v73_v8  ;;  %v199_v21 = vld [vmem:[%s321_s4] ss:$0 sm:$0xff]  ;;  %v203_v31 = vpop.eup %202 }
   0x8   :  { %58 = vmatpush.msra.mxu0 %v28_v5  ;;  %188 = vmatpush.msra.mxu3 %v28_v5  ;;  %v119_v32 = vmul.f32 32.0, %v203_v31  ;;  %vm123_vm2 = vweird.f32 %v203_v31  ;;  %v200_v59 = vld [vmem:[%s322_s5] ss:$0 sm:$0xff] }
   0x9   :  { %181 = vmatmul.msk.f32.vlgmr.msra.gmra.mxu0 %vm36_vm0, %v26_v6  ;;  %182 = vmatmul.msk.f32.vlgmr.msra.gmra.mxu3 %vm36_vm0, %v27_v7  ;;  %v201_v62 = vld [vmem:[%s323_s6] ss:$0 sm:$0xff] }
   0xa   :  { %98 = vmatpush.msra.mxu1 %v72_v9  ;;  %192 = vmatpush.msra.mxu2 %v72_v9  ;;  %v120_v33 = vsub.f32 1.0, %v119_v32 }
   0xc   :  { %99 = vmatpush.msra.mxu1 %v71_v10  ;;  %193 = vmatpush.msra.mxu2 %v71_v10  ;;  %v121_v34 = vmul.f32 %v203_v31, %v120_v33 }
   0xe   :  { %100 = vmatpush.msra.mxu1 %v70_v11  ;;  %194 = vmatpush.msra.mxu2 %v70_v11  ;;  %v122_v35 = vadd.f32 %v203_v31, %v121_v34 }
  0x10   :  { %101 = vmatpush.msra.mxu1 %v69_v12  ;;  %195 = vmatpush.msra.mxu2 %v69_v12  ;;  %v124_v36 = vsel %vm123_vm2, %v203_v31, %v122_v35 }
  0x12   :  { %102 = vmatpush.msra.mxu1 %v68_v13  ;;  %196 = vmatpush.msra.mxu2 %v68_v13 }
  0x86   :  { %v60_v15 = vpop.f32.mrf.mxu0 }
  0x87   :  { %v61_v16 = vadd.f32 %v198_v14, %v60_v15 }
  0x89   :  { %v66_v17 = vmax.f32 %v61_v16, 0.0 }
  0x8b   :  { %183 = vmatmul.msk.f32.vlgmr.msra.gmra.mxu1 %vm80_vm1, %v66_v17 }
  0x8c   :  { %v63_v18 = vpop.f32.mrf.mxu3 }
  0x8d   :  { %v64_v19 = vadd.f32 %v198_v14, %v63_v18 }
  0x8f   :  { %v67_v20 = vmax.f32 %v64_v19, 0.0 }
  0x91   :  { %184 = vmatmul.msk.f32.vlgmr.msra.gmra.mxu2 %vm80_vm1, %v67_v20 }
 0x108   :  { %v104_v22 = vpop.f32.mrf.mxu1 }
 0x109   :  { %v105_v23 = vadd.f32 %v199_v21, %v104_v22 }
 0x10b   :  { %v110_v24 = vadd.f32 %v105_v23, %v26_v6 }
 0x10d   :  { %v112_v25 = vsel %vm36_vm0, %v110_v24, 0.0 }
 0x10e   :  { %113 = vadd.xlane.f32.xlu0 %v112_v25 }
 0x114   :  { %v107_v26 = vpop.f32.mrf.mxu2 }
 0x115   :  { %v108_v27 = vadd.f32 %v199_v21, %v107_v26 }
 0x117   :  { %v111_v28 = vadd.f32 %v108_v27, %v27_v7 }
 0x119   :  { %v115_v29 = vsel %vm36_vm0, %v111_v28, 0.0 }
 0x11a   :  { %116 = vadd.xlane.f32.xlu0 %v115_v29 }
 0x181   :  { %v114_v37 = vpop.xlane.xlu0 %113 }
 0x182   :  { %v125_v38 = vmul.f32 %v124_v36, %v114_v37 }
 0x184   :  { %v127_v39 = vsub.f32 %v110_v24, %v125_v38 }
 0x186   :  { %v129_v40 = vmul.f32 %v127_v39, %v127_v39 }
 0x188   :  { %v131_v41 = vsel %vm36_vm0, %v129_v40, 0.0 }
 0x189   :  { %132 = vadd.xlane.f32.xlu1 %v131_v41 }
 0x18d   :  { %v117_v42 = vpop.xlane.xlu0 %116 }
 0x18e   :  { %v126_v43 = vmul.f32 %v124_v36, %v117_v42 }
 0x190   :  { %v128_v44 = vsub.f32 %v111_v28, %v126_v43 }
 0x192   :  { %v130_v45 = vmul.f32 %v128_v44, %v128_v44 }
 0x194   :  { %v134_v46 = vsel %vm36_vm0, %v130_v45, 0.0 }
 0x195   :  { %135 = vadd.xlane.f32.xlu1 %v134_v46 }
 0x1fc   :  { %v133_v47 = vpop.xlane.xlu1 %132 }
 0x1fd   :  { %v137_v48 = vmul.f32 %v133_v47, %v124_v36 }
 0x1ff   :  { %v139_v49 = vadd.f32 1e-05, %v137_v48 }
 0x201   :  { %204 = vrsqrt.f32 %v139_v49  ;;  %vm147_vm4 = vweird.f32 %v139_v49 }
 0x207   :  { %v205_v50 = vpop.eup %204 }
 0x208   :  { %v142_v51 = vmul.f32 %v205_v50, %v139_v49  ;;  %v136_v52 = vpop.xlane.xlu1 %135  ;;  %vm148_vm3 = vweird.f32 %v205_v50 }
 0x209   :  { %v138_v53 = vmul.f32 %v136_v52, %v124_v36  ;;  %vm149_vm5 = vmor %vm147_vm4, %vm148_vm3 }
 0x20a   :  { %v143_v54 = vmul.f32 %v205_v50, %v142_v51 }
 0x20b   :  { %v140_v55 = vadd.f32 1e-05, %v138_v53 }
 0x20c   :  { %v144_v56 = vmul.f32 0.5, %v143_v54 }
 0x20d   :  { %206 = vrsqrt.f32 %v140_v55  ;;  %vm157_vm7 = vweird.f32 %v140_v55 }
 0x20e   :  { %v145_v57 = vsub.f32 1.5, %v144_v56 }
 0x210   :  { %v146_v58 = vmul.f32 %v205_v50, %v145_v57 }
 0x212   :  { %v150_v60 = vsel %vm149_vm5, %v205_v50, %v146_v58 }
 0x213   :  { %v207_v61 = vpop.eup %206  ;;  %v161_v63 = vmul.f32 %v150_v60, %v127_v39 }
 0x214   :  { %v152_v0 = vmul.f32 %v207_v61, %v140_v55  ;;  %vm158_vm6 = vweird.f32 %v207_v61 }
 0x215   :  { %v167_v1 = vmul.f32 %v200_v59, %v161_v63  ;;  %vm159_vm8 = vmor %vm157_vm7, %vm158_vm6 }
 0x216   :  { %v153_v2 = vmul.f32 %v207_v61, %v152_v0 }
 0x217   :  { %v173_v3 = vadd.f32 %v201_v62, %v167_v1 }
 0x218   :  { %v154_v4 = vmul.f32 0.5, %v153_v2 }
 0x219   :  { %175 = vst.msk [vmem:[%s324_s7] sm:$0xff] %vm36_vm0, %v173_v3 }
 0x21a   :  { %v155_v5 = vsub.f32 1.5, %v154_v4 }
 0x21c   :  { %v156_v6 = vmul.f32 %v207_v61, %v155_v5 }
 0x21e   :  { %v160_v7 = vsel %vm159_vm8, %v207_v61, %v156_v6 }
 0x21f   :  { %v162_v8 = vmul.f32 %v160_v7, %v128_v44 }
 0x221   :  { %v168_v9 = vmul.f32 %v200_v59, %v162_v8 }
 0x223   :  { %v174_v10 = vadd.f32 %v201_v62, %v168_v9 }
 0x225   :  { %176 = vst.msk [vmem:[%s324_s7 + $0x8] sm:$0xff] %vm36_vm0, %v174_v10 }

// kernel: transformer_forward.15
= control target key start
LH: loop header
LB: loop body
LE: loop exit
PB: predicated region body
PF: predicated region fallthrough
CT: control target
= control target key end

     0   :  { %s1816_s0 = inlined_call_operand.vmem [shape: f32[2,8,32], index: 0, kind: input, shape index: {}, may-alias: {0,1}]   ;;  %s1817_s1 = inlined_call_operand.vmem [shape: f32[2,8,32], index: 1, kind: input, shape index: {}, may-alias: {0,1}]   ;;  %s1818_s2 = inlined_call_operand.vmem [shape: f32[2,8,32], index: 2, kind: input, shape index: {}, may-alias: {2,3}]   ;;  %s1819_s3 = inlined_call_operand.vmem [shape: f32[2,8,32], index: 3, kind: input, shape index: {}, may-alias: {2,3}]   ;;  %s1820_s4 = inlined_call_operand.vmem [shape: f32[32,32], index: 4, kind: input, shape index: {}]   ;;  %s1821_s5 = inlined_call_operand.hbm [shape: f32[1,32], index: 5, kind: input, shape index: {}]   ;;  %s1822_s6 = inlined_call_operand.vmem [shape: f32[32,32], index: 6, kind: input, shape index: {}]   ;;  %s1823_s7 = inlined_call_operand.hbm [shape: f32[1,32], index: 7, kind: input, shape index: {}]   ;;  %s1824_s8 = inlined_call_operand.vmem [shape: f32[32,32], index: 8, kind: input, shape index: {}]   ;;  %s1825_s9 = inlined_call_operand.hbm [shape: f32[1,32], index: 9, kind: input, shape index: {}]   ;;  %s1826_s10 = inlined_call_operand.vmem [shape: f32[32,32], index: 10, kind: input, shape index: {}]   ;;  %s1827_s11 = inlined_call_operand.hbm [shape: f32[1,32], index: 11, kind: input, shape index: {}]   ;;  %s1828_s12 = inlined_call_operand.hbm [shape: f32[1,32], index: 12, kind: input, shape index: {}]   ;;  %s1829_s13 = inlined_call_operand.hbm [shape: f32[1,32], index: 13, kind: input, shape index: {}]   ;;  %s1830_s14 = inlined_call_operand.vmem [shape: f32[2,8,32], index: 14, kind: output, shape index: {}]  }
   0x1   :  { %1831 = sst [smem:[#allocation16_spill]] %s1821_s5 }
   0x2   :  { %1832 = sst [smem:[#allocation17_spill]] %s1823_s7 }
   0x3   :  { %19 = vsyncpa [#allocation3], 0 }
   0x4   :  { %20 = vsyncpa [#allocation5], 0 }
   0x5   :  { %21 = vsyncpa [#allocation8], 0 }
   0x6   :  { %22 = vsyncpa [#allocation11], 0  ;;  %s1633_s29 = smov 0  }
   0x7 LB: > { %s1833_s7 = sld [smem:[#allocation17_spill]]  ;;  %s1642_s17 = sadd.s32 4294967295, %s1543_s29   ;;  %s1543_s29 = sphi %s1633_s29, %s28_s29  }
   0x8   : > { %p1201_p0 = scmp.ge.s32.totalorder %s1543_s29, 1  ;;  %p373_p1 = scmp.lt.s32.totalorder %s1543_s29, 3 }
   0x9   : > { %p1282_p2 = scmp.eq.s32.totalorder %s1642_s17, 0  ;;  %s1545_s19 = smov [#allocation4]  }
   0xa   : > { %p1647_p3 = pnand %p1201_p0, %p373_p1  ;;  %s405_s20 = sshll.u32 %s1545_s19, 4  ;;  %s406_s20 = int_to_ptr.vmem [resolvable:$true] %s405_s20 }
   0xb   : > { %s433_s23 = sshll.u32 %s1827_s11, 4  ;;  %s1835_s5 = sld [smem:[#allocation16_spill]]  ;;  %s434_s23 = int_to_ptr.hbm [resolvable:$true] %s433_s23 }
   0xc   : > { %p1263_p4 = pneg %p1647_p3  ;;  %s1546_s28 = smov [#allocation7]  }
   0xd   : > { %s403_s16 = sshll.u32 %s1833_s7, 4  ;;  %s435_s30 = sshll.u32 %s1546_s28, 4  ;;  %s404_s16 = int_to_ptr.hbm [resolvable:$true] %s403_s16  ;;  %s436_s30 = int_to_ptr.vmem [resolvable:$true] %s435_s30 }
   0xe   : > { %p1661_p5 = pnand %p1282_p2, %p1263_p4  ;;  %s1547_s15 = smov [#allocation2]  }
   0xf   : > { %s390_s19 = sshll.u32 %s1547_s15, 4  ;;  %s418_s24 = sshll.u32 %s1825_s9, 4  ;;  %s391_s19 = int_to_ptr.vmem [resolvable:$true] %s390_s19  ;;  %s419_s24 = int_to_ptr.hbm [resolvable:$true] %s418_s24 }
  0x10   : > { %1269 = dma.hbm_to_vmem [thread:$0]  (!%p1661_p5), %s404_s16, 16, %s406_s20, [#allocation5]  }
  0x11   : > { %s388_s26 = sshll.u32 %s1835_s5, 4  ;;  %s445_s5 = sshll.u32 %s1828_s12, 4  ;;  %s389_s26 = int_to_ptr.hbm [resolvable:$true] %s388_s26  ;;  %s446_s5 = int_to_ptr.hbm [resolvable:$true] %s445_s5 }
  0x12   : > { %1275 = dma.hbm_to_vmem [thread:$0]  (!%p1661_p5), %s434_s23, 16, %s436_s30, [#allocation8]  }
  0x13   : > { %1266 = dma.hbm_to_vmem [thread:$0]  (!%p1661_p5), %s389_s26, 16, %s391_s19, [#allocation3]  }
  0x14   : > { %s1548_s7 = smov [#allocation6]   ;;  %s1549_s20 = smov [#allocation9]  }
  0x15   : > { %s420_s16 = sshll.u32 %s1548_s7, 4  ;;  %s447_s23 = sshll.u32 %s1549_s20, 4  ;;  %s421_s16 = int_to_ptr.vmem [resolvable:$true] %s420_s16  ;;  %s448_s23 = int_to_ptr.vmem [resolvable:$true] %s447_s23 }
  0x16   : > { %1272 = dma.hbm_to_vmem [thread:$0]  (!%p1661_p5), %s419_s24, 16, %s421_s16, [#allocation5]  }
  0x17   : > { %s457_s21 = sshll.u32 %s1829_s13, 4  ;;  %s1550_s26 = smov [#allocation10]   ;;  %s458_s21 = int_to_ptr.hbm [resolvable:$true] %s457_s21 }
  0x18   : > { %1278 = dma.hbm_to_vmem [thread:$0]  (!%p1661_p5), %s446_s5, 16, %s448_s23, [#allocation8]  }
  0x19   : > { %s459_s19 = sshll.u32 %s1550_s26, 4  ;;  %500 = sbr.rel (%p1647_p3) target bundleno = 1343 (0x53f), region = 76  ;;  %s460_s19 = int_to_ptr.vmem [resolvable:$true] %s459_s19 }
  0x1a   : > { %1281 = dma.hbm_to_vmem [thread:$0]  (!%p1661_p5), %s458_s21, 16, %s460_s19, [#allocation11]  }
  0x1e   : > { %1526 = dma.done.wait (%p1282_p2), [#allocation3], 16  }
  0x1f   : > { %1528 = vsyncadd (%p1282_p2), [#allocation3], 4294967280 }
  0x20   : > { %1530 = dma.done.wait (%p1282_p2), [#allocation5], 32  }
  0x21   : > { %1532 = vsyncadd (%p1282_p2), [#allocation5], 4294967264 }
  0x22   : > { %1534 = dma.done.wait (%p1282_p2), [#allocation8], 32  }
  0x23   : > { %1536 = vsyncadd (%p1282_p2), [#allocation8], 4294967264 }
  0x24   : > { %1538 = dma.done.wait (%p1282_p2), [#allocation11], 16  }
  0x25   : > { %1540 = vsyncadd (%p1282_p2), [#allocation11], 4294967280  ;;  %p582_p6 = scmp.lt.s32.totalorder %s1642_s17, 1  ;;  %v640_v0 = vld [vmem:[%s1822_s6 + $0x18] sm:$0xff]  ;;  %v639_v1 = vld [vmem:[%s1822_s6 + $0x10] sm:$0xff]  ;;  %vm613_vm0 = vcmask 261120  }
  0x26   : > { %v608_v2 = vld [vmem:[%s1820_s4 + $0x18] sm:$0xff]  ;;  %660 = vmatpush.msra.mxu1 %v640_v0  ;;  %v607_v3 = vld [vmem:[%s1820_s4 + $0x10] sm:$0xff]  ;;  %v638_v4 = vld [vmem:[%s1822_s6 + $0x8] sm:$0xff]  ;;  %vm699_vm1 = vcmask 64512   ;;  %s1551_s28 = smov 104   ;;  %s1552_s16 = smov 120  }
  0x27   : > { %s1838_s17 = smov (!%p582_p6, %s1642_s17), 1  ;;  %629 = vmatpush.msra.mxu0 %v608_v2  ;;  %v637_v5 = vld [vmem:[%s1822_s6] sm:$0xff]  ;;  %v606_v6 = vld [vmem:[%s1820_s4 + $0x8] sm:$0xff]  ;;  %v671_v16 = vld [vmem:[%s1824_s8 + $0x18] sm:$0xff]  ;;  %s1554_s24 = smov 16   ;;  %vm973_vm2 = vcmask 130048  }
  0x28   : > { %s1706_s5 = sshll.u32 %s1838_s17, 3  ;;  %661 = vmatpush.msra.mxu1 %v639_v1  ;;  %v605_v8 = vld [vmem:[%s1820_s4] sm:$0xff]  ;;  %v670_v17 = vld [vmem:[%s1824_s8 + $0x10] sm:$0xff]  ;;  %691 = vmatpush.msra.mxu2 %v671_v16  ;;  %v669_v18 = vld [vmem:[%s1824_s8 + $0x8] sm:$0xff]  ;;  %s1555_s25 = smov 8   ;;  %vm975_vm3 = vcmask 195584  }
  0x29   : > { %s589_s20 = scalar_lea.vmem %s1817_s1, %s1706_s5  ;;  %s585_s22 = scalar_lea.vmem %s1816_s0, %s1706_s5  ;;  %630 = vmatpush.msra.mxu0 %v607_v3  ;;  %v1315_v10 = vld [vmem:[#allocation4] ss:$0 sm:$0xff]  ;;  %v1316_v11 = vld [vmem:[#allocation2] ss:$0 sm:$0xff]  ;;  %v1317_v30 = vld [vmem:[#allocation6] ss:$0 sm:$0xff] }
  0x2a   : > { %v603_v7 = vld [vmem:[%s589_s20] sm:$0xff]  ;;  %662 = vmatpush.msra.mxu1 %v638_v4  ;;  %s1553_s20 = smov 112   ;;  %692 = vmatpush.msra.mxu2 %v670_v17  ;;  %v980_v17 = vld [vmem:[%s1826_s10 + $0x18] sm:$0xff]  ;;  %s597_s18 = scalar_lea.vmem %s1819_s3, %s1706_s5 }
  0x2b   : > { %631 = vmatpush.msra.mxu0 %v606_v6  ;;  %v602_v9 = vld [vmem:[%s585_s22] sm:$0xff]  ;;  %s593_s22 = scalar_lea.vmem %s1818_s2, %s1706_s5 }
  0x2c   : > { %663 = vmatpush.msra.mxu1 %v637_v5  ;;  %v668_v19 = vld [vmem:[%s1824_s8] sm:$0xff]  ;;  %693 = vmatpush.msra.mxu2 %v669_v18  ;;  %v979_v18 = vld [vmem:[%s1826_s10 + $0x10] sm:$0xff] }
  0x2d   : > { %632 = vmatpush.msra.mxu0 %v605_v8  ;;  %1222 = vmatmul.msk.f32.vlgmr.msra.gmra.mxu1 %vm613_vm0, %v603_v7  ;;  %v604_v20 = vld [vmem:[%s593_s22] sm:$0xff] }
  0x2e   : > { %1221 = vmatmul.msk.f32.vlgmr.msra.gmra.mxu0 %vm613_vm0, %v602_v9  ;;  %694 = vmatpush.msra.mxu2 %v668_v19  ;;  %v978_v19 = vld [vmem:[%s1826_s10 + $0x8] sm:$0xff] }
  0x2f   : > { %1223 = vmatmul.msk.f32.vlgmr.msra.gmra.mxu2 %vm613_vm0, %v604_v20  ;;  %v977_v20 = vld [vmem:[%s1826_s10] sm:$0xff] }
  0xaa   : > { %v665_v12 = vpop.f32.mrf.mxu1 }
  0xab   : > { %v634_v13 = vpop.f32.mrf.mxu0  ;;  %v666_v14 = vadd.f32 %v1315_v10, %v665_v12 }
  0xac   : > { %v635_v15 = vadd.f32 %v1316_v11, %v634_v13 }
  0xad   : > { %896 = vrot.lane.b32.xlu2 %v666_v14, %s1551_s28  ;;  %763 = vrot.lane.b32.xlu1 %v666_v14, %s1552_s16 }
  0xae   : > { %830 = vrot.lane.b32.xlu0 %v666_v14, %s1553_s20  ;;  %1224 = vmatpush.xpose.msk.msra.mxu3 %vm699_vm1, %v666_v14 }
  0xb1   : > { %1225 = vmatmul.msk.f32.vlgmr.msra.gmra.mxu3 %vm699_vm1, %v635_v15 }
  0xb2   : > { %v696_v31 = vpop.f32.mrf.mxu2 }
  0xb3   : > { %v697_v32 = vadd.f32 %v1317_v30, %v696_v31 }
  0xb5   : > { %894 = vrot.lane.b32.xlu2 %v635_v15, %s1551_s28  ;;  %761 = vrot.lane.b32.xlu1 %v635_v15, %s1552_s16 }
  0xb6   : > { %828 = vrot.lane.b32.xlu0 %v635_v15, %s1553_s20  ;;  %756 = vmatpush.msrb.mxu3 %v697_v32 }
 0x107   : > { %v897_v22 = vpop.permute.xlu2 %896 }
 0x10f   : > { %v895_v26 = vpop.permute.xlu2 %894 }
 0x11f   : > { %v764_v21 = vpop.permute.xlu1 %763 }
 0x120   : > { %v831_v23 = vpop.permute.xlu0 %830  ;;  %1227 = vmatpush.xpose.msk.msrb.mxu0 %vm699_vm1, %v764_v21 }
 0x121   : > { %1230 = vmatpush.xpose.msk.msrb.mxu2 %vm699_vm1, %v831_v23 }
 0x124   : > { %1233 = vmatpush.xpose.msk.msra.mxu0 %vm699_vm1, %v897_v22 }
 0x125   : > { %1000 = vmatpush.msra.mxu2 %v980_v17 }
 0x127   : > { %v762_v24 = vpop.permute.xlu1 %761  ;;  %1001 = vmatpush.msra.mxu2 %v979_v18 }
 0x128   : > { %v829_v25 = vpop.permute.xlu0 %828  ;;  %1228 = vmatmul.msk.f32.vlgmr.msrb.gmra.mxu0 %vm699_vm1, %v762_v24 }
 0x129   : > { %1231 = vmatmul.msk.f32.vlgmr.msrb.gmra.mxu2 %vm699_vm1, %v829_v25 }
 0x12a   : > { %1002 = vmatpush.msra.mxu2 %v978_v19 }
 0x12c   : > { %1003 = vmatpush.msra.mxu2 %v977_v20 }
 0x130   : > { %1234 = vmatmul.msk.f32.vlgmr.msra.gmra.mxu0 %vm699_vm1, %v895_v26 }
 0x134   : > { %v723_v27 = vpop.f32.mrf.mxu3 }
 0x135   : > { %v726_v28 = vmul.f32 0.35355338, %v723_v27  ;;  %v1318_v27 = vld [vmem:[#allocation7] ss:$0 sm:$0xff] }
 0x137   : > { %v727_v29 = vsel %vm699_vm1, %v726_v28, -inf }
 0x138   : > { %728 = vmax.xlane.f32.xlu0 %v727_v29  ;;  %v1008_v29 = vld [vmem:[%s597_s18] sm:$0xff] }
 0x1a5   : > { %v786_v33 = vpop.f32.mrf.mxu0 }
 0x1a6   : > { %v789_v34 = vmul.f32 0.35355338, %v786_v33  ;;  %v1557_v33 = vmov 32.0  }
 0x1a8   : > { %v790_v35 = vsel %vm699_vm1, %v789_v34, -inf }
 0x1a9   : > { %791 = vmax.xlane.f32.xlu1 %v790_v35 }
 0x1ab   : > { %v729_v36 = vpop.xlane.xlu0 %728 }
 0x1ac   : > { %v730_v37 = vsub.f32 %v726_v28, %v729_v36  ;;  %v853_v38 = vpop.f32.mrf.mxu2 }
 0x1ad   : > { %v856_v39 = vmul.f32 0.35355338, %v853_v38  ;;  %v919_v42 = vpop.f32.mrf.mxu0 }
 0x1ae   : > { %v731_v40 = vmul.f32 1.442695, %v730_v37  ;;  %v922_v43 = vmul.f32 0.35355338, %v919_v42 }
 0x1af   : > { %v857_v41 = vsel %vm699_vm1, %v856_v39, -inf }
 0x1b0   : > { %1321 = vpow2.f32 %v731_v40  ;;  %858 = vmax.xlane.f32.xlu2 %v857_v41  ;;  %v923_v45 = vsel %vm699_vm1, %v922_v43, -inf }
 0x1b6   : > { %v1322_v44 = vpop.eup %1321 }
 0x1b7   : > { %v733_v46 = vsel %vm699_vm1, %v1322_v44, 0.0 }
 0x1b8   : > { %924 = vmax.xlane.f32.xlu2 %v923_v45  ;;  %734 = vadd.xlane.f32.xlu0 %v733_v46 }
 0x21c   : > { %v792_v47 = vpop.xlane.xlu1 %791 }
 0x21d   : > { %v793_v48 = vsub.f32 %v789_v34, %v792_v47 }
 0x21f   : > { %v794_v49 = vmul.f32 1.442695, %v793_v48 }
 0x221   : > { %1323 = vpow2.f32 %v794_v49 }
 0x223   : > { %v859_v50 = vpop.xlane.xlu2 %858 }
 0x224   : > { %v860_v51 = vsub.f32 %v856_v39, %v859_v50 }
 0x226   : > { %v861_v52 = vmul.f32 1.442695, %v860_v51 }
 0x227   : > { %v1324_v53 = vpop.eup %1323 }
 0x228   : > { %1325 = vpow2.f32 %v861_v52  ;;  %v796_v54 = vsel %vm699_vm1, %v1324_v53, 0.0 }
 0x229   : > { %797 = vadd.xlane.f32.xlu1 %v796_v54  ;;  %v1319_v54 = vld [vmem:[#allocation9] ss:$0 sm:$0xff] }
 0x22b   : > { %v925_v55 = vpop.xlane.xlu2 %924  ;;  %v735_v56 = vpop.xlane.xlu0 %734 }
 0x22c   : > { %v926_v57 = vsub.f32 %v922_v43, %v925_v55  ;;  %1327 = vrcp.f32 %v735_v56  ;;  %v1320_v56 = vld [vmem:[#allocation10] ss:$0 sm:$0xff] }
 0x22e   : > { %v1326_v58 = vpop.eup %1325  ;;  %v927_v59 = vmul.f32 1.442695, %v926_v57 }
 0x22f   : > { %v863_v60 = vsel %vm699_vm1, %v1326_v58, 0.0 }
 0x230   : > { %1329 = vpow2.f32 %v927_v59  ;;  %864 = vadd.xlane.f32.xlu2 %v863_v60 }
 0x232   : > { %v1328_v61 = vpop.eup %1327 }
 0x233   : > { %v737_v62 = vmul.f32 %v1328_v61, %v1322_v44 }
 0x235   : > { %1226 = vmatmul.msk.f32.vlgmr.msrb.gmra.mxu3 %vm699_vm1, %v737_v62 }
 0x236   : > { %v1330_v63 = vpop.eup %1329 }
 0x237   : > { %v929_v0 = vsel %vm699_vm1, %v1330_v63, 0.0 }
 0x238   : > { %930 = vadd.xlane.f32.xlu0 %v929_v0 }
 0x242   : > { %802 = vrot.lane.b32.xlu1 %v697_v32, %s1552_s16 }
 0x248   : > { %868 = vrot.lane.b32.xlu2 %v697_v32, %s1553_s20 }
 0x24c   : > { %934 = vrot.lane.b32.xlu0 %v697_v32, %s1551_s28  ;;  %s1556_s28 = smov 24  }
 0x29c   : > { %v798_v2 = vpop.xlane.xlu1 %797 }
 0x2a3   : > { %v865_v1 = vpop.xlane.xlu2 %864 }
 0x2a4   : > { %1331 = vrcp.f32 %v865_v1 }
 0x2a5   : > { %1333 = vrcp.f32 %v798_v2 }
 0x2aa   : > { %v1332_v3 = vpop.eup %1331 }
 0x2ab   : > { %v867_v4 = vmul.f32 %v1332_v3, %v1326_v58  ;;  %v869_v5 = vpop.permute.xlu2 %868  ;;  %v1334_v6 = vpop.eup %1333 }
 0x2ac   : > { %889 = vmatpush.msra.mxu3 %v869_v5  ;;  %v931_v7 = vpop.xlane.xlu0 %930  ;;  %v800_v9 = vmul.f32 %v1334_v6, %v1324_v53 }
 0x2ad   : > { %1232 = vmatmul.msk.f32.vlgmr.msra.gmra.mxu3 %vm699_vm1, %v867_v4  ;;  %1335 = vrcp.f32 %v931_v7 }
 0x2ae   : > { %1337 = vrcp.f32 %v1557_v33 }
 0x2b3   : > { %v1336_v10 = vpop.eup %1335 }
 0x2b4   : > { %v803_v8 = vpop.permute.xlu1 %802  ;;  %v933_v11 = vmul.f32 %v1336_v10, %v1330_v63  ;;  %v1338_v34 = vpop.eup %1337 }
 0x2b5   : > { %823 = vmatpush.msrb.mxu1 %v803_v8  ;;  %v1014_v35 = vmul.f32 32.0, %v1338_v34  ;;  %vm1018_vm4 = vweird.f32 %v1338_v34 }
 0x2b6   : > { %1229 = vmatmul.msk.f32.vlgmr.msrb.gmra.mxu1 %vm699_vm1, %v800_v9 }
 0x2b7   : > { %v1015_v36 = vsub.f32 1.0, %v1014_v35 }
 0x2b8   : > { %v758_v13 = vpop.f32.mrf.mxu3 }
 0x2b9   : > { %v1016_v37 = vmul.f32 %v1338_v34, %v1015_v36 }
 0x2bb   : > { %v1017_v38 = vadd.f32 %v1338_v34, %v1016_v37 }
 0x2bd   : > { %v1019_v39 = vsel %vm1018_vm4, %v1338_v34, %v1017_v38 }
 0x2be   : > { %v935_v12 = vpop.permute.xlu0 %934 }
 0x2bf   : > { %955 = vmatpush.msra.mxu1 %v935_v12 }
 0x2c0   : > { %1235 = vmatmul.msk.f32.vlgmr.msra.gmra.mxu1 %vm699_vm1, %v933_v11 }
 0x330   : > { %v891_v14 = vpop.f32.mrf.mxu3 }
 0x331   : > { %965 = vrot.lane.b32.xlu0 %v891_v14, %s1554_s24  ;;  %s601_s24 = scalar_lea.vmem %s1830_s14, %s1706_s5 }
 0x333   : > { %v825_v15 = vpop.f32.mrf.mxu1 }
 0x334   : > { %961 = vrot.lane.b32.xlu1 %v825_v15, %s1555_s25 }
 0x33d   : > { %v957_v16 = vpop.f32.mrf.mxu1 }
 0x33e   : > { %969 = vrot.lane.b32.xlu2 %v957_v16, %s1556_s28 }
 0x398   : > { %v970_v24 = vpop.permute.xlu2 %969 }
 0x3a3   : > { %v966_v22 = vpop.permute.xlu0 %965 }
 0x3a6   : > { %v962_v21 = vpop.permute.xlu1 %961 }
 0x3a7   : > { %v972_v23 = vsel %vm699_vm1, %v758_v13, %v962_v21 }
 0x3a8   : > { %v974_v25 = vsel %vm973_vm2, %v972_v23, %v966_v22 }
 0x3a9   : > { %v976_v26 = vsel %vm975_vm3, %v974_v25, %v970_v24 }
 0x3aa   : > { %1236 = vmatmul.msk.f32.vlgmr.msra.gmra.mxu2 %vm613_vm0, %v976_v26 }
 0x42d   : > { %v1005_v28 = vpop.f32.mrf.mxu2 }
 0x42e   : > { %v1006_v30 = vadd.f32 %v1318_v27, %v1005_v28 }
 0x430   : > { %v1009_v31 = vadd.f32 %v1008_v29, %v1006_v30 }
 0x432   : > { %v1010_v32 = vsel %vm613_vm0, %v1009_v31, 0.0 }
 0x433   : > { %1011 = vadd.xlane.f32.xlu1 %v1010_v32 }
 0x4a6   : > { %v1012_v40 = vpop.xlane.xlu1 %1011 }
 0x4a7   : > { %v1020_v41 = vmul.f32 %v1019_v39, %v1012_v40 }
 0x4a9   : > { %v1021_v42 = vsub.f32 %v1009_v31, %v1020_v41 }
 0x4ab   : > { %v1022_v43 = vmul.f32 %v1021_v42, %v1021_v42 }
 0x4ad   : > { %v1023_v44 = vsel %vm613_vm0, %v1022_v43, 0.0 }
 0x4ae   : > { %1024 = vadd.xlane.f32.xlu0 %v1023_v44 }
 0x521   : > { %v1025_v45 = vpop.xlane.xlu0 %1024 }
 0x522   : > { %v1026_v46 = vmul.f32 %v1025_v45, %v1019_v39 }
 0x524   : > { %v1027_v47 = vadd.f32 1e-05, %v1026_v46 }
 0x526   : > { %1339 = vrsqrt.f32 %v1027_v47  ;;  %vm1034_vm6 = vweird.f32 %v1027_v47 }
 0x52c   : > { %v1340_v48 = vpop.eup %1339 }
 0x52d   : > { %v1029_v49 = vmul.f32 %v1340_v48, %v1027_v47  ;;  %vm1035_vm5 = vweird.f32 %v1340_v48 }
 0x52e   : > { %vm1036_vm7 = vmor %vm1034_vm6, %vm1035_vm5 }
 0x52f   : > { %v1030_v50 = vmul.f32 %v1340_v48, %v1029_v49 }
 0x531   : > { %v1031_v51 = vmul.f32 0.5, %v1030_v50 }
 0x533   : > { %v1032_v52 = vsub.f32 1.5, %v1031_v51 }
 0x535   : > { %v1033_v53 = vmul.f32 %v1340_v48, %v1032_v52 }
 0x537   : > { %v1037_v55 = vsel %vm1036_vm7, %v1340_v48, %v1033_v53 }
 0x538   : > { %v1038_v57 = vmul.f32 %v1037_v55, %v1021_v42 }
 0x53a   : > { %v1043_v58 = vmul.f32 %v1319_v54, %v1038_v57 }
 0x53c   : > { %v1048_v59 = vadd.f32 %v1320_v56, %v1043_v58 }
 0x53e   : > { %1049 = vst.msk [vmem:[%s601_s24] sm:$0xff] %vm613_vm0, %v1048_v59 }
 0x53f PF: > { %s28_s29 = sadd.s32 1, %s1543_s29  }
 0x540   : > { %p25_p7 = scmp.ge.s32.totalorder %s28_s29, 4  }
 0x542   :  { %27 = sbr.rel (!%p25_p7) target bundleno = 7 (0x7), region = 140 }
 0x547   :  { %1069 = vsyncpa [#allocation3], 1 }
 0x548   :  { %1071 = vsyncpa [#allocation3 + $0x1], 1 }
 0x549   :  { %1072 = vsyncpa [#allocation5], 1 }
 0x54a   :  { %1073 = vsyncpa [#allocation8], 1 }
 0x54b   :  { %1074 = vsyncpa [#allocation11], 1 }

// kernel: transformer_forward.16
= control target key start
LH: loop header
LB: loop body
LE: loop exit
PB: predicated region body
PF: predicated region fallthrough
CT: control target
= control target key end

     0   :  { %s1653_s0 = inlined_call_operand.vmem [shape: f32[2,8,32], index: 0, kind: input, shape index: {}]   ;;  %s1654_s1 = inlined_call_operand.vmem [shape: f32[2,16,32], index: 1, kind: input, shape index: {}]   ;;  %s1655_s2 = inlined_call_operand.vmem [shape: f32[2,16,32], index: 2, kind: input, shape index: {}]   ;;  %s1656_s3 = inlined_call_operand.vmem [shape: f32[2,8,32], index: 3, kind: input, shape index: {}]   ;;  %s1657_s4 = inlined_call_operand.vmem [shape: f32[2,1,16], index: 4, kind: input, shape index: {}]   ;;  %s1658_s5 = inlined_call_operand.vmem [shape: f32[32,32], index: 5, kind: input, shape index: {}]   ;;  %s1659_s6 = inlined_call_operand.vmem [shape: f32[1,32], index: 6, kind: input, shape index: {}]   ;;  %s1660_s7 = inlined_call_operand.vmem [shape: f32[32,32], index: 7, kind: input, shape index: {}]   ;;  %s1661_s8 = inlined_call_operand.vmem [shape: f32[1,32], index: 8, kind: input, shape index: {}]   ;;  %s1662_s9 = inlined_call_operand.hbm [shape: f32[32,32], index: 9, kind: input, shape index: {}]   ;;  %s1663_s10 = inlined_call_operand.vmem [shape: f32[1,32], index: 10, kind: input, shape index: {}]   ;;  %s1664_s11 = inlined_call_operand.hbm [shape: f32[32,32], index: 11, kind: input, shape index: {}]   ;;  %s1665_s12 = inlined_call_operand.vmem [shape: f32[1,32], index: 12, kind: input, shape index: {}]   ;;  %s1666_s13 = inlined_call_operand.vmem [shape: f32[1,32], index: 13, kind: input, shape index: {}]   ;;  %s1667_s14 = inlined_call_operand.vmem [shape: f32[1,32], index: 14, kind: input, shape index: {}]   ;;  %s1668_s15 = inlined_call_operand.vmem [shape: f32[2,8,32], index: 15, kind: output, shape index: {}]  }
   0x1   :  { %1669 = sst [smem:[#allocation8_spill]] %s1662_s9 }
   0x2   :  { %20 = vsyncpa [#allocation3], 0 }
   0x3   :  { %21 = vsyncpa [#allocation5], 0  ;;  %s1502_s18 = smov 0  }
   0x4 LB: > { %s1670_s9 = sld [smem:[#allocation8_spill]]  ;;  %s1212_s22 = sadd.s32 4294967295, %s1408_s18   ;;  %s1408_s18 = sphi %s1502_s18, %s27_s18  }
   0x5   : > { %p1214_p0 = scmp.ge.s32.totalorder %s1408_s18, 1  ;;  %p398_p1 = scmp.lt.s32.totalorder %s1408_s18, 3 }
   0x6   : > { %p1269_p2 = scmp.eq.s32.totalorder %s1212_s22, 0  ;;  %s1410_s24 = smov [#allocation2]  }
   0x7   : > { %p1513_p3 = pnand %p1214_p0, %p398_p1  ;;  %s423_s25 = sshll.u32 %s1410_s24, 4  ;;  %s424_s25 = int_to_ptr.vmem [resolvable:$true] %s423_s25 }
   0x8   : > { %s438_s28 = sshll.u32 %s1664_s11, 4  ;;  %s1411_s29 = smov [#allocation4]   ;;  %s439_s28 = int_to_ptr.hbm [resolvable:$true] %s438_s28 }
   0x9   : > { %p1262_p4 = pneg %p1513_p3  ;;  %s440_s30 = sshll.u32 %s1411_s29, 4  ;;  %s441_s30 = int_to_ptr.vmem [resolvable:$true] %s440_s30 }
   0xa   : > { %s421_s21 = sshll.u32 %s1670_s9, 4  ;;  %s1412_s16 = smov 128   ;;  %s422_s21 = int_to_ptr.hbm [resolvable:$true] %s421_s21 }
   0xb   : > { %p1263_p5 = pnand %p1269_p2, %p1262_p4  ;;  %s1413_s17 = smov 8  }
   0xc   : > { %501 = sbr.rel (%p1513_p3) target bundleno = 1349 (0x545), region = 80 }
   0xd   : > { %1265 = dma.hbm_to_vmem [thread:$0]  (!%p1263_p5), %s422_s21, 512, %s424_s25, [#allocation3], %s1412_s16, %s1412_s16, %s1413_s17  }
   0xe   : > { %1268 = dma.hbm_to_vmem [thread:$0]  (!%p1263_p5), %s439_s28, 512, %s441_s30, [#allocation5], %s1412_s16, %s1412_s16, %s1413_s17  }
  0x11   : > { %1399 = dma.done.wait (%p1269_p2), [#allocation3], 512  }
  0x12   : > { %1401 = vsyncadd (%p1269_p2), [#allocation3], 4294966784 }
  0x13   : > { %1403 = dma.done.wait (%p1269_p2), [#allocation5], 512  }
  0x14   : > { %1405 = vsyncadd (%p1269_p2), [#allocation5], 4294966784  ;;  %p570_p6 = scmp.lt.s32.totalorder %s1212_s22, 1  ;;  %v603_v0 = vld [vmem:[%s1658_s5 + $0x18] sm:$0xff]  ;;  %v602_v2 = vld [vmem:[%s1658_s5 + $0x10] sm:$0xff]  ;;  %vm608_vm0 = vcmask 261120  }
  0x15   : > { %v635_v1 = vld [vmem:[%s1660_s7 + $0x18] sm:$0xff]  ;;  %624 = vmatpush.msra.mxu0 %v603_v0  ;;  %v634_v3 = vld [vmem:[%s1660_s7 + $0x10] sm:$0xff]  ;;  %v601_v4 = vld [vmem:[%s1658_s5 + $0x8] sm:$0xff]  ;;  %s1415_s26 = smov 120   ;;  %vm709_vm1 = vcmask 64512   ;;  %v1417_v31 = vmov 0.0  }
  0x16   : > { %s1673_s22 = smov (!%p570_p6, %s1212_s22), 1  ;;  %658 = vmatpush.msra.mxu1 %v635_v1  ;;  %v633_v5 = vld [vmem:[%s1660_s7 + $0x8] sm:$0xff]  ;;  %v600_v6 = vld [vmem:[%s1658_s5] sm:$0xff]  ;;  %v672_v20 = vld [vmem:[#allocation2 + $0x18] sm:$0xff]  ;;  %vm744_vm3 = vcmask 130048   ;;  %s1418_s21 = smov 8  }
  0x17   : > { %s1532_s19 = sshll.u32 %s1673_s22, 3  ;;  %s1252_s20 = sshll.u32 %s1673_s22, 4  ;;  %625 = vmatpush.msra.mxu0 %v602_v2  ;;  %v632_v7 = vld [vmem:[%s1660_s7] sm:$0xff]  ;;  %v671_v21 = vld [vmem:[#allocation2 + $0x10] sm:$0xff]  ;;  %695 = vmatpush.msra.mxu2 %v672_v20  ;;  %v670_v38 = vld [vmem:[#allocation2 + $0x8] sm:$0xff]  ;;  %vm1017_vm4 = vcmask 195584  }
  0x18   : > { %s573_s30 = scalar_lea.vmem %s1653_s0, %s1532_s19  ;;  %s578_s24 = scalar_lea.vmem %s1654_s1, %s1252_s20  ;;  %659 = vmatpush.msra.mxu1 %v634_v3  ;;  %v1308_v11 = vld [vmem:[%s1659_s6] ss:$0 sm:$0xff] }
  0x19   : > { %v595_v8 = vld [vmem:[%s573_s30] sm:$0xff]  ;;  %626 = vmatpush.msra.mxu0 %v601_v4  ;;  %v597_v10 = vld [vmem:[%s578_s24 + $0x8] sm:$0xff]  ;;  %s1414_s30 = smov 112   ;;  %696 = vmatpush.msra.mxu2 %v671_v21  ;;  %s590_s29 = scalar_lea.vmem %s1657_s4, %s1673_s22 }
  0x1a   : > { %v596_v9 = vld [vmem:[%s578_s24] sm:$0xff]  ;;  %660 = vmatpush.msra.mxu1 %v633_v5  ;;  %s1416_s24 = smov 104   ;;  %s583_s9 = scalar_lea.vmem %s1655_s2, %s1252_s20 }
  0x1b   : > { %627 = vmatpush.msra.mxu0 %v600_v6  ;;  %v1309_v12 = vld [vmem:[%s1661_s8] ss:$0 sm:$0xff]  ;;  %697 = vmatpush.msra.mxu2 %v670_v38  ;;  %v599_v41 = vld [vmem:[%s583_s9 + $0x8] sm:$0xff]  ;;  %s1419_s23 = smov 24   ;;  %s1420_s25 = smov 16  }
  0x1c   : > { %661 = vmatpush.msra.mxu1 %v632_v7  ;;  %1228 = vmatmul.msk.f32.vlgmr.msra.gmra.mxu0 %vm608_vm0, %v595_v8  ;;  %v706_v28 = vld [vmem:[%s590_s29] sm:$0x1]  ;;  %s587_s28 = scalar_lea.vmem %s1656_s3, %s1532_s19 }
  0x1d   : > { %1229 = vmatmul.msk.f32.vlgmr.msra.gmra.mxu1 %vm608_vm0, %v596_v9  ;;  %vm707_vm2 = vcmp.gt.f32.partialorder %v706_v28, 0.0  ;;  %v669_v39 = vld [vmem:[#allocation2] sm:$0xff] }
  0x1e   : > { %v708_v32 = vsel %vm707_vm2, -1e+30, %v1417_v31  ;;  %v598_v40 = vld [vmem:[%s583_s9] sm:$0xff]  ;;  %698 = vmatpush.msra.mxu2 %v669_v39 }
  0x1f   : > { %v741_v33 = vperm.slane %v708_v32, 0  ;;  %1231 = vmatmul.msk.f32.vlgmr.msra.gmra.mxu2 %vm608_vm0, %v598_v40  ;;  %v1310_v60 = vld [vmem:[%s1663_s10] ss:$0 sm:$0xff] }
  0x25   : > { %1230 = vmatmul.msk.f32.gmra.mxu1 %vm608_vm0, %v597_v10 }
  0x27   : > { %1232 = vmatmul.msk.f32.gmra.mxu2 %vm608_vm0, %v599_v41  ;;  %v1022_v41 = vld [vmem:[#allocation4 + $0x18] sm:$0xff] }
  0x99   : > { %v629_v13 = vpop.f32.mrf.mxu0 }
  0x9a   : > { %v663_v14 = vpop.f32.mrf.mxu1  ;;  %v630_v15 = vadd.f32 %v1308_v11, %v629_v13 }
  0x9b   : > { %v664_v16 = vadd.f32 %v1309_v12, %v663_v14 }
  0x9c   : > { %779 = vrot.lane.b32.xlu1 %v630_v15, %s1415_s26 }
  0x9d   : > { %857 = vrot.lane.b32.xlu2 %v664_v16, %s1414_s30 }
  0xa2   : > { %v666_v17 = vpop.f32.mrf.mxu1  ;;  %v700_v59 = vpop.f32.mrf.mxu2 }
  0xa3   : > { %v667_v18 = vadd.f32 %v1309_v12, %v666_v17  ;;  %v701_v61 = vadd.f32 %v1310_v60, %v700_v59 }
  0xa5   : > { %783 = vrot.lane.b32.xlu0 %v667_v18, %s1415_s26  ;;  %1233 = vmatpush.xpose.msk.msra.mxu3 %vm709_vm1, %v667_v18 }
  0xa6   : > { %933 = vrot.lane.b32.xlu2 %v667_v18, %s1416_s24  ;;  %859 = vrot.lane.b32.xlu1 %v667_v18, %s1414_s30 }
  0xa9   : > { %1234 = vmatpush.xpose.msk.msra.mxu3 %vm709_vm1, %v664_v16 }
  0xaa   : > { %v703_v62 = vpop.f32.mrf.mxu2 }
  0xab   : > { %v704_v63 = vadd.f32 %v1310_v60, %v703_v62 }
  0xac   : > { %1235 = vmatmul.msk.f32.vlgmr.msra.gmra.mxu3 %vm709_vm1, %v630_v15 }
  0xad   : > { %781 = vrot.lane.b32.xlu0 %v664_v16, %s1415_s26  ;;  %773 = vmatpush.msrb.mxu0 %v704_v63  ;;  %v1293_v0 = vpack.i.bf16 %v701_v61, %v704_v63 }
  0xae   : > { %855 = vrot.lane.b32.xlu1 %v630_v15, %s1414_s30  ;;  %929 = vrot.lane.b32.xlu2 %v630_v15, %s1416_s24 }
  0xaf   : > { %774 = vmatpush.msrb.mxu0 %v701_v61 }
  0xb5   : > { %931 = vrot.lane.b32.xlu0 %v664_v16, %s1416_s24 }
  0xf7   : > { %v858_v22 = vpop.permute.xlu2 %857 }
 0x100   : > { %v934_v26 = vpop.permute.xlu2 %933 }
 0x108   : > { %v930_v30 = vpop.permute.xlu2 %929 }
 0x10e   : > { %v780_v19 = vpop.permute.xlu1 %779 }
 0x117   : > { %v784_v23 = vpop.permute.xlu0 %783 }
 0x118   : > { %v860_v24 = vpop.permute.xlu1 %859  ;;  %1237 = vmatpush.xpose.msk.msrb.mxu3 %vm709_vm1, %v784_v23 }
 0x119   : > { %1241 = vmatpush.xpose.msk.msrb.mxu1 %vm709_vm1, %v860_v24 }
 0x11d   : > { %1242 = vmatpush.xpose.msk.msrb.mxu1 %vm709_vm1, %v858_v22 }
 0x11f   : > { %v782_v25 = vpop.permute.xlu0 %781 }
 0x120   : > { %v856_v27 = vpop.permute.xlu1 %855  ;;  %1238 = vmatpush.xpose.msk.msrb.mxu3 %vm709_vm1, %v782_v25 }
 0x121   : > { %1243 = vmatmul.msk.f32.vlgmr.msrb.gmra.mxu1 %vm709_vm1, %v856_v27 }
 0x122   : > { %1042 = vmatpush.msra.mxu1 %v1022_v41 }
 0x123   : > { %1239 = vmatmul.msk.f32.vlgmr.msrb.gmra.mxu3 %vm709_vm1, %v780_v19 }
 0x124   : > { %1245 = vmatpush.xpose.msk.msra.mxu3 %vm709_vm1, %v934_v26 }
 0x127   : > { %v932_v29 = vpop.permute.xlu0 %931 }
 0x128   : > { %1246 = vmatpush.xpose.msk.msra.mxu3 %vm709_vm1, %v932_v29 }
 0x12b   : > { %1247 = vmatmul.msk.f32.vlgmr.msra.gmra.mxu3 %vm709_vm1, %v930_v30 }
 0x12f   : > { %v736_v34 = vpop.f32.mrf.mxu3 }
 0x130   : > { %v739_v35 = vmul.f32 0.35355338, %v736_v34 }
 0x132   : > { %v743_v36 = vadd.f32 %v741_v33, %v739_v35 }
 0x134   : > { %v745_v37 = vsel %vm744_vm3, %v743_v36, -inf }
 0x135   : > { %746 = vmax.xlane.f32.xlu0 %v745_v37 }
 0x19e   : > { %v884_v42 = vpop.f32.mrf.mxu1 }
 0x19f   : > { %v887_v43 = vmul.f32 0.35355338, %v884_v42  ;;  %v1021_v42 = vld [vmem:[#allocation4 + $0x10] sm:$0xff] }
 0x1a0   : > { %1043 = vmatpush.msra.mxu1 %v1021_v42 }
 0x1a1   : > { %v888_v44 = vadd.f32 %v887_v43, %v741_v33  ;;  %v1020_v43 = vld [vmem:[#allocation4 + $0x8] sm:$0xff] }
 0x1a2   : > { %1044 = vmatpush.msra.mxu1 %v1020_v43 }
 0x1a3   : > { %v889_v45 = vsel %vm744_vm3, %v888_v44, -inf }
 0x1a4   : > { %890 = vmax.xlane.f32.xlu2 %v889_v45 }
 0x1a6   : > { %v808_v46 = vpop.f32.mrf.mxu3 }
 0x1a7   : > { %v811_v47 = vmul.f32 0.35355338, %v808_v46 }
 0x1a8   : > { %v747_v48 = vpop.xlane.xlu0 %746 }
 0x1a9   : > { %v748_v49 = vsub.f32 %v743_v36, %v747_v48  ;;  %v812_v50 = vadd.f32 %v811_v47, %v741_v33 }
 0x1ab   : > { %v749_v51 = vmul.f32 1.442695, %v748_v49  ;;  %v813_v52 = vsel %vm744_vm3, %v812_v50, -inf }
 0x1ac   : > { %814 = vmax.xlane.f32.xlu1 %v813_v52 }
 0x1ad   : > { %1314 = vpow2.f32 %v749_v51  ;;  %v1311_v51 = vld [vmem:[%s1665_s12] ss:$0 sm:$0xff] }
 0x1ae   : > { %v958_v53 = vpop.f32.mrf.mxu3 }
 0x1af   : > { %v961_v54 = vmul.f32 0.35355338, %v958_v53  ;;  %v1050_v53 = vld [vmem:[%s587_s28] sm:$0xff] }
 0x1b1   : > { %v962_v55 = vadd.f32 %v961_v54, %v741_v33 }
 0x1b3   : > { %v1315_v56 = vpop.eup %1314  ;;  %v963_v57 = vsel %vm744_vm3, %v962_v55, -inf }
 0x1b4   : > { %964 = vmax.xlane.f32.xlu2 %v963_v57  ;;  %v751_v58 = vsel %vm744_vm3, %v1315_v56, 0.0  ;;  %v1421_v57 = vmov 32.0  }
 0x1b5   : > { %752 = vadd.xlane.f32.xlu0 %v751_v58 }
 0x1c9   : > { %1294 = vrot.lane.b32.xlu0 %v1293_v0, %s1415_s26 }
 0x217   : > { %v891_v1 = vpop.xlane.xlu2 %890 }
 0x218   : > { %v892_v2 = vsub.f32 %v888_v44, %v891_v1  ;;  %v1019_v44 = vld [vmem:[#allocation4] sm:$0xff] }
 0x219   : > { %1045 = vmatpush.msra.mxu1 %v1019_v44 }
 0x21a   : > { %v893_v3 = vmul.f32 1.442695, %v892_v2 }
 0x21c   : > { %1316 = vpow2.f32 %v893_v3 }
 0x21f   : > { %v815_v4 = vpop.xlane.xlu1 %814 }
 0x220   : > { %v816_v5 = vsub.f32 %v812_v50, %v815_v4 }
 0x222   : > { %v1317_v6 = vpop.eup %1316  ;;  %v817_v7 = vmul.f32 1.442695, %v816_v5 }
 0x223   : > { %v895_v8 = vsel %vm744_vm3, %v1317_v6, 0.0 }
 0x224   : > { %1318 = vpow2.f32 %v817_v7  ;;  %896 = vadd.xlane.f32.xlu2 %v895_v8 }
 0x227   : > { %v965_v9 = vpop.xlane.xlu2 %964 }
 0x228   : > { %v966_v10 = vsub.f32 %v962_v55, %v965_v9  ;;  %v753_v11 = vpop.xlane.xlu0 %752 }
 0x229   : > { %1320 = vrcp.f32 %v753_v11 }
 0x22a   : > { %v1319_v12 = vpop.eup %1318  ;;  %v967_v13 = vmul.f32 1.442695, %v966_v10 }
 0x22b   : > { %v819_v14 = vsel %vm744_vm3, %v1319_v12, 0.0 }
 0x22c   : > { %1322 = vpow2.f32 %v967_v13  ;;  %820 = vadd.xlane.f32.xlu1 %v819_v14  ;;  %v1312_v14 = vld [vmem:[%s1666_s13] ss:$0 sm:$0xff] }
 0x22f   : > { %v1321_v15 = vpop.eup %1320 }
 0x230   : > { %v755_v16 = vmul.f32 %v1321_v15, %v1315_v56 }
 0x232   : > { %v1323_v17 = vpop.eup %1322  ;;  %1236 = vmatmul.msk.f32.vlgmr.msrb.gmra.mxu0 %vm744_vm3, %v755_v16  ;;  %v1313_v16 = vld [vmem:[%s1667_s14] ss:$0 sm:$0xff] }
 0x233   : > { %v969_v18 = vsel %vm744_vm3, %v1323_v17, 0.0 }
 0x234   : > { %970 = vadd.xlane.f32.xlu2 %v969_v18 }
 0x23b   : > { %v1295_v19 = vpop.permute.xlu0 %1294 }
 0x23c   : > { %v1296_v20 = vunpack.i.l.bf16 %v1295_v19  ;;  %v1297_v21 = vunpack.i.h.bf16 %v1295_v19 }
 0x23e   : > { %849 = vmatpush.msra.mxu0 %v1296_v20 }
 0x240   : > { %850 = vmatpush.msra.mxu0 %v1297_v21 }
 0x245   : > { %1299 = vrot.lane.b32.xlu1 %v1293_v0, %s1414_s30 }
 0x24c   : > { %1304 = vrot.lane.b32.xlu2 %v1293_v0, %s1416_s24 }
 0x297   : > { %v897_v22 = vpop.xlane.xlu2 %896 }
 0x29f   : > { %v821_v23 = vpop.xlane.xlu1 %820 }
 0x2a0   : > { %1324 = vrcp.f32 %v821_v23 }
 0x2a6   : > { %v1325_v24 = vpop.eup %1324 }
 0x2a7   : > { %v823_v25 = vmul.f32 %v1325_v24, %v1319_v12  ;;  %v971_v26 = vpop.xlane.xlu2 %970 }
 0x2a8   : > { %1326 = vrcp.f32 %v971_v26 }
 0x2a9   : > { %1240 = vmatmul.msk.f32.vlgmr.msra.gmra.mxu0 %vm744_vm3, %v823_v25  ;;  %1328 = vrcp.f32 %v897_v22 }
 0x2aa   : > { %1330 = vrcp.f32 %v1421_v57 }
 0x2ae   : > { %v1327_v28 = vpop.eup %1326 }
 0x2af   : > { %v1305_v27 = vpop.permute.xlu2 %1304  ;;  %v973_v31 = vmul.f32 %v1327_v28, %v1323_v17  ;;  %v1329_v33 = vpop.eup %1328 }
 0x2b0   : > { %v1306_v29 = vunpack.i.l.bf16 %v1305_v27  ;;  %v1307_v30 = vunpack.i.h.bf16 %v1305_v27  ;;  %v899_v36 = vmul.f32 %v1329_v33, %v1317_v6  ;;  %v776_v37 = vpop.f32.mrf.mxu0  ;;  %v1331_v58 = vpop.eup %1330 }
 0x2b1   : > { %v1056_v59 = vmul.f32 32.0, %v1331_v58  ;;  %vm1060_vm5 = vweird.f32 %v1331_v58 }
 0x2b2   : > { %997 = vmatpush.msrb.mxu0 %v1306_v29 }
 0x2b3   : > { %v1057_v60 = vsub.f32 1.0, %v1056_v59 }
 0x2b4   : > { %998 = vmatpush.msrb.mxu0 %v1307_v30 }
 0x2b5   : > { %1248 = vmatmul.msk.f32.vlgmr.msrb.gmra.mxu0 %vm744_vm3, %v973_v31  ;;  %v1058_v61 = vmul.f32 %v1331_v58, %v1057_v60 }
 0x2b7   : > { %v1300_v32 = vpop.permute.xlu1 %1299  ;;  %v1059_v62 = vadd.f32 %v1331_v58, %v1058_v61 }
 0x2b8   : > { %v1301_v34 = vunpack.i.l.bf16 %v1300_v32  ;;  %v1302_v35 = vunpack.i.h.bf16 %v1300_v32 }
 0x2b9   : > { %v1061_v63 = vsel %vm1060_vm5, %v1331_v58, %v1059_v62 }
 0x2ba   : > { %923 = vmatpush.msrb.mxu2 %v1301_v34 }
 0x2bc   : > { %924 = vmatpush.msrb.mxu2 %v1302_v35 }
 0x2bd   : > { %1244 = vmatmul.msk.f32.vlgmr.msrb.gmra.mxu2 %vm744_vm3, %v899_v36 }
 0x326   : > { %v852_v38 = vpop.f32.mrf.mxu0 }
 0x327   : > { %1004 = vrot.lane.b32.xlu0 %v852_v38, %s1418_s21  ;;  %s594_s21 = scalar_lea.vmem %s1668_s15, %s1532_s19 }
 0x332   : > { %v1000_v39 = vpop.f32.mrf.mxu0 }
 0x333   : > { %1012 = vrot.lane.b32.xlu0 %v1000_v39, %s1419_s23 }
 0x340   : > { %v926_v40 = vpop.f32.mrf.mxu2 }
 0x341   : > { %1008 = vrot.lane.b32.xlu1 %v926_v40, %s1420_s25 }
 0x399   : > { %v1005_v45 = vpop.permute.xlu0 %1004 }
 0x39a   : > { %v1015_v46 = vsel %vm709_vm1, %v776_v37, %v1005_v45 }
 0x3a5   : > { %v1013_v48 = vpop.permute.xlu0 %1012 }
 0x3b3   : > { %v1009_v47 = vpop.permute.xlu1 %1008 }
 0x3b4   : > { %v1016_v49 = vsel %vm744_vm3, %v1015_v46, %v1009_v47 }
 0x3b5   : > { %v1018_v50 = vsel %vm1017_vm4, %v1016_v49, %v1013_v48 }
 0x3b6   : > { %1249 = vmatmul.msk.f32.vlgmr.msra.gmra.mxu1 %vm608_vm0, %v1018_v50 }
 0x433   : > { %v1047_v52 = vpop.f32.mrf.mxu1 }
 0x434   : > { %v1048_v54 = vadd.f32 %v1311_v51, %v1047_v52 }
 0x436   : > { %v1051_v55 = vadd.f32 %v1050_v53, %v1048_v54 }
 0x438   : > { %v1052_v56 = vsel %vm608_vm0, %v1051_v55, 0.0 }
 0x439   : > { %1053 = vadd.xlane.f32.xlu1 %v1052_v56 }
 0x4ac   : > { %v1054_v0 = vpop.xlane.xlu1 %1053 }
 0x4ad   : > { %v1062_v1 = vmul.f32 %v1061_v63, %v1054_v0 }
 0x4af   : > { %v1063_v2 = vsub.f32 %v1051_v55, %v1062_v1 }
 0x4b1   : > { %v1064_v3 = vmul.f32 %v1063_v2, %v1063_v2 }
 0x4b3   : > { %v1065_v4 = vsel %vm608_vm0, %v1064_v3, 0.0 }
 0x4b4   : > { %1066 = vadd.xlane.f32.xlu0 %v1065_v4 }
 0x527   : > { %v1067_v5 = vpop.xlane.xlu0 %1066 }
 0x528   : > { %v1068_v6 = vmul.f32 %v1067_v5, %v1061_v63 }
 0x52a   : > { %v1069_v7 = vadd.f32 1e-05, %v1068_v6 }
 0x52c   : > { %1332 = vrsqrt.f32 %v1069_v7  ;;  %vm1076_vm7 = vweird.f32 %v1069_v7 }
 0x532   : > { %v1333_v8 = vpop.eup %1332 }
 0x533   : > { %v1071_v9 = vmul.f32 %v1333_v8, %v1069_v7  ;;  %vm1077_vm6 = vweird.f32 %v1333_v8 }
 0x534   : > { %vm1078_vm8 = vmor %vm1076_vm7, %vm1077_vm6 }
 0x535   : > { %v1072_v10 = vmul.f32 %v1333_v8, %v1071_v9 }
 0x537   : > { %v1073_v11 = vmul.f32 0.5, %v1072_v10 }
 0x539   : > { %v1074_v12 = vsub.f32 1.5, %v1073_v11 }
 0x53b   : > { %v1075_v13 = vmul.f32 %v1333_v8, %v1074_v12 }
 0x53d   : > { %v1079_v15 = vsel %vm1078_vm8, %v1333_v8, %v1075_v13 }
 0x53e   : > { %v1080_v17 = vmul.f32 %v1079_v15, %v1063_v2 }
 0x540   : > { %v1085_v18 = vmul.f32 %v1312_v14, %v1080_v17 }
 0x542   : > { %v1090_v19 = vadd.f32 %v1313_v16, %v1085_v18 }
 0x544   : > { %1091 = vst.msk [vmem:[%s594_s21] sm:$0xff] %vm608_vm0, %v1090_v19 }
 0x545 PF: > { %s27_s18 = sadd.s32 1, %s1408_s18  }
 0x546   : > { %p24_p7 = scmp.ge.s32.totalorder %s27_s18, 4  }
 0x548   :  { %26 = sbr.rel (!%p24_p7) target bundleno = 4 (0x4), region = 131 }
 0x54d   :  { %1111 = vsyncpa [#allocation3], 1 }
 0x54e   :  { %1113 = vsyncpa [#allocation3 + $0x1], 1 }
 0x54f   :  { %1114 = vsyncpa [#allocation5], 1 }

// kernel: transformer_forward.18
= control target key start
LH: loop header
LB: loop body
LE: loop exit
PB: predicated region body
PF: predicated region fallthrough
CT: control target
= control target key end

     0   :  { %19 = vsyncpa [#allocation3], 0  ;;  %s1291_s29 = smov 0   ;;  %s1418_s0 = inlined_call_operand.vmem [shape: f32[2,8,32], index: 0, kind: input, shape index: {}, may-alias: {0,1}]   ;;  %s1419_s1 = inlined_call_operand.vmem [shape: f32[2,8,32], index: 1, kind: input, shape index: {}, may-alias: {0,1}]   ;;  %s1420_s2 = inlined_call_operand.vmem [shape: f32[2,8,32], index: 2, kind: input, shape index: {}, may-alias: {2,3}]   ;;  %s1421_s3 = inlined_call_operand.vmem [shape: f32[2,8,32], index: 3, kind: input, shape index: {}, may-alias: {2,3}]   ;;  %s1422_s4 = inlined_call_operand.vmem [shape: f32[32,32], index: 4, kind: input, shape index: {}]   ;;  %s1423_s5 = inlined_call_operand.vmem [shape: f32[1,32], index: 5, kind: input, shape index: {}]   ;;  %s1424_s6 = inlined_call_operand.vmem [shape: f32[32,32], index: 6, kind: input, shape index: {}]   ;;  %s1425_s7 = inlined_call_operand.vmem [shape: f32[1,32], index: 7, kind: input, shape index: {}]   ;;  %s1426_s8 = inlined_call_operand.vmem [shape: f32[32,32], index: 8, kind: input, shape index: {}]   ;;  %s1427_s9 = inlined_call_operand.vmem [shape: f32[1,32], index: 9, kind: input, shape index: {}]   ;;  %s1428_s10 = inlined_call_operand.hbm [shape: f32[32,32], index: 10, kind: input, shape index: {}]   ;;  %s1429_s11 = inlined_call_operand.vmem [shape: f32[1,32], index: 11, kind: input, shape index: {}]   ;;  %s1430_s12 = inlined_call_operand.vmem [shape: f32[1,32], index: 12, kind: input, shape index: {}]   ;;  %s1431_s13 = inlined_call_operand.vmem [shape: f32[1,32], index: 13, kind: input, shape index: {}]   ;;  %s1432_s14 = inlined_call_operand.vmem [shape: f32[2,8,32], index: 14, kind: output, shape index: {}]  }
   0x1 LB: > { %s399_s16 = sshll.u32 %s1428_s10, 4  ;;  %s1080_s17 = sadd.s32 4294967295, %s1204_s29   ;;  %s1204_s29 = sphi %s1291_s29, %s25_s29   ;;  %s400_s16 = int_to_ptr.hbm [resolvable:$true] %s399_s16 }
   0x2   : > { %p1082_p0 = scmp.ge.s32.totalorder %s1204_s29, 1  ;;  %p370_p1 = scmp.lt.s32.totalorder %s1204_s29, 3 }
   0x3   : > { %p1118_p2 = scmp.eq.s32.totalorder %s1080_s17, 0  ;;  %s1206_s18 = smov [#allocation2]  }
   0x4   : > { %p371_p3 = pnand %p1082_p0, %p370_p1  ;;  %s401_s19 = sshll.u32 %s1206_s18, 4  ;;  %s402_s19 = int_to_ptr.vmem [resolvable:$true] %s401_s19 }
   0x5   : > { %s1207_s20 = smov 128   ;;  %s1208_s21 = smov 8  }
   0x6   : > { %p1114_p4 = pneg %p371_p3  ;;  %454 = sbr.rel (%p371_p3) target bundleno = 1318 (0x526), region = 76 }
   0x8   : > { %p1115_p5 = pnand %p1118_p2, %p1114_p4 }
   0xa   : > { %1117 = dma.hbm_to_vmem [thread:$0]  (!%p1115_p5), %s400_s16, 512, %s402_s19, [#allocation3], %s1207_s20, %s1207_s20, %s1208_s21  }
   0xb   : > { %1199 = dma.done.wait (%p1118_p2), [#allocation3], 512  }
   0xc   : > { %1201 = vsyncadd (%p1118_p2), [#allocation3], 4294966784  ;;  %p511_p6 = scmp.lt.s32.totalorder %s1080_s17, 1  ;;  %v569_v0 = vld [vmem:[%s1424_s6 + $0x18] sm:$0xff]  ;;  %v568_v1 = vld [vmem:[%s1424_s6 + $0x10] sm:$0xff]  ;;  %vm542_vm0 = vcmask 261120  }
   0xd   : > { %v537_v2 = vld [vmem:[%s1422_s4 + $0x18] sm:$0xff]  ;;  %589 = vmatpush.msra.mxu1 %v569_v0  ;;  %v536_v3 = vld [vmem:[%s1422_s4 + $0x10] sm:$0xff]  ;;  %v567_v4 = vld [vmem:[%s1424_s6 + $0x8] sm:$0xff]  ;;  %vm628_vm1 = vcmask 64512   ;;  %s1209_s20 = smov 104   ;;  %s1210_s21 = smov 120  }
   0xe   : > { %s1434_s17 = smov (!%p511_p6, %s1080_s17), 1  ;;  %558 = vmatpush.msra.mxu0 %v537_v2  ;;  %v566_v5 = vld [vmem:[%s1424_s6] sm:$0xff]  ;;  %v535_v6 = vld [vmem:[%s1422_s4 + $0x8] sm:$0xff]  ;;  %s1211_s23 = smov 112   ;;  %v600_v16 = vld [vmem:[%s1426_s8 + $0x18] sm:$0xff]  ;;  %vm902_vm2 = vcmask 130048  }
   0xf   : > { %s1302_s22 = sshll.u32 %s1434_s17, 3  ;;  %590 = vmatpush.msra.mxu1 %v568_v1  ;;  %v534_v8 = vld [vmem:[%s1422_s4] sm:$0xff]  ;;  %v599_v17 = vld [vmem:[%s1426_s8 + $0x10] sm:$0xff]  ;;  %620 = vmatpush.msra.mxu2 %v600_v16  ;;  %v598_v18 = vld [vmem:[%s1426_s8 + $0x8] sm:$0xff]  ;;  %vm904_vm3 = vcmask 195584  }
  0x10   : > { %s518_s16 = scalar_lea.vmem %s1419_s1, %s1302_s22  ;;  %s514_s28 = scalar_lea.vmem %s1418_s0, %s1302_s22  ;;  %559 = vmatpush.msra.mxu0 %v536_v3  ;;  %v1138_v10 = vld [vmem:[%s1425_s7] ss:$0 sm:$0xff] }
  0x11   : > { %v532_v7 = vld [vmem:[%s518_s16] sm:$0xff]  ;;  %591 = vmatpush.msra.mxu1 %v567_v4  ;;  %621 = vmatpush.msra.mxu2 %v599_v17  ;;  %s522_s16 = scalar_lea.vmem %s1420_s2, %s1302_s22  ;;  %v909_v17 = vld [vmem:[#allocation2 + $0x18] sm:$0xff]  ;;  %s526_s15 = scalar_lea.vmem %s1421_s3, %s1302_s22 }
  0x12   : > { %560 = vmatpush.msra.mxu0 %v535_v6  ;;  %v531_v9 = vld [vmem:[%s514_s28] sm:$0xff] }
  0x13   : > { %592 = vmatpush.msra.mxu1 %v566_v5  ;;  %v1139_v11 = vld [vmem:[%s1423_s5] ss:$0 sm:$0xff]  ;;  %622 = vmatpush.msra.mxu2 %v598_v18  ;;  %v908_v18 = vld [vmem:[#allocation2 + $0x10] sm:$0xff] }
  0x14   : > { %561 = vmatpush.msra.mxu0 %v534_v8  ;;  %1093 = vmatmul.msk.f32.vlgmr.msra.gmra.mxu1 %vm542_vm0, %v532_v7  ;;  %v597_v19 = vld [vmem:[%s1426_s8] sm:$0xff] }
  0x15   : > { %1092 = vmatmul.msk.f32.vlgmr.msra.gmra.mxu0 %vm542_vm0, %v531_v9  ;;  %623 = vmatpush.msra.mxu2 %v597_v19  ;;  %v533_v20 = vld [vmem:[%s522_s16] sm:$0xff]  ;;  %v907_v19 = vld [vmem:[#allocation2 + $0x8] sm:$0xff] }
  0x16   : > { %1094 = vmatmul.msk.f32.vlgmr.msra.gmra.mxu2 %vm542_vm0, %v533_v20  ;;  %v1140_v30 = vld [vmem:[%s1427_s9] ss:$0 sm:$0xff] }
  0x17   : > { %v906_v20 = vld [vmem:[#allocation2] sm:$0xff] }
  0x91   : > { %v594_v12 = vpop.f32.mrf.mxu1 }
  0x92   : > { %v563_v13 = vpop.f32.mrf.mxu0  ;;  %v595_v14 = vadd.f32 %v1138_v10, %v594_v12 }
  0x93   : > { %v564_v15 = vadd.f32 %v1139_v11, %v563_v13 }
  0x94   : > { %825 = vrot.lane.b32.xlu2 %v595_v14, %s1209_s20  ;;  %692 = vrot.lane.b32.xlu1 %v595_v14, %s1210_s21 }
  0x95   : > { %759 = vrot.lane.b32.xlu0 %v595_v14, %s1211_s23  ;;  %1095 = vmatpush.xpose.msk.msra.mxu3 %vm628_vm1, %v595_v14 }
  0x98   : > { %1096 = vmatmul.msk.f32.vlgmr.msra.gmra.mxu3 %vm628_vm1, %v564_v15 }
  0x99   : > { %v625_v31 = vpop.f32.mrf.mxu2 }
  0x9a   : > { %v626_v32 = vadd.f32 %v1140_v30, %v625_v31 }
  0x9c   : > { %823 = vrot.lane.b32.xlu2 %v564_v15, %s1209_s20  ;;  %690 = vrot.lane.b32.xlu1 %v564_v15, %s1210_s21 }
  0x9d   : > { %757 = vrot.lane.b32.xlu0 %v564_v15, %s1211_s23  ;;  %685 = vmatpush.msrb.mxu3 %v626_v32 }
  0xee   : > { %v826_v22 = vpop.permute.xlu2 %825 }
  0xf6   : > { %v824_v26 = vpop.permute.xlu2 %823 }
 0x106   : > { %v693_v21 = vpop.permute.xlu1 %692 }
 0x107   : > { %v760_v23 = vpop.permute.xlu0 %759  ;;  %1098 = vmatpush.xpose.msk.msrb.mxu0 %vm628_vm1, %v693_v21 }
 0x108   : > { %1101 = vmatpush.xpose.msk.msrb.mxu2 %vm628_vm1, %v760_v23 }
 0x10b   : > { %1104 = vmatpush.xpose.msk.msra.mxu0 %vm628_vm1, %v826_v22 }
 0x10c   : > { %929 = vmatpush.msra.mxu2 %v909_v17 }
 0x10e   : > { %v691_v24 = vpop.permute.xlu1 %690  ;;  %930 = vmatpush.msra.mxu2 %v908_v18 }
 0x10f   : > { %v758_v25 = vpop.permute.xlu0 %757  ;;  %1099 = vmatmul.msk.f32.vlgmr.msrb.gmra.mxu0 %vm628_vm1, %v691_v24 }
 0x110   : > { %1102 = vmatmul.msk.f32.vlgmr.msrb.gmra.mxu2 %vm628_vm1, %v758_v25 }
 0x111   : > { %931 = vmatpush.msra.mxu2 %v907_v19 }
 0x113   : > { %932 = vmatpush.msra.mxu2 %v906_v20 }
 0x117   : > { %1105 = vmatmul.msk.f32.vlgmr.msra.gmra.mxu0 %vm628_vm1, %v824_v26 }
 0x11b   : > { %v652_v27 = vpop.f32.mrf.mxu3 }
 0x11c   : > { %v655_v28 = vmul.f32 0.35355338, %v652_v27  ;;  %v1141_v27 = vld [vmem:[%s1429_s11] ss:$0 sm:$0xff] }
 0x11e   : > { %v656_v29 = vsel %vm628_vm1, %v655_v28, -inf }
 0x11f   : > { %657 = vmax.xlane.f32.xlu0 %v656_v29  ;;  %v937_v29 = vld [vmem:[%s526_s15] sm:$0xff] }
 0x18c   : > { %v715_v33 = vpop.f32.mrf.mxu0 }
 0x18d   : > { %v718_v34 = vmul.f32 0.35355338, %v715_v33  ;;  %v1215_v33 = vmov 32.0  }
 0x18f   : > { %v719_v35 = vsel %vm628_vm1, %v718_v34, -inf }
 0x190   : > { %720 = vmax.xlane.f32.xlu1 %v719_v35 }
 0x192   : > { %v658_v36 = vpop.xlane.xlu0 %657 }
 0x193   : > { %v659_v37 = vsub.f32 %v655_v28, %v658_v36  ;;  %v782_v38 = vpop.f32.mrf.mxu2 }
 0x194   : > { %v785_v39 = vmul.f32 0.35355338, %v782_v38  ;;  %v848_v42 = vpop.f32.mrf.mxu0 }
 0x195   : > { %v660_v40 = vmul.f32 1.442695, %v659_v37  ;;  %v851_v43 = vmul.f32 0.35355338, %v848_v42 }
 0x196   : > { %v786_v41 = vsel %vm628_vm1, %v785_v39, -inf }
 0x197   : > { %1144 = vpow2.f32 %v660_v40  ;;  %787 = vmax.xlane.f32.xlu2 %v786_v41  ;;  %v852_v45 = vsel %vm628_vm1, %v851_v43, -inf }
 0x19d   : > { %v1145_v44 = vpop.eup %1144 }
 0x19e   : > { %v662_v46 = vsel %vm628_vm1, %v1145_v44, 0.0 }
 0x19f   : > { %853 = vmax.xlane.f32.xlu2 %v852_v45  ;;  %663 = vadd.xlane.f32.xlu0 %v662_v46 }
 0x203   : > { %v721_v47 = vpop.xlane.xlu1 %720 }
 0x204   : > { %v722_v48 = vsub.f32 %v718_v34, %v721_v47 }
 0x206   : > { %v723_v49 = vmul.f32 1.442695, %v722_v48 }
 0x208   : > { %1146 = vpow2.f32 %v723_v49 }
 0x20a   : > { %v788_v50 = vpop.xlane.xlu2 %787 }
 0x20b   : > { %v789_v51 = vsub.f32 %v785_v39, %v788_v50 }
 0x20d   : > { %v790_v52 = vmul.f32 1.442695, %v789_v51 }
 0x20e   : > { %v1147_v53 = vpop.eup %1146 }
 0x20f   : > { %1148 = vpow2.f32 %v790_v52  ;;  %v725_v54 = vsel %vm628_vm1, %v1147_v53, 0.0 }
 0x210   : > { %726 = vadd.xlane.f32.xlu1 %v725_v54  ;;  %v1142_v54 = vld [vmem:[%s1430_s12] ss:$0 sm:$0xff] }
 0x212   : > { %v854_v55 = vpop.xlane.xlu2 %853  ;;  %v664_v56 = vpop.xlane.xlu0 %663 }
 0x213   : > { %v855_v57 = vsub.f32 %v851_v43, %v854_v55  ;;  %1150 = vrcp.f32 %v664_v56  ;;  %v1143_v56 = vld [vmem:[%s1431_s13] ss:$0 sm:$0xff] }
 0x215   : > { %v1149_v58 = vpop.eup %1148  ;;  %v856_v59 = vmul.f32 1.442695, %v855_v57 }
 0x216   : > { %v792_v60 = vsel %vm628_vm1, %v1149_v58, 0.0 }
 0x217   : > { %1152 = vpow2.f32 %v856_v59  ;;  %793 = vadd.xlane.f32.xlu2 %v792_v60 }
 0x219   : > { %v1151_v61 = vpop.eup %1150 }
 0x21a   : > { %v666_v62 = vmul.f32 %v1151_v61, %v1145_v44 }
 0x21c   : > { %1097 = vmatmul.msk.f32.vlgmr.msrb.gmra.mxu3 %vm628_vm1, %v666_v62 }
 0x21d   : > { %v1153_v63 = vpop.eup %1152 }
 0x21e   : > { %v858_v0 = vsel %vm628_vm1, %v1153_v63, 0.0 }
 0x21f   : > { %859 = vadd.xlane.f32.xlu0 %v858_v0 }
 0x229   : > { %731 = vrot.lane.b32.xlu1 %v626_v32, %s1210_s21  ;;  %s1213_s21 = smov 8  }
 0x22f   : > { %797 = vrot.lane.b32.xlu2 %v626_v32, %s1211_s23  ;;  %s1214_s23 = smov 24  }
 0x233   : > { %863 = vrot.lane.b32.xlu0 %v626_v32, %s1209_s20  ;;  %s1212_s20 = smov 16  }
 0x283   : > { %v727_v2 = vpop.xlane.xlu1 %726 }
 0x28a   : > { %v794_v1 = vpop.xlane.xlu2 %793 }
 0x28b   : > { %1154 = vrcp.f32 %v794_v1 }
 0x28c   : > { %1156 = vrcp.f32 %v727_v2 }
 0x291   : > { %v1155_v3 = vpop.eup %1154 }
 0x292   : > { %v796_v4 = vmul.f32 %v1155_v3, %v1149_v58  ;;  %v798_v5 = vpop.permute.xlu2 %797  ;;  %v1157_v6 = vpop.eup %1156 }
 0x293   : > { %818 = vmatpush.msra.mxu3 %v798_v5  ;;  %v860_v7 = vpop.xlane.xlu0 %859  ;;  %v729_v9 = vmul.f32 %v1157_v6, %v1147_v53 }
 0x294   : > { %1103 = vmatmul.msk.f32.vlgmr.msra.gmra.mxu3 %vm628_vm1, %v796_v4  ;;  %1158 = vrcp.f32 %v860_v7 }
 0x295   : > { %1160 = vrcp.f32 %v1215_v33 }
 0x29a   : > { %v1159_v10 = vpop.eup %1158 }
 0x29b   : > { %v732_v8 = vpop.permute.xlu1 %731  ;;  %v862_v11 = vmul.f32 %v1159_v10, %v1153_v63  ;;  %v1161_v34 = vpop.eup %1160 }
 0x29c   : > { %752 = vmatpush.msrb.mxu1 %v732_v8  ;;  %v943_v35 = vmul.f32 32.0, %v1161_v34  ;;  %vm947_vm4 = vweird.f32 %v1161_v34 }
 0x29d   : > { %1100 = vmatmul.msk.f32.vlgmr.msrb.gmra.mxu1 %vm628_vm1, %v729_v9 }
 0x29e   : > { %v944_v36 = vsub.f32 1.0, %v943_v35 }
 0x29f   : > { %v687_v13 = vpop.f32.mrf.mxu3 }
 0x2a0   : > { %v945_v37 = vmul.f32 %v1161_v34, %v944_v36 }
 0x2a2   : > { %v946_v38 = vadd.f32 %v1161_v34, %v945_v37 }
 0x2a4   : > { %v948_v39 = vsel %vm947_vm4, %v1161_v34, %v946_v38 }
 0x2a5   : > { %v864_v12 = vpop.permute.xlu0 %863 }
 0x2a6   : > { %884 = vmatpush.msra.mxu1 %v864_v12 }
 0x2a7   : > { %1106 = vmatmul.msk.f32.vlgmr.msra.gmra.mxu1 %vm628_vm1, %v862_v11 }
 0x317   : > { %v820_v14 = vpop.f32.mrf.mxu3 }
 0x318   : > { %894 = vrot.lane.b32.xlu0 %v820_v14, %s1212_s20  ;;  %s530_s20 = scalar_lea.vmem %s1432_s14, %s1302_s22 }
 0x31a   : > { %v754_v15 = vpop.f32.mrf.mxu1 }
 0x31b   : > { %890 = vrot.lane.b32.xlu1 %v754_v15, %s1213_s21 }
 0x324   : > { %v886_v16 = vpop.f32.mrf.mxu1 }
 0x325   : > { %898 = vrot.lane.b32.xlu2 %v886_v16, %s1214_s23 }
 0x37f   : > { %v899_v24 = vpop.permute.xlu2 %898 }
 0x38a   : > { %v895_v22 = vpop.permute.xlu0 %894 }
 0x38d   : > { %v891_v21 = vpop.permute.xlu1 %890 }
 0x38e   : > { %v901_v23 = vsel %vm628_vm1, %v687_v13, %v891_v21 }
 0x38f   : > { %v903_v25 = vsel %vm902_vm2, %v901_v23, %v895_v22 }
 0x390   : > { %v905_v26 = vsel %vm904_vm3, %v903_v25, %v899_v24 }
 0x391   : > { %1107 = vmatmul.msk.f32.vlgmr.msra.gmra.mxu2 %vm542_vm0, %v905_v26 }
 0x414   : > { %v934_v28 = vpop.f32.mrf.mxu2 }
 0x415   : > { %v935_v30 = vadd.f32 %v1141_v27, %v934_v28 }
 0x417   : > { %v938_v31 = vadd.f32 %v937_v29, %v935_v30 }
 0x419   : > { %v939_v32 = vsel %vm542_vm0, %v938_v31, 0.0 }
 0x41a   : > { %940 = vadd.xlane.f32.xlu1 %v939_v32 }
 0x48d   : > { %v941_v40 = vpop.xlane.xlu1 %940 }
 0x48e   : > { %v949_v41 = vmul.f32 %v948_v39, %v941_v40 }
 0x490   : > { %v950_v42 = vsub.f32 %v938_v31, %v949_v41 }
 0x492   : > { %v951_v43 = vmul.f32 %v950_v42, %v950_v42 }
 0x494   : > { %v952_v44 = vsel %vm542_vm0, %v951_v43, 0.0 }
 0x495   : > { %953 = vadd.xlane.f32.xlu0 %v952_v44 }
 0x508   : > { %v954_v45 = vpop.xlane.xlu0 %953 }
 0x509   : > { %v955_v46 = vmul.f32 %v954_v45, %v948_v39 }
 0x50b   : > { %v956_v47 = vadd.f32 1e-05, %v955_v46 }
 0x50d   : > { %1162 = vrsqrt.f32 %v956_v47  ;;  %vm963_vm6 = vweird.f32 %v956_v47 }
 0x513   : > { %v1163_v48 = vpop.eup %1162 }
 0x514   : > { %v958_v49 = vmul.f32 %v1163_v48, %v956_v47  ;;  %vm964_vm5 = vweird.f32 %v1163_v48 }
 0x515   : > { %vm965_vm7 = vmor %vm963_vm6, %vm964_vm5 }
 0x516   : > { %v959_v50 = vmul.f32 %v1163_v48, %v958_v49 }
 0x518   : > { %v960_v51 = vmul.f32 0.5, %v959_v50 }
 0x51a   : > { %v961_v52 = vsub.f32 1.5, %v960_v51 }
 0x51c   : > { %v962_v53 = vmul.f32 %v1163_v48, %v961_v52 }
 0x51e   : > { %v966_v55 = vsel %vm965_vm7, %v1163_v48, %v962_v53 }
 0x51f   : > { %v967_v57 = vmul.f32 %v966_v55, %v950_v42 }
 0x521   : > { %v972_v58 = vmul.f32 %v1142_v54, %v967_v57 }
 0x523   : > { %v977_v59 = vadd.f32 %v1143_v56, %v972_v58 }
 0x525   : > { %978 = vst.msk [vmem:[%s530_s20] sm:$0xff] %vm542_vm0, %v977_v59 }
 0x526 PF: > { %s25_s29 = sadd.s32 1, %s1204_s29  }
 0x527   : > { %p22_p7 = scmp.ge.s32.totalorder %s25_s29, 4  }
 0x529   :  { %24 = sbr.rel (!%p22_p7) target bundleno = 1 (0x1), region = 120 }
 0x52e   :  { %998 = vsyncpa [#allocation3], 1 }
 0x52f   :  { %1000 = vsyncpa [#allocation3 + $0x1], 1 }

// kernel: transformer_forward.21
= control target key start
LH: loop header
LB: loop body
LE: loop exit
PB: predicated region body
PF: predicated region fallthrough
CT: control target
= control target key end

     0   :  { %vm17_vm0 = vcmask 261120   ;;  %s184_s0 = inlined_call_operand.vmem [shape: f32[16,32], index: 0, kind: input, shape index: {}]   ;;  %s185_s1 = inlined_call_operand.vmem [shape: f32[1,32], index: 1, kind: input, shape index: {}]   ;;  %s186_s2 = inlined_call_operand.vmem [shape: f32[1,32], index: 2, kind: input, shape index: {}]   ;;  %s187_s3 = inlined_call_operand.hbm [shape: f32[16,32], index: 3, kind: output, shape index: {}]  }
   0x1   :  { %v15_v0 = vld [vmem:[%s184_s0] sm:$0xff] }
   0x2   :  { %v18_v1 = vsel %vm17_vm0, %v15_v0, 0.0 }
   0x3   :  { %8 = vsyncpa [#allocation3], 0  ;;  %19 = vadd.xlane.f32.xlu0 %v18_v1  ;;  %v16_v2 = vld [vmem:[%s184_s0 + $0x8] sm:$0xff]  ;;  %v139_v4 = vmov 32.0   ;;  %v105_v35 = vld [vmem:[%s185_s1] ss:$0 sm:$0xff] }
   0x4   :  { %v21_v3 = vsel %vm17_vm0, %v16_v2, 0.0  ;;  %107 = vrcp.f32 %v139_v4  ;;  %v106_v39 = vld [vmem:[%s186_s2] ss:$0 sm:$0xff]  ;;  %s140_s1 = smov [#allocation2]   ;;  %s89_s22 = sshll.u32 %s187_s3, 4  ;;  %s90_s22 = int_to_ptr.hbm [resolvable:$true] %s89_s22 }
   0x5   :  { %s87_s19 = sshll.u32 %s140_s1, 4  ;;  %s141_s2 = smov 128   ;;  %s88_s19 = int_to_ptr.vmem [resolvable:$true] %s87_s19 }
   0x6   :  { %s142_s23 = smov 8  }
   0xa   :  { %v108_v5 = vpop.eup %107 }
   0xb   :  { %22 = vadd.xlane.f32.xlu0 %v21_v3  ;;  %v25_v6 = vmul.f32 32.0, %v108_v5  ;;  %vm29_vm1 = vweird.f32 %v108_v5 }
   0xd   :  { %v26_v7 = vsub.f32 1.0, %v25_v6 }
   0xf   :  { %v27_v8 = vmul.f32 %v108_v5, %v26_v7 }
  0x11   :  { %v28_v9 = vadd.f32 %v108_v5, %v27_v8 }
  0x13   :  { %v30_v10 = vsel %vm29_vm1, %v108_v5, %v28_v9 }
  0x76   :  { %v20_v11 = vpop.xlane.xlu0 %19 }
  0x77   :  { %v31_v12 = vmul.f32 %v30_v10, %v20_v11 }
  0x79   :  { %v33_v13 = vsub.f32 %v15_v0, %v31_v12 }
  0x7b   :  { %v35_v14 = vmul.f32 %v33_v13, %v33_v13 }
  0x7d   :  { %v37_v15 = vsel %vm17_vm0, %v35_v14, 0.0 }
  0x7e   :  { %38 = vadd.xlane.f32.xlu1 %v37_v15  ;;  %v23_v16 = vpop.xlane.xlu0 %22 }
  0x7f   :  { %v32_v17 = vmul.f32 %v30_v10, %v23_v16 }
  0x81   :  { %v34_v18 = vsub.f32 %v16_v2, %v32_v17 }
  0x83   :  { %v36_v19 = vmul.f32 %v34_v18, %v34_v18 }
  0x85   :  { %v40_v20 = vsel %vm17_vm0, %v36_v19, 0.0 }
  0x86   :  { %41 = vadd.xlane.f32.xlu1 %v40_v20 }
  0xf1   :  { %v39_v21 = vpop.xlane.xlu1 %38 }
  0xf2   :  { %v43_v22 = vmul.f32 %v39_v21, %v30_v10 }
  0xf4   :  { %v45_v23 = vadd.f32 1e-05, %v43_v22 }
  0xf6   :  { %109 = vrsqrt.f32 %v45_v23  ;;  %vm53_vm3 = vweird.f32 %v45_v23 }
  0xf9   :  { %v42_v24 = vpop.xlane.xlu1 %41 }
  0xfa   :  { %v44_v25 = vmul.f32 %v42_v24, %v30_v10 }
  0xfc   :  { %v110_v26 = vpop.eup %109  ;;  %v46_v27 = vadd.f32 1e-05, %v44_v25 }
  0xfd   :  { %v48_v28 = vmul.f32 %v110_v26, %v45_v23  ;;  %vm54_vm2 = vweird.f32 %v110_v26 }
  0xfe   :  { %111 = vrsqrt.f32 %v46_v27  ;;  %vm55_vm4 = vmor %vm53_vm3, %vm54_vm2  ;;  %vm63_vm6 = vweird.f32 %v46_v27 }
  0xff   :  { %v49_v29 = vmul.f32 %v110_v26, %v48_v28 }
 0x101   :  { %v50_v30 = vmul.f32 0.5, %v49_v29 }
 0x103   :  { %v51_v31 = vsub.f32 1.5, %v50_v30 }
 0x104   :  { %v112_v32 = vpop.eup %111 }
 0x105   :  { %v52_v33 = vmul.f32 %v110_v26, %v51_v31  ;;  %v58_v34 = vmul.f32 %v112_v32, %v46_v27  ;;  %vm64_vm5 = vweird.f32 %v112_v32 }
 0x106   :  { %vm65_vm7 = vmor %vm63_vm6, %vm64_vm5 }
 0x107   :  { %v56_v36 = vsel %vm55_vm4, %v110_v26, %v52_v33  ;;  %v59_v37 = vmul.f32 %v112_v32, %v58_v34 }
 0x108   :  { %v67_v38 = vmul.f32 %v56_v36, %v33_v13 }
 0x109   :  { %v60_v40 = vmul.f32 0.5, %v59_v37 }
 0x10a   :  { %v73_v41 = vmul.f32 %v105_v35, %v67_v38 }
 0x10b   :  { %v61_v42 = vsub.f32 1.5, %v60_v40 }
 0x10c   :  { %v79_v43 = vadd.f32 %v106_v39, %v73_v41 }
 0x10d   :  { %v62_v44 = vmul.f32 %v112_v32, %v61_v42 }
 0x10e   :  { %81 = vst.msk [vmem:[#allocation2] sm:$0xff] %vm17_vm0, %v79_v43 }
 0x10f   :  { %v66_v45 = vsel %vm65_vm7, %v112_v32, %v62_v44 }
 0x110   :  { %v68_v46 = vmul.f32 %v66_v45, %v34_v18 }
 0x112   :  { %v74_v47 = vmul.f32 %v105_v35, %v68_v46 }
 0x114   :  { %v80_v48 = vadd.f32 %v106_v39, %v74_v47 }
 0x116   :  { %82 = vst.msk [vmem:[#allocation2 + $0x8] sm:$0xff] %vm17_vm0, %v80_v48 }
 0x117   :  { %95 = dma.vmem_to_hbm [thread:$0]  %s88_s19, 256, %s90_s22, [#allocation3], %s141_s2, %s141_s2, %s142_s23  }
 0x118   :  { %137 = dma.done.wait [#allocation3], 256  }
 0x119   :  { %138 = vsyncadd [#allocation3], 4294967040 }
 0x11a   :  { %100 = vsyncpa [#allocation3], 1 }

// kernel: transformer_forward.19
= control target key start
LH: loop header
LB: loop body
LE: loop exit
PB: predicated region body
PF: predicated region fallthrough
CT: control target
= control target key end

     0   :  { %s1803_s0 = inlined_call_operand.vmem [shape: f32[2,8,32], index: 0, kind: input, shape index: {}]   ;;  %s1804_s1 = inlined_call_operand.vmem [shape: f32[2,16,32], index: 1, kind: input, shape index: {}]   ;;  %s1805_s2 = inlined_call_operand.vmem [shape: f32[2,16,32], index: 2, kind: input, shape index: {}]   ;;  %s1806_s3 = inlined_call_operand.vmem [shape: f32[2,8,32], index: 3, kind: input, shape index: {}]   ;;  %s1807_s4 = inlined_call_operand.vmem [shape: f32[2,1,16], index: 4, kind: input, shape index: {}]   ;;  %s1808_s5 = inlined_call_operand.hbm [shape: f32[32,32], index: 5, kind: input, shape index: {}]   ;;  %s1809_s6 = inlined_call_operand.vmem [shape: f32[1,32], index: 6, kind: input, shape index: {}]   ;;  %s1810_s7 = inlined_call_operand.hbm [shape: f32[32,32], index: 7, kind: input, shape index: {}]   ;;  %s1811_s8 = inlined_call_operand.vmem [shape: f32[1,32], index: 8, kind: input, shape index: {}]   ;;  %s1812_s9 = inlined_call_operand.hbm [shape: f32[32,32], index: 9, kind: input, shape index: {}]   ;;  %s1813_s10 = inlined_call_operand.vmem [shape: f32[1,32], index: 10, kind: input, shape index: {}]   ;;  %s1814_s11 = inlined_call_operand.hbm [shape: f32[32,32], index: 11, kind: input, shape index: {}]   ;;  %s1815_s12 = inlined_call_operand.vmem [shape: f32[1,32], index: 12, kind: input, shape index: {}]   ;;  %s1816_s13 = inlined_call_operand.vmem [shape: f32[1,32], index: 13, kind: input, shape index: {}]   ;;  %s1817_s14 = inlined_call_operand.vmem [shape: f32[1,32], index: 14, kind: input, shape index: {}]   ;;  %s1818_s15 = inlined_call_operand.vmem [shape: f32[2,8,32], index: 15, kind: output, shape index: {}]  }
   0x1   :  { %1820 = sst [smem:[#allocation13_spill]] %s1808_s5 }
   0x2   :  { %1821 = sst [smem:[#allocation14_spill]] %s1810_s7 }
   0x3   :  { %1822 = sst [smem:[#allocation15_spill]] %s1818_s15 }
   0x4   :  { %20 = vsyncpa [#allocation3], 0 }
   0x5   :  { %21 = vsyncpa [#allocation5], 0 }
   0x6   :  { %22 = vsyncpa [#allocation8], 0  ;;  %s1644_s18 = smov 0  }
   0x7 LB: > { %1823 = sst [smem:[#allocation12_spill]] %s1548_s18  ;;  %s1650_s19 = sadd.s32 4294967295, %s1548_s18   ;;  %s1548_s18 = sphi %s1644_s18, %s28_s18  }
   0x8   : > { %p1266_p0 = scmp.ge.s32.totalorder %s1548_s18, 1  ;;  %p399_p1 = scmp.lt.s32.totalorder %s1548_s18, 3 }
   0x9   : > { %p1339_p2 = scmp.eq.s32.totalorder %s1650_s19, 0  ;;  %s1824_s7 = sld [smem:[#allocation14_spill]] }
   0xa   : > { %p1658_p3 = pnand %p1266_p0, %p399_p1  ;;  %s1826_s5 = sld [smem:[#allocation13_spill]] }
   0xb   : > { %s1550_s27 = smov [#allocation4]   ;;  %s1551_s30 = smov [#allocation2]  }
   0xc   : > { %p1326_p4 = pneg %p1658_p3  ;;  %s429_s28 = sshll.u32 %s1550_s27, 4  ;;  %s430_s28 = int_to_ptr.vmem [resolvable:$true] %s429_s28 }
   0xd   : > { %s412_s16 = sshll.u32 %s1551_s30, 4  ;;  %s444_s21 = sshll.u32 %s1812_s9, 4  ;;  %s413_s16 = int_to_ptr.vmem [resolvable:$true] %s412_s16  ;;  %s445_s21 = int_to_ptr.hbm [resolvable:$true] %s444_s21 }
   0xe   : > { %p1669_p5 = pnand %p1339_p2, %p1326_p4  ;;  %s1552_s24 = smov 128  }
   0xf   : > { %s427_s22 = sshll.u32 %s1824_s7, 4  ;;  %s1553_s25 = smov 8   ;;  %s428_s22 = int_to_ptr.hbm [resolvable:$true] %s427_s22 }
  0x10   : > { %s410_s26 = sshll.u32 %s1826_s5, 4  ;;  %s1554_s27 = smov [#allocation6]   ;;  %s411_s26 = int_to_ptr.hbm [resolvable:$true] %s410_s26 }
  0x11   : > { %1332 = dma.hbm_to_vmem [thread:$0]  (!%p1669_p5), %s428_s22, 512, %s430_s28, [#allocation5], %s1552_s24, %s1552_s24, %s1553_s25  }
  0x12   : > { %1329 = dma.hbm_to_vmem [thread:$0]  (!%p1669_p5), %s411_s26, 512, %s413_s16, [#allocation3], %s1552_s24, %s1552_s24, %s1553_s25  }
  0x13   : > { %s446_s5 = sshll.u32 %s1554_s27, 4  ;;  %s461_s15 = sshll.u32 %s1814_s11, 4  ;;  %s447_s5 = int_to_ptr.vmem [resolvable:$true] %s446_s5  ;;  %s462_s15 = int_to_ptr.hbm [resolvable:$true] %s461_s15 }
  0x14   : > { %1335 = dma.hbm_to_vmem [thread:$0]  (!%p1669_p5), %s445_s21, 512, %s447_s5, [#allocation5], %s1552_s24, %s1552_s24, %s1553_s25  }
  0x15   : > { %s1555_s30 = smov [#allocation7]   ;;  %524 = sbr.rel (%p1658_p3) target bundleno = 1360 (0x550), region = 80 }
  0x16   : > { %s463_s17 = sshll.u32 %s1555_s30, 4  ;;  %s464_s17 = int_to_ptr.vmem [resolvable:$true] %s463_s17 }
  0x17   : > { %1338 = dma.hbm_to_vmem [thread:$0]  (!%p1669_p5), %s462_s15, 512, %s464_s17, [#allocation8], %s1552_s24, %s1552_s24, %s1553_s25  }
  0x1a   : > { %1535 = dma.done.wait (%p1339_p2), [#allocation3], 512  }
  0x1b   : > { %1537 = vsyncadd (%p1339_p2), [#allocation3], 4294966784 }
  0x1c   : > { %1539 = dma.done.wait (%p1339_p2), [#allocation5], 1024  }
  0x1d   : > { %1541 = vsyncadd (%p1339_p2), [#allocation5], 4294966272 }
  0x1e   : > { %1543 = dma.done.wait (%p1339_p2), [#allocation8], 512  }
  0x1f   : > { %1545 = vsyncadd (%p1339_p2), [#allocation8], 4294966784  ;;  %p603_p6 = scmp.lt.s32.totalorder %s1650_s19, 1  ;;  %v636_v0 = vld [vmem:[#allocation2 + $0x18] sm:$0xff]  ;;  %v635_v2 = vld [vmem:[#allocation2 + $0x10] sm:$0xff]  ;;  %vm641_vm0 = vcmask 261120  }
  0x20   : > { %v668_v1 = vld [vmem:[#allocation4 + $0x18] sm:$0xff]  ;;  %657 = vmatpush.msra.mxu0 %v636_v0  ;;  %v667_v3 = vld [vmem:[#allocation4 + $0x10] sm:$0xff]  ;;  %v634_v4 = vld [vmem:[#allocation2 + $0x8] sm:$0xff]  ;;  %s1556_s24 = smov 112   ;;  %s1557_s25 = smov 120   ;;  %vm742_vm1 = vcmask 64512  }
  0x21   : > { %s1831_s19 = smov (!%p603_p6, %s1650_s19), 1  ;;  %691 = vmatpush.msra.mxu1 %v668_v1  ;;  %v666_v5 = vld [vmem:[#allocation4 + $0x8] sm:$0xff]  ;;  %v633_v6 = vld [vmem:[#allocation2] sm:$0xff]  ;;  %s1558_s27 = smov 104   ;;  %v705_v20 = vld [vmem:[#allocation6 + $0x18] sm:$0xff]  ;;  %v1559_v31 = vmov 0.0  }
  0x22   : > { %s1706_s5 = sshll.u32 %s1831_s19, 3  ;;  %s1308_s7 = sshll.u32 %s1831_s19, 4  ;;  %658 = vmatpush.msra.mxu0 %v635_v2  ;;  %v665_v7 = vld [vmem:[#allocation4] sm:$0xff]  ;;  %v704_v21 = vld [vmem:[#allocation6 + $0x10] sm:$0xff]  ;;  %728 = vmatpush.msra.mxu2 %v705_v20  ;;  %vm777_vm3 = vcmask 130048   ;;  %v703_v38 = vld [vmem:[#allocation6 + $0x8] sm:$0xff] }
  0x23   : > { %s606_s22 = scalar_lea.vmem %s1803_s0, %s1706_s5  ;;  %s611_s28 = scalar_lea.vmem %s1804_s1, %s1308_s7  ;;  %692 = vmatpush.msra.mxu1 %v667_v3  ;;  %v1384_v11 = vld [vmem:[%s1809_s6] ss:$0 sm:$0xff]  ;;  %vm1050_vm4 = vcmask 195584  }
  0x24   : > { %v628_v8 = vld [vmem:[%s606_s22] sm:$0xff]  ;;  %659 = vmatpush.msra.mxu0 %v634_v4  ;;  %v630_v10 = vld [vmem:[%s611_s28 + $0x8] sm:$0xff]  ;;  %729 = vmatpush.msra.mxu2 %v704_v21  ;;  %s623_s15 = scalar_lea.vmem %s1807_s4, %s1831_s19  ;;  %s616_s23 = scalar_lea.vmem %s1805_s2, %s1308_s7 }
  0x25   : > { %v629_v9 = vld [vmem:[%s611_s28] sm:$0xff]  ;;  %693 = vmatpush.msra.mxu1 %v666_v5  ;;  %v632_v41 = vld [vmem:[%s616_s23 + $0x8] sm:$0xff]  ;;  %s1560_s26 = smov 8   ;;  %s1561_s28 = smov 24  }
  0x26   : > { %660 = vmatpush.msra.mxu0 %v633_v6  ;;  %v1385_v12 = vld [vmem:[%s1811_s8] ss:$0 sm:$0xff]  ;;  %730 = vmatpush.msra.mxu2 %v703_v38  ;;  %s1562_s29 = smov 16  }
  0x27   : > { %694 = vmatpush.msra.mxu1 %v665_v7  ;;  %1284 = vmatmul.msk.f32.vlgmr.msra.gmra.mxu0 %vm641_vm0, %v628_v8  ;;  %v739_v28 = vld [vmem:[%s623_s15] sm:$0x1] }
  0x28   : > { %1285 = vmatmul.msk.f32.vlgmr.msra.gmra.mxu1 %vm641_vm0, %v629_v9  ;;  %vm740_vm2 = vcmp.gt.f32.partialorder %v739_v28, 0.0  ;;  %v702_v39 = vld [vmem:[#allocation6] sm:$0xff] }
  0x29   : > { %v741_v32 = vsel %vm740_vm2, -1e+30, %v1559_v31  ;;  %v631_v40 = vld [vmem:[%s616_s23] sm:$0xff]  ;;  %731 = vmatpush.msra.mxu2 %v702_v39  ;;  %s1828_s23 = sld [smem:[#allocation15_spill]] }
  0x2a   : > { %v774_v33 = vperm.slane %v741_v32, 0  ;;  %1287 = vmatmul.msk.f32.vlgmr.msra.gmra.mxu2 %vm641_vm0, %v631_v40  ;;  %v1386_v60 = vld [vmem:[%s1813_s10] ss:$0 sm:$0xff] }
  0x2f   : > { %s627_s19 = scalar_lea.vmem %s1828_s23, %s1706_s5 }
  0x30   : > { %1286 = vmatmul.msk.f32.gmra.mxu1 %vm641_vm0, %v630_v10 }
  0x32   : > { %1288 = vmatmul.msk.f32.gmra.mxu2 %vm641_vm0, %v632_v41  ;;  %v1055_v41 = vld [vmem:[#allocation7 + $0x18] sm:$0xff] }
  0xa4   : > { %v662_v13 = vpop.f32.mrf.mxu0 }
  0xa5   : > { %v696_v14 = vpop.f32.mrf.mxu1  ;;  %v663_v15 = vadd.f32 %v1384_v11, %v662_v13 }
  0xa6   : > { %v697_v16 = vadd.f32 %v1385_v12, %v696_v14 }
  0xa7   : > { %812 = vrot.lane.b32.xlu1 %v663_v15, %s1557_s25 }
  0xa8   : > { %890 = vrot.lane.b32.xlu2 %v697_v16, %s1556_s24 }
  0xad   : > { %v699_v17 = vpop.f32.mrf.mxu1  ;;  %v733_v59 = vpop.f32.mrf.mxu2 }
  0xae   : > { %v700_v18 = vadd.f32 %v1385_v12, %v699_v17  ;;  %v734_v61 = vadd.f32 %v1386_v60, %v733_v59 }
  0xb0   : > { %816 = vrot.lane.b32.xlu0 %v700_v18, %s1557_s25  ;;  %1289 = vmatpush.xpose.msk.msra.mxu3 %vm742_vm1, %v700_v18 }
  0xb1   : > { %966 = vrot.lane.b32.xlu2 %v700_v18, %s1558_s27  ;;  %892 = vrot.lane.b32.xlu1 %v700_v18, %s1556_s24 }
  0xb4   : > { %1290 = vmatpush.xpose.msk.msra.mxu3 %vm742_vm1, %v697_v16 }
  0xb5   : > { %v736_v62 = vpop.f32.mrf.mxu2 }
  0xb6   : > { %v737_v63 = vadd.f32 %v1386_v60, %v736_v62 }
  0xb7   : > { %1291 = vmatmul.msk.f32.vlgmr.msra.gmra.mxu3 %vm742_vm1, %v663_v15 }
  0xb8   : > { %814 = vrot.lane.b32.xlu0 %v697_v16, %s1557_s25  ;;  %806 = vmatpush.msrb.mxu0 %v737_v63  ;;  %v1369_v0 = vpack.i.bf16 %v734_v61, %v737_v63 }
  0xb9   : > { %888 = vrot.lane.b32.xlu1 %v663_v15, %s1556_s24  ;;  %962 = vrot.lane.b32.xlu2 %v663_v15, %s1558_s27 }
  0xba   : > { %807 = vmatpush.msrb.mxu0 %v734_v61 }
  0xc0   : > { %964 = vrot.lane.b32.xlu0 %v697_v16, %s1558_s27 }
 0x102   : > { %v891_v22 = vpop.permute.xlu2 %890 }
 0x10b   : > { %v967_v26 = vpop.permute.xlu2 %966 }
 0x113   : > { %v963_v30 = vpop.permute.xlu2 %962 }
 0x119   : > { %v813_v19 = vpop.permute.xlu1 %812 }
 0x122   : > { %v817_v23 = vpop.permute.xlu0 %816 }
 0x123   : > { %v893_v24 = vpop.permute.xlu1 %892  ;;  %1293 = vmatpush.xpose.msk.msrb.mxu3 %vm742_vm1, %v817_v23 }
 0x124   : > { %1297 = vmatpush.xpose.msk.msrb.mxu1 %vm742_vm1, %v893_v24 }
 0x128   : > { %1298 = vmatpush.xpose.msk.msrb.mxu1 %vm742_vm1, %v891_v22 }
 0x12a   : > { %v815_v25 = vpop.permute.xlu0 %814 }
 0x12b   : > { %v889_v27 = vpop.permute.xlu1 %888  ;;  %1294 = vmatpush.xpose.msk.msrb.mxu3 %vm742_vm1, %v815_v25 }
 0x12c   : > { %1299 = vmatmul.msk.f32.vlgmr.msrb.gmra.mxu1 %vm742_vm1, %v889_v27 }
 0x12d   : > { %1075 = vmatpush.msra.mxu1 %v1055_v41 }
 0x12e   : > { %1295 = vmatmul.msk.f32.vlgmr.msrb.gmra.mxu3 %vm742_vm1, %v813_v19 }
 0x12f   : > { %1301 = vmatpush.xpose.msk.msra.mxu3 %vm742_vm1, %v967_v26 }
 0x132   : > { %v965_v29 = vpop.permute.xlu0 %964 }
 0x133   : > { %1302 = vmatpush.xpose.msk.msra.mxu3 %vm742_vm1, %v965_v29 }
 0x136   : > { %1303 = vmatmul.msk.f32.vlgmr.msra.gmra.mxu3 %vm742_vm1, %v963_v30 }
 0x13a   : > { %v769_v34 = vpop.f32.mrf.mxu3 }
 0x13b   : > { %v772_v35 = vmul.f32 0.35355338, %v769_v34 }
 0x13d   : > { %v776_v36 = vadd.f32 %v774_v33, %v772_v35 }
 0x13f   : > { %v778_v37 = vsel %vm777_vm3, %v776_v36, -inf }
 0x140   : > { %779 = vmax.xlane.f32.xlu0 %v778_v37 }
 0x1a9   : > { %v917_v42 = vpop.f32.mrf.mxu1 }
 0x1aa   : > { %v920_v43 = vmul.f32 0.35355338, %v917_v42  ;;  %v1054_v42 = vld [vmem:[#allocation7 + $0x10] sm:$0xff] }
 0x1ab   : > { %1076 = vmatpush.msra.mxu1 %v1054_v42 }
 0x1ac   : > { %v921_v44 = vadd.f32 %v920_v43, %v774_v33  ;;  %v1053_v43 = vld [vmem:[#allocation7 + $0x8] sm:$0xff] }
 0x1ad   : > { %1077 = vmatpush.msra.mxu1 %v1053_v43 }
 0x1ae   : > { %v922_v45 = vsel %vm777_vm3, %v921_v44, -inf }
 0x1af   : > { %923 = vmax.xlane.f32.xlu2 %v922_v45 }
 0x1b1   : > { %v841_v46 = vpop.f32.mrf.mxu3 }
 0x1b2   : > { %v844_v47 = vmul.f32 0.35355338, %v841_v46 }
 0x1b3   : > { %v780_v48 = vpop.xlane.xlu0 %779 }
 0x1b4   : > { %v781_v49 = vsub.f32 %v776_v36, %v780_v48  ;;  %v845_v50 = vadd.f32 %v844_v47, %v774_v33 }
 0x1b6   : > { %v782_v51 = vmul.f32 1.442695, %v781_v49  ;;  %v846_v52 = vsel %vm777_vm3, %v845_v50, -inf }
 0x1b7   : > { %847 = vmax.xlane.f32.xlu1 %v846_v52 }
 0x1b8   : > { %1390 = vpow2.f32 %v782_v51  ;;  %v1387_v51 = vld [vmem:[%s1815_s12] ss:$0 sm:$0xff] }
 0x1b9   : > { %v991_v53 = vpop.f32.mrf.mxu3 }
 0x1ba   : > { %v994_v54 = vmul.f32 0.35355338, %v991_v53 }
 0x1bc   : > { %v995_v55 = vadd.f32 %v994_v54, %v774_v33 }
 0x1be   : > { %v1391_v56 = vpop.eup %1390  ;;  %v996_v57 = vsel %vm777_vm3, %v995_v55, -inf }
 0x1bf   : > { %997 = vmax.xlane.f32.xlu2 %v996_v57  ;;  %v784_v58 = vsel %vm777_vm3, %v1391_v56, 0.0  ;;  %v1563_v57 = vmov 32.0  }
 0x1c0   : > { %785 = vadd.xlane.f32.xlu0 %v784_v58 }
 0x1d4   : > { %1370 = vrot.lane.b32.xlu0 %v1369_v0, %s1557_s25  ;;  %s620_s25 = scalar_lea.vmem %s1806_s3, %s1706_s5 }
 0x1d5   : > { %v1083_v53 = vld [vmem:[%s620_s25] sm:$0xff] }
 0x222   : > { %v924_v1 = vpop.xlane.xlu2 %923 }
 0x223   : > { %v925_v2 = vsub.f32 %v921_v44, %v924_v1  ;;  %v1052_v44 = vld [vmem:[#allocation7] sm:$0xff] }
 0x224   : > { %1078 = vmatpush.msra.mxu1 %v1052_v44 }
 0x225   : > { %v926_v3 = vmul.f32 1.442695, %v925_v2 }
 0x227   : > { %1392 = vpow2.f32 %v926_v3 }
 0x22a   : > { %v848_v4 = vpop.xlane.xlu1 %847 }
 0x22b   : > { %v849_v5 = vsub.f32 %v845_v50, %v848_v4 }
 0x22d   : > { %v1393_v6 = vpop.eup %1392  ;;  %v850_v7 = vmul.f32 1.442695, %v849_v5 }
 0x22e   : > { %v928_v8 = vsel %vm777_vm3, %v1393_v6, 0.0 }
 0x22f   : > { %1394 = vpow2.f32 %v850_v7  ;;  %929 = vadd.xlane.f32.xlu2 %v928_v8 }
 0x232   : > { %v998_v9 = vpop.xlane.xlu2 %997 }
 0x233   : > { %v999_v10 = vsub.f32 %v995_v55, %v998_v9  ;;  %v786_v11 = vpop.xlane.xlu0 %785 }
 0x234   : > { %1396 = vrcp.f32 %v786_v11 }
 0x235   : > { %v1395_v12 = vpop.eup %1394  ;;  %v1000_v13 = vmul.f32 1.442695, %v999_v10 }
 0x236   : > { %v852_v14 = vsel %vm777_vm3, %v1395_v12, 0.0 }
 0x237   : > { %1398 = vpow2.f32 %v1000_v13  ;;  %853 = vadd.xlane.f32.xlu1 %v852_v14  ;;  %v1388_v14 = vld [vmem:[%s1816_s13] ss:$0 sm:$0xff] }
 0x23a   : > { %v1397_v15 = vpop.eup %1396 }
 0x23b   : > { %v788_v16 = vmul.f32 %v1397_v15, %v1391_v56 }
 0x23d   : > { %v1399_v17 = vpop.eup %1398  ;;  %1292 = vmatmul.msk.f32.vlgmr.msrb.gmra.mxu0 %vm777_vm3, %v788_v16  ;;  %v1389_v16 = vld [vmem:[%s1817_s14] ss:$0 sm:$0xff] }
 0x23e   : > { %v1002_v18 = vsel %vm777_vm3, %v1399_v17, 0.0 }
 0x23f   : > { %1003 = vadd.xlane.f32.xlu2 %v1002_v18 }
 0x246   : > { %v1371_v19 = vpop.permute.xlu0 %1370 }
 0x247   : > { %v1372_v20 = vunpack.i.l.bf16 %v1371_v19  ;;  %v1373_v21 = vunpack.i.h.bf16 %v1371_v19 }
 0x249   : > { %882 = vmatpush.msra.mxu0 %v1372_v20 }
 0x24b   : > { %883 = vmatpush.msra.mxu0 %v1373_v21 }
 0x250   : > { %1375 = vrot.lane.b32.xlu1 %v1369_v0, %s1556_s24 }
 0x257   : > { %1380 = vrot.lane.b32.xlu2 %v1369_v0, %s1558_s27 }
 0x2a2   : > { %v930_v22 = vpop.xlane.xlu2 %929 }
 0x2aa   : > { %v854_v23 = vpop.xlane.xlu1 %853 }
 0x2ab   : > { %1400 = vrcp.f32 %v854_v23 }
 0x2b1   : > { %v1401_v24 = vpop.eup %1400 }
 0x2b2   : > { %v856_v25 = vmul.f32 %v1401_v24, %v1395_v12  ;;  %v1004_v26 = vpop.xlane.xlu2 %1003 }
 0x2b3   : > { %1402 = vrcp.f32 %v1004_v26 }
 0x2b4   : > { %1296 = vmatmul.msk.f32.vlgmr.msra.gmra.mxu0 %vm777_vm3, %v856_v25  ;;  %1404 = vrcp.f32 %v930_v22 }
 0x2b5   : > { %1406 = vrcp.f32 %v1563_v57 }
 0x2b9   : > { %v1403_v28 = vpop.eup %1402 }
 0x2ba   : > { %v1381_v27 = vpop.permute.xlu2 %1380  ;;  %v1006_v31 = vmul.f32 %v1403_v28, %v1399_v17  ;;  %v1405_v33 = vpop.eup %1404 }
 0x2bb   : > { %v1382_v29 = vunpack.i.l.bf16 %v1381_v27  ;;  %v1383_v30 = vunpack.i.h.bf16 %v1381_v27  ;;  %v932_v36 = vmul.f32 %v1405_v33, %v1393_v6  ;;  %v809_v37 = vpop.f32.mrf.mxu0  ;;  %v1407_v58 = vpop.eup %1406 }
 0x2bc   : > { %v1089_v59 = vmul.f32 32.0, %v1407_v58  ;;  %vm1093_vm5 = vweird.f32 %v1407_v58 }
 0x2bd   : > { %1030 = vmatpush.msrb.mxu0 %v1382_v29 }
 0x2be   : > { %v1090_v60 = vsub.f32 1.0, %v1089_v59 }
 0x2bf   : > { %1031 = vmatpush.msrb.mxu0 %v1383_v30 }
 0x2c0   : > { %1304 = vmatmul.msk.f32.vlgmr.msrb.gmra.mxu0 %vm777_vm3, %v1006_v31  ;;  %v1091_v61 = vmul.f32 %v1407_v58, %v1090_v60 }
 0x2c2   : > { %v1376_v32 = vpop.permute.xlu1 %1375  ;;  %v1092_v62 = vadd.f32 %v1407_v58, %v1091_v61 }
 0x2c3   : > { %v1377_v34 = vunpack.i.l.bf16 %v1376_v32  ;;  %v1378_v35 = vunpack.i.h.bf16 %v1376_v32 }
 0x2c4   : > { %v1094_v63 = vsel %vm1093_vm5, %v1407_v58, %v1092_v62 }
 0x2c5   : > { %956 = vmatpush.msrb.mxu2 %v1377_v34 }
 0x2c7   : > { %957 = vmatpush.msrb.mxu2 %v1378_v35 }
 0x2c8   : > { %1300 = vmatmul.msk.f32.vlgmr.msrb.gmra.mxu2 %vm777_vm3, %v932_v36 }
 0x331   : > { %v885_v38 = vpop.f32.mrf.mxu0 }
 0x332   : > { %1037 = vrot.lane.b32.xlu0 %v885_v38, %s1560_s26 }
 0x33d   : > { %v1033_v39 = vpop.f32.mrf.mxu0 }
 0x33e   : > { %1045 = vrot.lane.b32.xlu0 %v1033_v39, %s1561_s28 }
 0x34b   : > { %v959_v40 = vpop.f32.mrf.mxu2 }
 0x34c   : > { %1041 = vrot.lane.b32.xlu1 %v959_v40, %s1562_s29 }
 0x3a4   : > { %v1038_v45 = vpop.permute.xlu0 %1037 }
 0x3a5   : > { %v1048_v46 = vsel %vm742_vm1, %v809_v37, %v1038_v45 }
 0x3b0   : > { %v1046_v48 = vpop.permute.xlu0 %1045 }
 0x3be   : > { %v1042_v47 = vpop.permute.xlu1 %1041 }
 0x3bf   : > { %v1049_v49 = vsel %vm777_vm3, %v1048_v46, %v1042_v47 }
 0x3c0   : > { %v1051_v50 = vsel %vm1050_vm4, %v1049_v49, %v1046_v48 }
 0x3c1   : > { %1305 = vmatmul.msk.f32.vlgmr.msra.gmra.mxu1 %vm641_vm0, %v1051_v50 }
 0x43e   : > { %v1080_v52 = vpop.f32.mrf.mxu1 }
 0x43f   : > { %v1081_v54 = vadd.f32 %v1387_v51, %v1080_v52 }
 0x441   : > { %v1084_v55 = vadd.f32 %v1083_v53, %v1081_v54 }
 0x443   : > { %v1085_v56 = vsel %vm641_vm0, %v1084_v55, 0.0 }
 0x444   : > { %1086 = vadd.xlane.f32.xlu1 %v1085_v56 }
 0x4b7   : > { %v1087_v0 = vpop.xlane.xlu1 %1086 }
 0x4b8   : > { %v1095_v1 = vmul.f32 %v1094_v63, %v1087_v0 }
 0x4ba   : > { %v1096_v2 = vsub.f32 %v1084_v55, %v1095_v1 }
 0x4bc   : > { %v1097_v3 = vmul.f32 %v1096_v2, %v1096_v2 }
 0x4be   : > { %v1098_v4 = vsel %vm641_vm0, %v1097_v3, 0.0 }
 0x4bf   : > { %1099 = vadd.xlane.f32.xlu0 %v1098_v4 }
 0x532   : > { %v1100_v5 = vpop.xlane.xlu0 %1099 }
 0x533   : > { %v1101_v6 = vmul.f32 %v1100_v5, %v1094_v63 }
 0x535   : > { %v1102_v7 = vadd.f32 1e-05, %v1101_v6 }
 0x537   : > { %1408 = vrsqrt.f32 %v1102_v7  ;;  %vm1109_vm7 = vweird.f32 %v1102_v7 }
 0x53d   : > { %v1409_v8 = vpop.eup %1408 }
 0x53e   : > { %v1104_v9 = vmul.f32 %v1409_v8, %v1102_v7  ;;  %vm1110_vm6 = vweird.f32 %v1409_v8 }
 0x53f   : > { %vm1111_vm8 = vmor %vm1109_vm7, %vm1110_vm6 }
 0x540   : > { %v1105_v10 = vmul.f32 %v1409_v8, %v1104_v9 }
 0x542   : > { %v1106_v11 = vmul.f32 0.5, %v1105_v10 }
 0x544   : > { %v1107_v12 = vsub.f32 1.5, %v1106_v11 }
 0x546   : > { %v1108_v13 = vmul.f32 %v1409_v8, %v1107_v12 }
 0x548   : > { %v1112_v15 = vsel %vm1111_vm8, %v1409_v8, %v1108_v13 }
 0x549   : > { %v1113_v17 = vmul.f32 %v1112_v15, %v1096_v2 }
 0x54b   : > { %v1118_v18 = vmul.f32 %v1388_v14, %v1113_v17 }
 0x54d   : > { %v1123_v19 = vadd.f32 %v1389_v16, %v1118_v18 }
 0x54f   : > { %1124 = vst.msk [vmem:[%s627_s19] sm:$0xff] %vm641_vm0, %v1123_v19 }
 0x550 PF: > { %s1829_s7 = sld [smem:[#allocation12_spill]] }
 0x556   : > { %s28_s18 = sadd.s32 1, %s1829_s7  }
 0x557   : > { %p25_p7 = scmp.ge.s32.totalorder %s28_s18, 4  }
 0x559   :  { %27 = sbr.rel (!%p25_p7) target bundleno = 7 (0x7), region = 139 }
 0x55e   :  { %1144 = vsyncpa [#allocation3], 1 }
 0x55f   :  { %1146 = vsyncpa [#allocation3 + $0x1], 1 }
 0x560   :  { %1147 = vsyncpa [#allocation5], 1 }
 0x561   :  { %1148 = vsyncpa [#allocation8], 1 }

</bundles_post_ra>
